<compile_context>
chip_gen: v7x
topology: tpu7x:2x2x1
jax: 0.10.0
libtpu: 0.0.40
codegen_flags: <defaults>
</compile_context>

<pallas_src>
import jax
import jax.numpy as jnp
from jax.experimental import pallas as pl
from jax.experimental.pallas import tpu as pltpu


# ----------------------------------------------------------------------------
# Fused ASFF_2 forward kernel — one grid step per image
# ----------------------------------------------------------------------------
def _asff2_fused_kernel(x1_ref, x2_ref, wc1_ref, wc2_ref, bc_ref,
                        wlvd_ref, blvd_ref, w3_ref, b3_ref,
                        o_ref, pad_ref, patch_ref):
    H = o_ref.shape[1]
    W = o_ref.shape[2]
    C = o_ref.shape[3]
    HW = H * W

    x1 = x1_ref[0].reshape(HW, C)                        # (HW, C) bf16
    x2 = x2_ref[0].reshape(HW, C)

    # ---- ASFF weight path ---------------------------------------------------
    # Both compress 1x1 convs (BN folded into weights) produce one (HW, 16)
    # tile: f[:, :8] = level-1 features, f[:, 8:] = level-2 features.
    f = (jnp.dot(x1, wc1_ref[...], preferred_element_type=jnp.float32)
         + jnp.dot(x2, wc2_ref[...], preferred_element_type=jnp.float32)
         + bc_ref[...])
    f = f * jax.nn.sigmoid(f)                            # SiLU, (HW, 16) f32

    # weight_levels 1x1 conv + 2-way softmax collapsed into a sigmoid of the
    # logit difference (pre-folded weight/bias diff); weights sum to exactly 1.
    ldiff = jnp.sum(f * wlvd_ref[...], axis=-1, keepdims=True) + blvd_ref[...]
    w1 = jax.nn.sigmoid(ldiff)                           # (HW, 1) f32

    x1f = x1.astype(jnp.float32)
    x2f = x2.astype(jnp.float32)
    fused = (x2f + (x1f - x2f) * w1).astype(jnp.bfloat16)   # = x1*w1 + x2*(1-w1)

    # ---- zero-padded fused tile in VMEM (replaces jnp.pad + 2nd launch) -----
    pad_ref[...] = jnp.zeros_like(pad_ref)
    pad_ref[pl.ds(1, H), pl.ds(1, W), :] = fused.reshape(H, W, C)

    # ---- 3x3 conv as ONE K-stacked MXU dot ----------------------------------
    # Copy the 9 shifted windows into an (HW, 9C) patch; the MXU accumulates
    # internally over K = 9C, so there is no f32 accumulator ping-pong.
    for dy in range(3):
        for dx in range(3):
            tap = dy * 3 + dx
            win = pad_ref[pl.ds(dy, H), pl.ds(dx, W), :]         # (H, W, C)
            patch_ref[:, pl.ds(tap * C, C)] = win.reshape(HW, C)

    y = jnp.dot(patch_ref[...], w3_ref[...], preferred_element_type=jnp.float32)
    y = y + b3_ref[...]
    y = y * jax.nn.sigmoid(y)                            # SiLU
    o_ref[0] = y.reshape(H, W, C).astype(o_ref.dtype)


# ----------------------------------------------------------------------------
# Forward (single outer jit; layout glue only outside the kernel)
# ----------------------------------------------------------------------------
def asff2_forward(params, input1_nchw, input2_nchw):
    # NCHW -> NHWC, bf16 storage for the MXU.
    x1 = jnp.transpose(input1_nchw, (0, 2, 3, 1)).astype(jnp.bfloat16)
    x2 = jnp.transpose(input2_nchw, (0, 2, 3, 1)).astype(jnp.bfloat16)
    N, H, W, C = x1.shape

    full2d = lambda n: (0, 0)
    out_nhwc = pl.pallas_call(
        _asff2_fused_kernel,
        out_shape=jax.ShapeDtypeStruct((N, H, W, C), jnp.float32),
        grid=(N,),
        in_specs=[
            pl.BlockSpec((1, H, W, C), lambda n: (n, 0, 0, 0)),   # x1
            pl.BlockSpec((1, H, W, C), lambda n: (n, 0, 0, 0)),   # x2
            pl.BlockSpec((C, 16), full2d),                        # compress W (lvl 1, BN-folded)
            pl.BlockSpec((C, 16), full2d),                        # compress W (lvl 2, BN-folded)
            pl.BlockSpec((1, 16), full2d),                        # compress bias
            pl.BlockSpec((1, 16), full2d),                        # weight_levels diff W
            pl.BlockSpec((1, 1), full2d),                         # weight_levels diff bias
            pl.BlockSpec((9 * C, C), full2d),                     # 3x3 conv W (K-stacked, BN-folded)
            pl.BlockSpec((1, C), full2d),                         # 3x3 conv bias
        ],
        out_specs=pl.BlockSpec((1, H, W, C), lambda n: (n, 0, 0, 0)),
        scratch_shapes=[
            pltpu.VMEM((H + 2, W + 2, C), jnp.bfloat16),          # zero-padded fused tile
            pltpu.VMEM((H * W, 9 * C), jnp.bfloat16),             # im2col patch
        ],
        compiler_params=pltpu.CompilerParams(dimension_semantics=("parallel",)),
    )(x1, x2, params["wc1"], params["wc2"], params["bc"],
      params["wlvd"], params["blvd"], params["w3"], params["b3"])

    # TODO(synk): if the consumer accepts NHWC / bf16, skip this transpose and
    # emit bf16 directly to halve the output HBM traffic.
    return jnp.transpose(out_nhwc, (0, 3, 1, 2))         # NCHW, f32 (PyTorch parity)


# ----------------------------------------------------------------------------
# Pure-JAX reference (same folded parameters / same math) for a sanity check
# ----------------------------------------------------------------------------
def asff2_reference(params, input1_nchw, input2_nchw):
    x1 = jnp.transpose(input1_nchw, (0, 2, 3, 1)).astype(jnp.bfloat16)
    x2 = jnp.transpose(input2_nchw, (0, 2, 3, 1)).astype(jnp.bfloat16)
    N, H, W, C = x1.shape
    x1f = x1.reshape(N * H * W, C)
    x2f = x2.reshape(N * H * W, C)
    f = (jnp.dot(x1f, params["wc1"], preferred_element_type=jnp.float32)
         + jnp.dot(x2f, params["wc2"], preferred_element_type=jnp.float32)
         + params["bc"])
    f = f * jax.nn.sigmoid(f)
    ldiff = jnp.sum(f * params["wlvd"], axis=-1, keepdims=True) + params["blvd"]
    w1 = jax.nn.sigmoid(ldiff)
    fused = (x2f.astype(jnp.float32)
             + (x1f.astype(jnp.float32) - x2f.astype(jnp.float32)) * w1)
    fused = fused.astype(jnp.bfloat16).reshape(N, H, W, C)
    xp = jnp.pad(fused, ((0, 0), (1, 1), (1, 1), (0, 0)))
    w3 = params["w3"].reshape(3, 3, C, C)
    acc = jnp.zeros((N, H, W, C), jnp.float32)
    for dy in range(3):
        for dx in range(3):
            win = xp[:, dy:dy + H, dx:dx + W, :]
            acc = acc + jnp.einsum("nhwc,cd->nhwd", win, w3[dy, dx],
                                   preferred_element_type=jnp.float32)
    y = acc + params["b3"].reshape(1, 1, 1, C)
    y = y * jax.nn.sigmoid(y)
    return jnp.transpose(y, (0, 3, 1, 2))


# ----------------------------------------------------------------------------
# Deterministic parameter initialization (BN folded to inference scale/bias,
# scales folded into the conv weights; only biases remain as kernel operands)
# ----------------------------------------------------------------------------
class KeyGen:
    def __init__(self, key):
        self.key = key

    def __call__(self):
        self.key, sub = jax.random.split(self.key)
        return sub


def _fold_bn(kg, c, eps=1e-5):
    gamma = 1.0 + 0.1 * jax.random.normal(kg(), (c,), jnp.float32)
    beta = 0.1 * jax.random.normal(kg(), (c,), jnp.float32)
    mean = 0.1 * jax.random.normal(kg(), (c,), jnp.float32)
    var = 1.0 + 0.1 * jnp.abs(jax.random.normal(kg(), (c,), jnp.float32))
    scale = gamma / jnp.sqrt(var + eps)
    bias = beta - mean * scale
    return scale.reshape(1, c), bias.reshape(1, c)


def _conv_w(kg, kh, kw, cin, cout):
    fan_in = kh * kw * cin
    return jax.random.normal(kg(), (kh, kw, cin, cout), jnp.float32) * (0.5 / fan_in ** 0.5)


def init_asff2(key, inter_dim, compress_c=8):
    # TODO(synk): BatchNorm is folded with inference running stats; train-mode
    # batch statistics are not implemented.
    kg = KeyGen(key)
    C = inter_dim
    cc = compress_c

    # weight_level_1 / weight_level_2: 1x1 conv (bias=False) + BN + SiLU
    w1 = _conv_w(kg, 1, 1, C, cc).reshape(C, cc)
    s1, b1 = _fold_bn(kg, cc)
    w2 = _conv_w(kg, 1, 1, C, cc).reshape(C, cc)
    s2, b2 = _fold_bn(kg, cc)
    wc1 = jnp.zeros((C, 2 * cc), jnp.float32).at[:, :cc].set(w1 * s1)
    wc2 = jnp.zeros((C, 2 * cc), jnp.float32).at[:, cc:].set(w2 * s2)
    bc = jnp.concatenate([b1, b2], axis=-1)                      # (1, 16)

    # weight_levels: plain 1x1 conv with bias; pre-fold the 2-way softmax into
    # a logit difference (w1 = sigmoid(l1 - l2)).
    wlv = jax.random.normal(kg(), (2 * cc, 2), jnp.float32) * (0.5 / (2 * cc) ** 0.5)
    blv = 0.1 * jax.random.normal(kg(), (1, 2), jnp.float32)
    wlvd = (wlv[:, 0] - wlv[:, 1]).reshape(1, 2 * cc)            # (1, 16)
    blvd = (blv[:, 0] - blv[:, 1]).reshape(1, 1)                 # (1, 1)

    # final 3x3 conv (bias=False) + BN + SiLU, reshaped for the K-stacked dot
    w3 = _conv_w(kg, 3, 3, C, C)
    s3, b3 = _fold_bn(kg, C)
    w3 = (w3 * s3.reshape(1, 1, 1, C)).reshape(9 * C, C)

    return {
        "wc1": wc1.astype(jnp.bfloat16),
        "wc2": wc2.astype(jnp.bfloat16),
        "bc": bc,
        "wlvd": wlvd,
        "blvd": blvd,
        "w3": w3.astype(jnp.bfloat16),
        "b3": b3,
    }


# ----------------------------------------------------------------------------
# Main
# ----------------------------------------------------------------------------
if __name__ == "__main__":
    root = jax.random.PRNGKey(0)
    kparam, k1, k2 = jax.random.split(root, 3)

    inter_dim = 128                      # small but lane-dense (128-lane tiles)
    N, H, W = 2, 16, 16

    params = init_asff2(kparam, inter_dim)
    input1 = jax.random.normal(k1, (N, inter_dim, H, W), jnp.float32)
    input2 = jax.random.normal(k2, (N, inter_dim, H, W), jnp.float32)

    fwd = jax.jit(asff2_forward)
    out = jax.block_until_ready(fwd(params, input1, input2))

    assert out.shape == (N, inter_dim, H, W), out.shape
    assert bool(jnp.all(jnp.isfinite(out)))

    ref = jax.block_until_ready(jax.jit(asff2_reference)(params, input1, input2))
    max_diff = float(jnp.max(jnp.abs(out - ref)))
    assert max_diff < 5e-2, f"max abs diff vs reference: {max_diff}"

    print("KERNEL_OK")
</pallas_src>

<mosaic_0001>
module attributes {stable_mosaic.version = 11 : i64} {
  func.func @_asff2_fused_kernel(%arg0: i32, %arg1: memref<1x16x16x128xbf16, #tpu.memory_space<vmem>>, %arg2: memref<1x16x16x128xbf16, #tpu.memory_space<vmem>>, %arg3: memref<128x16xbf16, #tpu.memory_space<vmem>>, %arg4: memref<128x16xbf16, #tpu.memory_space<vmem>>, %arg5: memref<1x16xf32, #tpu.memory_space<vmem>>, %arg6: memref<1x16xf32, #tpu.memory_space<vmem>>, %arg7: memref<1x1xf32, #tpu.memory_space<vmem>>, %arg8: memref<1152x128xbf16, #tpu.memory_space<vmem>>, %arg9: memref<1x128xf32, #tpu.memory_space<vmem>>, %arg10: memref<1x16x16x128xf32, #tpu.memory_space<vmem>>, %arg11: memref<18x18x128xbf16, #tpu.memory_space<vmem>>, %arg12: memref<256x1152xbf16, #tpu.memory_space<vmem>>) attributes {dimension_semantics = [#tpu.dimension_semantics<parallel>], iteration_bounds = array<i64: 2>, scalar_prefetch = 0 : i64, scratch_operands = 2 : i64, tpu.core_type = #tpu.core_type<tc>, window_params = [{transform_indices = @transform_0, window_bounds = array<i64: 1, 16, 16, 128>}, {transform_indices = @transform_1, window_bounds = array<i64: 1, 16, 16, 128>}, {pipeline_mode = #tpu.pipeline_mode<synchronous>, transform_indices = @transform_2, window_bounds = array<i64: 128, 16>}, {pipeline_mode = #tpu.pipeline_mode<synchronous>, transform_indices = @transform_3, window_bounds = array<i64: 128, 16>}, {pipeline_mode = #tpu.pipeline_mode<synchronous>, transform_indices = @transform_4, window_bounds = array<i64: 1, 16>}, {pipeline_mode = #tpu.pipeline_mode<synchronous>, transform_indices = @transform_5, window_bounds = array<i64: 1, 16>}, {pipeline_mode = #tpu.pipeline_mode<synchronous>, transform_indices = @transform_6, window_bounds = array<i64: 1, 1>}, {pipeline_mode = #tpu.pipeline_mode<synchronous>, transform_indices = @transform_7, window_bounds = array<i64: 1152, 128>}, {pipeline_mode = #tpu.pipeline_mode<synchronous>, transform_indices = @transform_8, window_bounds = array<i64: 1, 128>}, {transform_indices = @transform_9, window_bounds = array<i64: 1, 16, 16, 128>}]} {
    %c0 = arith.constant 0 : index
    %c0_0 = arith.constant 0 : index
    %c0_1 = arith.constant 0 : index
    %c0_2 = arith.constant 0 : index
    %0 = vector.load %arg1[%c0, %c0_0, %c0_1, %c0_2] : memref<1x16x16x128xbf16, #tpu.memory_space<vmem>>, vector<1x16x16x128xbf16>
    %1 = vector.shape_cast %0 : vector<1x16x16x128xbf16> to vector<16x16x128xbf16>
    %2 = vector.shape_cast %1 : vector<16x16x128xbf16> to vector<256x128xbf16>
    %c0_3 = arith.constant 0 : index
    %c0_4 = arith.constant 0 : index
    %c0_5 = arith.constant 0 : index
    %c0_6 = arith.constant 0 : index
    %3 = vector.load %arg2[%c0_3, %c0_4, %c0_5, %c0_6] : memref<1x16x16x128xbf16, #tpu.memory_space<vmem>>, vector<1x16x16x128xbf16>
    %4 = vector.shape_cast %3 : vector<1x16x16x128xbf16> to vector<16x16x128xbf16>
    %5 = vector.shape_cast %4 : vector<16x16x128xbf16> to vector<256x128xbf16>
    %c0_7 = arith.constant 0 : index
    %c0_8 = arith.constant 0 : index
    %6 = vector.load %arg3[%c0_7, %c0_8] : memref<128x16xbf16, #tpu.memory_space<vmem>>, vector<128x16xbf16>
    %cst = arith.constant dense<0.000000e+00> : vector<256x16xf32>
    %7 = tpu.matmul %2, %6, %cst {dimension_numbers = #tpu.dot_dimension_numbers<[1], [0], [0], [1], [0, 0, 1, 1], [], []>} : vector<256x128xbf16>, vector<128x16xbf16>, vector<256x16xf32> -> vector<256x16xf32>
    %c0_9 = arith.constant 0 : index
    %c0_10 = arith.constant 0 : index
    %8 = vector.load %arg4[%c0_9, %c0_10] : memref<128x16xbf16, #tpu.memory_space<vmem>>, vector<128x16xbf16>
    %cst_11 = arith.constant dense<0.000000e+00> : vector<256x16xf32>
    %9 = tpu.matmul %5, %8, %cst_11 {dimension_numbers = #tpu.dot_dimension_numbers<[1], [0], [0], [1], [0, 0, 1, 1], [], []>} : vector<256x128xbf16>, vector<128x16xbf16>, vector<256x16xf32> -> vector<256x16xf32>
    %10 = arith.addf %7, %9 : vector<256x16xf32>
    %c0_12 = arith.constant 0 : index
    %c0_13 = arith.constant 0 : index
    %11 = vector.load %arg5[%c0_12, %c0_13] : memref<1x16xf32, #tpu.memory_space<vmem>>, vector<1x16xf32>
    %12 = vector.broadcast %11 : vector<1x16xf32> to vector<256x16xf32>
    %13 = arith.addf %10, %12 : vector<256x16xf32>
    %14 = arith.negf %13 : vector<256x16xf32>
    %15 = math.exp %14 : vector<256x16xf32>
    %cst_14 = arith.constant 1.000000e+00 : f32
    %16 = vector.broadcast %cst_14 : f32 to vector<256x16xf32>
    %17 = arith.addf %16, %15 : vector<256x16xf32>
    %18 = arith.divf %16, %17 : vector<256x16xf32>
    %19 = arith.mulf %13, %18 : vector<256x16xf32>
    %c0_15 = arith.constant 0 : index
    %c0_16 = arith.constant 0 : index
    %20 = vector.load %arg6[%c0_15, %c0_16] : memref<1x16xf32, #tpu.memory_space<vmem>>, vector<1x16xf32>
    %21 = vector.broadcast %20 : vector<1x16xf32> to vector<256x16xf32>
    %22 = arith.mulf %19, %21 : vector<256x16xf32>
    %cst_17 = arith.constant dense<0.000000e+00> : vector<256xf32>
    %23 = vector.multi_reduction <add>, %22, %cst_17 [1] : vector<256x16xf32> to vector<256xf32>
    %24 = vector.shape_cast %23 : vector<256xf32> to vector<256x1xf32>
    %c0_18 = arith.constant 0 : index
    %c0_19 = arith.constant 0 : index
    %25 = vector.load %arg7[%c0_18, %c0_19] : memref<1x1xf32, #tpu.memory_space<vmem>>, vector<1x1xf32>
    %26 = vector.broadcast %25 : vector<1x1xf32> to vector<256x1xf32>
    %27 = arith.addf %24, %26 : vector<256x1xf32>
    %28 = arith.negf %27 : vector<256x1xf32>
    %29 = math.exp %28 : vector<256x1xf32>
    %cst_20 = arith.constant 1.000000e+00 : f32
    %30 = vector.broadcast %cst_20 : f32 to vector<256x1xf32>
    %31 = arith.addf %30, %29 : vector<256x1xf32>
    %32 = arith.divf %30, %31 : vector<256x1xf32>
    %33 = arith.extf %2 : vector<256x128xbf16> to vector<256x128xf32>
    %34 = arith.extf %5 : vector<256x128xbf16> to vector<256x128xf32>
    %35 = arith.subf %33, %34 : vector<256x128xf32>
    %36 = vector.broadcast %32 : vector<256x1xf32> to vector<256x128xf32>
    %37 = arith.mulf %35, %36 : vector<256x128xf32>
    %38 = arith.addf %34, %37 : vector<256x128xf32>
    %39 = arith.truncf %38 : vector<256x128xf32> to vector<256x128xbf16>
    %cst_21 = arith.constant 0.000000e+00 : bf16
    %40 = vector.broadcast %cst_21 : bf16 to vector<18x18x128xbf16>
    %c0_22 = arith.constant 0 : index
    %c0_23 = arith.constant 0 : index
    %c0_24 = arith.constant 0 : index
    %41 = vector.load %arg11[%c0_22, %c0_23, %c0_24] : memref<18x18x128xbf16, #tpu.memory_space<vmem>>, vector<18x18x128xbf16>
    tpu.vector_store %arg11[%c0_22, %c0_23, %c0_24], %40 {strides = array<i32>} : memref<18x18x128xbf16, #tpu.memory_space<vmem>>, vector<18x18x128xbf16>,
    %42 = vector.shape_cast %39 : vector<256x128xbf16> to vector<16x16x128xbf16>
    %c1 = arith.constant 1 : index
    %c1_25 = arith.constant 1 : index
    %c0_26 = arith.constant 0 : index
    %43 = vector.load %arg11[%c1, %c1_25, %c0_26] : memref<18x18x128xbf16, #tpu.memory_space<vmem>>, vector<16x16x128xbf16>
    tpu.vector_store %arg11[%c1, %c1_25, %c0_26], %42 {strides = array<i32>} : memref<18x18x128xbf16, #tpu.memory_space<vmem>>, vector<16x16x128xbf16>,
    %c0_27 = arith.constant 0 : index
    %c0_28 = arith.constant 0 : index
    %c0_29 = arith.constant 0 : index
    %44 = vector.load %arg11[%c0_27, %c0_28, %c0_29] : memref<18x18x128xbf16, #tpu.memory_space<vmem>>, vector<16x16x128xbf16>
    %45 = vector.shape_cast %44 : vector<16x16x128xbf16> to vector<256x128xbf16>
    %c0_30 = arith.constant 0 : index
    %c0_31 = arith.constant 0 : index
    %46 = vector.load %arg12[%c0_30, %c0_31] : memref<256x1152xbf16, #tpu.memory_space<vmem>>, vector<256x128xbf16>
    tpu.vector_store %arg12[%c0_30, %c0_31], %45 {strides = array<i32>} : memref<256x1152xbf16, #tpu.memory_space<vmem>>, vector<256x128xbf16>,
    %c0_32 = arith.constant 0 : index
    %c1_33 = arith.constant 1 : index
    %c0_34 = arith.constant 0 : index
    %47 = vector.load %arg11[%c0_32, %c1_33, %c0_34] : memref<18x18x128xbf16, #tpu.memory_space<vmem>>, vector<16x16x128xbf16>
    %48 = vector.shape_cast %47 : vector<16x16x128xbf16> to vector<256x128xbf16>
    %c0_35 = arith.constant 0 : index
    %c128 = arith.constant 128 : index
    %49 = vector.load %arg12[%c0_35, %c128] : memref<256x1152xbf16, #tpu.memory_space<vmem>>, vector<256x128xbf16>
    tpu.vector_store %arg12[%c0_35, %c128], %48 {strides = array<i32>} : memref<256x1152xbf16, #tpu.memory_space<vmem>>, vector<256x128xbf16>,
    %c0_36 = arith.constant 0 : index
    %c2 = arith.constant 2 : index
    %c0_37 = arith.constant 0 : index
    %50 = vector.load %arg11[%c0_36, %c2, %c0_37] : memref<18x18x128xbf16, #tpu.memory_space<vmem>>, vector<16x16x128xbf16>
    %51 = vector.shape_cast %50 : vector<16x16x128xbf16> to vector<256x128xbf16>
    %c0_38 = arith.constant 0 : index
    %c256 = arith.constant 256 : index
    %52 = vector.load %arg12[%c0_38, %c256] : memref<256x1152xbf16, #tpu.memory_space<vmem>>, vector<256x128xbf16>
    tpu.vector_store %arg12[%c0_38, %c256], %51 {strides = array<i32>} : memref<256x1152xbf16, #tpu.memory_space<vmem>>, vector<256x128xbf16>,
    %c1_39 = arith.constant 1 : index
    %c0_40 = arith.constant 0 : index
    %c0_41 = arith.constant 0 : index
    %53 = vector.load %arg11[%c1_39, %c0_40, %c0_41] : memref<18x18x128xbf16, #tpu.memory_space<vmem>>, vector<16x16x128xbf16>
    %54 = vector.shape_cast %53 : vector<16x16x128xbf16> to vector<256x128xbf16>
    %c0_42 = arith.constant 0 : index
    %c384 = arith.constant 384 : index
    %55 = vector.load %arg12[%c0_42, %c384] : memref<256x1152xbf16, #tpu.memory_space<vmem>>, vector<256x128xbf16>
    tpu.vector_store %arg12[%c0_42, %c384], %54 {strides = array<i32>} : memref<256x1152xbf16, #tpu.memory_space<vmem>>, vector<256x128xbf16>,
    %c1_43 = arith.constant 1 : index
    %c1_44 = arith.constant 1 : index
    %c0_45 = arith.constant 0 : index
    %56 = vector.load %arg11[%c1_43, %c1_44, %c0_45] : memref<18x18x128xbf16, #tpu.memory_space<vmem>>, vector<16x16x128xbf16>
    %57 = vector.shape_cast %56 : vector<16x16x128xbf16> to vector<256x128xbf16>
    %c0_46 = arith.constant 0 : index
    %c512 = arith.constant 512 : index
    %58 = vector.load %arg12[%c0_46, %c512] : memref<256x1152xbf16, #tpu.memory_space<vmem>>, vector<256x128xbf16>
    tpu.vector_store %arg12[%c0_46, %c512], %57 {strides = array<i32>} : memref<256x1152xbf16, #tpu.memory_space<vmem>>, vector<256x128xbf16>,
    %c1_47 = arith.constant 1 : index
    %c2_48 = arith.constant 2 : index
    %c0_49 = arith.constant 0 : index
    %59 = vector.load %arg11[%c1_47, %c2_48, %c0_49] : memref<18x18x128xbf16, #tpu.memory_space<vmem>>, vector<16x16x128xbf16>
    %60 = vector.shape_cast %59 : vector<16x16x128xbf16> to vector<256x128xbf16>
    %c0_50 = arith.constant 0 : index
    %c640 = arith.constant 640 : index
    %61 = vector.load %arg12[%c0_50, %c640] : memref<256x1152xbf16, #tpu.memory_space<vmem>>, vector<256x128xbf16>
    tpu.vector_store %arg12[%c0_50, %c640], %60 {strides = array<i32>} : memref<256x1152xbf16, #tpu.memory_space<vmem>>, vector<256x128xbf16>,
    %c2_51 = arith.constant 2 : index
    %c0_52 = arith.constant 0 : index
    %c0_53 = arith.constant 0 : index
    %62 = vector.load %arg11[%c2_51, %c0_52, %c0_53] : memref<18x18x128xbf16, #tpu.memory_space<vmem>>, vector<16x16x128xbf16>
    %63 = vector.shape_cast %62 : vector<16x16x128xbf16> to vector<256x128xbf16>
    %c0_54 = arith.constant 0 : index
    %c768 = arith.constant 768 : index
    %64 = vector.load %arg12[%c0_54, %c768] : memref<256x1152xbf16, #tpu.memory_space<vmem>>, vector<256x128xbf16>
    tpu.vector_store %arg12[%c0_54, %c768], %63 {strides = array<i32>} : memref<256x1152xbf16, #tpu.memory_space<vmem>>, vector<256x128xbf16>,
    %c2_55 = arith.constant 2 : index
    %c1_56 = arith.constant 1 : index
    %c0_57 = arith.constant 0 : index
    %65 = vector.load %arg11[%c2_55, %c1_56, %c0_57] : memref<18x18x128xbf16, #tpu.memory_space<vmem>>, vector<16x16x128xbf16>
    %66 = vector.shape_cast %65 : vector<16x16x128xbf16> to vector<256x128xbf16>
    %c0_58 = arith.constant 0 : index
    %c896 = arith.constant 896 : index
    %67 = vector.load %arg12[%c0_58, %c896] : memref<256x1152xbf16, #tpu.memory_space<vmem>>, vector<256x128xbf16>
    tpu.vector_store %arg12[%c0_58, %c896], %66 {strides = array<i32>} : memref<256x1152xbf16, #tpu.memory_space<vmem>>, vector<256x128xbf16>,
    %c2_59 = arith.constant 2 : index
    %c2_60 = arith.constant 2 : index
    %c0_61 = arith.constant 0 : index
    %68 = vector.load %arg11[%c2_59, %c2_60, %c0_61] : memref<18x18x128xbf16, #tpu.memory_space<vmem>>, vector<16x16x128xbf16>
    %69 = vector.shape_cast %68 : vector<16x16x128xbf16> to vector<256x128xbf16>
    %c0_62 = arith.constant 0 : index
    %c1024 = arith.constant 1024 : index
    %70 = vector.load %arg12[%c0_62, %c1024] : memref<256x1152xbf16, #tpu.memory_space<vmem>>, vector<256x128xbf16>
    tpu.vector_store %arg12[%c0_62, %c1024], %69 {strides = array<i32>} : memref<256x1152xbf16, #tpu.memory_space<vmem>>, vector<256x128xbf16>,
    %c0_63 = arith.constant 0 : index
    %c0_64 = arith.constant 0 : index
    %71 = vector.load %arg12[%c0_63, %c0_64] : memref<256x1152xbf16, #tpu.memory_space<vmem>>, vector<256x1152xbf16>
    %c0_65 = arith.constant 0 : index
    %c0_66 = arith.constant 0 : index
    %72 = vector.load %arg8[%c0_65, %c0_66] : memref<1152x128xbf16, #tpu.memory_space<vmem>>, vector<1152x128xbf16>
    %cst_67 = arith.constant dense<0.000000e+00> : vector<256x128xf32>
    %73 = tpu.matmul %71, %72, %cst_67 {dimension_numbers = #tpu.dot_dimension_numbers<[1], [0], [0], [1], [0, 0, 1, 1], [], []>} : vector<256x1152xbf16>, vector<1152x128xbf16>, vector<256x128xf32> -> vector<256x128xf32>
    %c0_68 = arith.constant 0 : index
    %c0_69 = arith.constant 0 : index
    %74 = vector.load %arg9[%c0_68, %c0_69] : memref<1x128xf32, #tpu.memory_space<vmem>>, vector<1x128xf32>
    %75 = vector.broadcast %74 : vector<1x128xf32> to vector<256x128xf32>
    %76 = arith.addf %73, %75 : vector<256x128xf32>
    %77 = arith.negf %76 : vector<256x128xf32>
    %78 = math.exp %77 : vector<256x128xf32>
    %cst_70 = arith.constant 1.000000e+00 : f32
    %79 = vector.broadcast %cst_70 : f32 to vector<256x128xf32>
    %80 = arith.addf %79, %78 : vector<256x128xf32>
    %81 = arith.divf %79, %80 : vector<256x128xf32>
    %82 = arith.mulf %76, %81 : vector<256x128xf32>
    %83 = vector.shape_cast %82 : vector<256x128xf32> to vector<16x16x128xf32>
    %c0_71 = arith.constant 0 : index
    %c0_72 = arith.constant 0 : index
    %c0_73 = arith.constant 0 : index
    %c0_74 = arith.constant 0 : index
    %84 = vector.load %arg10[%c0_71, %c0_72, %c0_73, %c0_74] : memref<1x16x16x128xf32, #tpu.memory_space<vmem>>, vector<1x16x16x128xf32>
    %85 = vector.shape_cast %84 : vector<1x16x16x128xf32> to vector<16x16x128xf32>
    %86 = vector.shape_cast %83 : vector<16x16x128xf32> to vector<1x16x16x128xf32>
    tpu.vector_store %arg10[%c0_71, %c0_72, %c0_73, %c0_74], %86 {strides = array<i32>} : memref<1x16x16x128xf32, #tpu.memory_space<vmem>>, vector<1x16x16x128xf32>,
    return
  }
  func.func @transform_0(%arg0: i32) -> (i32, i32, i32, i32) {
    %c0_i32 = arith.constant 0 : i32
    %c0_i32_0 = arith.constant 0 : i32
    %c0_i32_1 = arith.constant 0 : i32
    %c0_i32_2 = arith.constant 0 : i32
    return %arg0, %c0_i32, %c0_i32_0, %c0_i32_1 : i32, i32, i32, i32
  }
  func.func @transform_1(%arg0: i32) -> (i32, i32, i32, i32) {
    %c0_i32 = arith.constant 0 : i32
    %c0_i32_0 = arith.constant 0 : i32
    %c0_i32_1 = arith.constant 0 : i32
    %c0_i32_2 = arith.constant 0 : i32
    return %arg0, %c0_i32, %c0_i32_0, %c0_i32_1 : i32, i32, i32, i32
  }
  func.func @transform_2(%arg0: i32) -> (i32, i32) {
    %c0_i32 = arith.constant 0 : i32
    %c0_i32_0 = arith.constant 0 : i32
    %c0_i32_1 = arith.constant 0 : i32
    return %c0_i32, %c0_i32_0 : i32, i32
  }
  func.func @transform_3(%arg0: i32) -> (i32, i32) {
    %c0_i32 = arith.constant 0 : i32
    %c0_i32_0 = arith.constant 0 : i32
    %c0_i32_1 = arith.constant 0 : i32
    return %c0_i32, %c0_i32_0 : i32, i32
  }
  func.func @transform_4(%arg0: i32) -> (i32, i32) {
    %c0_i32 = arith.constant 0 : i32
    %c0_i32_0 = arith.constant 0 : i32
    %c0_i32_1 = arith.constant 0 : i32
    return %c0_i32, %c0_i32_0 : i32, i32
  }
  func.func @transform_5(%arg0: i32) -> (i32, i32) {
    %c0_i32 = arith.constant 0 : i32
    %c0_i32_0 = arith.constant 0 : i32
    %c0_i32_1 = arith.constant 0 : i32
    return %c0_i32, %c0_i32_0 : i32, i32
  }
  func.func @transform_6(%arg0: i32) -> (i32, i32) {
    %c0_i32 = arith.constant 0 : i32
    %c0_i32_0 = arith.constant 0 : i32
    %c0_i32_1 = arith.constant 0 : i32
    return %c0_i32, %c0_i32_0 : i32, i32
  }
  func.func @transform_7(%arg0: i32) -> (i32, i32) {
    %c0_i32 = arith.constant 0 : i32
    %c0_i32_0 = arith.constant 0 : i32
    %c0_i32_1 = arith.constant 0 : i32
    return %c0_i32, %c0_i32_0 : i32, i32
  }
  func.func @transform_8(%arg0: i32) -> (i32, i32) {
    %c0_i32 = arith.constant 0 : i32
    %c0_i32_0 = arith.constant 0 : i32
    %c0_i32_1 = arith.constant 0 : i32
    return %c0_i32, %c0_i32_0 : i32, i32
  }
  func.func @transform_9(%arg0: i32) -> (i32, i32, i32, i32) {
    %c0_i32 = arith.constant 0 : i32
    %c0_i32_0 = arith.constant 0 : i32
    %c0_i32_1 = arith.constant 0 : i32
    %c0_i32_2 = arith.constant 0 : i32
    return %arg0, %c0_i32, %c0_i32_0, %c0_i32_1 : i32, i32, i32, i32
  }
}

</mosaic_0001>

<bundles_post_ra>
// kernel: asff2_forward.1
= control target key start
LH: loop header
LB: loop body
LE: loop exit
PB: predicated region body
PF: predicated region fallthrough
CT: control target
= control target key end

     0   :  { %s12443_s0 = inlined_call_operand.vmem [shape: bf16[2,16,16,128], index: 0, kind: input, shape index: {}]   ;;  %s12444_s1 = inlined_call_operand.vmem [shape: bf16[2,16,16,128], index: 1, kind: input, shape index: {}]   ;;  %s12445_s2 = inlined_call_operand.vmem [shape: bf16[128,16], index: 2, kind: input, shape index: {}]   ;;  %s12446_s3 = inlined_call_operand.vmem [shape: bf16[128,16], index: 3, kind: input, shape index: {}]   ;;  %s12447_s4 = inlined_call_operand.vmem [shape: f32[1,16], index: 4, kind: input, shape index: {}]   ;;  %s12448_s5 = inlined_call_operand.vmem [shape: f32[1,16], index: 5, kind: input, shape index: {}]   ;;  %s12449_s6 = inlined_call_operand.<no memory space> [shape: f32[1,1], index: 6, kind: input, shape index: {}]   ;;  %s12450_s7 = inlined_call_operand.vmem [shape: bf16[1152,128], index: 7, kind: input, shape index: {}]   ;;  %s12451_s8 = inlined_call_operand.vmem [shape: f32[1,128], index: 8, kind: input, shape index: {}]   ;;  %s12452_s9 = inlined_call_operand.hbm [shape: f32[2,16,16,128], index: 9, kind: output, shape index: {}]  }
   0x1   :  { %v14_v0 = vstv %s12449_s6 }
   0x2   :  { %15 = vst [vmem:[#allocation4] sm:$0x1] %v14_v0 }
   0x3   :  { %16 = vsyncpa [#allocation6], 0 }
   0x4   :  { %18 = vsyncpa [#allocation6 + $0x1], 0  ;;  %s9310_s11 = smov 0   ;;  %s9312_s12 = smov 0  }
   0x5   :  { %s9314_s13 = smov 0   ;;  %s9316_s14 = smov 0  }
   0x6 LB: > { %s9331_s6 = sadd.s32 4294967295, %s9251_s14   ;;  %s7316_s15 = sadd.s32 4294967294, %s9251_s14   ;;  %s9251_s14 = sphi %s9316_s14, %s12623_s14   ;;  %s9247_s13 = sphi %s9314_s13, %s12622_s13   ;;  %s9243_s12 = sphi %s9312_s12, %s12621_s12   ;;  %s9239_s11 = sphi %s9310_s11, %s12620_s11  }
   0x7   : > { %s9335_s16 = sadd.s32 1, %s9251_s14   ;;  %s230_s17 = sadd.s32 1, %s9247_s13 }
   0x8   : > { %s227_s18 = ssub.s32 %s9251_s14, %s9335_s16  ;;  %p240_p0 = scmp.ne.s32.totalorder %s9247_s13, %s9243_s12 }
   0x9   : > { %p228_p1 = scmp.eq.s32.totalorder %s227_s18, 0  ;;  %p241_p2 = scmp.eq.s32.totalorder %s9331_s6, 1 }
   0xa   : > { %p246_p3 = scmp.ne.s32.totalorder %s9243_s12, %s9239_s11  ;;  %p247_p4 = scmp.eq.s32.totalorder %s7316_s15, 1 }
   0xb   : > { %s9346_s19 = scalar_select %p228_p1, %s9247_s13, %s230_s17  }
   0xc   : > { %p9348_p5 = por %p241_p2, %p240_p0  ;;  %p9352_p6 = por %p247_p4, %p246_p3 }
   0xd   : > { %p7319_p7 = scmp.ge.s32.totalorder %s9251_s14, 1  ;;  %p302_p8 = scmp.lt.s32.totalorder %s9251_s14, 3 }
   0xf   : > { %p303_p9 = pnand %p7319_p7, %p302_p8 }
  0x11   : > { %306 = sbr.rel (%p303_p9) target bundleno = 1346 (0x542), region = 56 }
  0x18   : > { %v8565_v1 = vld [vmem:[%s12446_s3] sm:$0xff]   ;;  %p343_p10 = scmp.lt.s32.totalorder %s9331_s6, 1  ;;  %v8566_v2 = vld [vmem:[%s12446_s3 + $0x8] sm:$0xff]   ;;  %v8567_v3 = vld [vmem:[%s12446_s3 + $0x10] sm:$0xff]   ;;  %vm1362_vm0 = vcmask 130048   ;;  %vm3356_vm4 = vcmask 1042432  }
  0x19   : > { %8329 = vmatprep.subr.bf16.mxu0 %v8565_v1  ;;  %8473 = vmatprep.subr.bf16.mxu1 %v8565_v1  ;;  %v8568_v4 = vld [vmem:[%s12446_s3 + $0x18] sm:$0xff]   ;;  %v8569_v6 = vld [vmem:[%s12446_s3 + $0x20] sm:$0xff]   ;;  %v8570_v7 = vld [vmem:[%s12446_s3 + $0x28] sm:$0xff]   ;;  %vm2793_vm1 = vsmask.f32 3328  ;;  %vm3357_vm5 = vcmask 1046532  }
  0x1a   : > { %s9366_s26 = scalar_select %p343_p10, %s9331_s6, 1  ;;  %8330 = vmatpush3.bf16.msra.mxu0 %v8565_v1  ;;  %8481 = vmatpush3.bf16.msra.mxu1 %v8565_v1  ;;  %v8571_v8 = vld [vmem:[%s12446_s3 + $0x30] sm:$0xff]   ;;  %v8572_v10 = vld [vmem:[%s12446_s3 + $0x38] sm:$0xff]   ;;  %v8575_v12 = vld [vmem:[%s12445_s2] sm:$0xff]   ;;  %vm2794_vm2 = vsmask.f32 7440 }
  0x1b   : > { %8331 = vmatprep.subr.bf16.mxu0 %v8566_v2  ;;  %8474 = vmatprep.subr.bf16.mxu1 %v8566_v2  ;;  %v8576_v16 = vld [vmem:[%s12445_s2 + $0x8] sm:$0xff]   ;;  %v8579_v18 = vld [vmem:[%s12445_s2 + $0x10] sm:$0xff]   ;;  %v8580_v22 = vld [vmem:[%s12445_s2 + $0x18] sm:$0xff]   ;;  %vm2484_vm7 = vcmask 1043456   ;;  %vm2485_vm8 = vsmask.f32 7938 }
  0x1c   : > { %s7774_s29 = sshll.u32 %s9366_s26, 7  ;;  %v8583_v24 = vld [vmem:[%s12445_s2 + $0x20] sm:$0xff]   ;;  %v8584_v28 = vld [vmem:[%s12445_s2 + $0x28] sm:$0xff]   ;;  %v8587_v30 = vld [vmem:[%s12445_s2 + $0x30] sm:$0xff]   ;;  %vm2160_vm9 = vsmask.f32 256 }
  0x1d   : > { %s9377_s15 = scalar_lea.vmem %s12444_s1, %s7774_s29  ;;  %s9431_s24 = scalar_lea.vmem %s12443_s0, %s7774_s29  ;;  %v8588_v33 = vld [vmem:[%s12445_s2 + $0x38] sm:$0xff]   ;;  %v9492_v1 = vld [vmem:[%s12447_s4] ss:$0 sm:$0xff]  ;;  %vm9863_vm3 = vmor %vm2793_vm1, %vm2794_vm2  ;;  %vm2161_vm10 = vsmask.f32 4368  ;;  %vm2491_vm11 = vcmask 1040384  }
  0x1e   : > { %8332 = vmatpush3.bf16.msra.mxu0 %v8566_v2  ;;  %8482 = vmatpush3.bf16.msra.mxu1 %v8566_v2  ;;  %v386_v5 = vld [vmem:[%s9377_s15] sm:$0xff]   ;;  %v388_v11 = vld [vmem:[%s9377_s15 + $0x8] sm:$0xff]   ;;  %v390_v13 = vld [vmem:[%s9377_s15 + $0x10] sm:$0xff]   ;;  %s340_s10 = sand.u32 1, %s9243_s12   ;;  %s7808_s22 = sshll.u32 %s9331_s6, 12 }
  0x1f   : > { %8333 = vmatprep.subr.bf16.mxu0 %v8567_v3  ;;  %8475 = vmatprep.subr.bf16.mxu1 %v8567_v3  ;;  %v402_v9 = vld [vmem:[%s9377_s15 + $0x40] sm:$0xff]   ;;  %v404_v14 = vld [vmem:[%s9377_s15 + $0x48] sm:$0xff]   ;;  %v406_v15 = vld [vmem:[%s9377_s15 + $0x50] sm:$0xff]   ;;  %s12230_s17 = sshll.u32 %s340_s10, 8  ;;  %s12402_s6 = scalar_lea.sflag [#allocation6], %s340_s10 }
  0x20   : > { %8345 = vmatprep.mubr.bf16.mxu0 %v386_v5  ;;  %8361 = vmatprep.mubr.bf16.mxu1 %v402_v9  ;;  %v392_v17 = vld [vmem:[%s9377_s15 + $0x18] sm:$0xff]   ;;  %v394_v19 = vld [vmem:[%s9377_s15 + $0x20] sm:$0xff]   ;;  %v396_v23 = vld [vmem:[%s9377_s15 + $0x28] sm:$0xff]   ;;  %s12251_s18 = scalar_lea.vmem [#allocation5], %s12230_s17  ;;  %s9254_s26 = smov [#allocation5]  }
  0x21   : > { %v408_v20 = vld [vmem:[%s9377_s15 + $0x58] sm:$0xff]   ;;  %v410_v21 = vld [vmem:[%s9377_s15 + $0x60] sm:$0xff]   ;;  %v398_v25 = vld [vmem:[%s9377_s15 + $0x30] sm:$0xff]   ;;  %s7242_s23 = sshll.u32 %s12251_s18, 4  ;;  %s9193_s29 = sshll.u32 %s9254_s26, 4  ;;  %s12394_s23 = int_to_ptr.vmem [resolvable:$true] %s7242_s23  ;;  %s9194_s29 = int_to_ptr.vmem [resolvable:$false] %s9193_s29 }
  0x22   : > { %8334 = vmatpush3.bf16.msra.mxu0 %v8567_v3  ;;  %8483 = vmatpush3.bf16.msra.mxu1 %v8567_v3  ;;  %v412_v26 = vld [vmem:[%s9377_s15 + $0x68] sm:$0xff]   ;;  %v414_v27 = vld [vmem:[%s9377_s15 + $0x70] sm:$0xff]   ;;  %v400_v29 = vld [vmem:[%s9377_s15 + $0x38] sm:$0xff]   ;;  %s9189_s27 = scalar_lea.vmem %s12394_s23, 4096  ;;  %s9195_s28 = scalar_lea.vmem %s9194_s29, 8192 }
  0x23   : > { %8335 = vmatprep.subr.bf16.mxu0 %v8568_v4  ;;  %8476 = vmatprep.subr.bf16.mxu1 %v8568_v4  ;;  %v354_v31 = vld [vmem:[%s9431_s24] sm:$0xff]   ;;  %v416_v32 = vld [vmem:[%s9377_s15 + $0x78] sm:$0xff]   ;;  %v356_v34 = vld [vmem:[%s9431_s24 + $0x8] sm:$0xff]   ;;  %p9190_p11 = scmp.ne.s32.totalorder %s12394_s23, %s9189_s27  ;;  %p9196_p0 = scmp.lt.s32.totalorder %s12394_s23, %s9194_s29 }
  0x24   : > { %v358_v35 = vld [vmem:[%s9431_s24 + $0x10] sm:$0xff]   ;;  %v360_v36 = vld [vmem:[%s9431_s24 + $0x18] sm:$0xff]   ;;  %v362_v37 = vld [vmem:[%s9431_s24 + $0x20] sm:$0xff]   ;;  %p9197_p1 = scmp.lt.s32.totalorder %s9195_s28, %s9189_s27 }
  0x25   : > { %v364_v38 = vld [vmem:[%s9431_s24 + $0x28] sm:$0xff]   ;;  %v366_v39 = vld [vmem:[%s9431_s24 + $0x30] sm:$0xff]   ;;  %v368_v40 = vld [vmem:[%s9431_s24 + $0x38] sm:$0xff]   ;;  %p9191_p12 = pnand %p9190_p11, %p9348_p5 }
  0x26   : > { %8336 = vmatpush3.bf16.msra.mxu0 %v8568_v4  ;;  %8484 = vmatpush3.bf16.msra.mxu1 %v8568_v4  ;;  %v370_v41 = vld [vmem:[%s9431_s24 + $0x40] sm:$0xff]   ;;  %v372_v42 = vld [vmem:[%s9431_s24 + $0x48] sm:$0xff]   ;;  %v374_v43 = vld [vmem:[%s9431_s24 + $0x50] sm:$0xff]   ;;  %p9198_p2 = por %p9197_p1, %p9196_p0 }
  0x27   : > { %8337 = vmatprep.subr.bf16.mxu0 %v8569_v6  ;;  %8477 = vmatprep.subr.bf16.mxu1 %v8569_v6  ;;  %v376_v44 = vld [vmem:[%s9431_s24 + $0x58] sm:$0xff]   ;;  %v378_v45 = vld [vmem:[%s9431_s24 + $0x60] sm:$0xff]   ;;  %v380_v46 = vld [vmem:[%s9431_s24 + $0x68] sm:$0xff]   ;;  %p9192_p13 = pneg %p9191_p12 }
  0x28   : > { %v382_v47 = vld [vmem:[%s9431_s24 + $0x70] sm:$0xff]   ;;  %v384_v48 = vld [vmem:[%s9431_s24 + $0x78] sm:$0xff]   ;;  %vm9959_vm6 = vmor %vm3356_vm4, %vm3357_vm5 }
  0x29   : > { %vm10081_vm12 = vmand %vm2484_vm7, %vm2485_vm8  ;;  %p9199_p3 = pnand %p9198_p2, %p9192_p13 }
  0x2a   : > { %8338 = vmatpush3.bf16.msra.mxu0 %v8569_v6  ;;  %8485 = vmatpush3.bf16.msra.mxu1 %v8569_v6  ;;  %vm10112_vm13 = vmor %vm2160_vm9, %vm2161_vm10 }
  0x2b   : > { %8339 = vmatprep.subr.bf16.mxu0 %v8570_v7  ;;  %8478 = vmatprep.subr.bf16.mxu1 %v8570_v7  ;;  %vm10124_vm14 = vmand %vm2491_vm11, %vm2160_vm9 }
  0x2e   : > { %8340 = vmatpush3.bf16.msra.mxu0 %v8570_v7  ;;  %8486 = vmatpush3.bf16.msra.mxu1 %v8570_v7 }
  0x2f   : > { %8341 = vmatprep.subr.bf16.mxu0 %v8571_v8  ;;  %8479 = vmatprep.subr.bf16.mxu1 %v8571_v8 }
  0x32   : > { %8342 = vmatpush3.bf16.msra.mxu0 %v8571_v8  ;;  %8487 = vmatpush3.bf16.msra.mxu1 %v8571_v8 }
  0x33   : > { %8343 = vmatprep.subr.bf16.mxu0 %v8572_v10  ;;  %8480 = vmatprep.subr.bf16.mxu1 %v8572_v10 }
  0x36   : > { %8344 = vmatpush3.bf16.msra.mxu0 %v8572_v10  ;;  %8488 = vmatpush3.bf16.msra.mxu1 %v8572_v10 }
  0x37   : > { %8377 = vmatprep.subr.bf16.mxu0 %v8575_v12 }
  0x39   : > { %8346 = vmatmul.mubr.bf16.vlgmr.msra.gmra.mrb[0].mxu0 %v388_v11  ;;  %8362 = vmatmul.mubr.bf16.vlgmr.msra.gmra.mrb[0].mxu1 %v404_v14 }
  0x3a   : > { %8378 = vmatpush3.bf16.msra.mxu0 %v8575_v12  ;;  %8349 = vmatprep.mubr.bf16.mxu0 %v390_v13 }
  0x3b   : > { %8379 = vmatprep.subr.bf16.mxu0 %v8576_v16  ;;  %8365 = vmatprep.mubr.bf16.mxu1 %v406_v15 }
  0x3e   : > { %8380 = vmatpush3.bf16.msra.mxu0 %v8576_v16 }
  0x3f   : > { %8381 = vmatprep.subr.bf16.mxu0 %v8579_v18 }
  0x41   : > { %8350 = vmatmul.mubr.bf16.gmra.mrb[4].mxu0 %v392_v17  ;;  %8366 = vmatmul.mubr.bf16.gmra.mrb[4].mxu1 %v408_v20 }
  0x42   : > { %8382 = vmatpush3.bf16.msra.mxu0 %v8579_v18  ;;  %8353 = vmatprep.mubr.bf16.mxu0 %v394_v19 }
  0x43   : > { %8383 = vmatprep.subr.bf16.mxu0 %v8580_v22  ;;  %8369 = vmatprep.mubr.bf16.mxu1 %v410_v21 }
  0x46   : > { %8384 = vmatpush3.bf16.msra.mxu0 %v8580_v22 }
  0x47   : > { %8385 = vmatprep.subr.bf16.mxu0 %v8583_v24 }
  0x49   : > { %8354 = vmatmul.mubr.bf16.gmra.mrb[8].mxu0 %v396_v23  ;;  %8370 = vmatmul.mubr.bf16.gmra.mrb[8].mxu1 %v412_v26 }
  0x4a   : > { %8386 = vmatpush3.bf16.msra.mxu0 %v8583_v24  ;;  %8357 = vmatprep.mubr.bf16.mxu0 %v398_v25 }
  0x4b   : > { %8387 = vmatprep.subr.bf16.mxu0 %v8584_v28  ;;  %8373 = vmatprep.mubr.bf16.mxu1 %v414_v27 }
  0x4e   : > { %8388 = vmatpush3.bf16.msra.mxu0 %v8584_v28 }
  0x4f   : > { %8389 = vmatprep.subr.bf16.mxu0 %v8587_v30 }
  0x51   : > { %8358 = vmatmul.mubr.bf16.gmra.mrb[12].mxu0 %v400_v29  ;;  %8374 = vmatmul.mubr.bf16.gmra.mrb[12].mxu1 %v416_v32 }
  0x52   : > { %8390 = vmatpush3.bf16.msra.mxu0 %v8587_v30  ;;  %8393 = vmatprep.mubr.bf16.mxu0 %v354_v31 }
  0x53   : > { %8391 = vmatprep.subr.bf16.mxu0 %v8588_v33 }
  0x56   : > { %8392 = vmatpush3.bf16.msra.mxu0 %v8588_v33 }
  0x59   : > { %8394 = vmatmul.mubr.bf16.vlgmr.msra.gmra.mrb[0].mxu0 %v356_v34 }
  0x5a   : > { %8397 = vmatprep.mubr.bf16.mxu0 %v358_v35 }
  0x61   : > { %8398 = vmatmul.mubr.bf16.gmra.mrb[4].mxu0 %v360_v36 }
  0x62   : > { %8401 = vmatprep.mubr.bf16.mxu0 %v362_v37 }
  0x69   : > { %8402 = vmatmul.mubr.bf16.gmra.mrb[8].mxu0 %v364_v38 }
  0x6a   : > { %8405 = vmatprep.mubr.bf16.mxu0 %v366_v39 }
  0x71   : > { %8406 = vmatmul.mubr.bf16.gmra.mrb[12].mxu0 %v368_v40 }
  0x72   : > { %8409 = vmatprep.mubr.bf16.mxu0 %v370_v41 }
  0x79   : > { %8410 = vmatmul.mubr.bf16.gmra.mrb[16].mxu0 %v372_v42 }
  0x7a   : > { %8413 = vmatprep.mubr.bf16.mxu0 %v374_v43 }
  0x81   : > { %8414 = vmatmul.mubr.bf16.gmra.mrb[20].mxu0 %v376_v44 }
  0x82   : > { %8417 = vmatprep.mubr.bf16.mxu0 %v378_v45 }
  0x89   : > { %8418 = vmatmul.mubr.bf16.gmra.mrb[24].mxu0 %v380_v46 }
  0x8a   : > { %8421 = vmatprep.mubr.bf16.mxu0 %v382_v47 }
  0x91   : > { %8422 = vmatmul.mubr.bf16.gmra.mrb[28].mxu0 %v384_v48 }
 0x10c   : > { %v9457_v49 = vpop.f32.mrb[0].mxu1 }
 0x10d   : > { %v9459_v50 = vpop.f32.mrb[1].mxu1 }
 0x10e   : > { %v9461_v51 = vpop.f32.mrb[2].mxu1 }
 0x10f   : > { %v9463_v52 = vpop.f32.mrb[3].mxu1 }
 0x114   : > { %v9465_v53 = vpop.f32.mrb[4].mxu1 }
 0x115   : > { %v9467_v54 = vpop.f32.mrb[5].mxu1 }
 0x116   : > { %v9469_v55 = vpop.f32.mrb[6].mxu1 }
 0x117   : > { %v9471_v56 = vpop.f32.mrb[7].mxu1 }
 0x11c   : > { %v9473_v57 = vpop.f32.mrb[8].mxu1 }
 0x11d   : > { %v9475_v58 = vpop.f32.mrb[9].mxu1 }
 0x11e   : > { %v9477_v59 = vpop.f32.mrb[10].mxu1 }
 0x11f   : > { %v9479_v60 = vpop.f32.mrb[11].mxu1 }
 0x124   : > { %v9481_v61 = vpop.f32.mrb[12].mxu1 }
 0x125   : > { %v9483_v62 = vpop.f32.mrb[13].mxu1 }
 0x126   : > { %v9485_v63 = vpop.f32.mrb[14].mxu1 }
 0x127   : > { %v9487_v0 = vpop.f32.mrb[15].mxu1 }
 0x12c   : > { %v8395_v2 = vpop.f32.mrb[0].mxu0 }
 0x12d   : > { %v9495_v3 = vadd.f32 %v8395_v2, %v9492_v1  ;;  %v933_v4 = vpop.f32.mrb[1].mxu0 }
 0x12e   : > { %v9498_v5 = vadd.f32 %v9492_v1, %v933_v4  ;;  %v8396_v6 = vpop.f32.mrb[2].mxu0 }
 0x12f   : > { %v7376_v7 = vmul.f32 -1.442695, %v9495_v3  ;;  %v9502_v8 = vadd.f32 %v8396_v6, %v9492_v1  ;;  %v936_v9 = vpop.f32.mrb[3].mxu0 }
 0x130   : > { %v7374_v10 = vmul.f32 -1.442695, %v9498_v5  ;;  %v9506_v11 = vadd.f32 %v9492_v1, %v936_v9 }
 0x131   : > { %8765 = vpow2.f32 %v7376_v7  ;;  %v7377_v12 = vmul.f32 -1.442695, %v9502_v8 }
 0x132   : > { %8767 = vpow2.f32 %v7374_v10  ;;  %v7375_v13 = vmul.f32 -1.442695, %v9506_v11 }
 0x133   : > { %8769 = vpow2.f32 %v7377_v12 }
 0x134   : > { %8771 = vpow2.f32 %v7375_v13  ;;  %v8399_v14 = vpop.f32.mrb[4].mxu0 }
 0x135   : > { %v9511_v15 = vadd.f32 %v8399_v14, %v9492_v1  ;;  %v949_v16 = vpop.f32.mrb[5].mxu0 }
 0x136   : > { %v9514_v17 = vadd.f32 %v9492_v1, %v949_v16  ;;  %v8400_v18 = vpop.f32.mrb[6].mxu0 }
 0x137   : > { %v7380_v19 = vmul.f32 -1.442695, %v9511_v15  ;;  %v9518_v20 = vadd.f32 %v8400_v18, %v9492_v1  ;;  %v952_v21 = vpop.f32.mrb[7].mxu0 }
 0x138   : > { %v7378_v22 = vmul.f32 -1.442695, %v9514_v17  ;;  %v9522_v23 = vadd.f32 %v9492_v1, %v952_v21 }
 0x139   : > { %8773 = vpow2.f32 %v7380_v19  ;;  %v7381_v24 = vmul.f32 -1.442695, %v9518_v20 }
 0x13a   : > { %8775 = vpow2.f32 %v7378_v22  ;;  %v7379_v25 = vmul.f32 -1.442695, %v9522_v23 }
 0x13b   : > { %v8766_v26 = vpop.eup %8765  ;;  %8777 = vpow2.f32 %v7381_v24 }
 0x13c   : > { %v8768_v27 = vpop.eup %8767  ;;  %v1197_v28 = vadd.f32 1.0, %v8766_v26  ;;  %8779 = vpow2.f32 %v7379_v25  ;;  %v8403_v29 = vpop.f32.mrb[8].mxu0  ;;  %v9559_v26 = vld [vmem:[%s12448_s5] ss:$0 sm:$0xff] }
 0x13d   : > { %v8770_v30 = vpop.eup %8769  ;;  %v1195_v31 = vadd.f32 1.0, %v8768_v27  ;;  %v9527_v32 = vadd.f32 %v8403_v29, %v9492_v1  ;;  %v965_v33 = vpop.f32.mrb[9].mxu0 }
 0x13e   : > { %v8772_v34 = vpop.eup %8771  ;;  %8781 = vrcp.f32 %v1197_v28  ;;  %v1198_v35 = vadd.f32 1.0, %v8770_v30  ;;  %v9530_v36 = vadd.f32 %v9492_v1, %v965_v33  ;;  %v8404_v37 = vpop.f32.mrb[10].mxu0 }
 0x13f   : > { %8783 = vrcp.f32 %v1195_v31  ;;  %v1196_v38 = vadd.f32 1.0, %v8772_v34  ;;  %v7384_v39 = vmul.f32 -1.442695, %v9527_v32  ;;  %v9534_v40 = vadd.f32 %v8404_v37, %v9492_v1  ;;  %v968_v41 = vpop.f32.mrb[11].mxu0 }
 0x140   : > { %8785 = vrcp.f32 %v1198_v35  ;;  %v7382_v42 = vmul.f32 -1.442695, %v9530_v36  ;;  %v9538_v43 = vadd.f32 %v9492_v1, %v968_v41 }
 0x141   : > { %8787 = vrcp.f32 %v1196_v38  ;;  %v7385_v44 = vmul.f32 -1.442695, %v9534_v40 }
 0x142   : > { %8789 = vpow2.f32 %v7384_v39  ;;  %v7383_v45 = vmul.f32 -1.442695, %v9538_v43 }
 0x143   : > { %v8774_v46 = vpop.eup %8773  ;;  %8791 = vpow2.f32 %v7382_v42 }
 0x144   : > { %v8776_v47 = vpop.eup %8775  ;;  %v1201_v48 = vadd.f32 1.0, %v8774_v46  ;;  %8793 = vpow2.f32 %v7385_v44  ;;  %v8407_v2 = vpop.f32.mrb[12].mxu0 }
 0x145   : > { %v8778_v4 = vpop.eup %8777  ;;  %v1199_v6 = vadd.f32 1.0, %v8776_v47  ;;  %8795 = vpow2.f32 %v7383_v45  ;;  %v9543_v7 = vadd.f32 %v8407_v2, %v9492_v1  ;;  %v981_v9 = vpop.f32.mrb[13].mxu0 }
 0x146   : > { %v8780_v10 = vpop.eup %8779  ;;  %8797 = vrcp.f32 %v1201_v48  ;;  %v1202_v12 = vadd.f32 1.0, %v8778_v4  ;;  %v9546_v13 = vadd.f32 %v9492_v1, %v981_v9  ;;  %v8408_v14 = vpop.f32.mrb[14].mxu0 }
 0x147   : > { %8799 = vrcp.f32 %v1199_v6  ;;  %v1200_v16 = vadd.f32 1.0, %v8780_v10  ;;  %v7388_v18 = vmul.f32 -1.442695, %v9543_v7  ;;  %v9550_v19 = vadd.f32 %v8408_v14, %v9492_v1  ;;  %v984_v21 = vpop.f32.mrb[15].mxu0 }
 0x148   : > { %v8782_v22 = vpop.eup %8781  ;;  %8801 = vrcp.f32 %v1202_v12  ;;  %v7386_v24 = vmul.f32 -1.442695, %v9546_v13  ;;  %v9554_v25 = vadd.f32 %v9492_v1, %v984_v21 }
 0x149   : > { %v8784_v27 = vpop.eup %8783  ;;  %v1293_v28 = vmul.f32 %v8782_v22, %v9495_v3  ;;  %8803 = vrcp.f32 %v1200_v16  ;;  %v7389_v29 = vmul.f32 -1.442695, %v9550_v19 }
 0x14a   : > { %v8786_v30 = vpop.eup %8785  ;;  %v1291_v31 = vmul.f32 %v8784_v27, %v9498_v5  ;;  %8805 = vpow2.f32 %v7388_v18  ;;  %v7387_v33 = vmul.f32 -1.442695, %v9554_v25 }
 0x14b   : > { %v8788_v34 = vpop.eup %8787  ;;  %v1294_v35 = vmul.f32 %v8786_v30, %v9502_v8  ;;  %8807 = vpow2.f32 %v7386_v24  ;;  %v1332_v37 = vmul.f32 %v9559_v26, %v1293_v28 }
 0x14c   : > { %v8790_v38 = vpop.eup %8789  ;;  %v1292_v39 = vmul.f32 %v8788_v34, %v9506_v11  ;;  %8809 = vpow2.f32 %v7389_v29  ;;  %v8411_v3 = vpop.f32.mrb[16].mxu0  ;;  %v1330_v41 = vmul.f32 %v9559_v26, %v1291_v31 }
 0x14d   : > { %v8792_v42 = vpop.eup %8791  ;;  %v1205_v44 = vadd.f32 1.0, %v8790_v38  ;;  %8811 = vpow2.f32 %v7387_v33  ;;  %v1369_v5 = vsel %vm1362_vm0, %v1332_v37, 0.0  ;;  %v1006_v45 = vadd.f32 %v8411_v3, %v9457_v49  ;;  %v997_v46 = vpop.f32.mrb[17].mxu0 }
 0x14e   : > { %v8794_v47 = vpop.eup %8793  ;;  %v1203_v8 = vadd.f32 1.0, %v8792_v42  ;;  %1370 = vadd.xlane.f32.xlu1 %v1369_v5  ;;  %v1363_v48 = vsel %vm1362_vm0, %v1330_v41, 0.0  ;;  %v998_v2 = vadd.f32 %v997_v46, %v9459_v50  ;;  %v8412_v11 = vpop.f32.mrb[18].mxu0  ;;  %v1333_v4 = vmul.f32 %v9559_v26, %v1294_v35 }
 0x14f   : > { %v8796_v6 = vpop.eup %8795  ;;  %8813 = vrcp.f32 %v1205_v44  ;;  %v1206_v9 = vadd.f32 1.0, %v8794_v47  ;;  %v9575_v10 = vadd.f32 %v9492_v1, %v1006_v45  ;;  %1364 = vadd.xlane.f32.xlu0 %v1363_v48  ;;  %v1009_v49 = vadd.f32 %v8412_v11, %v9461_v51  ;;  %v1000_v12 = vpop.f32.mrb[19].mxu0 }
 0x150   : > { %v8798_v14 = vpop.eup %8797  ;;  %8815 = vrcp.f32 %v1203_v8  ;;  %v1204_v16 = vadd.f32 1.0, %v8796_v6  ;;  %v9579_v18 = vadd.f32 %v9492_v1, %v998_v2  ;;  %v1372_v50 = vsel %vm1362_vm0, %v1333_v4, 0.0 }
 0x151   : > { %v8800_v21 = vpop.eup %8799  ;;  %v1297_v22 = vmul.f32 %v8798_v14, %v9511_v15  ;;  %8817 = vrcp.f32 %v1206_v9  ;;  %v7392_v24 = vmul.f32 -1.442695, %v9575_v10  ;;  %v9585_v27 = vadd.f32 %v9492_v1, %v1009_v49 }
 0x152   : > { %v8802_v28 = vpop.eup %8801  ;;  %v1295_v51 = vmul.f32 %v8800_v21, %v9514_v17  ;;  %8819 = vrcp.f32 %v1204_v16  ;;  %v7390_v29 = vmul.f32 -1.442695, %v9579_v18  ;;  %1373 = vadd.xlane.f32.xlu1 %v1372_v50  ;;  %v1331_v30 = vmul.f32 %v9559_v26, %v1292_v39 }
 0x153   : > { %v8804_v31 = vpop.eup %8803  ;;  %v1298_v33 = vmul.f32 %v8802_v28, %v9518_v20  ;;  %8821 = vpow2.f32 %v7392_v24  ;;  %v7393_v15 = vmul.f32 -1.442695, %v9585_v27  ;;  %v1001_v34 = vadd.f32 %v1000_v12, %v9463_v52 }
 0x154   : > { %v8806_v35 = vpop.eup %8805  ;;  %v1296_v37 = vmul.f32 %v8804_v31, %v9522_v23  ;;  %8823 = vpow2.f32 %v7390_v29  ;;  %v1366_v17 = vsel %vm1362_vm0, %v1331_v30, 0.0  ;;  %v8415_v38 = vpop.f32.mrb[20].mxu0  ;;  %v1336_v3 = vmul.f32 %v9559_v26, %v1297_v22 }
 0x155   : > { %v8808_v41 = vpop.eup %8807  ;;  %v1209_v42 = vadd.f32 1.0, %v8806_v35  ;;  %8825 = vpow2.f32 %v7393_v15  ;;  %1367 = vadd.xlane.f32.xlu0 %v1366_v17  ;;  %v9597_v20 = vadd.f32 %v9492_v1, %v1001_v34  ;;  %v1022_v39 = vadd.f32 %v8415_v38, %v9465_v53  ;;  %v1013_v44 = vpop.f32.mrb[21].mxu0 }
 0x156   : > { %v8810_v52 = vpop.eup %8809  ;;  %v1207_v5 = vadd.f32 1.0, %v8808_v41  ;;  %v1381_v23 = vsel %vm1362_vm0, %v1336_v3, 0.0  ;;  %v1014_v45 = vadd.f32 %v1013_v44, %v9467_v54  ;;  %v1337_v46 = vmul.f32 %v9559_v26, %v1298_v33  ;;  %v8416_v47 = vpop.f32.mrb[22].mxu0 }
 0x157   : > { %v8812_v8 = vpop.eup %8811  ;;  %8827 = vrcp.f32 %v1209_v42  ;;  %v1210_v48 = vadd.f32 1.0, %v8810_v52  ;;  %v7391_v2 = vmul.f32 -1.442695, %v9597_v20  ;;  %v9605_v11 = vadd.f32 %v9492_v1, %v1022_v39  ;;  %v1016_v4 = vpop.f32.mrb[23].mxu0 }
 0x158   : > { %8829 = vrcp.f32 %v1207_v5  ;;  %v1208_v53 = vadd.f32 1.0, %v8812_v8  ;;  %v9608_v6 = vadd.f32 %v9492_v1, %v1014_v45  ;;  %v1384_v9 = vsel %vm1362_vm0, %v1337_v46, 0.0 }
 0x159   : > { %v8814_v54 = vpop.eup %8813  ;;  %8831 = vrcp.f32 %v1210_v48  ;;  %v7396_v49 = vmul.f32 -1.442695, %v9605_v11  ;;  %1382 = vadd.xlane.f32.xlu0 %v1381_v23  ;;  %1385 = vadd.xlane.f32.xlu1 %v1384_v9  ;;  %v1025_v12 = vadd.f32 %v8416_v47, %v9469_v55  ;;  %v1334_v14 = vmul.f32 %v9559_v26, %v1295_v51 }
 0x15a   : > { %v8816_v16 = vpop.eup %8815  ;;  %v1301_v50 = vmul.f32 %v8814_v54, %v9527_v32  ;;  %8833 = vrcp.f32 %v1208_v53  ;;  %v7394_v21 = vmul.f32 -1.442695, %v9608_v6  ;;  %v1335_v22 = vmul.f32 %v9559_v26, %v1296_v37 }
 0x15b   : > { %v8818_v24 = vpop.eup %8817  ;;  %v1299_v28 = vmul.f32 %v8816_v16, %v9530_v36  ;;  %8835 = vpow2.f32 %v7391_v2  ;;  %v9619_v29 = vadd.f32 %v9492_v1, %v1025_v12  ;;  %v1375_v30 = vsel %vm1362_vm0, %v1334_v14, 0.0 }
 0x15c   : > { %v8820_v55 = vpop.eup %8819  ;;  %v1302_v51 = vmul.f32 %v8818_v24, %v9534_v40  ;;  %8837 = vpow2.f32 %v7396_v49  ;;  %v1378_v32 = vsel %vm1362_vm0, %v1335_v22, 0.0  ;;  %v1017_v31 = vadd.f32 %v1016_v4, %v9471_v56  ;;  %v8419_v33 = vpop.f32.mrb[24].mxu0 }
 0x15d   : > { %v8822_v15 = vpop.eup %8821  ;;  %v1300_v34 = vmul.f32 %v8820_v55, %v9538_v43  ;;  %8839 = vpow2.f32 %v7394_v21  ;;  %v7397_v36 = vmul.f32 -1.442695, %v9619_v29  ;;  %1376 = vadd.xlane.f32.xlu0 %v1375_v30  ;;  %1379 = vadd.xlane.f32.xlu1 %v1378_v32  ;;  %v1340_v35 = vmul.f32 %v9559_v26, %v1301_v50  ;;  %v1029_v37 = vpop.f32.mrb[25].mxu0 }
 0x15e   : > { %v8824_v17 = vpop.eup %8823  ;;  %v1213_v38 = vadd.f32 1.0, %v8822_v15  ;;  %v9629_v40 = vadd.f32 %v9492_v1, %v1017_v31  ;;  %v1341_v3 = vmul.f32 %v9559_v26, %v1302_v51  ;;  %v1338_v56 = vmul.f32 %v9559_v26, %v1299_v28  ;;  %v8420_v41 = vpop.f32.mrb[26].mxu0 }
 0x15f   : > { %v8826_v42 = vpop.eup %8825  ;;  %v1211_v43 = vadd.f32 1.0, %v8824_v17  ;;  %8841 = vpow2.f32 %v7397_v36  ;;  %v1393_v39 = vsel %vm1362_vm0, %v1340_v35, 0.0  ;;  %v1339_v44 = vmul.f32 %v9559_v26, %v1300_v34  ;;  %v1032_v52 = vpop.f32.mrb[27].mxu0 }
 0x160   : > { %8843 = vrcp.f32 %v1213_v38  ;;  %v1214_v5 = vadd.f32 1.0, %v8826_v42  ;;  %v7395_v23 = vmul.f32 -1.442695, %v9629_v40  ;;  %v1396_v45 = vsel %vm1362_vm0, %v1341_v3, 0.0 }
 0x161   : > { %v8828_v46 = vpop.eup %8827  ;;  %8845 = vrcp.f32 %v1211_v43  ;;  %1394 = vadd.xlane.f32.xlu0 %v1393_v39  ;;  %1397 = vadd.xlane.f32.xlu1 %v1396_v45  ;;  %v1387_v47 = vsel %vm1362_vm0, %v1338_v56, 0.0  ;;  %v1038_v8 = vadd.f32 %v8419_v33, %v9473_v57  ;;  %v1030_v4 = vadd.f32 %v1029_v37, %v9475_v58 }
 0x162   : > { %v8830_v48 = vpop.eup %8829  ;;  %v1305_v2 = vmul.f32 %v8828_v46, %v9543_v7  ;;  %8847 = vrcp.f32 %v1214_v5  ;;  %v1041_v53 = vadd.f32 %v8420_v41, %v9477_v59  ;;  %v1033_v12 = vadd.f32 %v1032_v52, %v9479_v60 }
 0x163   : > { %v8832_v9 = vpop.eup %8831  ;;  %v1303_v54 = vmul.f32 %v8830_v48, %v9546_v13  ;;  %8849 = vpow2.f32 %v7395_v23  ;;  %v9644_v49 = vadd.f32 %v9492_v1, %v1038_v8  ;;  %v1390_v16 = vsel %vm1362_vm0, %v1339_v44, 0.0 }
 0x164   : > { %v8834_v14 = vpop.eup %8833  ;;  %v1306_v57 = vmul.f32 %v8832_v9, %v9550_v19  ;;  %v1344_v7 = vmul.f32 %v9559_v26, %v1305_v2  ;;  %v9651_v58 = vadd.f32 %v9492_v1, %v1030_v4  ;;  %v8423_v59 = vpop.f32.mrb[28].mxu0  ;;  %v9656_v60 = vadd.f32 %v9492_v1, %v1041_v53 }
 0x165   : > { %v8836_v50 = vpop.eup %8835  ;;  %v1304_v13 = vmul.f32 %v8834_v14, %v9554_v25  ;;  %1388 = vadd.xlane.f32.xlu0 %v1387_v47  ;;  %1391 = vadd.xlane.f32.xlu1 %v1390_v16  ;;  %v7400_v21 = vmul.f32 -1.442695, %v9644_v49  ;;  %v9659_v19 = vadd.f32 %v9492_v1, %v1033_v12  ;;  %v1045_v22 = vpop.f32.mrb[29].mxu0  ;;  %v1342_v31 = vmul.f32 %v9559_v26, %v1303_v54 }
 0x166   : > { %v8838_v24 = vpop.eup %8837  ;;  %v1212_v28 = vadd.f32 1.0, %v8836_v50  ;;  %v1405_v30 = vsel %vm1362_vm0, %v1344_v7, 0.0  ;;  %v1345_v55 = vmul.f32 %v9559_v26, %v1306_v57  ;;  %v8424_v51 = vpop.f32.mrb[30].mxu0  ;;  %v7398_v33 = vmul.f32 -1.442695, %v9651_v58 }
 0x167   : > { %v8840_v32 = vpop.eup %8839  ;;  %v1217_v25 = vadd.f32 1.0, %v8838_v24  ;;  %8851 = vpow2.f32 %v7400_v21  ;;  %v1048_v15 = vpop.f32.mrb[31].mxu0  ;;  %v1343_v35 = vmul.f32 %v9559_v26, %v1304_v13  ;;  %v7401_v17 = vmul.f32 -1.442695, %v9656_v60 }
 0x168   : > { %8853 = vrcp.f32 %v1212_v28  ;;  %v1215_v34 = vadd.f32 1.0, %v8840_v32  ;;  %v1408_v36 = vsel %vm1362_vm0, %v1345_v55, 0.0  ;;  %v7399_v38 = vmul.f32 -1.442695, %v9659_v19 }
 0x169   : > { %v8842_v37 = vpop.eup %8841  ;;  %8855 = vrcp.f32 %v1217_v25  ;;  %1406 = vadd.xlane.f32.xlu0 %v1405_v30  ;;  %1409 = vadd.xlane.f32.xlu1 %v1408_v36  ;;  %v9670_v3 = vadd.f32 %v8423_v59, %v9481_v61  ;;  %v9673_v42 = vadd.f32 %v1045_v22, %v9483_v62  ;;  %v9676_v43 = vadd.f32 %v8424_v51, %v9485_v63 }
 0x16a   : > { %v8844_v56 = vpop.eup %8843  ;;  %8857 = vrcp.f32 %v1215_v34  ;;  %v1218_v41 = vadd.f32 1.0, %v8842_v37  ;;  %v1049_v52 = vadd.f32 %v1048_v15, %v9487_v0  ;;  %v1399_v61 = vsel %vm1362_vm0, %v1342_v31, 0.0 }
 0x16b   : > { %v8846_v39 = vpop.eup %8845  ;;  %v1309_v44 = vmul.f32 %v8844_v56, %v9575_v10  ;;  %8859 = vpow2.f32 %v7398_v33  ;;  %v1402_v23 = vsel %vm1362_vm0, %v1343_v35, 0.0  ;;  %v9253_v33 = vmov 0  }
 0x16c   : > { %v8848_v5 = vpop.eup %8847  ;;  %8861 = vrcp.f32 %v1218_v41  ;;  %v1307_v45 = vmul.f32 %v8846_v39, %v9579_v18  ;;  %v9689_v48 = vadd.f32 %v9492_v1, %v1049_v52  ;;  %2026 = vst [vmem:[#allocation2] sm:$0xf] %v9253_v33  ;;  %2027 = vst [vmem:[#allocation2 + $0x4] sm:$0xf] %v9253_v33  ;;  %8564 = vset.pattern.permute.xlu0 %v9253_v33  ;;  %8563 = vset.pattern.permute.xlu1 %v9253_v33 }
 0x16d   : > { %v8850_v46 = vpop.eup %8849  ;;  %1400 = vadd.xlane.f32.xlu0 %v1399_v61  ;;  %1403 = vadd.xlane.f32.xlu1 %v1402_v23  ;;  %v1348_v62 = vmul.f32 %v9559_v26, %v1309_v44  ;;  %v1310_v63 = vmul.f32 %v8848_v5, %v9585_v27  ;;  %8863 = vpow2.f32 %v7401_v17  ;;  %2028 = vst [vmem:[#allocation2 + $0x8] sm:$0x1] %v9253_v33  ;;  %2029 = vst [vmem:[#allocation2 + $0xc] sm:$0xf] %v9253_v33 }
 0x16e   : > { %v1216_v10 = vadd.f32 1.0, %v8850_v46  ;;  %v1346_v47 = vmul.f32 %v9559_v26, %v1307_v45  ;;  %8865 = vpow2.f32 %v7399_v38  ;;  %v7403_v9 = vmul.f32 -1.442695, %v9689_v48  ;;  %2030 = vst [vmem:[#allocation2 + $0x10] sm:$0xf] %v9253_v33 }
 0x16f   : > { %v1417_v0 = vsel %vm1362_vm0, %v1348_v62, 0.0  ;;  %v1349_v8 = vmul.f32 %v9559_v26, %v1310_v63  ;;  %2031 = vst [vmem:[#allocation2 + $0x14] sm:$0x1] %v9253_v33  ;;  %2032 = vst [vmem:[#allocation2 + $0x18] sm:$0xf] %v9253_v33 }
 0x170   : > { %8867 = vrcp.f32 %v1216_v10  ;;  %v1411_v27 = vsel %vm1362_vm0, %v1346_v47, 0.0  ;;  %2033 = vst [vmem:[#allocation2 + $0x1c] sm:$0xf] %v9253_v33  ;;  %2034 = vst [vmem:[#allocation2 + $0x20] sm:$0x1] %v9253_v33 }
 0x171   : > { %v8852_v18 = vpop.eup %8851  ;;  %1418 = vadd.xlane.f32.xlu0 %v1417_v0  ;;  %v1420_v2 = vsel %vm1362_vm0, %v1349_v8, 0.0  ;;  %2035 = vst [vmem:[#allocation2 + $0x24] sm:$0xf] %v9253_v33  ;;  %2036 = vst [vmem:[#allocation2 + $0x28] sm:$0xf] %v9253_v33 }
 0x172   : > { %v8854_v4 = vpop.eup %8853  ;;  %1421 = vadd.xlane.f32.xlu1 %v1420_v2  ;;  %v1221_v53 = vadd.f32 1.0, %v8852_v18  ;;  %2037 = vst [vmem:[#allocation2 + $0x2c] sm:$0x1] %v9253_v33  ;;  %2038 = vst [vmem:[#allocation2 + $0x30] sm:$0xf] %v9253_v33 }
 0x173   : > { %v8856_v54 = vpop.eup %8855  ;;  %v1308_v12 = vmul.f32 %v8854_v4, %v9597_v20  ;;  %2039 = vst [vmem:[#allocation2 + $0x34] sm:$0xf] %v9253_v33  ;;  %2040 = vst [vmem:[#allocation2 + $0x38] sm:$0x1] %v9253_v33  ;;  %v9727_v10 = vld [vmem:[#allocation4] ss:$0 sm:$0xff] }
 0x174   : > { %v8858_v14 = vpop.eup %8857  ;;  %v1313_v57 = vmul.f32 %v8856_v54, %v9605_v11  ;;  %8869 = vrcp.f32 %v1221_v53  ;;  %2041 = vst [vmem:[#allocation2 + $0x3c] sm:$0xf] %v9253_v33  ;;  %2042 = vst [vmem:[#allocation2 + $0x40] sm:$0xf] %v9253_v33 }
 0x175   : > { %v8860_v16 = vpop.eup %8859  ;;  %v1347_v7 = vmul.f32 %v9559_v26, %v1308_v12  ;;  %1412 = vadd.xlane.f32.xlu0 %v1411_v27  ;;  %v1311_v59 = vmul.f32 %v8858_v14, %v9608_v6  ;;  %8871 = vpow2.f32 %v7403_v9  ;;  %2043 = vst [vmem:[#allocation2 + $0x44] sm:$0x1] %v9253_v33  ;;  %2044 = vst [vmem:[#allocation2 + $0x48] sm:$0xf] %v9253_v33 }
 0x176   : > { %v8862_v50 = vpop.eup %8861  ;;  %v1352_v13 = vmul.f32 %v9559_v26, %v1313_v57  ;;  %v1219_v21 = vadd.f32 1.0, %v8860_v16  ;;  %2045 = vst [vmem:[#allocation2 + $0x4c] sm:$0xf] %v9253_v33  ;;  %2046 = vst [vmem:[#allocation2 + $0x50] sm:$0x1] %v9253_v33 }
 0x177   : > { %v8864_v22 = vpop.eup %8863  ;;  %v1414_v24 = vsel %vm1362_vm0, %v1347_v7, 0.0  ;;  %v1314_v20 = vmul.f32 %v8862_v50, %v9619_v29  ;;  %v1350_v28 = vmul.f32 %v9559_v26, %v1311_v59  ;;  %2047 = vst [vmem:[#allocation2 + $0x54] sm:$0xf] %v9253_v33  ;;  %2048 = vst [vmem:[#allocation2 + $0x58] sm:$0xf] %v9253_v33 }
 0x178   : > { %v8866_v11 = vpop.eup %8865  ;;  %1415 = vadd.xlane.f32.xlu1 %v1414_v24  ;;  %v1429_v30 = vsel %vm1362_vm0, %v1352_v13, 0.0  ;;  %8873 = vrcp.f32 %v1219_v21  ;;  %v1222_v55 = vadd.f32 1.0, %v8864_v22  ;;  %2049 = vst [vmem:[#allocation2 + $0x5c] sm:$0x1] %v9253_v33  ;;  %2050 = vst [vmem:[#allocation2 + $0x60] sm:$0xf] %v9253_v33 }
 0x179   : > { %v1353_v6 = vmul.f32 %v9559_v26, %v1314_v20  ;;  %1430 = vadd.xlane.f32.xlu0 %v1429_v30  ;;  %v1220_v51 = vadd.f32 1.0, %v8866_v11  ;;  %v9705_v25 = vsel %vm1362_vm0, %v1350_v28, 0.0  ;;  %2051 = vst [vmem:[#allocation2 + $0x64] sm:$0xf] %v9253_v33  ;;  %2052 = vst [vmem:[#allocation2 + $0x68] sm:$0x1] %v9253_v33 }
 0x17a   : > { %v8868_v32 = vpop.eup %8867  ;;  %8875 = vrcp.f32 %v1222_v55  ;;  %2053 = vst [vmem:[#allocation2 + $0x6c] sm:$0xf] %v9253_v33  ;;  %2054 = vst [vmem:[#allocation2 + $0x70] sm:$0xf] %v9253_v33 }
 0x17b   : > { %v1432_v31 = vsel %vm1362_vm0, %v1353_v6, 0.0  ;;  %v1312_v29 = vmul.f32 %v8868_v32, %v9629_v40  ;;  %8877 = vrcp.f32 %v1220_v51  ;;  %2055 = vst [vmem:[#allocation2 + $0x74] sm:$0x1] %v9253_v33  ;;  %2056 = vst [vmem:[#allocation2 + $0x78] sm:$0xf] %v9253_v33 }
 0x17c   : > { %1433 = vadd.xlane.f32.xlu1 %v1432_v31  ;;  %2057 = vst [vmem:[#allocation2 + $0x7c] sm:$0xf] %v9253_v33  ;;  %2058 = vst [vmem:[#allocation2 + $0x80] sm:$0x1] %v9253_v33 }
 0x17d   : > { %2059 = vst [vmem:[#allocation2 + $0x84] sm:$0xf] %v9253_v33  ;;  %2060 = vst [vmem:[#allocation2 + $0x88] sm:$0xf] %v9253_v33  ;;  %v1351_v40 = vmul.f32 %v9559_v26, %v1312_v29  ;;  %1424 = vadd.xlane.f32.xlu0 %v9705_v25 }
 0x17e   : > { %2061 = vst [vmem:[#allocation2 + $0x8c] sm:$0x1] %v9253_v33  ;;  %2062 = vst [vmem:[#allocation2 + $0x90] sm:$0xf] %v9253_v33  ;;  %v8870_v15 = vpop.eup %8869 }
 0x17f   : > { %2063 = vst [vmem:[#allocation2 + $0x94] sm:$0xf] %v9253_v33  ;;  %2064 = vst [vmem:[#allocation2 + $0x98] sm:$0x1] %v9253_v33  ;;  %v8872_v34 = vpop.eup %8871  ;;  %v1426_v36 = vsel %vm1362_vm0, %v1351_v40, 0.0  ;;  %v1317_v35 = vmul.f32 %v8870_v15, %v9644_v49 }
 0x180   : > { %2065 = vst [vmem:[#allocation2 + $0x9c] sm:$0xf] %v9253_v33  ;;  %2066 = vst [vmem:[#allocation2 + $0xa0] sm:$0xf] %v9253_v33  ;;  %1427 = vadd.xlane.f32.xlu1 %v1426_v36  ;;  %v1224_v37 = vadd.f32 1.0, %v8872_v34 }
 0x181   : > { %2067 = vst [vmem:[#allocation2 + $0xa4] sm:$0x1] %v9253_v33  ;;  %2068 = vst [vmem:[#allocation2 + $0xa8] sm:$0xf] %v9253_v33  ;;  %v1356_v17 = vmul.f32 %v9559_v26, %v1317_v35 }
 0x182   : > { %2069 = vst [vmem:[#allocation2 + $0xac] sm:$0xf] %v9253_v33  ;;  %2070 = vst [vmem:[#allocation2 + $0xb0] sm:$0x1] %v9253_v33  ;;  %v8874_v38 = vpop.eup %8873  ;;  %8879 = vrcp.f32 %v1224_v37  ;;  %v9743_v37 = vadd.f32 %v9492_v1, %v9673_v42  ;;  %v8613_v1 = vld [vmem:[%s12450_s7 + $0xc0] sm:$0xff]  }
 0x183   : > { %2071 = vst [vmem:[#allocation2 + $0xb4] sm:$0xf] %v9253_v33  ;;  %2072 = vst [vmem:[#allocation2 + $0xb8] sm:$0xf] %v9253_v33  ;;  %v1315_v56 = vmul.f32 %v8874_v38, %v9651_v58  ;;  %v1441_v41 = vsel %vm1362_vm0, %v1356_v17, 0.0  ;;  %7969 = vmatprep.subr.bf16.mxu0 %v8613_v1 }
 0x184   : > { %2073 = vst [vmem:[#allocation2 + $0xbc] sm:$0x1] %v9253_v33  ;;  %2074 = vst [vmem:[#allocation2 + $0xc0] sm:$0xf] %v9253_v33  ;;  %v8876_v39 = vpop.eup %8875  ;;  %1442 = vadd.xlane.f32.xlu1 %v1441_v41 }
 0x185   : > { %2075 = vst [vmem:[#allocation2 + $0xc4] sm:$0xf] %v9253_v33  ;;  %2076 = vst [vmem:[#allocation2 + $0xc8] sm:$0x1] %v9253_v33  ;;  %v8878_v44 = vpop.eup %8877  ;;  %v1354_v52 = vmul.f32 %v9559_v26, %v1315_v56  ;;  %v1318_v5 = vmul.f32 %v8876_v39, %v9656_v60 }
 0x186   : > { %2077 = vst [vmem:[#allocation2 + $0xcc] sm:$0xf] %v9253_v33  ;;  %2078 = vst [vmem:[#allocation2 + $0xd0] sm:$0xf] %v9253_v33  ;;  %v1316_v61 = vmul.f32 %v8878_v44, %v9659_v19 }
 0x187   : > { %2079 = vst [vmem:[#allocation2 + $0xd4] sm:$0x1] %v9253_v33  ;;  %v1435_v49 = vsel %vm1362_vm0, %v1354_v52, 0.0  ;;  %v1357_v23 = vmul.f32 %v9559_v26, %v1318_v5 }
 0x188   : > { %1436 = vadd.xlane.f32.xlu0 %v1435_v49  ;;  %v1355_v45 = vmul.f32 %v9559_v26, %v1316_v61  ;;  %v7402_v61 = vmul.f32 -1.442695, %v9743_v37 }
 0x189   : > { %v1444_v58 = vsel %vm1362_vm0, %v1357_v23, 0.0 }
 0x18a   : > { %v1438_v46 = vsel %vm1362_vm0, %v1355_v45, 0.0 }
 0x18b   : > { %1439 = vadd.xlane.f32.xlu1 %v1438_v46  ;;  %v8615_v46 = vld [vmem:[%s12450_s7 + $0x80] sm:$0xff]  }
 0x18c   : > { %v8880_v62 = vpop.eup %8879  ;;  %1445 = vadd.xlane.f32.xlu0 %v1444_v58  ;;  %7970 = vmatpush3.bf16.msra.mxu0 %v8615_v46  ;;  %v2746_v46 = vld [vmem:[#allocation2 + $0x4] sm:$0xf] }
 0x18d   : > { %v1320_v63 = vmul.f32 %v8880_v62, %v9689_v48 }
 0x18f   : > { %v1359_v60 = vmul.f32 %v9559_v26, %v1320_v63  ;;  %v8614_v63 = vld [vmem:[%s12450_s7 + $0x40] sm:$0xff]  }
 0x190   : > { %7857 = vmatprep.subr.bf16.mxu1 %v8614_v63 }
 0x191   : > { %v1450_v19 = vsel %vm1362_vm0, %v1359_v60, 0.0 }
 0x192   : > { %1451 = vadd.xlane.f32.xlu0 %v1450_v19  ;;  %v8616_v19 = vld [vmem:[%s12450_s7] sm:$0xff]  }
 0x193   : > { %7858 = vmatpush3.bf16.msra.mxu1 %v8616_v19  ;;  %v8639_v19 = vld [vmem:[%s12450_s7 + $0xb0] sm:$0xff]  }
 0x1db   : > { %v1371_v47 = vpop.xlane.xlu1 %1370 }
 0x1dc   : > { %v1468_v0 = vadd.f32 %v9727_v10, %v1371_v47  ;;  %v1365_v8 = vpop.xlane.xlu0 %1364 }
 0x1dd   : > { %v1466_v18 = vadd.f32 %v9727_v10, %v1365_v8 }
 0x1de   : > { %v7410_v2 = vmul.f32 -1.442695, %v1468_v0  ;;  %v8617_v0 = vld [vmem:[%s12450_s7 + $0xc8] sm:$0xff]  }
 0x1df   : > { %v7408_v4 = vmul.f32 -1.442695, %v1466_v18  ;;  %v1374_v27 = vpop.xlane.xlu1 %1373  ;;  %7971 = vmatprep.subr.bf16.mxu0 %v8617_v0 }
 0x1e0   : > { %8881 = vpow2.f32 %v7410_v2  ;;  %v1469_v53 = vadd.f32 %v9727_v10, %v1374_v27 }
 0x1e1   : > { %8883 = vpow2.f32 %v7408_v4  ;;  %v8619_v4 = vld [vmem:[%s12450_s7 + $0x88] sm:$0xff]  }
 0x1e2   : > { %v7411_v48 = vmul.f32 -1.442695, %v1469_v53  ;;  %v1368_v26 = vpop.xlane.xlu0 %1367  ;;  %v8618_v53 = vld [vmem:[%s12450_s7 + $0x48] sm:$0xff]   ;;  %7972 = vmatpush3.bf16.msra.mxu0 %v8619_v4  ;;  %v8638_v4 = vld [vmem:[%s12450_s7 + $0x70] sm:$0xff]  }
 0x1e3   : > { %v1467_v9 = vadd.f32 %v9727_v10, %v1368_v26  ;;  %v8620_v26 = vld [vmem:[%s12450_s7 + $0x8] sm:$0xff]   ;;  %7859 = vmatprep.subr.bf16.mxu1 %v8618_v53  ;;  %v8640_v53 = vld [vmem:[%s12450_s7 + $0x30] sm:$0xff]  }
 0x1e4   : > { %8885 = vpow2.f32 %v7411_v48  ;;  %7860 = vmatpush3.bf16.msra.mxu1 %v8620_v26 }
 0x1e5   : > { %v7409_v54 = vmul.f32 -1.442695, %v1467_v9 }
 0x1e6   : > { %v1383_v12 = vpop.xlane.xlu0 %1382  ;;  %v1386_v14 = vpop.xlane.xlu1 %1385 }
 0x1e7   : > { %8887 = vpow2.f32 %v7409_v54  ;;  %v1472_v57 = vadd.f32 %v9727_v10, %v1383_v12  ;;  %v1473_v16 = vadd.f32 %v9727_v10, %v1386_v14  ;;  %v8621_v12 = vld [vmem:[%s12450_s7 + $0xd0] sm:$0xff]  }
 0x1e8   : > { %7973 = vmatprep.subr.bf16.mxu0 %v8621_v12  ;;  %v8643_v12 = vld [vmem:[%s12450_s7 + $0xb8] sm:$0xff]  }
 0x1e9   : > { %v7414_v7 = vmul.f32 -1.442695, %v1472_v57  ;;  %v7415_v59 = vmul.f32 -1.442695, %v1473_v16  ;;  %v8623_v16 = vld [vmem:[%s12450_s7 + $0x90] sm:$0xff]  }
 0x1ea   : > { %v8882_v50 = vpop.eup %8881  ;;  %v1377_v13 = vpop.xlane.xlu0 %1376  ;;  %7974 = vmatpush3.bf16.msra.mxu0 %v8623_v16 }
 0x1eb   : > { %v1380_v21 = vpop.xlane.xlu1 %1379  ;;  %v8884_v22 = vpop.eup %8883  ;;  %v1596_v24 = vadd.f32 1.0, %v8882_v50  ;;  %8889 = vpow2.f32 %v7414_v7  ;;  %v1470_v20 = vadd.f32 %v9727_v10, %v1377_v13  ;;  %v8624_v13 = vld [vmem:[%s12450_s7 + $0x10] sm:$0xff]  }
 0x1ec   : > { %v1471_v28 = vadd.f32 %v9727_v10, %v1380_v21  ;;  %v1594_v11 = vadd.f32 1.0, %v8884_v22  ;;  %8891 = vpow2.f32 %v7415_v59  ;;  %v8622_v59 = vld [vmem:[%s12450_s7 + $0x50] sm:$0xff]  }
 0x1ed   : > { %8893 = vrcp.f32 %v1596_v24  ;;  %v7412_v30 = vmul.f32 -1.442695, %v1470_v20  ;;  %7861 = vmatprep.subr.bf16.mxu1 %v8622_v59  ;;  %v8625_v20 = vld [vmem:[%s12450_s7 + $0xd8] sm:$0xff]  }
 0x1ee   : > { %v8886_v55 = vpop.eup %8885  ;;  %8895 = vrcp.f32 %v1594_v11  ;;  %v1395_v6 = vpop.xlane.xlu0 %1394  ;;  %v7413_v25 = vmul.f32 -1.442695, %v1471_v28  ;;  %7862 = vmatpush3.bf16.msra.mxu1 %v8624_v13  ;;  %7975 = vmatprep.subr.bf16.mxu0 %v8625_v20  ;;  %v8642_v13 = vld [vmem:[%s12450_s7 + $0x78] sm:$0xff]  }
 0x1ef   : > { %v1398_v51 = vpop.xlane.xlu1 %1397  ;;  %v1597_v32 = vadd.f32 1.0, %v8886_v55  ;;  %8897 = vpow2.f32 %v7412_v30  ;;  %v1476_v31 = vadd.f32 %v9727_v10, %v1395_v6  ;;  %v8627_v55 = vld [vmem:[%s12450_s7 + $0x98] sm:$0xff]  }
 0x1f0   : > { %v1477_v34 = vadd.f32 %v9727_v10, %v1398_v51  ;;  %v8626_v51 = vld [vmem:[%s12450_s7 + $0x58] sm:$0xff]   ;;  %7976 = vmatpush3.bf16.msra.mxu0 %v8627_v55 }
 0x1f1   : > { %v8888_v29 = vpop.eup %8887  ;;  %8899 = vrcp.f32 %v1597_v32  ;;  %v7418_v15 = vmul.f32 -1.442695, %v1476_v31  ;;  %7863 = vmatprep.subr.bf16.mxu1 %v8626_v51  ;;  %v8644_v20 = vld [vmem:[%s12450_s7 + $0x38] sm:$0xff]  }
 0x1f2   : > { %v1595_v33 = vadd.f32 1.0, %v8888_v29  ;;  %v9738_v40 = vpop.xlane.xlu0 %1388  ;;  %8901 = vpow2.f32 %v7413_v25  ;;  %v7419_v39 = vmul.f32 -1.442695, %v1477_v34  ;;  %v8628_v25 = vld [vmem:[%s12450_s7 + $0x18] sm:$0xff]  }
 0x1f3   : > { %v1392_v36 = vpop.xlane.xlu1 %1391  ;;  %7864 = vmatpush3.bf16.msra.mxu1 %v8628_v25 }
 0x1f4   : > { %8903 = vrcp.f32 %v1595_v33  ;;  %v1475_v44 = vadd.f32 %v9727_v10, %v1392_v36 }
 0x1f5   : > { %v8890_v35 = vpop.eup %8889  ;;  %8905 = vpow2.f32 %v7418_v15  ;;  %v8629_v15 = vld [vmem:[%s12450_s7 + $0xe0] sm:$0xff]  }
 0x1f6   : > { %v8892_v17 = vpop.eup %8891  ;;  %v1600_v38 = vadd.f32 1.0, %v8890_v35  ;;  %v1407_v56 = vpop.xlane.xlu0 %1406  ;;  %v7417_v45 = vmul.f32 -1.442695, %v1475_v44  ;;  %v8631_v35 = vld [vmem:[%s12450_s7 + $0xa0] sm:$0xff]   ;;  %7977 = vmatprep.subr.bf16.mxu0 %v8629_v15 }
 0x1f7   : > { %v8894_v41 = vpop.eup %8893  ;;  %v1480_v58 = vadd.f32 %v9727_v10, %v1407_v56  ;;  %v1601_v62 = vadd.f32 1.0, %v8892_v17  ;;  %v9786_v22 = vpop.xlane.xlu1 %1409  ;;  %v8630_v56 = vld [vmem:[%s12450_s7 + $0x60] sm:$0xff]   ;;  %7978 = vmatpush3.bf16.msra.mxu0 %v8631_v35 }
 0x1f8   : > { %v8896_v52 = vpop.eup %8895  ;;  %8907 = vrcp.f32 %v1600_v38  ;;  %1798 = vperm.xlu1 %8563, %v8894_v41   ;;  %7865 = vmatprep.subr.bf16.mxu1 %v8630_v56  ;;  %v9149_v56 = vld [vmem:[%s12447_s4] ss:$0 sm:$0xff] }
 0x1f9   : > { %v8898_v5 = vpop.eup %8897  ;;  %1788 = vperm.xlu0 %8564, %v8896_v52   ;;  %8909 = vpow2.f32 %v7419_v39  ;;  %v7422_v18 = vmul.f32 -1.442695, %v1480_v58  ;;  %v8632_v39 = vld [vmem:[%s12450_s7 + $0x20] sm:$0xff]   ;;  %v1474_v52 = vadd.f32 %v9727_v10, %v9738_v40  ;;  %v8634_v40 = vld [vmem:[%s12450_s7 + $0x68] sm:$0xff]  }
 0x1fa   : > { %v1598_v49 = vadd.f32 1.0, %v8898_v5  ;;  %v1401_v23 = vpop.xlane.xlu0 %1400  ;;  %v8633_v5 = vld [vmem:[%s12450_s7 + $0xe8] sm:$0xff]   ;;  %7866 = vmatpush3.bf16.msra.mxu1 %v8632_v39  ;;  %v2745_v58 = vld [vmem:[#allocation2] sm:$0xf] }
 0x1fb   : > { %v8900_v42 = vpop.eup %8899  ;;  %v1478_v2 = vadd.f32 %v9727_v10, %v1401_v23  ;;  %v9810_v38 = vpop.xlane.xlu1 %1403  ;;  %7979 = vmatprep.subr.bf16.mxu0 %v8633_v5  ;;  %v7416_v63 = vmul.f32 -1.442695, %v1474_v52  ;;  %7867 = vmatprep.subr.bf16.mxu1 %v8634_v40  ;;  %v2800_v0 = vshll.u32 %v2745_v58, 16  ;;  %v9882_v39 = vld [vmem:[%s12448_s5] ss:$0 sm:$0xff] }
 0x1fc   : > { %8911 = vrcp.f32 %v1598_v49  ;;  %1803 = vperm.xlu1 %8563, %v8900_v42   ;;  %v8902_v60 = vpop.eup %8901  ;;  %v8635_v49 = vld [vmem:[%s12450_s7 + $0xa8] sm:$0xff]  }
 0x1fd   : > { %8913 = vpow2.f32 %v7402_v61  ;;  %v1599_v27 = vadd.f32 1.0, %v8902_v60  ;;  %v7420_v14 = vmul.f32 -1.442695, %v1478_v2  ;;  %7980 = vmatpush3.bf16.msra.mxu0 %v8635_v49  ;;  %v8637_v60 = vld [vmem:[%s12450_s7 + $0xf0] sm:$0xff]  }
 0x1fe   : > { %v1419_v47 = vpop.xlane.xlu0 %1418  ;;  %v8904_v8 = vpop.eup %8903  ;;  %8915 = vpow2.f32 %v7417_v45  ;;  %v8636_v45 = vld [vmem:[%s12450_s7 + $0x28] sm:$0xff]   ;;  %7981 = vmatprep.subr.bf16.mxu0 %v8637_v60 }
 0x1ff   : > { %8917 = vrcp.f32 %v1601_v62  ;;  %v8906_v48 = vpop.eup %8905  ;;  %v1484_v57 = vadd.f32 %v9727_v10, %v1419_v47  ;;  %v9826_v1 = vpop.xlane.xlu1 %1421  ;;  %7868 = vmatpush3.bf16.msra.mxu1 %v8636_v45  ;;  %v2797_v47 = vshrl.u32 %v2745_v58, 16 }
 0x200   : > { %1793 = vperm.xlu1 %8563, %v8904_v8   ;;  %8919 = vpow2.f32 %v7422_v18  ;;  %v1604_v7 = vadd.f32 1.0, %v8906_v48  ;;  %v2806_v8 = vshll.u32 %v2746_v46, 16  ;;  %v1481_v18 = vadd.f32 %v9727_v10, %v9786_v22  ;;  %7869 = vmatprep.subr.bf16.mxu1 %v8638_v4 }
 0x201   : > { %8921 = vrcp.f32 %v1599_v27  ;;  %v7426_v11 = vmul.f32 -1.442695, %v1484_v57  ;;  %7982 = vmatpush3.bf16.msra.mxu0 %v8639_v19  ;;  %v2810_v48 = vshrl.u32 %v2746_v46, 16  ;;  %v2802_v57 = vrot.slane %v2800_v0, 5 }
 0x202   : > { %v8908_v9 = vpop.eup %8907  ;;  %v1413_v54 = vpop.xlane.xlu0 %1412  ;;  %8923 = vpow2.f32 %v7420_v14  ;;  %v2799_v14 = vrot.slane %v2797_v47, 4  ;;  %v2808_v16 = vrot.slane %v2806_v8, 5  ;;  %v7423_v59 = vmul.f32 -1.442695, %v1481_v18 }
 0x203   : > { %1818 = vperm.xlu0 %8564, %v8908_v9   ;;  %v8910_v50 = vpop.eup %8909  ;;  %v1482_v30 = vadd.f32 %v9727_v10, %v1413_v54  ;;  %8925 = vrcp.f32 %v1604_v7  ;;  %v8641_v54 = vld [vmem:[%s12450_s7 + $0xf8] sm:$0xff]   ;;  %7870 = vmatpush3.bf16.msra.mxu1 %v8640_v53  ;;  %v1479_v22 = vadd.f32 %v9727_v10, %v9810_v38 }
 0x204   : > { %v1605_v6 = vadd.f32 1.0, %v8910_v50  ;;  %8927 = vpow2.f32 %v7426_v11  ;;  %7983 = vmatprep.subr.bf16.mxu0 %v8641_v54  ;;  %v2803_v11 = vor.u32 %v2802_v57, %v2799_v14  ;;  %7871 = vmatprep.subr.bf16.mxu1 %v8642_v13 }
 0x205   : > { %v7424_v34 = vmul.f32 -1.442695, %v1482_v30  ;;  %v1416_v9 = vpop.xlane.xlu1 %1415  ;;  %7984 = vmatpush3.bf16.msra.mxu0 %v8643_v12  ;;  %v2812_v30 = vrot.slane %v2810_v48, 4 }
 0x206   : > { %v8912_v21 = vpop.eup %8911  ;;  %v9788_v24 = vpop.xlane.xlu0 %1430  ;;  %8929 = vrcp.f32 %v1605_v6 }
 0x207   : > { %v8914_v28 = vpop.eup %8913  ;;  %1808 = vperm.xlu0 %8564, %v8912_v21   ;;  %7872 = vmatpush3.bf16.msra.mxu1 %v8644_v20  ;;  %v2813_v25 = vor.u32 %v2812_v30, %v2808_v16 }
 0x208   : > { %v8916_v32 = vpop.eup %8915  ;;  %v1223_v29 = vadd.f32 1.0, %v8914_v28  ;;  %v2747_v28 = vld [vmem:[#allocation2 + $0x8] sm:$0x1] }
 0x209   : > { %v8918_v31 = vpop.eup %8917  ;;  %v1603_v17 = vadd.f32 1.0, %v8916_v32  ;;  %v2804_v32 = vrot.slane %v2803_v11, 4  ;;  %v2814_v35 = vrot.slane %v2813_v25, 4 }
 0x20a   : > { %v1425_v33 = vpop.xlane.xlu0 %1424  ;;  %v8920_v41 = vpop.eup %8919  ;;  %8931 = vrcp.f32 %v1223_v29 }
 0x20b   : > { %1823 = vperm.xlu0 %8564, %v8918_v31   ;;  %v1486_v36 = vadd.f32 %v9727_v10, %v1425_v33  ;;  %v8922_v44 = vpop.eup %8921  ;;  %8933 = vpow2.f32 %v7424_v34  ;;  %v1608_v23 = vadd.f32 1.0, %v8920_v41  ;;  %v9867_v29 = vpop.xlane.xlu1 %1433  ;;  %v2816_v33 = vshll.u32 %v2747_v28, 16 }
 0x20c   : > { %8935 = vrcp.f32 %v1603_v17  ;;  %v8924_v42 = vpop.eup %8923  ;;  %v7421_v34 = vmul.f32 -1.442695, %v1479_v22  ;;  %v2809_v17 = vsel %vm9863_vm3, %v2804_v32, %v2808_v16  ;;  %v9877_v41 = vadd.f32 %v9149_v56, %v9670_v3 }
 0x20d   : > { %v7428_v61 = vmul.f32 -1.442695, %v1486_v36  ;;  %v8926_v62 = vpop.eup %8925  ;;  %v1606_v2 = vadd.f32 1.0, %v8924_v42  ;;  %v1485_v36 = vadd.f32 %v9727_v10, %v9826_v1  ;;  %v2818_v38 = vrot.slane %v2816_v33, 5 }
 0x20e   : > { %v8928_v27 = vpop.eup %8927  ;;  %v1483_v3 = vadd.f32 %v9727_v10, %v1416_v9  ;;  %v7404_v45 = vmul.f32 -1.442695, %v9877_v41 }
 0x20f   : > { %1813 = vperm.xlu0 %8564, %v8922_v44   ;;  %8937 = vpow2.f32 %v7428_v61  ;;  %v1612_v50 = vadd.f32 1.0, %v8928_v27  ;;  %v2819_v5 = vsel %vm9863_vm3, %v2814_v35, %v2818_v38  ;;  %v8646_v61 = vld [vmem:[#allocation2] sm:$0xff]   ;;  %v1428_v42 = vpop.xlane.xlu1 %1427 }
 0x210   : > { %8939 = vrcp.f32 %v1608_v23  ;;  %v8930_v26 = vpop.eup %8929  ;;  %v7427_v23 = vmul.f32 -1.442695, %v1485_v36  ;;  %v7488_v1 = vcombine.low %v2809_v17, %v2819_v5  ;;  %v7425_v46 = vmul.f32 -1.442695, %v1483_v3 }
 0x211   : > { %8941 = vpow2.f32 %v7416_v63 }
 0x212   : > { %8943 = vrcp.f32 %v1606_v2  ;;  %6199 = vmatprep.mubr.bf16.mxu1 %v7488_v1 }
 0x213   : > { %1838 = vperm.xlu0 %8564, %v8926_v62   ;;  %8945 = vrcp.f32 %v1612_v50  ;;  %6200 = vmatmul.mubr.bf16.vlgmr.msra.gmra.mrb[16].mxu1 %v8646_v61  ;;  %v1487_v62 = vadd.f32 %v9727_v10, %v1428_v42  ;;  %v1443_v11 = vpop.xlane.xlu1 %1442 }
 0x214   : > { %v8932_v7 = vpop.eup %8931  ;;  %8947 = vpow2.f32 %v7423_v59  ;;  %v1098_v59 = vadd.f32 %v9149_v56, %v9676_v43  ;;  %v1492_v32 = vadd.f32 %v9727_v10, %v1443_v11  ;;  %v1489_v56 = vadd.f32 %v9727_v10, %v9867_v29 }
 0x215   : > { %v8934_v21 = vpop.eup %8933  ;;  %v1319_v6 = vmul.f32 %v8932_v7, %v9743_v37  ;;  %v7429_v47 = vmul.f32 -1.442695, %v1487_v62  ;;  %v1437_v50 = vpop.xlane.xlu0 %1436 }
 0x216   : > { %v8936_v55 = vpop.eup %8935  ;;  %v1610_v31 = vadd.f32 1.0, %v8934_v21  ;;  %v1488_v21 = vadd.f32 %v9727_v10, %v9788_v24  ;;  %v7405_v22 = vmul.f32 -1.442695, %v1098_v59  ;;  %v1490_v28 = vadd.f32 %v9727_v10, %v1437_v50 }
 0x217   : > { %1843 = vperm.xlu0 %8564, %v8930_v26   ;;  %v1358_v44 = vmul.f32 %v9882_v39, %v1319_v6  ;;  %v7431_v61 = vmul.f32 -1.442695, %v1489_v56 }
 0x218   : > { %8949 = vrcp.f32 %v1610_v31  ;;  %v7432_v43 = vmul.f32 -1.442695, %v1490_v28  ;;  %v7434_v31 = vmul.f32 -1.442695, %v1492_v32  ;;  %v9935_v28 = vld [vmem:[%s9377_s15 + $0x40] sm:$0xff]  }
 0x219   : > { %v8938_v15 = vpop.eup %8937  ;;  %8951 = vpow2.f32 %v7421_v34  ;;  %v1447_v58 = vsel %vm1362_vm0, %v1358_v44, 0.0  ;;  %v12453_v11 = vunpack.c.l.bf16 %v9935_v28 }
 0x21a   : > { %v8940_v37 = vpop.eup %8939  ;;  %v1614_v52 = vadd.f32 1.0, %v8938_v15 }
 0x21b   : > { %1833 = vperm.xlu0 %8564, %v8936_v55   ;;  %v8942_v49 = vpop.eup %8941  ;;  %v7430_v55 = vmul.f32 -1.442695, %v1488_v21 }
 0x21c   : > { %v8944_v40 = vpop.eup %8943  ;;  %8953 = vrcp.f32 %v1614_v52  ;;  %v1602_v60 = vadd.f32 1.0, %v8942_v49  ;;  %v1446_v52 = vpop.xlane.xlu0 %1445 }
 0x21d   : > { %8955 = vpow2.f32 %v7427_v23  ;;  %v8946_v63 = vpop.eup %8945  ;;  %v1493_v1 = vadd.f32 %v9727_v10, %v1446_v52 }
 0x21e   : > { %v8948_v19 = vpop.eup %8947  ;;  %8957 = vpow2.f32 %v7404_v45 }
 0x21f   : > { %1858 = vperm.xlu0 %8564, %v8940_v37   ;;  %8959 = vpow2.f32 %v7425_v46  ;;  %v1609_v8 = vadd.f32 1.0, %v8948_v19 }
 0x220   : > { %8961 = vrcp.f32 %v1602_v60  ;;  %v1452_v49 = vpop.xlane.xlu0 %1451  ;;  %v9906_v60 = vld [vmem:[%s9377_s15] sm:$0xff]  }
 0x221   : > { %8963 = vpow2.f32 %v7429_v47  ;;  %v1722_v19 = vunpack.c.l.bf16 %v9906_v60  ;;  %v3261_v47 = vld [vmem:[#allocation2 + $0x4] sm:$0xf] }
 0x222   : > { %v8950_v0 = vpop.eup %8949  ;;  %8965 = vrcp.f32 %v1609_v8  ;;  %v9152_v8 = vld [vmem:[%s9431_s24 + $0x8] sm:$0xff]   ;;  %v3361_v21 = vrot.slane %v3261_v47, 5 }
 0x223   : > { %1848 = vperm.xlu0 %8564, %v8944_v40   ;;  %v8952_v18 = vpop.eup %8951  ;;  %v1495_v40 = vadd.f32 %v9727_v10, %v1452_v49 }
 0x224   : > { %1448 = vadd.xlane.f32.xlu1 %v1447_v58  ;;  %v1607_v4 = vadd.f32 1.0, %v8952_v18  ;;  %v7435_v58 = vmul.f32 -1.442695, %v1493_v1  ;;  %v1692_v18 = vunpack.c.l.bf16 %v9152_v8 }
 0x225   : > { %v7437_v46 = vmul.f32 -1.442695, %v1495_v40  ;;  %v9978_v40 = vld [vmem:[%s9431_s24 + $0x20] sm:$0xff]  }
 0x226   : > { %v8954_v2 = vpop.eup %8953  ;;  %8967 = vrcp.f32 %v1607_v4  ;;  %v9154_v4 = vld [vmem:[%s9431_s24] sm:$0xff]  }
 0x227   : > { %1878 = vperm.xlu0 %8564, %v8946_v63   ;;  %v8956_v27 = vpop.eup %8955 }
 0x228   : > { %v8958_v53 = vpop.eup %8957  ;;  %v1613_v48 = vadd.f32 1.0, %v8956_v27  ;;  %v1690_v27 = vunpack.c.l.bf16 %v9154_v4 }
 0x229   : > { %v8960_v26 = vpop.eup %8959  ;;  %v1225_v54 = vadd.f32 1.0, %v8958_v53 }
 0x22a   : > { %v8962_v9 = vpop.eup %8961  ;;  %8969 = vrcp.f32 %v1613_v48  ;;  %v1611_v12 = vadd.f32 1.0, %v8960_v26  ;;  %v1693_v48 = vunpack.c.h.bf16 %v9152_v8  ;;  %v9998_v8 = vld [vmem:[%s9431_s24 + $0x30] sm:$0xff]  }
 0x22b   : > { %1868 = vperm.xlu0 %8564, %v8950_v0   ;;  %v8964_v14 = vpop.eup %8963  ;;  %8971 = vrcp.f32 %v1225_v54  ;;  %v9919_v54 = vld [vmem:[%s9431_s24 + $0x18] sm:$0xff]  }
 0x22c   : > { %v8966_v57 = vpop.eup %8965  ;;  %8973 = vrcp.f32 %v1611_v12  ;;  %v1615_v16 = vadd.f32 1.0, %v8964_v14  ;;  %v1696_v12 = vunpack.c.l.bf16 %v9919_v54  ;;  %v9923_v14 = vld [vmem:[%s9377_s15 + $0x18] sm:$0xff]  }
 0x22e   : > { %8975 = vrcp.f32 %v1615_v16  ;;  %v9927_v16 = vld [vmem:[%s9431_s24 + $0x10] sm:$0xff]  }
 0x22f   : > { %1888 = vperm.xlu0 %8564, %v8954_v2   ;;  %8977 = vpow2.f32 %v7405_v22  ;;  %v9913_v2 = vld [vmem:[%s9377_s15 + $0x8] sm:$0xff]  }
 0x230   : > { %v8968_v7 = vpop.eup %8967  ;;  %8979 = vpow2.f32 %v7430_v55  ;;  %v1725_v26 = vunpack.c.h.bf16 %v9913_v2  ;;  %v3262_v22 = vld [vmem:[#allocation2 + $0x8] sm:$0x1] }
 0x231   : > { %8981 = vpow2.f32 %v7432_v43  ;;  %v1754_v43 = vsub.f32 %v1690_v27, %v1722_v19 }
 0x232   : > { %8983 = vpow2.f32 %v7434_v31  ;;  %v9945_v32 = vsub.f32 %v1693_v48, %v1725_v26 }
 0x234   : > { %v8970_v13 = vpop.eup %8969 }
 0x235   : > { %1828 = vperm.xlu1 %8563, %v8962_v9   ;;  %v8972_v20 = vpop.eup %8971  ;;  %v1691_v9 = vunpack.c.h.bf16 %v9154_v4  ;;  %v10002_v4 = vld [vmem:[%s9377_s15 + $0x30] sm:$0xff]  }
 0x236   : > { %v8974_v30 = vpop.eup %8973  ;;  %v1321_v6 = vmul.f32 %v8972_v20, %v9877_v41  ;;  %v1440_v41 = vpop.xlane.xlu1 %1439  ;;  %v12455_v27 = vunpack.c.l.bf16 %v10002_v4 }
 0x237   : > { %v1491_v5 = vadd.f32 %v9727_v10, %v1440_v41  ;;  %v1723_v10 = vunpack.c.h.bf16 %v9906_v60 }
 0x238   : > { %v8976_v25 = vpop.eup %8975  ;;  %v1360_v24 = vmul.f32 %v9882_v39, %v1321_v6 }
 0x239   : > { %1863 = vperm.xlu1 %8563, %v8966_v57   ;;  %v8978_v15 = vpop.eup %8977  ;;  %v7433_v3 = vmul.f32 -1.442695, %v1491_v5  ;;  %v1728_v57 = vunpack.c.l.bf16 %v9923_v14  ;;  %v9969_v5 = vld [vmem:[%s9377_s15 + $0x28] sm:$0xff]  }
 0x23a   : > { %v1453_v33 = vsel %vm1362_vm0, %v1360_v24, 0.0  ;;  %v8980_v34 = vpop.eup %8979  ;;  %v1226_v36 = vadd.f32 1.0, %v8978_v15 }
 0x23b   : > { %v8982_v35 = vpop.eup %8981  ;;  %v1616_v37 = vadd.f32 1.0, %v8980_v34  ;;  %v9953_v31 = vsub.f32 %v1696_v12, %v1728_v57  ;;  %v3363_v34 = vrot.slane %v3361_v21, 4  ;;  %v10010_v12 = vld [vmem:[%s9377_s15 + $0x48] sm:$0xff]  }
 0x23c   : > { %8985 = vrcp.f32 %v1226_v36  ;;  %v1618_v17 = vadd.f32 1.0, %v8982_v35  ;;  %v8984_v38 = vpop.eup %8983  ;;  %v3364_v36 = vrot.slane %v3262_v22, 5 }
 0x23d   : > { %1853 = vperm.xlu1 %8563, %v8968_v7   ;;  %8987 = vrcp.f32 %v1616_v37  ;;  %v1620_v44 = vadd.f32 1.0, %v8984_v38  ;;  %v1694_v7 = vunpack.c.l.bf16 %v9927_v16  ;;  %v1697_v37 = vunpack.c.h.bf16 %v9919_v54 }
 0x23e   : > { %8989 = vrcp.f32 %v1618_v17  ;;  %v1729_v17 = vunpack.c.h.bf16 %v9923_v14  ;;  %v1695_v38 = vunpack.c.h.bf16 %v9927_v16  ;;  %v12454_v16 = vunpack.c.l.bf16 %v10010_v12 }
 0x23f   : > { %8991 = vrcp.f32 %v1620_v44  ;;  %v9160_v44 = vld [vmem:[%s9431_s24 + $0x28] sm:$0xff]  }
 0x240   : > { %8993 = vpow2.f32 %v7431_v61  ;;  %v1700_v52 = vunpack.c.l.bf16 %v9160_v44  ;;  %v12468_v61 = vunpack.c.l.bf16 %v9969_v5 }
 0x241   : > { %1883 = vperm.xlu1 %8563, %v8970_v13   ;;  %8995 = vpow2.f32 %v7433_v3  ;;  %v3260_v13 = vld [vmem:[#allocation2] sm:$0xe]  ;;  %v12464_v3 = vunpack.c.h.bf16 %v9969_v5 }
 0x242   : > { %8997 = vpow2.f32 %v7435_v58  ;;  %v7504_v24 = vrot.slane %v3260_v13, 9 }
 0x243   : > { %8999 = vpow2.f32 %v7437_v46  ;;  %v9990_v46 = vld [vmem:[%s9431_s24 + $0x38] sm:$0xff]  }
 0x244   : > { %v9975_v1 = vsel %vm9959_vm6, %v7504_v24, %v3361_v21  ;;  %v10027_v24 = vsub.f32 %v1700_v52, %v12468_v61 }
 0x245   : > { %1873 = vperm.xlu1 %8563, %v8974_v30   ;;  %v12461_v30 = vunpack.c.h.bf16 %v9935_v28 }
 0x246   : > { %v8986_v23 = vpop.eup %8985 }
 0x247   : > { %v8988_v42 = vpop.eup %8987  ;;  %v1322_v45 = vmul.f32 %v8986_v23, %v1098_v59  ;;  %v9931_v59 = vld [vmem:[%s9377_s15 + $0x10] sm:$0xff]   ;;  %v1701_v23 = vunpack.c.h.bf16 %v9160_v44 }
 0x248   : > { %v8990_v29 = vpop.eup %8989  ;;  %v1726_v50 = vunpack.c.l.bf16 %v9931_v59  ;;  %v1727_v41 = vunpack.c.h.bf16 %v9931_v59 }
 0x249   : > { %1893 = vperm.xlu1 %8563, %v8976_v25   ;;  %v1361_v62 = vmul.f32 %v9882_v39, %v1322_v45  ;;  %v8992_v63 = vpop.eup %8991  ;;  %v1724_v39 = vunpack.c.l.bf16 %v9913_v2  ;;  %v9949_v25 = vsub.f32 %v1691_v9, %v1723_v10  ;;  %v9983_v45 = vsel %vm9959_vm6, %v3363_v34, %v3364_v36  ;;  %v10006_v9 = vld [vmem:[%s9431_s24 + $0x48] sm:$0xff]  }
 0x24a   : > { %v8994_v53 = vpop.eup %8993  ;;  %v1708_v54 = vunpack.c.l.bf16 %v10006_v9 }
 0x24b   : > { %v1456_v0 = vsel %vm1362_vm0, %v1361_v62, 0.0  ;;  %v8996_v20 = vpop.eup %8995  ;;  %v1617_v55 = vadd.f32 1.0, %v8994_v53  ;;  %v1756_v6 = vsub.f32 %v1692_v18, %v1724_v39  ;;  %v1704_v62 = vunpack.c.l.bf16 %v9990_v46 }
 0x24c   : > { %v1619_v35 = vadd.f32 1.0, %v8996_v20  ;;  %v8998_v56 = vpop.eup %8997  ;;  %v1702_v18 = vunpack.c.l.bf16 %v9998_v8  ;;  %v10019_v20 = vsub.f32 %v1697_v37, %v1729_v17  ;;  %v10053_v52 = vsub.f32 %v1708_v54, %v12454_v16 }
 0x24d   : > { %9001 = vrcp.f32 %v1617_v55  ;;  %v9000_v49 = vpop.eup %8999  ;;  %v10023_v55 = vsub.f32 %v1695_v38, %v1727_v41 }
 0x24e   : > { %1454 = vadd.xlane.f32.xlu0 %v1453_v33  ;;  %v9957_v33 = vsub.f32 %v1694_v7, %v1726_v50  ;;  %9003 = vrcp.f32 %v1619_v35  ;;  %v1623_v53 = vadd.f32 1.0, %v9000_v49  ;;  %v10014_v7 = vld [vmem:[%s9431_s24 + $0x40] sm:$0xff]   ;;  %v10047_v38 = vsub.f32 %v1702_v18, %v12455_v27 }
 0x24f   : > { %v1706_v13 = vunpack.c.l.bf16 %v10014_v7 }
 0x257   : > { %v9002_v18 = vpop.eup %9001 }
 0x258   : > { %v9004_v16 = vpop.eup %9003 }
 0x264   : > { %1898 = vperm.xlu0 %8564, %v8988_v42   ;;  %v1699_v42 = vunpack.c.h.bf16 %v9978_v40 }
 0x268   : > { %1908 = vperm.xlu0 %8564, %v8990_v29   ;;  %v9986_v29 = vld [vmem:[%s9377_s15 + $0x20] sm:$0xff]  }
 0x269   : > { %v12457_v58 = vunpack.c.h.bf16 %v9986_v29  ;;  %v12462_v54 = vunpack.c.l.bf16 %v9986_v29 }
 0x26b   : > { %v10037_v35 = vsub.f32 %v1699_v42, %v12457_v58  ;;  %v10061_v42 = vld [vmem:[%s9431_s24 + $0x50] sm:$0xff]  }
 0x26c   : > { %1918 = vperm.xlu0 %8564, %v8992_v63   ;;  %v9994_v63 = vld [vmem:[%s9377_s15 + $0x38] sm:$0xff]  }
 0x26d   : > { %1457 = vadd.xlane.f32.xlu1 %v1456_v0  ;;  %v12456_v47 = vunpack.c.l.bf16 %v9994_v63  ;;  %v1621_v0 = vadd.f32 1.0, %v8998_v56 }
 0x26f   : > { %9005 = vrcp.f32 %v1621_v0  ;;  %v10065_v0 = vld [vmem:[%s9377_s15 + $0x50] sm:$0xff]  }
 0x270   : > { %9007 = vrcp.f32 %v1623_v53 }
 0x277   : > { %v1799_v48 = vpop.permute.xlu1 %1798 }
 0x278   : > { %v1948_v21 = vmul.f32 %v1799_v48, %v1756_v6  ;;  %v1789_v22 = vpop.permute.xlu0 %1788  ;;  %v10031_v6 = vsub.f32 %v1701_v23, %v12464_v3  ;;  %v1698_v48 = vunpack.c.l.bf16 %v9978_v40  ;;  %v12459_v40 = vunpack.c.h.bf16 %v10010_v12 }
 0x279   : > { %v1946_v34 = vmul.f32 %v1789_v22, %v1754_v43  ;;  %v10043_v43 = vsub.f32 %v1704_v62, %v12456_v47  ;;  %v1710_v62 = vunpack.c.l.bf16 %v10061_v42  ;;  %v12458_v22 = vunpack.c.h.bf16 %v9994_v63 }
 0x27a   : > { %v1980_v37 = vadd.f32 %v1948_v21, %v1724_v39  ;;  %v10057_v39 = vsub.f32 %v1706_v13, %v12453_v11  ;;  %v1705_v13 = vunpack.c.h.bf16 %v9990_v46  ;;  %v12460_v11 = vunpack.c.h.bf16 %v10002_v4 }
 0x27b   : > { %v1978_v56 = vadd.f32 %v1946_v34, %v1722_v19  ;;  %v1804_v44 = vpop.permute.xlu1 %1803  ;;  %v12463_v19 = vunpack.c.l.bf16 %v10065_v0  ;;  %v1703_v34 = vunpack.c.h.bf16 %v9998_v8  ;;  %v2496_v8 = vld [vmem:[#allocation2 + $0x18] sm:$0xf] }
 0x27c   : > { %v7778_v49 = vpack.c.bf16 %v1980_v37, %v1980_v37  ;;  %v1949_v23 = vmul.f32 %v1804_v44, %v9945_v32 }
 0x27d   : > { %v7776_v53 = vpack.c.bf16 %v1978_v56, %v1978_v56  ;;  %v1709_v56 = vunpack.c.h.bf16 %v10006_v9  ;;  %v10089_v9 = vsub.f32 %v1710_v62, %v12463_v19  ;;  %v9177_v19 = vld [vmem:[%s9431_s24 + $0x68] sm:$0xff]  }
 0x27e   : > { %v2181_v21 = vshrl.u32 %v7778_v49, 16  ;;  %v1981_v32 = vadd.f32 %v1949_v23, %v1725_v26  ;;  %1903 = vperm.xlu1 %8563, %v9002_v18   ;;  %v2184_v46 = vshll.u32 %v7778_v49, 16  ;;  %v1716_v3 = vunpack.c.l.bf16 %v9177_v19 }
 0x27f   : > { %v2164_v37 = vshrl.u32 %v7776_v53, 16  ;;  %v1794_v44 = vpop.permute.xlu1 %1793  ;;  %v2167_v18 = vshll.u32 %v7776_v53, 16  ;;  %v10118_v60 = vsub.f32 %v1709_v56, %v12459_v40 }
 0x280   : > { %v2183_v27 = vrot.slane %v2181_v21, 7  ;;  %v7779_v47 = vpack.c.bf16 %v1981_v32, %v1981_v32  ;;  %v1947_v2 = vmul.f32 %v1794_v44, %v9949_v25  ;;  %v1707_v21 = vunpack.c.h.bf16 %v10014_v7  ;;  %v2487_v32 = vld [vmem:[#allocation2 + $0xc] sm:$0xf] }
 0x281   : > { %v10085_v23 = vrot.slane %v2164_v37, 7  ;;  %v10094_v44 = vsub.f32 %v1698_v48, %v12462_v54  ;;  %v10098_v37 = vsub.f32 %v1705_v13, %v12458_v22 }
 0x282   : > { %v2186_v49 = vor.u32 %v2184_v46, %v2183_v27  ;;  %v2189_v58 = vshrl.u32 %v7779_v47, 16  ;;  %v1819_v25 = vpop.permute.xlu0 %1818  ;;  %1913 = vperm.xlu1 %8563, %v9004_v16   ;;  %v1979_v62 = vadd.f32 %v1947_v2, %v1723_v10  ;;  %v10106_v46 = vsub.f32 %v1703_v34, %v12460_v11  ;;  %v9006_v16 = vpop.eup %9005  ;;  %v2500_v2 = vld [vmem:[#allocation2 + $0x20] sm:$0x1] }
 0x283   : > { %v2169_v53 = vor.u32 %v2167_v18, %v10085_v23  ;;  %v1952_v7 = vmul.f32 %v1819_v25, %v9953_v31  ;;  %v2192_v22 = vshll.u32 %v7779_v47, 16  ;;  %v9008_v10 = vpop.eup %9007  ;;  %v12490_v34 = vmov 0 }
 0x284   : > { %v2497_v48 = vsel %vm10081_vm12, %v2186_v49, %v2496_v8  ;;  %v2191_v18 = vrot.slane %v2189_v58, 7  ;;  %v12491_v34 = vsel %vm10124_vm14, 4294967295, %v12490_v34  ;;  %v7777_v8 = vpack.c.bf16 %v1979_v62, %v1979_v62 }
 0x285   : > { %2498 = vst [vmem:[#allocation2 + $0x18] sm:$0xf] %v2497_v48  ;;  %v2488_v31 = vsel %vm10081_vm12, %v2169_v53, %v2487_v32  ;;  %12492 = vst [vmem:[#allocation8_spill] sm:$0xff] %v12491_v34  ;;  %v1984_v58 = vadd.f32 %v1952_v7, %v1728_v57  ;;  %v10132_v47 = vsub.f32 %v1707_v21, %v12461_v30  ;;  %v2187_v56 = vrot.slane %v2183_v27, 4  ;;  %v10142_v27 = vld [vmem:[%s9431_s24 + $0x58] sm:$0xff]   ;;  %v10157_v30 = vld [vmem:[%s9377_s15 + $0x60] sm:$0xff]  }
 0x286   : > { %2489 = vst [vmem:[#allocation2 + $0xc] sm:$0xf] %v2488_v31  ;;  %v2194_v49 = vor.u32 %v2192_v22, %v2191_v18  ;;  %v2196_v32 = vrot.slane %v2191_v18, 4  ;;  %v1809_v25 = vpop.permute.xlu0 %1808  ;;  %1923 = vperm.xlu1 %8563, %v9006_v16   ;;  %v1711_v53 = vunpack.c.h.bf16 %v10061_v42  ;;  %v2172_v48 = vshrl.u32 %v7777_v8, 16  ;;  %v10146_v7 = vld [vmem:[%s9377_s15 + $0x58] sm:$0xff]  }
 0x287   : > { %v7782_v40 = vpack.c.bf16 %v1984_v58, %v1984_v58  ;;  %v1950_v62 = vmul.f32 %v1809_v25, %v9957_v33  ;;  %v12466_v11 = vunpack.c.h.bf16 %v10065_v0  ;;  %v1712_v22 = vunpack.c.l.bf16 %v10142_v27  ;;  %v2493_v58 = vld [vmem:[#allocation2 + $0x14] sm:$0x1] }
 0x288   : > { %v2195_v57 = vsel %vm10112_vm13, %v2187_v56, %v2194_v49  ;;  %v2501_v21 = vsel %vm10124_vm14, %v2196_v32, %v2500_v2  ;;  %v12465_v42 = vunpack.c.l.bf16 %v10146_v7  ;;  %v2174_v33 = vrot.slane %v2172_v48, 7  ;;  %v10153_v32 = vld [vmem:[%s9431_s24 + $0x60] sm:$0xff]  }
 0x289   : > { %2499 = vst [vmem:[#allocation2 + $0x1c] sm:$0xf] %v2195_v57  ;;  %2502 = vst [vmem:[#allocation2 + $0x20] sm:$0x1] %v2501_v21  ;;  %v2175_v16 = vshll.u32 %v7777_v8, 16  ;;  %v2215_v18 = vshrl.u32 %v7782_v40, 16  ;;  %v1982_v31 = vadd.f32 %v1950_v62, %v1726_v50  ;;  %v1714_v25 = vunpack.c.l.bf16 %v10153_v32 }
 0x28a   : > { %v2170_v2 = vrot.slane %v10085_v23, 4  ;;  %v2218_v56 = vshll.u32 %v7782_v40, 16  ;;  %v1824_v49 = vpop.permute.xlu0 %1823  ;;  %1933 = vperm.xlu1 %8563, %v9008_v10   ;;  %v12467_v48 = vunpack.c.l.bf16 %v10157_v30  ;;  %v2179_v57 = vrot.slane %v2174_v33, 4  ;;  %v2510_v23 = vld [vmem:[#allocation2 + $0x30] sm:$0xf] }
 0x28b   : > { %v2177_v8 = vor.u32 %v2175_v16, %v2174_v33  ;;  %v10160_v21 = vrot.slane %v2215_v18, 7  ;;  %v7780_v50 = vpack.c.bf16 %v1982_v31, %v1982_v31  ;;  %v1953_v40 = vmul.f32 %v1824_v49, %v10019_v20  ;;  %v10178_v31 = vld [vmem:[%s9377_s15 + $0x68] sm:$0xff]  }
 0x28c   : > { %v2751_v62 = vld [vmem:[#allocation2 + $0x18] sm:$0xf]  ;;  %v10165_v10 = vsub.f32 %v1711_v53, %v12466_v11  ;;  %v10169_v54 = vsub.f32 %v1712_v22, %v12465_v42  ;;  %v2494_v16 = vsel %vm10124_vm14, %v2179_v57, %v2493_v58  ;;  %v8666_v22 = vld [vmem:[%s12450_s7 + $0x140] sm:$0xff]  }
 0x28d   : > { %v2178_v33 = vsel %vm10112_vm13, %v2170_v2, %v2177_v8  ;;  %v2220_v18 = vor.u32 %v2218_v56, %v10160_v21  ;;  %v2748_v20 = vld [vmem:[#allocation2 + $0xc] sm:$0xf]  ;;  %2495 = vst [vmem:[#allocation2 + $0x14] sm:$0x1] %v2494_v16  ;;  %v2198_v19 = vshrl.u32 %v7780_v50, 16  ;;  %v1985_v2 = vadd.f32 %v1953_v40, %v1729_v17  ;;  %v8667_v57 = vld [vmem:[%s12450_s7 + $0x100] sm:$0xff]   ;;  %8081 = vmatprep.subr.bf16.mxu1 %v8666_v22 }
 0x28e   : > { %2490 = vst [vmem:[#allocation2 + $0x10] sm:$0xf] %v2178_v33  ;;  %v1814_v49 = vpop.permute.xlu0 %1813  ;;  %v2821_v8 = vshrl.u32 %v2748_v20, 16  ;;  %v10186_v58 = vld [vmem:[#allocation2 + $0xc] sm:$0xe]  ;;  %v10190_v56 = vsub.f32 %v1714_v25, %v12467_v48  ;;  %v2201_v16 = vshll.u32 %v7780_v50, 16  ;;  %8082 = vmatpush3.bf16.msra.mxu1 %v8667_v57 }
 0x28f   : > { %v2511_v33 = vsel %vm10081_vm12, %v2220_v18, %v2510_v23  ;;  %v1951_v42 = vmul.f32 %v1814_v49, %v10023_v55  ;;  %v2824_v14 = vshll.u32 %v2748_v20, 16  ;;  %v10198_v17 = vrot.slane %v2198_v19, 7  ;;  %v2503_v25 = vld [vmem:[#allocation2 + $0x24] sm:$0xf] }
 0x290   : > { %2512 = vst [vmem:[#allocation2 + $0x30] sm:$0xf] %v2511_v33  ;;  %v7783_v40 = vpack.c.bf16 %v1985_v2, %v1985_v2  ;;  %v2823_v11 = vrot.slane %v2821_v8, 4  ;;  %v2845_v36 = vshrl.u32 %v2751_v62, 16  ;;  %v2848_v53 = vshll.u32 %v2751_v62, 16 }
 0x291   : > { %v1983_v48 = vadd.f32 %v1951_v42, %v1727_v41  ;;  %v2826_v61 = vrot.slane %v2824_v14, 5  ;;  %v12493_v23 = vunpack.c.l.bf16 %v10178_v31  ;;  %v2221_v55 = vrot.slane %v10160_v21, 4  ;;  %v10209_v2 = vld [vmem:[#allocation2 + $0x1c] sm:$0xf]  ;;  %v2514_v62 = vld [vmem:[#allocation2 + $0x38] sm:$0x1] }
 0x292   : > { %v2203_v18 = vor.u32 %v2201_v16, %v10198_v17  ;;  %v2223_v20 = vshrl.u32 %v7783_v40, 16  ;;  %v1839_v22 = vpop.permute.xlu0 %1838  ;;  %v2204_v49 = vrot.slane %v10198_v17, 4  ;;  %v2226_v59 = vshll.u32 %v7783_v40, 16 }
 0x293   : > { %v10204_v50 = vsub.f32 %v1716_v3, %v12493_v23  ;;  %v7781_v41 = vpack.c.bf16 %v1983_v48, %v1983_v48  ;;  %v1956_v42 = vmul.f32 %v1839_v22, %v10027_v24  ;;  %v2827_v21 = vor.u32 %v2826_v61, %v2823_v11  ;;  %v2507_v61 = vld [vmem:[#allocation2 + $0x2c] sm:$0x1] }
 0x294   : > { %v2504_v3 = vsel %vm10081_vm12, %v2203_v18, %v2503_v25  ;;  %v2225_v8 = vrot.slane %v2223_v20, 7  ;;  %v10215_v57 = vrot.slane %v2845_v36, 4  ;;  %v12494_v16 = vunpack.c.l.bf16 %v9969_v5  ;;  %v2750_v18 = vld [vmem:[#allocation2 + $0x14] sm:$0x1] }
 0x295   : > { %2505 = vst [vmem:[#allocation2 + $0x24] sm:$0xf] %v2504_v3  ;;  %v2206_v33 = vshrl.u32 %v7781_v41, 16  ;;  %v8645_v23 = vld [vmem:[#allocation2 + $0xc] sm:$0xff]   ;;  %v10219_v19 = vrot.slane %v2848_v53, 5  ;;  %v2854_v48 = vshll.u32 %v10209_v2, 16 }
 0x296   : > { %v1988_v14 = vadd.f32 %v1956_v42, %v12494_v16  ;;  %v2228_v17 = vor.u32 %v2226_v59, %v2225_v8  ;;  %v2230_v24 = vrot.slane %v2225_v8, 4  ;;  %v2209_v40 = vshll.u32 %v7781_v41, 16  ;;  %v1844_v22 = vpop.permute.xlu0 %1843  ;;  %v2749_v25 = vld [vmem:[#allocation2 + $0x10] sm:$0xf]  ;;  %6360 = vmatprep.mubr.bf16.mxu0 %v8645_v23  ;;  %v8647_v42 = vld [vmem:[#allocation2 + $0x18] sm:$0xff]  }
 0x297   : > { %v2208_v36 = vrot.slane %v2206_v33, 7  ;;  %v1957_v3 = vmul.f32 %v1844_v22, %v10031_v6  ;;  %v2830_v16 = vshll.u32 %v2749_v25, 16  ;;  %v12495_v41 = vcombine.low %v9975_v1, %v9983_v45  ;;  %v3264_v22 = vld [vmem:[#allocation2 + $0x10] sm:$0xf] }
 0x298   : > { %v7786_v20 = vpack.c.bf16 %v1988_v14, %v1988_v14  ;;  %v2229_v53 = vsel %vm10112_vm13, %v2221_v55, %v2228_v17  ;;  %v2515_v59 = vsel %vm10124_vm14, %v2230_v24, %v2514_v62  ;;  %v2828_v8 = vrot.slane %v2827_v21, 4  ;;  %v8670_v55 = vld [vmem:[%s12450_s7 + $0x148] sm:$0xff]  }
 0x299   : > { %6361 = vmatmul.mubr.bf16.vlgmr.msra.gmra.mrb[32].mxu0 %v12495_v41  ;;  %v2834_v11 = vshrl.u32 %v2749_v25, 16  ;;  %2513 = vst [vmem:[#allocation2 + $0x34] sm:$0xf] %v2229_v53  ;;  %2516 = vst [vmem:[#allocation2 + $0x38] sm:$0x1] %v2515_v59  ;;  %v2211_v33 = vor.u32 %v2209_v40, %v2208_v36  ;;  %v2213_v14 = vrot.slane %v2208_v36, 4  ;;  %v12496_v62 = vunpack.c.h.bf16 %v9969_v5  ;;  %8083 = vmatprep.subr.bf16.mxu1 %v8670_v55 }
 0x29a   : > { %v2249_v6 = vshrl.u32 %v7786_v20, 16  ;;  %6368 = vmatprep.mubr.bf16.mxu0 %v8647_v42  ;;  %v2840_v23 = vshll.u32 %v2750_v18, 16  ;;  %v2252_v17 = vshll.u32 %v7786_v20, 16  ;;  %v1834_v1 = vpop.permute.xlu0 %1833  ;;  %v2832_v45 = vrot.slane %v2830_v16, 5  ;;  %v8671_v40 = vld [vmem:[%s12450_s7 + $0x108] sm:$0xff]   ;;  %v8674_v5 = vld [vmem:[%s12450_s7 + $0x150] sm:$0xff]  }
 0x29b   : > { %v1989_v24 = vadd.f32 %v1957_v3, %v12496_v62  ;;  %v2836_v21 = vrot.slane %v2834_v11, 4  ;;  %v2212_v25 = vsel %vm10112_vm13, %v2204_v49, %v2211_v33  ;;  %v2508_v18 = vsel %vm10124_vm14, %v2213_v14, %v2507_v61  ;;  %v3265_v20 = vld [vmem:[#allocation2 + $0x14] sm:$0x1]  ;;  %v2524_v11 = vld [vmem:[#allocation2 + $0x48] sm:$0xf]  ;;  %8084 = vmatpush3.bf16.msra.mxu1 %v8671_v40 }
 0x29c   : > { %v2251_v36 = vrot.slane %v2249_v6, 7  ;;  %v1955_v42 = vmul.f32 %v1834_v1, %v10037_v35  ;;  %2506 = vst [vmem:[#allocation2 + $0x28] sm:$0xf] %v2212_v25  ;;  %2509 = vst [vmem:[#allocation2 + $0x2c] sm:$0x1] %v2508_v18  ;;  %v3368_v53 = vrot.slane %v3264_v22, 5  ;;  %v2851_v49 = vor.u32 %v10219_v19, %v10215_v57  ;;  %8085 = vmatprep.subr.bf16.mxu1 %v8674_v5 }
 0x29d   : > { %v7787_v3 = vpack.c.bf16 %v1989_v24, %v1989_v24  ;;  %v2837_v16 = vor.u32 %v2836_v21, %v2832_v45  ;;  %v8675_v35 = vld [vmem:[%s12450_s7 + $0x110] sm:$0xff]   ;;  %v12497_v59 = vunpack.c.h.bf16 %v9986_v29  ;;  %v2833_v33 = vsel %vm9863_vm3, %v2828_v8, %v2832_v45 }
 0x29e   : > { %v2254_v61 = vor.u32 %v2252_v17, %v2251_v36  ;;  %v2842_v14 = vrot.slane %v2840_v23, 5  ;;  %v2255_v6 = vrot.slane %v2251_v36, 4  ;;  %v1859_v22 = vpop.permute.xlu0 %1858  ;;  %v3371_v24 = vrot.slane %v3265_v20, 5  ;;  %v2528_v45 = vld [vmem:[#allocation2 + $0x50] sm:$0x1] }
 0x29f   : > { %v1987_v41 = vadd.f32 %v1955_v42, %v12497_v59  ;;  %v2257_v55 = vshrl.u32 %v7787_v3, 16  ;;  %v2838_v62 = vrot.slane %v2837_v16, 4  ;;  %v1960_v17 = vmul.f32 %v1859_v22, %v10043_v43  ;;  %8086 = vmatpush3.bf16.msra.mxu1 %v8675_v35  ;;  %v2753_v20 = vld [vmem:[#allocation2 + $0x20] sm:$0x1]  ;;  %v2521_v22 = vld [vmem:[#allocation2 + $0x44] sm:$0x1] }
 0x2a0   : > { %v2525_v19 = vsel %vm10081_vm12, %v2254_v61, %v2524_v11  ;;  %v3370_v1 = vrot.slane %v3368_v53, 4  ;;  %v2260_v40 = vshll.u32 %v7787_v3, 16  ;;  %v10263_v23 = vrot.slane %v2851_v49, 4  ;;  %v8648_v61 = vld [vmem:[#allocation2 + $0xc] sm:$0xff]  }
 0x2a1   : > { %v10258_v57 = vpack.c.bf16 %v1987_v41, %v1987_v41  ;;  %2526 = vst [vmem:[#allocation2 + $0x48] sm:$0xf] %v2525_v19  ;;  %v2259_v21 = vrot.slane %v2257_v55, 7  ;;  %v2843_v8 = vsel %vm9863_vm3, %v2838_v62, %v2842_v14  ;;  %v12498_v18 = vunpack.c.l.bf16 %v9994_v63  ;;  %v3266_v55 = vld [vmem:[#allocation2 + $0x18] sm:$0xe] }
 0x2a2   : > { %v7489_v42 = vcombine.low %v2833_v33, %v2843_v8  ;;  %v10270_v43 = vrot.slane %v2854_v48, 5  ;;  %v12499_v3 = vrot.slane %v10186_v58, 9  ;;  %v3372_v49 = vsel %vm9959_vm6, %v3370_v1, %v3371_v24  ;;  %v1849_v35 = vpop.permute.xlu0 %1848  ;;  %v3267_v19 = vld [vmem:[#allocation2 + $0x1c] sm:$0xf] }
 0x2a3   : > { %v2240_v25 = vshrl.u32 %v10258_v57, 16  ;;  %v1992_v36 = vadd.f32 %v1960_v17, %v12498_v18  ;;  %v2262_v5 = vor.u32 %v2260_v40, %v2259_v21  ;;  %v2264_v11 = vrot.slane %v2259_v21, 4  ;;  %v8649_v14 = vld [vmem:[#allocation2 + $0x24] sm:$0xff]  }
 0x2a4   : > { %v3369_v16 = vsel %vm9959_vm6, %v12499_v3, %v3368_v53  ;;  %6207 = vmatprep.mubr.bf16.mxu1 %v7489_v42  ;;  %v1958_v48 = vmul.f32 %v1849_v35, %v10047_v38  ;;  %v2858_v62 = vshrl.u32 %v10209_v2, 16  ;;  %v2864_v24 = vshll.u32 %v2753_v20, 16  ;;  %v2754_v21 = vld [vmem:[#allocation2 + $0x24] sm:$0xf] }
 0x2a5   : > { %v10278_v59 = vrot.slane %v2240_v25, 7  ;;  %v7790_v41 = vpack.c.bf16 %v1992_v36, %v1992_v36  ;;  %v7521_v33 = vcombine.low %v3369_v16, %v3372_v49  ;;  %v2263_v58 = vsel %vm10112_vm13, %v2255_v6, %v2262_v5  ;;  %6208 = vmatmul.mubr.bf16.gmra.mrb[20].mxu1 %v8648_v61  ;;  %v3268_v6 = vld [vmem:[#allocation2 + $0x20] sm:$0x1] }
 0x2a6   : > { %v2529_v53 = vsel %vm10124_vm14, %v2264_v11, %v2528_v45  ;;  %2527 = vst [vmem:[#allocation2 + $0x4c] sm:$0xf] %v2263_v58  ;;  %v2857_v38 = vsel %vm9863_vm3, %v10263_v23, %v10270_v43  ;;  %v12469_v40 = vunpack.c.h.bf16 %v10146_v7  ;;  %v12500_v2 = vunpack.c.l.bf16 %v10002_v4  ;;  %v1879_v18 = vpop.permute.xlu0 %1878  ;;  %v2538_v11 = vld [vmem:[#allocation2 + $0x60] sm:$0xf] }
 0x2a7   : > { %2530 = vst [vmem:[#allocation2 + $0x50] sm:$0x1] %v2529_v53  ;;  %v2247_v17 = vrot.slane %v10278_v59, 4  ;;  %v2283_v1 = vshrl.u32 %v7790_v41, 16  ;;  %6369 = vmatmul.mubr.bf16.gmra.mrb[36].mxu0 %v7521_v33  ;;  %v2286_v8 = vshll.u32 %v7790_v41, 16  ;;  %v2860_v25 = vrot.slane %v2858_v62, 4 }
 0x2a8   : > { %v1990_v45 = vadd.f32 %v1958_v48, %v12500_v2  ;;  %6376 = vmatprep.mubr.bf16.mxu0 %v8649_v14  ;;  %v7506_v36 = vrot.slane %v3266_v55, 9  ;;  %v1964_v5 = vmul.f32 %v1879_v18, %v10053_v52  ;;  %v3375_v23 = vrot.slane %v3267_v19, 5  ;;  %v8679_v52 = vld [vmem:[%s12450_s7 + $0x158] sm:$0xff]  }
 0x2a9   : > { %v2522_v42 = vsel %vm10124_vm14, %v2247_v17, %v2521_v22  ;;  %v10296_v20 = vrot.slane %v2283_v1, 7  ;;  %v2861_v16 = vor.u32 %v2860_v25, %v10270_v43  ;;  %v2866_v49 = vrot.slane %v2864_v24, 5  ;;  %v8680_v55 = vld [vmem:[%s12450_s7 + $0x118] sm:$0xff]   ;;  %8087 = vmatprep.subr.bf16.mxu1 %v8679_v52 }
 0x2aa   : > { %2523 = vst [vmem:[#allocation2 + $0x44] sm:$0x1] %v2522_v42  ;;  %v7788_v3 = vpack.c.bf16 %v1990_v45, %v1990_v45  ;;  %v2869_v35 = vshrl.u32 %v2754_v21, 16  ;;  %v12501_v41 = vunpack.c.l.bf16 %v10010_v12  ;;  %v3376_v48 = vsel %vm9959_vm6, %v7506_v36, %v3375_v23  ;;  %v1869_v62 = vpop.permute.xlu0 %1868  ;;  %v2755_v45 = vld [vmem:[#allocation2 + $0x28] sm:$0xf]  ;;  %8088 = vmatpush3.bf16.msra.mxu1 %v8680_v55 }
 0x2ab   : > { %v2288_v61 = vor.u32 %v2286_v8, %v10296_v20  ;;  %v3378_v14 = vrot.slane %v3268_v6, 5  ;;  %v2862_v53 = vrot.slane %v2861_v16, 4  ;;  %v3377_v22 = vrot.slane %v3375_v23, 4  ;;  %v2531_v36 = vld [vmem:[#allocation2 + $0x54] sm:$0xf] }
 0x2ac   : > { %v1996_v33 = vadd.f32 %v1964_v5, %v12501_v41  ;;  %v2266_v43 = vshrl.u32 %v7788_v3, 16  ;;  %v2269_v58 = vshll.u32 %v7788_v3, 16  ;;  %v1962_v17 = vmul.f32 %v1869_v62, %v10057_v39  ;;  %v2756_v23 = vld [vmem:[#allocation2 + $0x2c] sm:$0x1]  ;;  %v8682_v62 = vld [vmem:[%s12450_s7 + $0x1c0] sm:$0xff]  }
 0x2ad   : > { %v2539_v24 = vsel %vm10081_vm12, %v2288_v61, %v2538_v11  ;;  %v2871_v1 = vrot.slane %v2869_v35, 4  ;;  %v2867_v8 = vsel %vm9863_vm3, %v2862_v53, %v2866_v49  ;;  %v3379_v2 = vsel %vm9959_vm6, %v3377_v22, %v3378_v14  ;;  %v8650_v49 = vld [vmem:[#allocation2 + $0x18] sm:$0xff]   ;;  %v8651_v61 = vld [vmem:[#allocation2 + $0x30] sm:$0xff]   ;;  %v10329_v53 = vld [vmem:[#allocation2 + $0x24] sm:$0xe]  ;;  %8193 = vmatprep.subr.bf16.mxu0 %v8682_v62 }
 0x2ae   : > { %v7794_v19 = vpack.c.bf16 %v1996_v33, %v1996_v33  ;;  %2540 = vst [vmem:[#allocation2 + $0x60] sm:$0xf] %v2539_v24  ;;  %v10314_v6 = vrot.slane %v2266_v43, 7  ;;  %v2872_v25 = vshll.u32 %v2754_v21, 16  ;;  %v2243_v18 = vshll.u32 %v10258_v57, 16  ;;  %v1889_v41 = vpop.permute.xlu0 %1888 }
 0x2af   : > { %v7490_v42 = vcombine.low %v2857_v38, %v2867_v8  ;;  %v7522_v39 = vcombine.low %v3376_v48, %v3379_v2  ;;  %v12502_v16 = vunpack.c.l.bf16 %v9935_v28  ;;  %v2552_v21 = vld [vmem:[#allocation2 + $0x78] sm:$0xf]  ;;  %v1966_v57 = vmul.f32 %v1889_v41, %v10089_v9  ;;  %v10331_v22 = vld [vmem:[#allocation2 + $0x28] sm:$0xf]  ;;  %v2758_v62 = vld [vmem:[#allocation2 + $0x34] sm:$0xf] }
 0x2b0   : > { %v2317_v5 = vshrl.u32 %v7794_v19, 16  ;;  %v2271_v11 = vor.u32 %v2269_v58, %v10314_v6  ;;  %v2320_v3 = vshll.u32 %v7794_v19, 16  ;;  %v2874_v33 = vrot.slane %v2872_v25, 5  ;;  %v8685_v25 = vld [vmem:[%s12450_s7 + $0x120] sm:$0xff]   ;;  %v2542_v2 = vld [vmem:[#allocation2 + $0x68] sm:$0x1] }
 0x2b1   : > { %v1994_v35 = vadd.f32 %v1962_v17, %v12502_v16  ;;  %6215 = vmatprep.mubr.bf16.mxu1 %v7490_v42  ;;  %6377 = vmatmul.mubr.bf16.gmra.mrb[40].mxu0 %v7522_v39  ;;  %v2878_v38 = vshll.u32 %v2755_v45, 16  ;;  %v2882_v48 = vshrl.u32 %v2755_v45, 16  ;;  %v2888_v58 = vshll.u32 %v2756_v23, 16  ;;  %v1449_v8 = vpop.xlane.xlu1 %1448  ;;  %v8684_v45 = vld [vmem:[%s12450_s7 + $0x160] sm:$0xff]   ;;  %v3271_v39 = vld [vmem:[#allocation2 + $0x2c] sm:$0x1] }
 0x2b2   : > { %v10324_v14 = vrot.slane %v2317_v5, 7  ;;  %v2532_v52 = vsel %vm10081_vm12, %v2271_v11, %v2531_v36  ;;  %6216 = vmatmul.mubr.bf16.gmra.mrb[24].mxu1 %v8650_v49  ;;  %6384 = vmatprep.mubr.bf16.mxu0 %v8651_v61  ;;  %v2875_v43 = vor.u32 %v2874_v33, %v2871_v1  ;;  %v12503_v24 = vunpack.c.l.bf16 %v10065_v0  ;;  %v8683_v1 = vld [vmem:[%s12450_s7 + $0x180] sm:$0xff]   ;;  %v2757_v23 = vld [vmem:[#allocation2 + $0x30] sm:$0xf]  ;;  %v8686_v16 = vld [vmem:[%s12450_s7 + $0x1c8] sm:$0xff]  }
 0x2b3   : > { %v7792_v55 = vpack.c.bf16 %v1994_v35, %v1994_v35  ;;  %2533 = vst [vmem:[#allocation2 + $0x54] sm:$0xf] %v2532_v52  ;;  %v2880_v17 = vrot.slane %v2878_v38, 5  ;;  %v10350_v36 = vor.u32 %v2243_v18, %v10278_v59  ;;  %v2884_v5 = vrot.slane %v2882_v48, 4  ;;  %v2545_v59 = vld [vmem:[#allocation2 + $0x6c] sm:$0xf]  ;;  %8194 = vmatpush3.bf16.msra.mxu0 %v8683_v1  ;;  %8089 = vmatprep.subr.bf16.mxu1 %v8684_v45 }
 0x2b4   : > { %v2322_v9 = vor.u32 %v2320_v3, %v10324_v14  ;;  %v1998_v19 = vadd.f32 %v1966_v57, %v12503_v24  ;;  %v12504_v11 = vunpack.c.h.bf16 %v10142_v27  ;;  %v2876_v61 = vrot.slane %v2875_v43, 4  ;;  %v8687_v27 = vld [vmem:[%s12450_s7 + $0x188] sm:$0xff]   ;;  %8090 = vmatpush3.bf16.msra.mxu1 %v8685_v25  ;;  %8195 = vmatprep.subr.bf16.mxu0 %v8686_v16  ;;  %v2759_v16 = vld [vmem:[#allocation2 + $0x38] sm:$0x1] }
 0x2b5   : > { %v2300_v42 = vshrl.u32 %v7792_v55, 16  ;;  %v2303_v18 = vshll.u32 %v7792_v55, 16  ;;  %v2885_v33 = vor.u32 %v2884_v5, %v2880_v17  ;;  %v2890_v57 = vrot.slane %v2888_v58, 5  ;;  %v10372_v55 = vld [vmem:[#allocation4] ss:$0 sm:$0xff]  ;;  %v8688_v58 = vld [vmem:[%s12450_s7 + $0x168] sm:$0xff]  }
 0x2b6   : > { %v10356_v3 = vsub.f32 %v12504_v11, %v12469_v40  ;;  %v2553_v35 = vsel %vm10081_vm12, %v2322_v9, %v2552_v21  ;;  %v7796_v49 = vpack.c.bf16 %v1998_v19, %v1998_v19  ;;  %v3382_v38 = vrot.slane %v10331_v22, 5  ;;  %v1829_v9 = vpop.permute.xlu1 %1828  ;;  %v8689_v22 = vld [vmem:[%s12450_s7 + $0x128] sm:$0xff]   ;;  %v2559_v19 = vld [vmem:[#allocation2 + $0x84] sm:$0xf]  ;;  %8091 = vmatprep.subr.bf16.mxu1 %v8688_v58  ;;  %v10393_v58 = vld [vmem:[#allocation2 + $0x34] sm:$0xf] }
 0x2b7   : > { %2554 = vst [vmem:[#allocation2 + $0x78] sm:$0xf] %v2553_v35  ;;  %v10366_v41 = vrot.slane %v2300_v42, 7  ;;  %v2881_v48 = vsel %vm9863_vm3, %v2876_v61, %v2880_v17  ;;  %v7507_v52 = vrot.slane %v10329_v53, 9  ;;  %v1494_v43 = vadd.f32 %v10372_v55, %v1449_v8  ;;  %8196 = vmatpush3.bf16.msra.mxu0 %v8687_v27 }
 0x2b8   : > { %v2334_v21 = vshrl.u32 %v7796_v49, 16  ;;  %v2337_v17 = vshll.u32 %v7796_v49, 16  ;;  %v2886_v1 = vrot.slane %v2885_v33, 4  ;;  %v3385_v53 = vrot.slane %v3271_v39, 5  ;;  %8092 = vmatpush3.bf16.msra.mxu1 %v8689_v22 }
 0x2b9   : > { %v2305_v24 = vor.u32 %v2303_v18, %v10366_v41  ;;  %v3384_v25 = vrot.slane %v3382_v38, 4  ;;  %v7436_v8 = vmul.f32 -1.442695, %v1494_v43  ;;  %v2893_v42 = vshrl.u32 %v2757_v23, 16 }
 0x2ba   : > { %v10382_v45 = vrot.slane %v2334_v21, 7  ;;  %v2891_v11 = vsel %vm9863_vm3, %v2886_v1, %v2890_v57  ;;  %v2896_v35 = vshll.u32 %v2757_v23, 16  ;;  %v2902_v18 = vshll.u32 %v2758_v62, 16  ;;  %v1864_v33 = vpop.permute.xlu1 %1863 }
 0x2bb   : > { %v2546_v5 = vsel %vm10081_vm12, %v2305_v24, %v2545_v59  ;;  %v7491_v49 = vcombine.low %v2881_v48, %v2891_v11  ;;  %v3383_v61 = vsel %vm9959_vm6, %v7507_v52, %v3382_v38  ;;  %v3386_v27 = vsel %vm9959_vm6, %v3384_v25, %v3385_v53  ;;  %v8652_v59 = vld [vmem:[#allocation2 + $0x24] sm:$0xff]   ;;  %v10400_v53 = vld [vmem:[#allocation2 + $0x30] sm:$0xe] }
 0x2bc   : > { %2547 = vst [vmem:[#allocation2 + $0x6c] sm:$0xf] %v2546_v5  ;;  %v2339_v39 = vor.u32 %v2337_v17, %v10382_v45  ;;  %v7523_v21 = vcombine.low %v3383_v61, %v3386_v27  ;;  %9009 = vpow2.f32 %v7436_v8  ;;  %v2895_v43 = vrot.slane %v2893_v42, 4 }
 0x2bd   : > { %v2898_v57 = vrot.slane %v2896_v35, 5  ;;  %6223 = vmatprep.mubr.bf16.mxu1 %v7491_v49  ;;  %v2904_v22 = vrot.slane %v2902_v18, 5  ;;  %v2906_v48 = vshrl.u32 %v2758_v62, 16  ;;  %v2912_v24 = vshll.u32 %v2759_v16, 16  ;;  %v10413_v18 = vld [vmem:[#allocation2 + $0x44] sm:$0x1] }
 0x2be   : > { %v2560_v23 = vsel %vm10081_vm12, %v2339_v39, %v2559_v19  ;;  %v2289_v38 = vrot.slane %v10296_v20, 4  ;;  %6385 = vmatmul.mubr.bf16.gmra.mrb[44].mxu0 %v7523_v21  ;;  %6224 = vmatmul.mubr.bf16.gmra.mrb[28].mxu1 %v8652_v59  ;;  %v1954_v17 = vmul.f32 %v1829_v9, %v10094_v44  ;;  %v1961_v1 = vmul.f32 %v1864_v33, %v10098_v37  ;;  %v1854_v42 = vpop.permute.xlu1 %1853  ;;  %v10411_v9 = vld [vmem:[#allocation2 + $0x38] sm:$0x1] }
 0x2bf   : > { %2561 = vst [vmem:[#allocation2 + $0x84] sm:$0xf] %v2560_v23  ;;  %v2899_v52 = vor.u32 %v2898_v57, %v2895_v43  ;;  %v2272_v25 = vrot.slane %v10314_v6, 4  ;;  %v2323_v19 = vrot.slane %v10324_v14, 4  ;;  %v2908_v8 = vrot.slane %v2906_v48, 4 }
 0x2c0   : > { %v3389_v62 = vrot.slane %v10393_v58, 5  ;;  %v12505_v11 = vunpack.c.l.bf16 %v9986_v29  ;;  %v12506_v35 = vunpack.c.h.bf16 %v9994_v63  ;;  %v1959_v37 = vmul.f32 %v1854_v42, %v10106_v46  ;;  %v10419_v63 = vld [vmem:[#allocation2 + $0x48] sm:$0xf] }
 0x2c1   : > { %v2909_v49 = vor.u32 %v2908_v8, %v2904_v22  ;;  %v2914_v61 = vrot.slane %v2912_v24, 5  ;;  %v7508_v27 = vrot.slane %v10400_v53, 9  ;;  %v2900_v33 = vrot.slane %v2899_v52, 4  ;;  %v8655_v53 = vld [vmem:[#allocation2 + $0x48] sm:$0xff]  }
 0x2c2   : > { %v1986_v16 = vadd.f32 %v1954_v17, %v12505_v11  ;;  %v1993_v44 = vadd.f32 %v1961_v1, %v12506_v35  ;;  %v12507_v29 = vunpack.c.h.bf16 %v10002_v4  ;;  %v1884_v46 = vpop.permute.xlu1 %1883  ;;  %v3391_v23 = vrot.slane %v3389_v62, 4 }
 0x2c3   : > { %v2910_v57 = vrot.slane %v2909_v49, 4  ;;  %v3392_v48 = vrot.slane %v10411_v9, 5  ;;  %v2936_v17 = vshll.u32 %v10413_v18, 16  ;;  %v2905_v24 = vsel %vm9863_vm3, %v2900_v33, %v2904_v22  ;;  %v8653_v22 = vld [vmem:[#allocation2 + $0x30] sm:$0xff]  }
 0x2c4   : > { %v7784_v21 = vpack.c.bf16 %v1986_v16, %v1986_v16  ;;  %v7791_v59 = vpack.c.bf16 %v1993_v44, %v1993_v44  ;;  %v1991_v43 = vadd.f32 %v1959_v37, %v12507_v29  ;;  %v1965_v16 = vmul.f32 %v1884_v46, %v10118_v60  ;;  %v2517_v37 = vld [vmem:[#allocation2 + $0x3c] sm:$0xf] }
 0x2c5   : > { %v2915_v4 = vsel %vm9863_vm3, %v2910_v57, %v2914_v61  ;;  %v2941_v29 = vshrl.u32 %v10419_v63, 16  ;;  %v12508_v39 = vunpack.c.h.bf16 %v10010_v12  ;;  %v3390_v14 = vsel %vm9959_vm6, %v7508_v27, %v3389_v62 }
 0x2c6   : > { %v2232_v52 = vshrl.u32 %v7784_v21, 16  ;;  %v2235_v1 = vshll.u32 %v7784_v21, 16  ;;  %v2291_v8 = vshrl.u32 %v7791_v59, 16  ;;  %v2294_v42 = vshll.u32 %v7791_v59, 16  ;;  %v9010_v35 = vpop.eup %9009  ;;  %v1874_v61 = vpop.permute.xlu1 %1873 }
 0x2c7   : > { %v7789_v11 = vpack.c.bf16 %v1991_v43, %v1991_v43  ;;  %v7492_v44 = vcombine.low %v2905_v24, %v2915_v4  ;;  %v1622_v40 = vadd.f32 1.0, %v9010_v35  ;;  %v1997_v5 = vadd.f32 %v1965_v16, %v12508_v39  ;;  %v2764_v4 = vld [vmem:[#allocation2 + $0x4c] sm:$0xf] }
 0x2c8   : > { %v2234_v49 = vrot.slane %v2232_v52, 7  ;;  %v2293_v9 = vrot.slane %v2291_v8, 7  ;;  %v1963_v52 = vmul.f32 %v1874_v61, %v10132_v47  ;;  %v12509_v16 = vunpack.c.h.bf16 %v9935_v28  ;;  %v2556_v28 = vld [vmem:[#allocation2 + $0x80] sm:$0x1] }
 0x2c9   : > { %v2274_v33 = vshrl.u32 %v7789_v11, 16  ;;  %v2277_v21 = vshll.u32 %v7789_v11, 16  ;;  %6231 = vmatprep.mubr.bf16.mxu1 %v7492_v44  ;;  %9011 = vrcp.f32 %v1622_v40  ;;  %v7795_v24 = vpack.c.bf16 %v1997_v5, %v1997_v5 }
 0x2ca   : > { %v2237_v59 = vor.u32 %v2235_v1, %v2234_v49  ;;  %v2238_v43 = vrot.slane %v2234_v49, 4  ;;  %v2296_v60 = vor.u32 %v2294_v42, %v2293_v9  ;;  %v2298_v57 = vrot.slane %v2293_v9, 4  ;;  %6232 = vmatmul.mubr.bf16.gmra.mrb[32].mxu1 %v8653_v22  ;;  %v2535_v1 = vld [vmem:[#allocation2 + $0x5c] sm:$0x1]  ;;  %v1894_v42 = vpop.permute.xlu1 %1893  ;;  %v10457_v9 = vld [vmem:[#allocation2 + $0x50] sm:$0x1] }
 0x2cb   : > { %v2276_v46 = vrot.slane %v2274_v33, 7  ;;  %v3393_v11 = vsel %vm9959_vm6, %v3391_v23, %v3392_v48  ;;  %v2328_v20 = vshll.u32 %v7795_v24, 16  ;;  %v1967_v35 = vmul.f32 %v1894_v42, %v10165_v10 }
 0x2cc   : > { %v2246_v8 = vsel %vm10112_vm13, %v2238_v43, %v10350_v36  ;;  %v2518_v12 = vsel %vm10081_vm12, %v2237_v59, %v2517_v37  ;;  %v2297_v39 = vsel %vm10112_vm13, %v2289_v38, %v2296_v60  ;;  %v2543_v40 = vsel %vm10124_vm14, %v2298_v57, %v2542_v2 }
 0x2cd   : > { %2519 = vst [vmem:[#allocation2 + $0x3c] sm:$0xf] %v2518_v12  ;;  %2520 = vst [vmem:[#allocation2 + $0x40] sm:$0xf] %v2246_v8  ;;  %v2279_v47 = vor.u32 %v2277_v21, %v2276_v46  ;;  %v2281_v5 = vrot.slane %v2276_v46, 4  ;;  %v2325_v36 = vshrl.u32 %v7795_v24, 16  ;;  %v1995_v38 = vadd.f32 %v1963_v52, %v12509_v16 }
 0x2ce   : > { %2541 = vst [vmem:[#allocation2 + $0x64] sm:$0xf] %v2297_v39  ;;  %2544 = vst [vmem:[#allocation2 + $0x68] sm:$0x1] %v2543_v40  ;;  %v2944_v2 = vshll.u32 %v10419_v63, 16  ;;  %v2950_v23 = vshll.u32 %v2764_v4, 16  ;;  %v12510_v10 = vunpack.c.h.bf16 %v10065_v0  ;;  %v7524_v40 = vcombine.low %v3390_v14, %v3393_v11 }
 0x2cf   : > { %v2280_v44 = vsel %vm10112_vm13, %v2272_v25, %v2279_v47  ;;  %v2536_v37 = vsel %vm10124_vm14, %v2281_v5, %v2535_v1  ;;  %v2327_v49 = vrot.slane %v2325_v36, 7  ;;  %v7793_v48 = vpack.c.bf16 %v1995_v38, %v1995_v38  ;;  %v2549_v46 = vld [vmem:[#allocation2 + $0x74] sm:$0x1]  ;;  %v2563_v39 = vld [vmem:[#allocation2 + $0x8c] sm:$0x1] }
 0x2d0   : > { %2534 = vst [vmem:[#allocation2 + $0x58] sm:$0xf] %v2280_v44  ;;  %2537 = vst [vmem:[#allocation2 + $0x5c] sm:$0x1] %v2536_v37  ;;  %v1999_v22 = vadd.f32 %v1967_v35, %v12510_v10  ;;  %v10461_v63 = vrot.slane %v2941_v29, 4  ;;  %v2954_v6 = vshrl.u32 %v2764_v4, 16  ;;  %v1747_v42 = vunpack.c.h.bf16 %v10157_v30 }
 0x2d1   : > { %v2330_v33 = vor.u32 %v2328_v20, %v2327_v49  ;;  %v2332_v21 = vrot.slane %v2327_v49, 4  ;;  %v10463_v25 = vrot.slane %v2944_v2, 5  ;;  %v10465_v61 = vrot.slane %v2950_v23, 5  ;;  %v3277_v47 = vld [vmem:[#allocation2 + $0x44] sm:$0x1] }
 0x2d2   : > { %v2308_v59 = vshrl.u32 %v7793_v48, 16  ;;  %v7797_v43 = vpack.c.bf16 %v1999_v22, %v1999_v22  ;;  %v10469_v60 = vrot.slane %v2936_v17, 5  ;;  %v2960_v57 = vshll.u32 %v10457_v9, 16  ;;  %v10488_v37 = vld [vmem:[#allocation2 + $0x4c] sm:$0xf] }
 0x2d3   : > { %v2331_v0 = vsel %vm10112_vm13, %v2323_v19, %v2330_v33  ;;  %v2557_v29 = vsel %vm10124_vm14, %v2332_v21, %v2556_v28  ;;  %v2311_v24 = vshll.u32 %v7793_v48, 16  ;;  %v2956_v52 = vrot.slane %v2954_v6, 4  ;;  %v9012_v19 = vpop.eup %9011 }
 0x2d4   : > { %2555 = vst [vmem:[#allocation2 + $0x7c] sm:$0xf] %v2331_v0  ;;  %2558 = vst [vmem:[#allocation2 + $0x80] sm:$0x1] %v2557_v29  ;;  %v2310_v8 = vrot.slane %v2308_v59, 7  ;;  %v2342_v12 = vshrl.u32 %v7797_v43, 16  ;;  %v2947_v5 = vor.u32 %v10463_v25, %v10461_v63  ;;  %1928 = vperm.xlu0 %8564, %v9012_v19  }
 0x2d5   : > { %v2345_v18 = vshll.u32 %v7797_v43, 16  ;;  %v8654_v17 = vld [vmem:[#allocation2 + $0x3c] sm:$0xff]   ;;  %v2957_v36 = vor.u32 %v2956_v52, %v10465_v61  ;;  %v12511_v49 = vrot.slane %v10366_v41, 4  ;;  %v12512_v33 = vrot.slane %v10382_v45, 4  ;;  %v3278_v43 = vld [vmem:[#allocation2 + $0x48] sm:$0xe] }
 0x2d6   : > { %v2760_v1 = vld [vmem:[#allocation2 + $0x3c] sm:$0xf]  ;;  %v2761_v4 = vld [vmem:[#allocation2 + $0x40] sm:$0xf]  ;;  %v2313_v20 = vor.u32 %v2311_v24, %v2310_v8  ;;  %v2315_v58 = vrot.slane %v2310_v8, 4  ;;  %v2344_v16 = vrot.slane %v2342_v12, 7  ;;  %6392 = vmatprep.mubr.bf16.mxu0 %v8654_v17  ;;  %v12513_v17 = vunpack.c.h.bf16 %v10153_v32 }
 0x2d7   : > { %v2917_v62 = vshrl.u32 %v2760_v1, 16  ;;  %v3275_v27 = vld [vmem:[#allocation2 + $0x3c] sm:$0xe]  ;;  %6393 = vmatmul.mubr.bf16.gmra.mrb[48].mxu0 %v7524_v40  ;;  %v2920_v11 = vshll.u32 %v2760_v1, 16  ;;  %v2926_v38 = vshll.u32 %v2761_v4, 16  ;;  %v2930_v35 = vshrl.u32 %v2761_v4, 16 }
 0x2d8   : > { %v3276_v2 = vld [vmem:[#allocation2 + $0x40] sm:$0xf]  ;;  %v7509_v44 = vrot.slane %v3275_v27, 9  ;;  %v2314_v9 = vsel %vm10112_vm13, %v12511_v49, %v2313_v20  ;;  %v2550_v23 = vsel %vm10124_vm14, %v2315_v58, %v2549_v46  ;;  %v2347_v28 = vor.u32 %v2345_v18, %v2344_v16  ;;  %6400 = vmatprep.mubr.bf16.mxu0 %v8655_v53  ;;  %v3280_v52 = vld [vmem:[#allocation2 + $0x50] sm:$0x1] }
 0x2d9   : > { %v2349_v48 = vrot.slane %v2344_v16, 4  ;;  %2548 = vst [vmem:[#allocation2 + $0x70] sm:$0xf] %v2314_v9  ;;  %2551 = vst [vmem:[#allocation2 + $0x74] sm:$0x1] %v2550_v23  ;;  %v2919_v10 = vrot.slane %v2917_v62, 4  ;;  %v10507_v14 = vsub.f32 %v12513_v17, %v1747_v42 }
 0x2da   : > { %v2922_v22 = vrot.slane %v2920_v11, 5  ;;  %v2928_v63 = vrot.slane %v2926_v38, 5  ;;  %v2932_v6 = vrot.slane %v2930_v35, 4  ;;  %v2348_v41 = vsel %vm10112_vm13, %v12512_v33, %v2347_v28  ;;  %v2766_v18 = vld [vmem:[#allocation2 + $0x54] sm:$0xf]  ;;  %v8656_v49 = vld [vmem:[#allocation2 + $0x3c] sm:$0xff]  }
 0x2db   : > { %v2564_v21 = vsel %vm10124_vm14, %v2349_v48, %v2563_v39  ;;  %v3396_v25 = vrot.slane %v3276_v2, 5  ;;  %v3399_v59 = vrot.slane %v3277_v47, 5  ;;  %2562 = vst [vmem:[#allocation2 + $0x88] sm:$0xf] %v2348_v41  ;;  %v2958_v46 = vrot.slane %v2957_v36, 4  ;;  %v1455_v16 = vpop.xlane.xlu0 %1454  ;;  %v8657_v35 = vld [vmem:[#allocation2 + $0x54] sm:$0xff]  }
 0x2dc   : > { %2565 = vst [vmem:[#allocation2 + $0x8c] sm:$0x1] %v2564_v21  ;;  %v2923_v0 = vor.u32 %v2922_v22, %v2919_v10  ;;  %v2933_v29 = vor.u32 %v2932_v6, %v2928_v63  ;;  %v2962_v24 = vrot.slane %v2960_v57, 5  ;;  %v2948_v12 = vrot.slane %v2947_v5, 4  ;;  %v2767_v36 = vld [vmem:[#allocation2 + $0x58] sm:$0xf] }
 0x2dd   : > { %v3398_v8 = vrot.slane %v3396_v25, 4  ;;  %v3403_v45 = vrot.slane %v10488_v37, 5  ;;  %v3397_v40 = vsel %vm9959_vm6, %v7509_v44, %v3396_v25  ;;  %v7510_v1 = vrot.slane %v3278_v43, 9  ;;  %v2768_v53 = vld [vmem:[#allocation2 + $0x5c] sm:$0x1] }
 0x2de   : > { %v2924_v19 = vrot.slane %v2923_v0, 4  ;;  %v2934_v39 = vrot.slane %v2933_v29, 4  ;;  %v2963_v4 = vsel %vm9863_vm3, %v2958_v46, %v2962_v24  ;;  %v3406_v5 = vrot.slane %v3280_v52, 5  ;;  %v10520_v27 = vld [vmem:[#allocation2 + $0x58] sm:$0xf] }
 0x2df   : > { %v3400_v57 = vsel %vm9959_vm6, %v3398_v8, %v3399_v59  ;;  %v3405_v47 = vrot.slane %v3403_v45, 4  ;;  %v2965_v62 = vshrl.u32 %v2766_v18, 16  ;;  %v2769_v11 = vld [vmem:[#allocation2 + $0x60] sm:$0xf]  ;;  %v2953_v2 = vsel %vm9863_vm3, %v2948_v12, %v10465_v61  ;;  %v3283_v6 = vld [vmem:[#allocation2 + $0x5c] sm:$0x1] }
 0x2e0   : > { %v2929_v32 = vsel %vm9863_vm3, %v2924_v19, %v2928_v63  ;;  %v2939_v20 = vsel %vm9863_vm3, %v2934_v39, %v10469_v60  ;;  %v7525_v58 = vcombine.low %v3397_v40, %v3400_v57  ;;  %v1496_v44 = vadd.f32 %v10372_v55, %v1455_v16  ;;  %v2770_v25 = vld [vmem:[#allocation2 + $0x64] sm:$0xf]  ;;  %v3281_v0 = vld [vmem:[#allocation2 + $0x54] sm:$0xe]  ;;  %v2771_v29 = vld [vmem:[#allocation2 + $0x68] sm:$0x1] }
 0x2e1   : > { %v7493_v38 = vcombine.low %v2929_v32, %v2939_v20  ;;  %v2968_v37 = vshll.u32 %v2766_v18, 16  ;;  %v3407_v60 = vsel %vm9959_vm6, %v3405_v47, %v3406_v5  ;;  %v2967_v9 = vrot.slane %v2965_v62, 4  ;;  %v3285_v47 = vld [vmem:[#allocation2 + $0x64] sm:$0xf]  ;;  %v2772_v16 = vld [vmem:[#allocation2 + $0x6c] sm:$0xf] }
 0x2e2   : > { %6401 = vmatmul.mubr.bf16.gmra.mrb[52].mxu0 %v7525_v58  ;;  %v2974_v23 = vshll.u32 %v2767_v36, 16  ;;  %v2978_v28 = vshrl.u32 %v2767_v36, 16  ;;  %v7494_v48 = vcombine.low %v2953_v2, %v2963_v4  ;;  %v7438_v10 = vmul.f32 -1.442695, %v1496_v44  ;;  %v8659_v5 = vld [vmem:[#allocation2 + $0x60] sm:$0xff]   ;;  %v8658_v62 = vld [vmem:[#allocation2 + $0x48] sm:$0xff]  }
 0x2e3   : > { %6239 = vmatprep.mubr.bf16.mxu1 %v7493_v38  ;;  %6408 = vmatprep.mubr.bf16.mxu0 %v8657_v35  ;;  %v2970_v22 = vrot.slane %v2968_v37, 5  ;;  %v2984_v63 = vshll.u32 %v2768_v53, 16  ;;  %v3404_v61 = vsel %vm9959_vm6, %v7510_v1, %v3403_v45  ;;  %v3410_v21 = vrot.slane %v10520_v27, 5  ;;  %v1899_v1 = vpop.permute.xlu0 %1898  ;;  %v8690_v53 = vld [vmem:[%s12450_s7 + $0x1d0] sm:$0xff]   ;;  %v3284_v35 = vld [vmem:[#allocation2 + $0x60] sm:$0xe] }
 0x2e4   : > { %6240 = vmatmul.mubr.bf16.gmra.mrb[36].mxu1 %v8656_v49  ;;  %v2976_v33 = vrot.slane %v2974_v23, 5  ;;  %v2980_v41 = vrot.slane %v2978_v28, 4  ;;  %9013 = vpow2.f32 %v7438_v10  ;;  %v7526_v59 = vcombine.low %v3404_v61, %v3407_v60  ;;  %v3286_v60 = vld [vmem:[#allocation2 + $0x68] sm:$0x1]  ;;  %8197 = vmatprep.subr.bf16.mxu0 %v8690_v53  ;;  %v8660_v53 = vld [vmem:[#allocation2 + $0x54] sm:$0xff]  }
 0x2e5   : > { %6247 = vmatprep.mubr.bf16.mxu1 %v7494_v48  ;;  %v2971_v43 = vor.u32 %v2970_v22, %v2967_v9  ;;  %v2989_v46 = vshrl.u32 %v2769_v11, 16  ;;  %v3412_v52 = vrot.slane %v3410_v21, 4  ;;  %v3413_v8 = vrot.slane %v3283_v6, 5 }
 0x2e6   : > { %v2981_v24 = vor.u32 %v2980_v41, %v2976_v33  ;;  %v2992_v12 = vshll.u32 %v2769_v11, 16  ;;  %v2986_v18 = vrot.slane %v2984_v63, 5  ;;  %v2998_v19 = vshll.u32 %v2770_v25, 16  ;;  %v8691_v63 = vld [vmem:[%s12450_s7 + $0x190] sm:$0xff]  }
 0x2e7   : > { %v2991_v17 = vrot.slane %v2989_v46, 4  ;;  %v3002_v45 = vshrl.u32 %v2770_v25, 16  ;;  %v2972_v39 = vrot.slane %v2971_v43, 4  ;;  %v3008_v4 = vshll.u32 %v2771_v29, 16  ;;  %v1909_v23 = vpop.permute.xlu0 %1908  ;;  %8198 = vmatpush3.bf16.msra.mxu0 %v8691_v63  ;;  %v8693_v29 = vld [vmem:[%s12450_s7 + $0x130] sm:$0xff]   ;;  %v8695_v46 = vld [vmem:[%s12450_s7 + $0x1d8] sm:$0xff]  }
 0x2e8   : > { %v2982_v40 = vrot.slane %v2981_v24, 4  ;;  %v2994_v57 = vrot.slane %v2992_v12, 5  ;;  %v1968_v36 = vmul.f32 %v1899_v1, %v10169_v54  ;;  %v7511_v32 = vrot.slane %v3281_v0, 9  ;;  %8199 = vmatprep.subr.bf16.mxu0 %v8695_v46  ;;  %v2776_v46 = vld [vmem:[#allocation2 + $0x7c] sm:$0xf] }
 0x2e9   : > { %v10534_v20 = vsel %vm9959_vm6, %v3412_v52, %v3413_v8  ;;  %v10536_v58 = vrot.slane %v2998_v19, 5  ;;  %v2977_v27 = vsel %vm9863_vm3, %v2972_v39, %v2976_v33  ;;  %v3004_v38 = vrot.slane %v3002_v45, 4  ;;  %v8696_v19 = vld [vmem:[%s12450_s7 + $0x198] sm:$0xff]  }
 0x2ea   : > { %6409 = vmatmul.mubr.bf16.gmra.mrb[56].mxu0 %v7526_v59  ;;  %v2987_v54 = vsel %vm9863_vm3, %v2982_v40, %v2986_v18  ;;  %v2995_v11 = vor.u32 %v2994_v57, %v2991_v17  ;;  %v12514_v44 = vunpack.c.l.bf16 %v10146_v7  ;;  %v3411_v49 = vsel %vm9959_vm6, %v7511_v32, %v3410_v21  ;;  %v8692_v21 = vld [vmem:[%s12450_s7 + $0x170] sm:$0xff]   ;;  %v8697_v45 = vld [vmem:[%s12450_s7 + $0x178] sm:$0xff]  }
 0x2eb   : > { %6416 = vmatprep.mubr.bf16.mxu0 %v8659_v5  ;;  %v7495_v2 = vcombine.low %v2977_v27, %v2987_v54  ;;  %v3417_v9 = vrot.slane %v3285_v47, 5  ;;  %v7527_v28 = vcombine.low %v3411_v49, %v10534_v20  ;;  %v3005_v48 = vor.u32 %v3004_v38, %v10536_v58  ;;  %v2773_v17 = vld [vmem:[#allocation2 + $0x70] sm:$0xf]  ;;  %8093 = vmatprep.subr.bf16.mxu1 %v8692_v21  ;;  %v1919_v57 = vpop.permute.xlu0 %1918 }
 0x2ec   : > { %v2000_v37 = vadd.f32 %v1968_v36, %v12514_v44  ;;  %6248 = vmatmul.mubr.bf16.gmra.mrb[40].mxu1 %v8658_v62  ;;  %v3010_v10 = vrot.slane %v3008_v4, 5  ;;  %v3013_v22 = vshrl.u32 %v2772_v16, 16  ;;  %v1970_v61 = vmul.f32 %v1909_v23, %v10190_v56  ;;  %v2566_v47 = vld [vmem:[#allocation2 + $0x90] sm:$0xf]  ;;  %v2774_v62 = vld [vmem:[#allocation2 + $0x74] sm:$0x1]  ;;  %8200 = vmatpush3.bf16.msra.mxu0 %v8696_v19 }
 0x2ed   : > { %6255 = vmatprep.mubr.bf16.mxu1 %v7495_v2  ;;  %v2996_v33 = vrot.slane %v2995_v11, 4  ;;  %v7512_v41 = vrot.slane %v3284_v35, 9  ;;  %v3006_v25 = vrot.slane %v3005_v48, 4  ;;  %v3420_v59 = vrot.slane %v3286_v60, 5  ;;  %8094 = vmatpush3.bf16.msra.mxu1 %v8693_v29  ;;  %v8661_v20 = vld [vmem:[#allocation2 + $0x6c] sm:$0xff]  }
 0x2ee   : > { %v7798_v6 = vpack.c.bf16 %v2000_v37, %v2000_v37  ;;  %v3015_v43 = vrot.slane %v3013_v22, 4  ;;  %v3016_v0 = vshll.u32 %v2772_v16, 16  ;;  %v9014_v56 = vpop.eup %9013  ;;  %v12515_v52 = vunpack.c.l.bf16 %v10157_v30  ;;  %8095 = vmatprep.subr.bf16.mxu1 %v8697_v45  ;;  %v10590_v44 = vld [vmem:[#allocation2 + $0x70] sm:$0xf] }
 0x2ef   : > { %v10568_v12 = vsel %vm9959_vm6, %v7512_v41, %v3417_v9  ;;  %v3419_v18 = vrot.slane %v3417_v9, 4  ;;  %v1624_v39 = vadd.f32 1.0, %v9014_v56  ;;  %v3001_v40 = vsel %vm9863_vm3, %v2996_v33, %v10536_v58  ;;  %v8698_v58 = vld [vmem:[%s12450_s7 + $0x138] sm:$0xff]  }
 0x2f0   : > { %v2351_v24 = vshrl.u32 %v7798_v6, 16  ;;  %v2002_v8 = vadd.f32 %v1970_v61, %v12515_v52  ;;  %v3011_v1 = vsel %vm9863_vm3, %v3006_v25, %v3010_v10  ;;  %v3018_v4 = vrot.slane %v3016_v0, 5  ;;  %v2573_v61 = vld [vmem:[#allocation2 + $0x9c] sm:$0xf]  ;;  %v2775_v25 = vld [vmem:[#allocation2 + $0x78] sm:$0xf] }
 0x2f1   : > { %v2354_v36 = vshll.u32 %v7798_v6, 16  ;;  %v1972_v16 = vmul.f32 %v1919_v57, %v10204_v50  ;;  %9015 = vrcp.f32 %v1624_v39  ;;  %v3022_v54 = vshll.u32 %v2773_v17, 16  ;;  %v3289_v6 = vld [vmem:[#allocation2 + $0x74] sm:$0x1]  ;;  %8096 = vmatpush3.bf16.msra.mxu1 %v8698_v58 }
 0x2f2   : > { %v10581_v5 = vrot.slane %v2351_v24, 7  ;;  %v7800_v32 = vpack.c.bf16 %v2002_v8, %v2002_v8  ;;  %6417 = vmatmul.mubr.bf16.gmra.mrb[60].mxu0 %v7527_v28  ;;  %v3019_v27 = vor.u32 %v3018_v4, %v3015_v43  ;;  %v3026_v11 = vshrl.u32 %v2773_v17, 16  ;;  %v3287_v28 = vld [vmem:[#allocation2 + $0x6c] sm:$0xe]  ;;  %v8663_v17 = vld [vmem:[#allocation2 + $0x78] sm:$0xff]  }
 0x2f3   : > { %6424 = vmatprep.mubr.bf16.mxu0 %v8661_v20  ;;  %v7496_v2 = vcombine.low %v3001_v40, %v3011_v1  ;;  %v3421_v50 = vsel %vm9959_vm6, %v3419_v18, %v3420_v59  ;;  %v12516_v49 = vunpack.c.l.bf16 %v10178_v31  ;;  %v3024_v9 = vrot.slane %v3022_v54, 5  ;;  %v8662_v1 = vld [vmem:[#allocation2 + $0x60] sm:$0xff]  }
 0x2f4   : > { %v2356_v38 = vor.u32 %v2354_v36, %v10581_v5  ;;  %v2368_v35 = vshrl.u32 %v7800_v32, 16  ;;  %v2371_v37 = vshll.u32 %v7800_v32, 16  ;;  %6256 = vmatmul.mubr.bf16.gmra.mrb[44].mxu1 %v8660_v53  ;;  %v3028_v23 = vrot.slane %v3026_v11, 4  ;;  %v2777_v4 = vld [vmem:[#allocation2 + $0x80] sm:$0x1] }
 0x2f5   : > { %v2004_v60 = vadd.f32 %v1972_v16, %v12516_v49  ;;  %6263 = vmatprep.mubr.bf16.mxu1 %v7496_v2  ;;  %v3020_v22 = vrot.slane %v3019_v27, 4  ;;  %v3032_v63 = vshll.u32 %v2774_v62, 16  ;;  %v7528_v41 = vcombine.low %v10568_v12, %v3421_v50  ;;  %v2580_v12 = vld [vmem:[#allocation2 + $0xa8] sm:$0xf]  ;;  %v10611_v53 = vld [vmem:[#allocation2 + $0x7c] sm:$0xf] }
 0x2f6   : > { %v2567_v48 = vsel %vm10081_vm12, %v2356_v38, %v2566_v47  ;;  %v10596_v10 = vrot.slane %v2368_v35, 7  ;;  %v3029_v31 = vor.u32 %v3028_v23, %v3024_v9  ;;  %v3424_v21 = vrot.slane %v10590_v44, 5  ;;  %v2778_v62 = vld [vmem:[#allocation2 + $0x84] sm:$0xf]  ;;  %v3290_v38 = vld [vmem:[#allocation2 + $0x78] sm:$0xe] }
 0x2f7   : > { %2568 = vst [vmem:[#allocation2 + $0x90] sm:$0xf] %v2567_v48  ;;  %v7802_v33 = vpack.c.bf16 %v2004_v60, %v2004_v60  ;;  %v3025_v43 = vsel %vm9863_vm3, %v3020_v22, %v3024_v9  ;;  %v3034_v0 = vrot.slane %v3032_v63, 5  ;;  %v7513_v29 = vrot.slane %v3287_v28, 9  ;;  %v3292_v35 = vld [vmem:[#allocation2 + $0x80] sm:$0x1] }
 0x2f8   : > { %v2373_v59 = vor.u32 %v2371_v37, %v10596_v10  ;;  %v3030_v52 = vrot.slane %v3029_v31, 4  ;;  %v3427_v8 = vrot.slane %v3289_v6, 5  ;;  %v3426_v19 = vrot.slane %v3424_v21, 4  ;;  %v10615_v2 = vld [vmem:[%s9431_s24 + $0x68] sm:$0xff]   ;;  %v10622_v49 = vpop.f32.mrb[16].mxu1 }
 0x2f9   : > { %v2385_v56 = vshrl.u32 %v7802_v33, 16  ;;  %v2388_v24 = vshll.u32 %v7802_v33, 16  ;;  %v3037_v45 = vshrl.u32 %v2775_v25, 16  ;;  %v3040_v39 = vshll.u32 %v2775_v25, 16  ;;  %v10619_v44 = vld [vmem:[%s9377_s15 + $0x68] sm:$0xff]   ;;  %v10626_v48 = vpop.f32.mrb[17].mxu1 }
 0x2fa   : > { %v2574_v18 = vsel %vm10081_vm12, %v2373_v59, %v2573_v61  ;;  %6425 = vmatmul.mubr.bf16.gmra.mrb[64].mxu0 %v7528_v41  ;;  %v3035_v57 = vsel %vm9863_vm3, %v3030_v52, %v3034_v0  ;;  %v3046_v47 = vshll.u32 %v2776_v46, 16  ;;  %v3050_v36 = vshrl.u32 %v2776_v46, 16  ;;  %v2779_v61 = vld [vmem:[#allocation2 + $0x88] sm:$0xf]  ;;  %v10631_v41 = vpop.f32.mrb[18].mxu1  ;;  %v1458_v25 = vpop.xlane.xlu1 %1457 }
 0x2fb   : > { %2575 = vst [vmem:[#allocation2 + $0x9c] sm:$0xf] %v2574_v18  ;;  %v10605_v40 = vrot.slane %v2385_v56, 7  ;;  %6432 = vmatprep.mubr.bf16.mxu0 %v8663_v17  ;;  %v7497_v32 = vcombine.low %v3025_v43, %v3035_v57  ;;  %v3428_v20 = vsel %vm9959_vm6, %v3426_v19, %v3427_v8  ;;  %v3039_v16 = vrot.slane %v3037_v45, 4  ;;  %v9016_v27 = vpop.eup %9015  ;;  %v2780_v43 = vld [vmem:[#allocation2 + $0x8c] sm:$0x1] }
 0x2fc   : > { %v3042_v58 = vrot.slane %v3040_v39, 5  ;;  %6264 = vmatmul.mubr.bf16.gmra.mrb[48].mxu1 %v8662_v1  ;;  %v3048_v11 = vrot.slane %v3046_v47, 5  ;;  %v1717_v50 = vunpack.c.h.bf16 %v10615_v2  ;;  %v1749_v37 = vunpack.c.h.bf16 %v10619_v44  ;;  %1938 = vperm.xlu0 %8564, %v9016_v27   ;;  %v8665_v46 = vld [vmem:[#allocation2 + $0x84] sm:$0xff]   ;;  %v8664_v45 = vld [vmem:[#allocation2 + $0x6c] sm:$0xff]  }
 0x2fd   : > { %v2390_v54 = vor.u32 %v2388_v24, %v10605_v40  ;;  %6271 = vmatprep.mubr.bf16.mxu1 %v7497_v32  ;;  %v3425_v60 = vsel %vm9959_vm6, %v7513_v29, %v3424_v21  ;;  %v3052_v23 = vrot.slane %v3050_v36, 4  ;;  %v3056_v28 = vshll.u32 %v2777_v4, 16  ;;  %v10633_v29 = vpop.f32.mrb[19].mxu1  ;;  %v8700_v2 = vld [vmem:[%s12450_s7 + $0x1e0] sm:$0xff]  }
 0x2fe   : > { %v3043_v9 = vor.u32 %v3042_v58, %v3039_v16  ;;  %v7529_v63 = vcombine.low %v3425_v60, %v3428_v20  ;;  %v3431_v6 = vrot.slane %v10611_v53, 5  ;;  %v3061_v33 = vshrl.u32 %v2778_v62, 16  ;;  %v1904_v47 = vpop.permute.xlu1 %1903  ;;  %v2781_v60 = vld [vmem:[#allocation2 + $0x90] sm:$0xf]  ;;  %8201 = vmatprep.subr.bf16.mxu0 %v8700_v2 }
 0x2ff   : > { %v2581_v22 = vsel %vm10081_vm12, %v2390_v54, %v2580_v12  ;;  %v3053_v31 = vor.u32 %v3052_v23, %v3048_v11  ;;  %v7514_v21 = vrot.slane %v3290_v38, 9  ;;  %v3434_v59 = vrot.slane %v3292_v35, 5  ;;  %v10648_v38 = vld [vmem:[%s9431_s24 + $0x70] sm:$0xff]  }
 0x300   : > { %2582 = vst [vmem:[#allocation2 + $0xa8] sm:$0xf] %v2581_v22  ;;  %v3064_v0 = vshll.u32 %v2778_v62, 16  ;;  %v3044_v56 = vrot.slane %v3043_v9, 4  ;;  %v1497_v24 = vadd.f32 %v10372_v55, %v1458_v25  ;;  %v3433_v52 = vrot.slane %v3431_v6, 4 }
 0x301   : > { %v3063_v8 = vrot.slane %v3061_v33, 4  ;;  %v3054_v18 = vrot.slane %v3053_v31, 4  ;;  %v3058_v12 = vrot.slane %v3056_v28, 5  ;;  %v3070_v19 = vshll.u32 %v2779_v61, 16  ;;  %v8668_v31 = vld [vmem:[#allocation2 + $0x78] sm:$0xff]  }
 0x302   : > { %v3066_v17 = vrot.slane %v3064_v0, 5  ;;  %6433 = vmatmul.mubr.bf16.gmra.mrb[68].mxu0 %v7529_v63  ;;  %v3049_v39 = vsel %vm9863_vm3, %v3044_v56, %v3048_v11  ;;  %v7439_v1 = vmul.f32 -1.442695, %v1497_v24  ;;  %v3435_v57 = vsel %vm9959_vm6, %v3433_v52, %v3434_v59  ;;  %v1914_v22 = vpop.permute.xlu1 %1913  ;;  %v10652_v63 = vld [vmem:[%s9377_s15 + $0x70] sm:$0xff]   ;;  %v8702_v56 = vld [vmem:[%s12450_s7 + $0x200] sm:$0xff]  }
 0x303   : > { %v3074_v4 = vshrl.u32 %v2779_v61, 16  ;;  %6440 = vmatprep.mubr.bf16.mxu0 %v8665_v46  ;;  %v3059_v55 = vsel %vm9863_vm3, %v3054_v18, %v3058_v12  ;;  %v3072_v32 = vrot.slane %v3070_v19, 5  ;;  %v3080_v20 = vshll.u32 %v2780_v43, 16  ;;  %v2570_v18 = vld [vmem:[#allocation2 + $0x98] sm:$0x1]  ;;  %8425 = vmatprep.subr.bf16.mxu1 %v8702_v56 }
 0x304   : > { %v3067_v36 = vor.u32 %v3066_v17, %v3063_v8  ;;  %6272 = vmatmul.mubr.bf16.gmra.mrb[52].mxu1 %v8664_v45  ;;  %v7498_v16 = vcombine.low %v3049_v39, %v3059_v55  ;;  %9017 = vpow2.f32 %v7439_v1  ;;  %v1969_v58 = vmul.f32 %v1904_v47, %v10356_v3  ;;  %v10679_v1 = vld [vmem:[#allocation2 + $0x9c] sm:$0xf] }
 0x305   : > { %v3076_v53 = vrot.slane %v3074_v4, 4  ;;  %v12517_v62 = vunpack.c.h.bf16 %v10146_v7  ;;  %v3432_v54 = vsel %vm9959_vm6, %v7514_v21, %v3431_v6  ;;  %v1719_v35 = vunpack.c.h.bf16 %v10648_v38  ;;  %v10662_v21 = vld [vmem:[#allocation2 + $0x88] sm:$0xf] }
 0x306   : > { %6279 = vmatprep.mubr.bf16.mxu1 %v7498_v16  ;;  %v7530_v9 = vcombine.low %v3432_v54, %v3435_v57  ;;  %v3068_v23 = vrot.slane %v3067_v36, 4  ;;  %v3082_v28 = vrot.slane %v3080_v20, 5  ;;  %v1751_v3 = vunpack.c.h.bf16 %v10652_v63  ;;  %v1924_v52 = vpop.permute.xlu1 %1923 }
 0x307   : > { %v2001_v27 = vadd.f32 %v1969_v58, %v12517_v62  ;;  %v3077_v11 = vor.u32 %v3076_v53, %v3072_v32  ;;  %v1971_v33 = vmul.f32 %v1914_v22, %v10507_v14  ;;  %v1781_v6 = vsub.f32 %v1717_v50, %v1749_v37  ;;  %v8701_v50 = vld [vmem:[%s12450_s7 + $0x1a0] sm:$0xff]  }
 0x308   : > { %v3073_v25 = vsel %vm9863_vm3, %v3068_v23, %v3072_v32  ;;  %v3085_v59 = vshrl.u32 %v2781_v60, 16  ;;  %v3088_v46 = vshll.u32 %v2781_v60, 16  ;;  %v1783_v8 = vsub.f32 %v1719_v35, %v1751_v3  ;;  %8202 = vmatpush3.bf16.msra.mxu0 %v8701_v50  ;;  %v3295_v35 = vld [vmem:[#allocation2 + $0x8c] sm:$0x1]  ;;  %v3293_v60 = vld [vmem:[#allocation2 + $0x84] sm:$0xe] }
 0x309   : > { %v7799_v61 = vpack.c.bf16 %v2001_v27, %v2001_v27  ;;  %v3078_v7 = vrot.slane %v3077_v11, 4  ;;  %v2003_v14 = vadd.f32 %v1971_v33, %v1747_v42  ;;  %v1973_v17 = vmul.f32 %v1924_v52, %v1781_v6  ;;  %v2577_v27 = vld [vmem:[#allocation2 + $0xa4] sm:$0x1]  ;;  %v10688_v23 = vld [vmem:[#allocation2 + $0x90] sm:$0xe] }
 0x30a   : > { %6441 = vmatmul.mubr.bf16.gmra.mrb[72].mxu0 %v7530_v9  ;;  %v2357_v19 = vrot.slane %v10581_v5, 4  ;;  %v3438_v45 = vrot.slane %v10662_v21, 5  ;;  %v3087_v39 = vrot.slane %v3085_v59, 4  ;;  %v3090_v36 = vrot.slane %v3088_v46, 5  ;;  %v1934_v58 = vpop.permute.xlu1 %1933  ;;  %v8669_v22 = vld [vmem:[#allocation2 + $0x84] sm:$0xff]  }
 0x30b   : > { %v2359_v43 = vshrl.u32 %v7799_v61, 16  ;;  %v3083_v0 = vsel %vm9863_vm3, %v3078_v7, %v3082_v28  ;;  %v2362_v30 = vshll.u32 %v7799_v61, 16  ;;  %v7801_v42 = vpack.c.bf16 %v2003_v14, %v2003_v14  ;;  %v10704_v52 = vld [vmem:[#allocation2 + $0xa8] sm:$0xf] }
 0x30c   : > { %v7499_v24 = vcombine.low %v3073_v25, %v3083_v0  ;;  %6280 = vmatmul.mubr.bf16.gmra.mrb[56].mxu1 %v8668_v31  ;;  %v2374_v32 = vrot.slane %v10596_v10, 4  ;;  %v2005_v5 = vadd.f32 %v1973_v17, %v1749_v37  ;;  %v1975_v11 = vmul.f32 %v1934_v58, %v1783_v8  ;;  %v2584_v0 = vld [vmem:[#allocation2 + $0xb0] sm:$0x1] }
 0x30d   : > { %v2361_v12 = vrot.slane %v2359_v43, 7  ;;  %v2376_v47 = vshrl.u32 %v7801_v42, 16  ;;  %v2379_v16 = vshll.u32 %v7801_v42, 16  ;;  %v3440_v9 = vrot.slane %v3438_v45, 4 }
 0x30e   : > { %6287 = vmatprep.mubr.bf16.mxu1 %v7499_v24  ;;  %v9018_v57 = vpop.eup %9017  ;;  %v7803_v10 = vpack.c.bf16 %v2005_v5, %v2005_v5  ;;  %v3109_v44 = vshrl.u32 %v10679_v1, 16  ;;  %v2007_v61 = vadd.f32 %v1975_v11, %v1751_v3  ;;  %v3091_v7 = vor.u32 %v3090_v36, %v3087_v39 }
 0x30f   : > { %v2364_v4 = vor.u32 %v2362_v30, %v2361_v12  ;;  %v2366_v55 = vrot.slane %v2361_v12, 4  ;;  %v1625_v20 = vadd.f32 1.0, %v9018_v57  ;;  %v2378_v54 = vrot.slane %v2376_v47, 7  ;;  %v2591_v12 = vld [vmem:[#allocation2 + $0xbc] sm:$0x1] }
 0x310   : > { %v2391_v33 = vrot.slane %v10605_v40, 4  ;;  %v2393_v6 = vshrl.u32 %v7803_v10, 16  ;;  %v3441_v31 = vrot.slane %v3295_v35, 5  ;;  %v7805_v59 = vpack.c.bf16 %v2007_v61, %v2007_v61 }
 0x311   : > { %v2365_v53 = vsel %vm10112_vm13, %v2357_v19, %v2364_v4  ;;  %v2571_v62 = vsel %vm10124_vm14, %v2366_v55, %v2570_v18  ;;  %9019 = vrcp.f32 %v1625_v20  ;;  %v2381_v37 = vor.u32 %v2379_v16, %v2378_v54 }
 0x312   : > { %2569 = vst [vmem:[#allocation2 + $0x94] sm:$0xf] %v2365_v53  ;;  %2572 = vst [vmem:[#allocation2 + $0x98] sm:$0x1] %v2571_v62  ;;  %v2383_v28 = vrot.slane %v2378_v54, 4  ;;  %v7515_v43 = vrot.slane %v3293_v60, 9  ;;  %v3442_v3 = vsel %vm9959_vm6, %v3440_v9, %v3441_v31  ;;  %v10710_v4 = vadd.f32 %v10626_v48, %v10622_v49 }
 0x313   : > { %v2382_v25 = vsel %vm10112_vm13, %v2374_v32, %v2381_v37  ;;  %v2395_v14 = vrot.slane %v2393_v6, 7  ;;  %v2396_v46 = vshll.u32 %v7803_v10, 16  ;;  %v7516_v40 = vrot.slane %v10688_v23, 9 }
 0x314   : > { %v2578_v21 = vsel %vm10124_vm14, %v2383_v28, %v2577_v27  ;;  %6288 = vmatmul.mubr.bf16.gmra.mrb[60].mxu1 %v8669_v22  ;;  %2576 = vst [vmem:[#allocation2 + $0xa0] sm:$0xf] %v2382_v25  ;;  %v2410_v2 = vshrl.u32 %v7805_v59, 16  ;;  %v10699_v50 = vrot.slane %v3091_v7, 4  ;;  %v10701_v56 = vrot.slane %v3109_v44, 4 }
 0x315   : > { %2579 = vst [vmem:[#allocation2 + $0xa4] sm:$0x1] %v2578_v21  ;;  %v3112_v24 = vshll.u32 %v10679_v1, 16  ;;  %v2398_v8 = vor.u32 %v2396_v46, %v2395_v14  ;;  %v2400_v18 = vrot.slane %v2395_v14, 4  ;;  %v2413_v30 = vshll.u32 %v7805_v59, 16  ;;  %v8704_v59 = vld [vmem:[%s12450_s7 + $0x1a8] sm:$0xff]  }
 0x316   : > { %v3439_v42 = vsel %vm9959_vm6, %v7515_v43, %v3438_v45  ;;  %v2412_v17 = vrot.slane %v2410_v2, 7  ;;  %v10714_v1 = vadd.f32 %v10633_v29, %v10631_v41  ;;  %v3133_v41 = vshrl.u32 %v10704_v52, 16 }
 0x317   : > { %v7531_v39 = vcombine.low %v3439_v42, %v3442_v3  ;;  %v2399_v55 = vsel %vm10112_vm13, %v2391_v33, %v2398_v8  ;;  %v2585_v47 = vsel %vm10124_vm14, %v2400_v18, %v2584_v0  ;;  %v3114_v27 = vrot.slane %v3112_v24, 5  ;;  %v8703_v33 = vld [vmem:[%s12450_s7 + $0x1e8] sm:$0xff]  }
 0x318   : > { %2583 = vst [vmem:[#allocation2 + $0xac] sm:$0xf] %v2399_v55  ;;  %2586 = vst [vmem:[#allocation2 + $0xb0] sm:$0x1] %v2585_v47  ;;  %v10720_v16 = vor.u32 %v2413_v30, %v2412_v17  ;;  %v2417_v49 = vrot.slane %v2412_v17, 4  ;;  %v3136_v60 = vshll.u32 %v10704_v52, 16  ;;  %8203 = vmatprep.subr.bf16.mxu0 %v8703_v33 }
 0x319   : > { %v8672_v19 = vld [vmem:[#allocation2 + $0x90] sm:$0xff]   ;;  %v2783_v36 = vld [vmem:[#allocation2 + $0x98] sm:$0x1]  ;;  %v3135_v7 = vrot.slane %v3133_v41, 4  ;;  %v3115_v25 = vor.u32 %v3114_v27, %v10701_v56  ;;  %8204 = vmatpush3.bf16.msra.mxu0 %v8704_v59  ;;  %v4207_v33 = vld [vmem:[#allocation2 + $0xc] sm:$0xe]  ;;  %v1750_v59 = vunpack.c.l.bf16 %v10652_v63 }
 0x31a   : > { %v2782_v57 = vld [vmem:[#allocation2 + $0x94] sm:$0xf]  ;;  %6448 = vmatprep.mubr.bf16.mxu0 %v8672_v19  ;;  %v3298_v48 = vld [vmem:[#allocation2 + $0x98] sm:$0x1]  ;;  %v3104_v62 = vshll.u32 %v2783_v36, 16  ;;  %v2592_v54 = vsel %vm10124_vm14, %v2417_v49, %v2591_v12  ;;  %v3138_v18 = vrot.slane %v3136_v60, 5 }
 0x31b   : > { %v3094_v45 = vshll.u32 %v2782_v57, 16  ;;  %v3098_v32 = vshrl.u32 %v2782_v57, 16  ;;  %v3297_v20 = vld [vmem:[#allocation2 + $0x94] sm:$0xf]  ;;  %v9020_v29 = vpop.eup %9019  ;;  %6449 = vmatmul.mubr.bf16.gmra.mrb[76].mxu0 %v7531_v39  ;;  %v8673_v11 = vld [vmem:[#allocation2 + $0x9c] sm:$0xff]   ;;  %v3448_v10 = vrot.slane %v3298_v48, 5 }
 0x31c   : > { %v3445_v5 = vrot.slane %v3297_v20, 5  ;;  %1943 = vperm.xlu1 %8563, %v9020_v29   ;;  %2593 = vst [vmem:[#allocation2 + $0xbc] sm:$0x1] %v2592_v54  ;;  %v2785_v23 = vld [vmem:[#allocation2 + $0xa0] sm:$0xf]  ;;  %6456 = vmatprep.mubr.bf16.mxu0 %v8673_v11  ;;  %v3106_v31 = vrot.slane %v3104_v62, 5 }
 0x31d   : > { %v3096_v58 = vrot.slane %v3094_v45, 5  ;;  %v3100_v53 = vrot.slane %v3098_v32, 4  ;;  %v2786_v44 = vld [vmem:[#allocation2 + $0xa4] sm:$0x1]  ;;  %v3300_v37 = vld [vmem:[#allocation2 + $0xa0] sm:$0xf]  ;;  %v3139_v32 = vor.u32 %v3138_v18, %v3135_v7 }
 0x31e   : > { %v3447_v35 = vrot.slane %v3445_v5, 4  ;;  %v3118_v22 = vshll.u32 %v2785_v23, 16  ;;  %v3122_v61 = vshrl.u32 %v2785_v23, 16  ;;  %v3452_v21 = vrot.slane %v3300_v37, 5  ;;  %v3301_v3 = vld [vmem:[#allocation2 + $0xa4] sm:$0x1] }
 0x31f   : > { %v3101_v9 = vor.u32 %v3100_v53, %v3096_v58  ;;  %v3446_v43 = vsel %vm9959_vm6, %v7516_v40, %v3445_v5  ;;  %v3128_v46 = vshll.u32 %v2786_v44, 16  ;;  %v3097_v2 = vsel %vm9863_vm3, %v10699_v50, %v3096_v58  ;;  %v8677_v52 = vld [vmem:[#allocation2 + $0xa8] sm:$0xff]   ;;  %v2789_v42 = vld [vmem:[#allocation2 + $0xb0] sm:$0x1]  ;;  %v3299_v57 = vld [vmem:[#allocation2 + $0x9c] sm:$0xe] }
 0x320   : > { %v3449_v28 = vsel %vm9959_vm6, %v3447_v35, %v3448_v10  ;;  %v3120_v0 = vrot.slane %v3118_v22, 5  ;;  %v3124_v14 = vrot.slane %v3122_v61, 4  ;;  %v2788_v8 = vld [vmem:[#allocation2 + $0xac] sm:$0xf]  ;;  %v3454_v40 = vrot.slane %v3452_v21, 4  ;;  %v8676_v19 = vld [vmem:[#allocation2 + $0x90] sm:$0xff]  }
 0x321   : > { %v3102_v6 = vrot.slane %v3101_v9, 4  ;;  %v7532_v24 = vcombine.low %v3446_v43, %v3449_v28  ;;  %v3142_v17 = vshll.u32 %v2788_v8, 16  ;;  %v3116_v39 = vrot.slane %v3115_v25, 4  ;;  %v8706_v10 = vld [vmem:[%s12450_s7 + $0x1f0] sm:$0xff]   ;;  %v8678_v9 = vld [vmem:[#allocation2 + $0x9c] sm:$0xff]   ;;  %v8681_v61 = vld [vmem:[#allocation2 + $0xa8] sm:$0xff]  }
 0x322   : > { %v3125_v30 = vor.u32 %v3124_v14, %v3120_v0  ;;  %v3146_v55 = vshrl.u32 %v2788_v8, 16  ;;  %v3130_v47 = vrot.slane %v3128_v46, 5  ;;  %v3455_v36 = vrot.slane %v3301_v3, 5  ;;  %v8707_v60 = vld [vmem:[%s12450_s7 + $0x1b0] sm:$0xff]   ;;  %8205 = vmatprep.subr.bf16.mxu0 %v8706_v10  ;;  %v8709_v28 = vld [vmem:[%s12450_s7 + $0x1f8] sm:$0xff]  }
 0x323   : > { %v3107_v56 = vsel %vm9863_vm3, %v3102_v6, %v3106_v31  ;;  %6457 = vmatmul.mubr.bf16.gmra.mrb[80].mxu0 %v7532_v24  ;;  %v3144_v45 = vrot.slane %v3142_v17, 5  ;;  %v3152_v49 = vshll.u32 %v2789_v42, 16  ;;  %v3121_v48 = vsel %vm9863_vm3, %v3116_v39, %v3120_v0  ;;  %v8710_v22 = vld [vmem:[%s12450_s7 + $0x1b8] sm:$0xff]   ;;  %v4208_v7 = vld [vmem:[#allocation2 + $0x10] sm:$0xf] }
 0x324   : > { %v7500_v12 = vcombine.low %v3097_v2, %v3107_v56  ;;  %6464 = vmatprep.mubr.bf16.mxu0 %v8677_v52  ;;  %v3126_v50 = vrot.slane %v3125_v30, 4  ;;  %v3148_v20 = vrot.slane %v3146_v55, 4  ;;  %v7517_v41 = vrot.slane %v3299_v57, 9  ;;  %8206 = vmatpush3.bf16.msra.mxu0 %v8707_v60  ;;  %v3302_v31 = vld [vmem:[#allocation2 + $0xa8] sm:$0xe]  ;;  %v10776_v42 = vld [vmem:[%s9431_s24 + $0x78] sm:$0xff]   ;;  %s12392_s24 = scalar_lea.hbm %s12452_s9, %s7808_s22 }
 0x325   : > { %v3456_v29 = vsel %vm9959_vm6, %v3454_v40, %v3455_v36  ;;  %v3140_v54 = vrot.slane %v3139_v32, 4  ;;  %v3154_v35 = vrot.slane %v3152_v49, 5  ;;  %8207 = vmatprep.subr.bf16.mxu0 %v8709_v28  ;;  %v4305_v6 = vrot.slane %v4208_v7, 5  ;;  %v3303_v25 = vld [vmem:[#allocation2 + $0xac] sm:$0xf] }
 0x326   : > { %6295 = vmatprep.mubr.bf16.mxu1 %v7500_v12  ;;  %v3131_v5 = vsel %vm9863_vm3, %v3126_v50, %v3130_v47  ;;  %v3149_v53 = vor.u32 %v3148_v20, %v3144_v45  ;;  %v3453_v62 = vsel %vm9959_vm6, %v7517_v41, %v3452_v21  ;;  %v1718_v21 = vunpack.c.l.bf16 %v10648_v38  ;;  %v3695_v43 = vld [vmem:[#allocation2 + $0xc] sm:$0xf]  ;;  %v3696_v0 = vld [vmem:[#allocation2 + $0x10] sm:$0xf]  ;;  %v3698_v14 = vld [vmem:[#allocation2 + $0x18] sm:$0xf] }
 0x327   : > { %6296 = vmatmul.mubr.bf16.gmra.mrb[64].mxu1 %v8676_v19  ;;  %v7501_v58 = vcombine.low %v3121_v48, %v3131_v5  ;;  %v7533_v27 = vcombine.low %v3453_v62, %v3456_v29  ;;  %v3145_v23 = vsel %vm9863_vm3, %v3140_v54, %v3144_v45  ;;  %v3699_v46 = vld [vmem:[#allocation2 + $0x1c] sm:$0xf]  ;;  %v7518_v3 = vrot.slane %v3302_v31, 9  ;;  %v7664_v52 = vld [vmem:[%s12451_s8] ss:$0 sm:$0xff] }
 0x328   : > { %v3150_v11 = vrot.slane %v3149_v53, 4  ;;  %8208 = vmatpush3.bf16.msra.mxu0 %v8710_v22  ;;  %v3459_v2 = vrot.slane %v3303_v25, 5  ;;  %v7568_v56 = vrot.slane %v4207_v33, 9  ;;  %v4307_v24 = vrot.slane %v4305_v6, 4  ;;  %v3304_v8 = vld [vmem:[#allocation2 + $0xb0] sm:$0x1] }
 0x329   : > { %6303 = vmatprep.mubr.bf16.mxu1 %v7501_v58  ;;  %v2792_v18 = vld [vmem:[#allocation2 + $0xbc] sm:$0x1]  ;;  %v4209_v12 = vld [vmem:[#allocation2 + $0x14] sm:$0x1]  ;;  %v3753_v30 = vshll.u32 %v3696_v0, 16  ;;  %v3757_v38 = vshrl.u32 %v3696_v0, 16  ;;  %v10773_v40 = vsub.f32 %v1718_v21, %v1750_v59  ;;  %v1720_v17 = vunpack.c.l.bf16 %v10776_v42 }
 0x32a   : > { %v3155_v44 = vsel %vm9863_vm3, %v3150_v11, %v3154_v35  ;;  %v3777_v19 = vshll.u32 %v3699_v46, 16  ;;  %v3781_v39 = vshrl.u32 %v3699_v46, 16  ;;  %v10781_v57 = vsel %vm9959_vm6, %v7568_v56, %v4305_v6  ;;  %v4211_v32 = vld [vmem:[#allocation2 + $0x1c] sm:$0xf]  ;;  %v3697_v29 = vld [vmem:[#allocation2 + $0x14] sm:$0x1] }
 0x32b   : > { %6465 = vmatmul.mubr.bf16.gmra.mrb[84].mxu0 %v7533_v27  ;;  %v7502_v37 = vcombine.low %v3145_v23, %v3155_v44  ;;  %v10784_v55 = vadd.f32 %v10710_v4, %v7664_v52  ;;  %v3744_v50 = vshrl.u32 %v3695_v43, 16  ;;  %v3747_v47 = vshll.u32 %v3695_v43, 16  ;;  %v10790_v5 = vld [vmem:[%s9377_s15 + $0x78] sm:$0xff]   ;;  %v10797_v11 = vld [vmem:[#allocation2 + $0x28] sm:$0xf] }
 0x32c   : > { %v3461_v36 = vrot.slane %v3459_v2, 4  ;;  %v10787_v45 = vadd.f32 %v10714_v1, %v7664_v52  ;;  %v3768_v20 = vshrl.u32 %v3698_v14, 16  ;;  %v3771_v49 = vshll.u32 %v3698_v14, 16  ;;  %v3700_v6 = vld [vmem:[#allocation2 + $0x20] sm:$0x1] }
 0x32d   : > { %12518 = vst [vmem:[#allocation9_spill] sm:$0xff] %v10784_v55  ;;  %v3176_v48 = vshll.u32 %v2792_v18, 16  ;;  %v12471_v41 = vunpack.c.l.bf16 %v10790_v5  ;;  %v10793_v58 = vrot.slane %v3753_v30, 5  ;;  %v3759_v53 = vrot.slane %v3757_v38, 4  ;;  %v3701_v25 = vld [vmem:[#allocation2 + $0x24] sm:$0xf] }
 0x32e   : > { %12519 = vst [vmem:[#allocation10_spill] sm:$0xff] %v10787_v45  ;;  %v3462_v4 = vrot.slane %v3304_v8, 5  ;;  %v4308_v62 = vrot.slane %v4209_v12, 5  ;;  %v10795_v27 = vrot.slane %v3777_v19, 5  ;;  %v3783_v54 = vrot.slane %v3781_v39, 4 }
 0x32f   : > { %6304 = vmatmul.mubr.bf16.gmra.mrb[68].mxu1 %v8678_v9  ;;  %v10801_v1 = vsel %vm9959_vm6, %v7518_v3, %v3459_v2  ;;  %v3746_v35 = vrot.slane %v3744_v50, 4  ;;  %v3749_v10 = vrot.slane %v3747_v47, 5  ;;  %v4312_v60 = vrot.slane %v4211_v32, 5  ;;  %v3702_v9 = vld [vmem:[#allocation2 + $0x28] sm:$0xf] }
 0x330   : > { %6311 = vmatprep.mubr.bf16.mxu1 %v7502_v37  ;;  %v10805_v23 = vsel %vm9959_vm6, %v3461_v36, %v3462_v4  ;;  %v10809_v44 = vsel %vm9959_vm6, %v4307_v24, %v4308_v62  ;;  %v4210_v37 = vld [vmem:[#allocation2 + $0x18] sm:$0xe]  ;;  %v3770_v28 = vrot.slane %v3768_v20, 4  ;;  %v3773_v22 = vrot.slane %v3771_v49, 5  ;;  %v4212_v43 = vld [vmem:[#allocation2 + $0x20] sm:$0x1] }
 0x331   : > { %v10815_v7 = vsub.f32 %v1720_v17, %v12471_v41  ;;  %v3760_v33 = vor.u32 %v3759_v53, %v10793_v58  ;;  %v4319_v31 = vrot.slane %v10797_v11, 5  ;;  %v3763_v21 = vshll.u32 %v3697_v29, 16  ;;  %v4215_v18 = vld [vmem:[#allocation2 + $0x2c] sm:$0x1]  ;;  %v4213_v39 = vld [vmem:[#allocation2 + $0x24] sm:$0xe] }
 0x332   : > { %v3784_v0 = vor.u32 %v3783_v54, %v10795_v27  ;;  %v3801_v14 = vshll.u32 %v3702_v9, 16  ;;  %v3805_v46 = vshrl.u32 %v3702_v9, 16  ;;  %v7534_v3 = vcombine.low %v10801_v1, %v10805_v23  ;;  %v3703_v32 = vld [vmem:[#allocation2 + $0x2c] sm:$0x1]  ;;  %v4217_v62 = vld [vmem:[#allocation2 + $0x34] sm:$0xf] }
 0x333   : > { %v3750_v56 = vor.u32 %v3749_v10, %v3746_v35  ;;  %v4314_v24 = vrot.slane %v4312_v60, 4  ;;  %v3774_v52 = vor.u32 %v3773_v22, %v3770_v28  ;;  %v3787_v8 = vshll.u32 %v3700_v6, 16  ;;  %v3704_v54 = vld [vmem:[#allocation2 + $0x30] sm:$0xf] }
 0x334   : > { %v3792_v12 = vshrl.u32 %v3701_v25, 16  ;;  %v3795_v30 = vshll.u32 %v3701_v25, 16  ;;  %v3761_v38 = vrot.slane %v3760_v33, 4  ;;  %v7569_v17 = vrot.slane %v4210_v37, 9  ;;  %v3705_v37 = vld [vmem:[#allocation2 + $0x34] sm:$0xf] }
 0x335   : > { %v4315_v19 = vrot.slane %v4212_v43, 5  ;;  %v4321_v50 = vrot.slane %v4319_v31, 4  ;;  %v3765_v47 = vrot.slane %v3763_v21, 5  ;;  %v3785_v36 = vrot.slane %v3784_v0, 4 }
 0x336   : > { %v10824_v20 = vrot.slane %v3801_v14, 5  ;;  %v3807_v49 = vrot.slane %v3805_v46, 4  ;;  %v10828_v29 = vsel %vm9959_vm6, %v7569_v17, %v4312_v60  ;;  %v4322_v4 = vrot.slane %v4215_v18, 5  ;;  %v4216_v14 = vld [vmem:[#allocation2 + $0x30] sm:$0xe] }
 0x337   : > { %6312 = vmatmul.mubr.bf16.gmra.mrb[72].mxu1 %v8681_v61  ;;  %v10811_v61 = vrot.slane %v3176_v48, 5  ;;  %v3751_v48 = vrot.slane %v3750_v56, 4  ;;  %v10832_v53 = vsel %vm9959_vm6, %v4314_v24, %v4315_v19  ;;  %v3775_v11 = vrot.slane %v3774_v52, 4  ;;  %v4218_v19 = vld [vmem:[#allocation2 + $0x38] sm:$0x1] }
 0x338   : > { %v3789_v35 = vrot.slane %v3787_v8, 5  ;;  %v3794_v10 = vrot.slane %v3792_v12, 4  ;;  %v3797_v9 = vrot.slane %v3795_v30, 5  ;;  %v3766_v28 = vsel %vm9863_vm3, %v3761_v38, %v3765_v47 }
 0x339   : > { %v7570_v22 = vrot.slane %v4213_v39, 9  ;;  %v10838_v60 = vsel %vm9959_vm6, %v4321_v50, %v4322_v4  ;;  %v3811_v33 = vshll.u32 %v3703_v32, 16  ;;  %v3808_v25 = vor.u32 %v3807_v49, %v10824_v20  ;;  %v3707_v39 = vld [vmem:[#allocation2 + $0x3c] sm:$0xf]  ;;  %v3708_v49 = vld [vmem:[#allocation2 + $0x40] sm:$0xf] }
 0x33a   : > { %v3790_v6 = vsel %vm9863_vm3, %v3785_v36, %v3789_v35  ;;  %v4326_v21 = vrot.slane %v4217_v62, 5  ;;  %v3816_v43 = vshrl.u32 %v3704_v54, 16  ;;  %v3756_v0 = vsel %vm9863_vm3, %v3751_v48, %v10793_v58  ;;  %v3706_v48 = vld [vmem:[#allocation2 + $0x38] sm:$0x1] }
 0x33b   : > { %v3819_v46 = vshll.u32 %v3704_v54, 16  ;;  %v3825_v56 = vshll.u32 %v3705_v37, 16  ;;  %v3829_v24 = vshrl.u32 %v3705_v37, 16  ;;  %v3780_v8 = vsel %vm9863_vm3, %v3775_v11, %v10795_v27 }
 0x33c   : > { %v10853_v18 = vsel %vm9959_vm6, %v7570_v22, %v4319_v31  ;;  %v3798_v12 = vor.u32 %v3797_v9, %v3794_v10  ;;  %v10855_v30 = vcombine.low %v3756_v0, %v3766_v28  ;;  %v10857_v38 = vcombine.low %v3780_v8, %v3790_v6  ;;  %v4219_v10 = vld [vmem:[#allocation2 + $0x3c] sm:$0xe] }
 0x33d   : > { %v3813_v17 = vrot.slane %v3811_v33, 5  ;;  %v3809_v47 = vrot.slane %v3808_v25, 4  ;;  %v7571_v36 = vrot.slane %v4216_v14, 9  ;;  %v4328_v32 = vrot.slane %v4326_v21, 4  ;;  %v4220_v33 = vld [vmem:[#allocation2 + $0x40] sm:$0xf] }
 0x33e   : > { %v3818_v27 = vrot.slane %v3816_v43, 4  ;;  %v3821_v4 = vrot.slane %v3819_v46, 5  ;;  %v10862_v62 = vrot.slane %v3825_v56, 5  ;;  %v3831_v54 = vrot.slane %v3829_v24, 4  ;;  %v3710_v25 = vld [vmem:[#allocation2 + $0x48] sm:$0xf] }
 0x33f   : > { %v3799_v11 = vrot.slane %v3798_v12, 4  ;;  %v4329_v35 = vrot.slane %v4218_v19, 5  ;;  %v3840_v9 = vshrl.u32 %v3707_v39, 16  ;;  %v3843_v37 = vshll.u32 %v3707_v39, 16  ;;  %v4221_v56 = vld [vmem:[#allocation2 + $0x44] sm:$0x1] }
 0x340   : > { %v10868_v22 = vsel %vm9959_vm6, %v7571_v36, %v4326_v21  ;;  %v3849_v6 = vshll.u32 %v3708_v49, 16  ;;  %v3814_v0 = vsel %vm9863_vm3, %v3809_v47, %v3813_v17  ;;  %v3835_v63 = vshll.u32 %v3706_v48, 16  ;;  %v10882_v17 = vld [vmem:[#allocation2 + $0x4c] sm:$0xf] }
 0x341   : > { %v3804_v43 = vsel %vm9863_vm3, %v3799_v11, %v10824_v20  ;;  %v10877_v14 = vsel %vm9959_vm6, %v4328_v32, %v4329_v35  ;;  %v3822_v46 = vor.u32 %v3821_v4, %v3818_v27  ;;  %v3832_v21 = vor.u32 %v3831_v54, %v10862_v62  ;;  %v2587_v32 = vld [vmem:[#allocation2 + $0xb4] sm:$0xf]  ;;  %v4227_v27 = vld [vmem:[#allocation2 + $0x5c] sm:$0x1] }
 0x342   : > { %v7572_v24 = vrot.slane %v4219_v10, 9  ;;  %v4333_v8 = vrot.slane %v4220_v33, 5  ;;  %v3842_v12 = vrot.slane %v3840_v9, 4  ;;  %v3845_v19 = vrot.slane %v3843_v37, 5  ;;  %v3709_v10 = vld [vmem:[#allocation2 + $0x44] sm:$0x1] }
 0x343   : > { %v3864_v39 = vshrl.u32 %v3710_v25, 16  ;;  %v10880_v20 = vrot.slane %v3849_v6, 5  ;;  %v3867_v47 = vshll.u32 %v3710_v25, 16  ;;  %v4336_v48 = vrot.slane %v4221_v56, 5  ;;  %v3711_v33 = vld [vmem:[#allocation2 + $0x4c] sm:$0xf] }
 0x344   : > { %v3823_v11 = vrot.slane %v3822_v46, 4  ;;  %v3833_v35 = vrot.slane %v3832_v21, 4  ;;  %v4335_v9 = vrot.slane %v4333_v8, 4  ;;  %v3846_v37 = vor.u32 %v3845_v19, %v3842_v12  ;;  %v4222_v56 = vld [vmem:[#allocation2 + $0x48] sm:$0xe] }
 0x345   : > { %v3866_v6 = vrot.slane %v3864_v39, 4  ;;  %v1721_v46 = vunpack.c.h.bf16 %v10776_v42  ;;  %v12470_v21 = vunpack.c.h.bf16 %v10790_v5  ;;  %v4224_v12 = vld [vmem:[#allocation2 + $0x50] sm:$0x1] }
 0x346   : > { %v3712_v19 = vld [vmem:[#allocation2 + $0x50] sm:$0x1] }
 0x353   : > { %v1929_v50 = vpop.permute.xlu0 %1928 }
 0x354   : > { %v1974_v31 = vmul.f32 %v1929_v50, %v10773_v40  ;;  %v3853_v40 = vshrl.u32 %v3708_v49, 16  ;;  %v10884_v49 = vcombine.low %v3804_v43, %v3814_v0  ;;  %v3869_v0 = vrot.slane %v3867_v47, 5 }
 0x356   : > { %v2006_v28 = vadd.f32 %v1974_v31, %v1750_v59  ;;  %v3855_v36 = vrot.slane %v3853_v40, 4  ;;  %v10888_v31 = vrot.slane %v3835_v63, 5  ;;  %v3828_v63 = vsel %vm9863_vm3, %v3823_v11, %v10862_v62 }
 0x357   : > { %v3873_v62 = vshll.u32 %v3711_v33, 16  ;;  %v3870_v11 = vor.u32 %v3869_v0, %v3866_v6 }
 0x358   : > { %v7804_v59 = vpack.c.bf16 %v2006_v28, %v2006_v28  ;;  %v4340_v28 = vrot.slane %v10882_v17, 5  ;;  %v3856_v43 = vor.u32 %v3855_v36, %v10880_v20  ;;  %v3859_v36 = vshll.u32 %v3709_v10, 16  ;;  %v10906_v17 = vld [vmem:[#allocation2 + $0x58] sm:$0xf] }
 0x359   : > { %v3838_v42 = vsel %vm9863_vm3, %v3833_v35, %v10888_v31  ;;  %v3883_v10 = vshll.u32 %v3712_v19, 16  ;;  %v7573_v31 = vrot.slane %v4222_v56, 9  ;;  %v10916_v35 = vrot.slane %v3873_v62, 5  ;;  %v10931_v19 = vld [vmem:[#allocation2 + $0x64] sm:$0xf] }
 0x35a   : > { %v2402_v50 = vshrl.u32 %v7804_v59, 16  ;;  %v2405_v54 = vshll.u32 %v7804_v59, 16  ;;  %v10897_v59 = vsel %vm9959_vm6, %v7572_v24, %v4333_v8  ;;  %v3714_v24 = vld [vmem:[#allocation2 + $0x58] sm:$0xf]  ;;  %v3847_v8 = vrot.slane %v3846_v37, 4 }
 0x35b   : > { %v4342_v47 = vrot.slane %v4340_v28, 4  ;;  %v3901_v58 = vshrl.u32 %v3714_v24, 16  ;;  %v3861_v52 = vrot.slane %v3859_v36, 5  ;;  %v10927_v0 = vrot.slane %v3870_v11, 4 }
 0x35c   : > { %v2404_v4 = vrot.slane %v2402_v50, 7  ;;  %v4350_v56 = vrot.slane %v4227_v27, 5 }
 0x35e   : > { %v2407_v40 = vor.u32 %v2405_v54, %v2404_v4  ;;  %v2408_v25 = vrot.slane %v2404_v4, 4  ;;  %v3877_v4 = vshrl.u32 %v3711_v33, 16  ;;  %v3713_v54 = vld [vmem:[#allocation2 + $0x54] sm:$0xf] }
 0x35f   : > { %v3888_v37 = vshrl.u32 %v3713_v54, 16  ;;  %v3891_v62 = vshll.u32 %v3713_v54, 16 }
 0x360   : > { %v2416_v39 = vsel %vm10112_vm13, %v2408_v25, %v10720_v16  ;;  %v2588_v50 = vsel %vm10081_vm12, %v2407_v40, %v2587_v32  ;;  %v10913_v16 = vsel %vm9959_vm6, %v4335_v9, %v4336_v48  ;;  %v3857_v32 = vrot.slane %v3856_v43, 4  ;;  %v4225_v40 = vld [vmem:[#allocation2 + $0x54] sm:$0xe] }
 0x361   : > { %2589 = vst [vmem:[#allocation2 + $0xb4] sm:$0xf] %v2588_v50  ;;  %2590 = vst [vmem:[#allocation2 + $0xb8] sm:$0xf] %v2416_v39  ;;  %v4343_v25 = vrot.slane %v4224_v12, 5  ;;  %v4347_v39 = vrot.slane %v10906_v17, 5  ;;  %v3852_v48 = vsel %vm9863_vm3, %v3847_v8, %v10880_v20 }
 0x362   : > { %v3897_v50 = vshll.u32 %v3714_v24, 16  ;;  %v3879_v33 = vrot.slane %v3877_v4, 4  ;;  %v7574_v6 = vrot.slane %v4225_v40, 9  ;;  %v3862_v43 = vsel %vm9863_vm3, %v3857_v32, %v3861_v52  ;;  %v3716_v24 = vld [vmem:[#allocation2 + $0x60] sm:$0xf] }
 0x363   : > { %v10923_v9 = vsel %vm9959_vm6, %v4342_v47, %v4343_v25  ;;  %v10929_v12 = vrot.slane %v3883_v10, 5  ;;  %v4349_v36 = vrot.slane %v4347_v39, 4  ;;  %v3903_v20 = vrot.slane %v3901_v58, 4  ;;  %v3717_v32 = vld [vmem:[#allocation2 + $0x64] sm:$0xf] }
 0x364   : > { %v10933_v17 = vrot.slane %v3897_v50, 5  ;;  %v10935_v47 = vcombine.low %v3828_v63, %v3838_v42  ;;  %v10939_v4 = vsub.f32 %v1721_v46, %v12470_v21  ;;  %v10943_v52 = vsel %vm9959_vm6, %v7573_v31, %v4340_v28 }
 0x365   : > { %v3890_v27 = vrot.slane %v3888_v37, 4  ;;  %v10947_v58 = vcombine.low %v3852_v48, %v3862_v43  ;;  %v3880_v42 = vor.u32 %v3879_v33, %v10916_v35  ;;  %v3893_v50 = vrot.slane %v3891_v62, 5  ;;  %v3715_v33 = vld [vmem:[#allocation2 + $0x5c] sm:$0x1] }
 0x366   : > { %v3904_v31 = vor.u32 %v3903_v20, %v10933_v17  ;;  %v4354_v37 = vrot.slane %v10931_v19, 5  ;;  %v3912_v48 = vshrl.u32 %v3716_v24, 16  ;;  %v3921_v41 = vshll.u32 %v3717_v32, 16 }
 0x367   : > { %v3925_v1 = vshrl.u32 %v3717_v32, 16  ;;  %v3881_v20 = vrot.slane %v3880_v42, 4  ;;  %v10963_v19 = vsel %vm9959_vm6, %v4349_v36, %v4350_v56  ;;  %v3907_v2 = vshll.u32 %v3715_v33, 16  ;;  %v4228_v42 = vld [vmem:[#allocation2 + $0x60] sm:$0xe] }
 0x368   : > { %v8694_v8 = vld [vmem:[#allocation2 + $0xb4] sm:$0xff]   ;;  %v4356_v45 = vrot.slane %v4354_v37, 4  ;;  %v3905_v32 = vrot.slane %v3904_v31, 4  ;;  %v10969_v34 = vrot.slane %v3921_v41, 5 }
 0x369   : > { %v2790_v11 = vld [vmem:[#allocation2 + $0xb4] sm:$0xf]  ;;  %v2791_v10 = vld [vmem:[#allocation2 + $0xb8] sm:$0xf]  ;;  %6472 = vmatprep.mubr.bf16.mxu0 %v8694_v8  ;;  %v3927_v56 = vrot.slane %v3925_v1, 4  ;;  %v3886_v41 = vsel %vm9863_vm3, %v3881_v20, %v10929_v12  ;;  %v3909_v33 = vrot.slane %v3907_v2, 5 }
 0x36a   : > { %v3157_v46 = vshrl.u32 %v2790_v11, 16  ;;  %v3160_v40 = vshll.u32 %v2790_v11, 16  ;;  %v3166_v25 = vshll.u32 %v2791_v10, 16  ;;  %v3170_v28 = vshrl.u32 %v2791_v10, 16  ;;  %6473 = vmatmul.mubr.bf16.gmra.mrb[88].mxu0 %v7534_v3  ;;  %v10992_v12 = vld [vmem:[#allocation2 + $0x74] sm:$0x1] }
 0x36b   : > { %v10959_v11 = vsel %vm9959_vm6, %v7574_v6, %v4347_v39  ;;  %v3915_v10 = vshll.u32 %v3716_v24, 16  ;;  %v3718_v39 = vld [vmem:[#allocation2 + $0x68] sm:$0x1]  ;;  %v3928_v2 = vor.u32 %v3927_v56, %v10969_v34  ;;  %v3720_v56 = vld [vmem:[#allocation2 + $0x70] sm:$0xf] }
 0x36c   : > { %v3159_v43 = vrot.slane %v3157_v46, 4  ;;  %v3162_v21 = vrot.slane %v3160_v40, 5  ;;  %v3168_v63 = vrot.slane %v3166_v25, 5  ;;  %v3172_v54 = vrot.slane %v3170_v28, 4  ;;  %v7985_v8 = vpop.f32.mrb[32].mxu0 }
 0x36d   : > { %v7986_v62 = vpop.f32.mrb[33].mxu0  ;;  %v4230_v46 = vld [vmem:[#allocation2 + $0x68] sm:$0x1]  ;;  %v3894_v28 = vor.u32 %v3893_v50, %v3890_v27  ;;  %v3876_v50 = vsel %vm9863_vm3, %v10927_v0, %v10916_v35  ;;  %v4231_v35 = vld [vmem:[#allocation2 + $0x6c] sm:$0xe]  ;;  %v3910_v0 = vsel %vm9863_vm3, %v3905_v32, %v3909_v33 }
 0x36e   : > { %v3163_v23 = vor.u32 %v3162_v21, %v3159_v43  ;;  %v3173_v3 = vor.u32 %v3172_v54, %v3168_v63  ;;  %v10965_v40 = vadd.f32 %v7986_v62, %v7985_v8  ;;  %v7988_v25 = vpop.f32.mrb[34].mxu0  ;;  %v3914_v21 = vrot.slane %v3912_v48, 4 }
 0x36f   : > { %v7989_v55 = vpop.f32.mrb[35].mxu0  ;;  %v3917_v43 = vrot.slane %v3915_v10, 5  ;;  %v4357_v31 = vrot.slane %v4230_v46, 5  ;;  %v3931_v8 = vshll.u32 %v3718_v39, 16  ;;  %v4640_v10 = vld [vmem:[#allocation2 + $0x18] sm:$0xf] }
 0x370   : > { %12520 = vst [vmem:[#allocation11_spill] sm:$0xff] %v10965_v40  ;;  %v3164_v6 = vrot.slane %v3163_v23, 4  ;;  %v3174_v24 = vrot.slane %v3173_v3, 4  ;;  %v10967_v54 = vadd.f32 %v7989_v55, %v7988_v25  ;;  %v4232_v55 = vld [vmem:[#allocation2 + $0x70] sm:$0xf]  ;;  %v7575_v23 = vrot.slane %v4228_v42, 9 }
 0x371   : > { %v10987_v3 = vsel %vm9959_vm6, %v4356_v45, %v4357_v31  ;;  %v3918_v62 = vor.u32 %v3917_v43, %v3914_v21  ;;  %v4361_v20 = vrot.slane %v4232_v55, 5  ;;  %v4641_v46 = vld [vmem:[#allocation2 + $0x1c] sm:$0xf]  ;;  %v10994_v25 = vcombine.low %v3876_v50, %v3886_v41  ;;  %v4644_v50 = vld [vmem:[#allocation2 + $0x28] sm:$0xf] }
 0x372   : > { %12521 = vst [vmem:[#allocation12_spill] sm:$0xff] %v10967_v54  ;;  %v3169_v36 = vsel %vm9863_vm3, %v3164_v6, %v3168_v63  ;;  %v3179_v27 = vsel %vm9863_vm3, %v3174_v24, %v10811_v61  ;;  %v8699_v63 = vld [vmem:[#allocation2 + $0xb4] sm:$0xff]   ;;  %v3895_v61 = vrot.slane %v3894_v28, 4  ;;  %12522 = vst [vmem:[#allocation13_spill] sm:$0xff] %v10987_v3  ;;  %v11001_v28 = vsel %vm9959_vm6, %v7575_v23, %v4354_v37  ;;  %v3719_v6 = vld [vmem:[#allocation2 + $0x6c] sm:$0xf] }
 0x373   : > { %v7503_v48 = vcombine.low %v3169_v36, %v3179_v27  ;;  %12523 = vst [vmem:[#allocation14_spill] sm:$0xff] %v11001_v28  ;;  %v4689_v39 = vshrl.u32 %v4640_v10, 16  ;;  %v12524_v24 = vcombine.low %v10781_v57, %v10809_v44  ;;  %v11008_v21 = vrot.slane %v3931_v8, 5 }
 0x374   : > { %v3900_v45 = vsel %vm9863_vm3, %v3895_v61, %v10933_v17  ;;  %v7576_v42 = vrot.slane %v4231_v35, 9  ;;  %v4692_v43 = vshll.u32 %v4640_v10, 16  ;;  %v4698_v37 = vshll.u32 %v4641_v46, 16 }
 0x375   : > { %6319 = vmatprep.mubr.bf16.mxu1 %v7503_v48  ;;  %v11010_v36 = vcombine.low %v3900_v45, %v3910_v0  ;;  %v4702_v27 = vshrl.u32 %v4641_v46, 16  ;;  %v11013_v48 = vrot.slane %v3918_v62, 4  ;;  %v3929_v57 = vrot.slane %v3928_v2, 4  ;;  %v4642_v45 = vld [vmem:[#allocation2 + $0x20] sm:$0x1] }
 0x376   : > { %6320 = vmatmul.mubr.bf16.gmra.mrb[76].mxu1 %v8699_v63  ;;  %v11017_v44 = vsel %vm9959_vm6, %v7576_v42, %v4361_v20  ;;  %v4363_v41 = vrot.slane %v4361_v20, 4  ;;  %v4691_v63 = vrot.slane %v4689_v39, 4  ;;  %v3936_v61 = vshrl.u32 %v3719_v6, 16 }
 0x377   : > { %6521 = vmatprep.mubr.bf16.mxu1 %v12524_v24  ;;  %v3939_v23 = vshll.u32 %v3719_v6, 16  ;;  %v4694_v62 = vrot.slane %v4692_v43, 5  ;;  %v3945_v24 = vshll.u32 %v3720_v56, 16  ;;  %v3949_v2 = vshrl.u32 %v3720_v56, 16  ;;  %v3721_v56 = vld [vmem:[#allocation2 + $0x74] sm:$0x1] }
 0x378   : > { %v7879_v31 = vpop.f32.mrb[20].mxu1  ;;  %v12526_v20 = vunpack.c.l.bf16 %v10790_v5  ;;  %v11029_v39 = vrot.slane %v4698_v37, 5  ;;  %v4704_v6 = vrot.slane %v4702_v27, 4  ;;  %v3924_v43 = vsel %vm9863_vm3, %v11013_v48, %v10969_v34  ;;  %v9186_v27 = vld [vmem:[%s12450_s7 + $0x200] sm:$0xff]  }
 0x379   : > { %v7880_v8 = vpop.f32.mrb[21].mxu1  ;;  %v3941_v37 = vrot.slane %v3939_v23, 5  ;;  %v3934_v34 = vsel %vm9863_vm3, %v3929_v57, %v11008_v21  ;;  %v3955_v23 = vshll.u32 %v3721_v56, 16  ;;  %v11069_v56 = vld [vmem:[#allocation2 + $0x2c] sm:$0x1] }
 0x37a   : > { %v7991_v33 = vpop.f32.mrb[36].mxu0  ;;  %v11020_v0 = vadd.f32 %v7880_v8, %v7879_v31  ;;  %v7882_v46 = vpop.f32.mrb[22].mxu1  ;;  %v4726_v8 = vshrl.u32 %v4644_v50, 16 }
 0x37b   : > { %v1939_v55 = vpop.permute.xlu0 %1938  ;;  %v7992_v35 = vpop.f32.mrb[37].mxu0 }
 0x37c   : > { %v1976_v10 = vmul.f32 %v1939_v55, %v10815_v7  ;;  %v11022_v32 = vadd.f32 %v7992_v35, %v7991_v33  ;;  %v7994_v42 = vpop.f32.mrb[38].mxu0  ;;  %v7883_v17 = vpop.f32.mrb[23].mxu1  ;;  %v8705_v7 = vld [vmem:[%s12450_s7 + $0x208] sm:$0xff]   ;;  %v4722_v33 = vshll.u32 %v4644_v50, 16  ;;  %v11049_v50 = vrot.slane %v3945_v24, 5 }
 0x37d   : > { %v7995_v31 = vpop.f32.mrb[39].mxu0  ;;  %v11031_v55 = vadd.f32 %v7883_v17, %v7882_v46  ;;  %v12528_v17 = vcombine.low %v10828_v29, %v10832_v53  ;;  %v8708_v29 = vld [vmem:[%s12450_s7 + $0x210] sm:$0xff]   ;;  %v4705_v53 = vor.u32 %v4704_v6, %v11029_v39  ;;  %v11055_v46 = vld [vmem:[#allocation2 + $0x7c] sm:$0xf] }
 0x37e   : > { %12525 = vst [vmem:[#allocation15_spill] sm:$0xff] %v11022_v32  ;;  %v2008_v1 = vadd.f32 %v1976_v10, %v12526_v20  ;;  %v11037_v35 = vadd.f32 %v7995_v31, %v7994_v42  ;;  %6522 = vmatmul.mubr.bf16.vlgmr.msra.gmra.mrb[80].mxu1 %v10855_v30  ;;  %v3938_v20 = vrot.slane %v3936_v61, 4  ;;  %v4643_v32 = vld [vmem:[#allocation2 + $0x24] sm:$0xf]  ;;  %v3951_v30 = vrot.slane %v3949_v2, 4 }
 0x37f   : > { %6529 = vmatprep.mubr.bf16.mxu1 %v12528_v17  ;;  %8426 = vmatpush3.bf16.msra.mxu1 %v9186_v27  ;;  %v4708_v61 = vshll.u32 %v4642_v45, 16  ;;  %v11057_v42 = vld [vmem:[#allocation2 + $0x78] sm:$0xe]  ;;  %v4713_v31 = vshrl.u32 %v4643_v32, 16  ;;  %v4716_v21 = vshll.u32 %v4643_v32, 16  ;;  %v11059_v57 = vrot.slane %v4722_v33, 5 }
 0x380   : > { %v7806_v10 = vpack.c.bf16 %v2008_v1, %v2008_v1  ;;  %12527 = vst [vmem:[#allocation16_spill] sm:$0xff] %v11037_v35  ;;  %v4695_v1 = vor.u32 %v4694_v62, %v4691_v63  ;;  %8427 = vmatprep.subr.bf16.mxu1 %v8705_v7  ;;  %v4728_v63 = vrot.slane %v4726_v8, 4  ;;  %v2594_v62 = vld [vmem:[#allocation2 + $0xc0] sm:$0xf]  ;;  %v12529_v17 = vrot.slane %v10992_v12, 5 }
 0x381   : > { %v3942_v45 = vor.u32 %v3941_v37, %v3938_v20  ;;  %v11071_v27 = vcombine.low %v3924_v43, %v3934_v34  ;;  %v3952_v33 = vor.u32 %v3951_v30, %v11049_v50  ;;  %v4236_v8 = vld [vmem:[#allocation2 + $0x80] sm:$0x1]  ;;  %v3723_v12 = vld [vmem:[#allocation2 + $0x7c] sm:$0xf]  ;;  %v11083_v43 = vrot.slane %v4705_v53, 4 }
 0x382   : > { %v2419_v48 = vshrl.u32 %v7806_v10, 16  ;;  %v2422_v2 = vshll.u32 %v7806_v10, 16  ;;  %v11067_v6 = vsel %vm9959_vm6, %v4363_v41, %v12529_v17  ;;  %v11073_v32 = vrot.slane %v4695_v1, 4  ;;  %v11077_v10 = vld [vmem:[#allocation2 + $0x78] sm:$0xf] }
 0x383   : > { %8428 = vmatpush3.bf16.msra.mxu1 %v8705_v7  ;;  %12530 = vst [vmem:[#allocation17_spill] sm:$0xff] %v11071_v27  ;;  %v8711_v7 = vld [vmem:[%s12450_s7 + $0x218] sm:$0xff]   ;;  %v11085_v20 = vrot.slane %v4708_v61, 5  ;;  %v7577_v37 = vrot.slane %v11057_v42, 9  ;;  %v11088_v30 = vrot.slane %v3955_v23, 5  ;;  %v4718_v17 = vrot.slane %v4716_v21, 5 }
 0x384   : > { %v11061_v24 = vrot.slane %v2419_v48, 7  ;;  %v4368_v48 = vrot.slane %v11055_v46, 5  ;;  %v7997_v41 = vpop.f32.mrb[40].mxu0  ;;  %8429 = vmatprep.subr.bf16.mxu1 %v8708_v29  ;;  %v4715_v46 = vrot.slane %v4713_v31, 4  ;;  %v3943_v61 = vrot.slane %v3942_v45, 4 }
 0x385   : > { %v7885_v34 = vpop.f32.mrb[24].mxu1  ;;  %v7998_v1 = vpop.f32.mrb[41].mxu0  ;;  %v4371_v3 = vrot.slane %v4236_v8, 5  ;;  %v12532_v31 = vcombine.low %v10853_v18, %v10838_v60  ;;  %v3953_v26 = vrot.slane %v3952_v33, 4  ;;  %v4732_v21 = vshll.u32 %v11069_v56, 16 }
 0x386   : > { %v2424_v35 = vor.u32 %v2422_v2, %v11061_v24  ;;  %v4729_v2 = vor.u32 %v4728_v63, %v11059_v57  ;;  %v11093_v40 = vadd.f32 %v7998_v1, %v7997_v41  ;;  %v7886_v27 = vpop.f32.mrb[25].mxu1  ;;  %v8000_v53 = vpop.f32.mrb[42].mxu0  ;;  %6530 = vmatmul.mubr.bf16.gmra.mrb[84].mxu1 %v10857_v38  ;;  %v8714_v38 = vld [vmem:[%s12450_s7 + $0x220] sm:$0xff]   ;;  %v3969_v45 = vshll.u32 %v3723_v12, 16  ;;  %v3305_v60 = vld [vmem:[#allocation2 + $0xb4] sm:$0xe] }
 0x387   : > { %v11096_v42 = vadd.f32 %v7886_v27, %v7885_v34  ;;  %v7888_v23 = vpop.f32.mrb[26].mxu1  ;;  %v8001_v28 = vpop.f32.mrb[43].mxu0  ;;  %6537 = vmatprep.mubr.bf16.mxu1 %v12532_v31  ;;  %8430 = vmatpush3.bf16.msra.mxu1 %v8708_v29  ;;  %v3973_v27 = vshrl.u32 %v3723_v12, 16  ;;  %v3306_v18 = vld [vmem:[#allocation2 + $0xb8] sm:$0xf]  ;;  %v4719_v29 = vor.u32 %v4718_v17, %v4715_v46  ;;  %v3963_v56 = vshll.u32 %v11077_v10, 16 }
 0x388   : > { %v2595_v54 = vsel %vm10081_vm12, %v2424_v35, %v2594_v62  ;;  %12531 = vst [vmem:[#allocation18_spill] sm:$0xff] %v11093_v40  ;;  %v4370_v35 = vrot.slane %v4368_v48, 4  ;;  %v11102_v63 = vadd.f32 %v8001_v28, %v8000_v53  ;;  %v7889_v62 = vpop.f32.mrb[27].mxu1  ;;  %8431 = vmatprep.subr.bf16.mxu1 %v8711_v7  ;;  %v4730_v33 = vrot.slane %v4729_v2, 4  ;;  %v11125_v1 = vld [vmem:[#allocation2 + $0x30] sm:$0xf] }
 0x389   : > { %2596 = vst [vmem:[#allocation2 + $0xc0] sm:$0xf] %v2595_v54  ;;  %v3960_v54 = vshrl.u32 %v11077_v10, 16  ;;  %v11108_v8 = vadd.f32 %v7889_v62, %v7888_v23  ;;  %v4701_v41 = vsel %vm9863_vm3, %v11073_v32, %v11029_v39  ;;  %v4711_v12 = vsel %vm9863_vm3, %v11083_v43, %v11085_v20  ;;  %v4647_v10 = vld [vmem:[#allocation2 + $0x34] sm:$0xf] }
 0x38a   : > { %12533 = vst [vmem:[#allocation19_spill] sm:$0xff] %v11102_v63  ;;  %v11123_v34 = vsel %vm9959_vm6, %v7577_v37, %v4368_v48  ;;  %v11127_v46 = vld [vmem:[#allocation2 + $0xbc] sm:$0x1]  ;;  %v3948_v17 = vsel %vm9863_vm3, %v3943_v61, %v11049_v50  ;;  %v3958_v39 = vsel %vm9863_vm3, %v3953_v26, %v11088_v30  ;;  %v11137_v32 = vsel %vm9959_vm6, %v4370_v35, %v4371_v3  ;;  %v11139_v43 = vld [vmem:[#allocation2 + $0x88] sm:$0xf] }
 0x38b   : > { %8432 = vmatpush3.bf16.msra.mxu1 %v8711_v7  ;;  %12534 = vst [vmem:[#allocation20_spill] sm:$0xff] %v11137_v32  ;;  %v4734_v48 = vrot.slane %v4732_v21, 5  ;;  %v7519_v20 = vrot.slane %v3305_v60, 9  ;;  %v3466_v37 = vrot.slane %v3306_v18, 5  ;;  %v11141_v7 = vrot.slane %v3969_v45, 5  ;;  %v8717_v50 = vld [vmem:[%s12450_s7 + $0x228] sm:$0xff]  }
 0x38c   : > { %8433 = vmatprep.subr.bf16.mxu1 %v8714_v38  ;;  %v3975_v2 = vrot.slane %v3973_v27, 4  ;;  %v4720_v53 = vrot.slane %v4719_v29, 4  ;;  %v3724_v61 = vld [vmem:[#allocation2 + $0x80] sm:$0x1]  ;;  %v3962_v3 = vrot.slane %v3960_v54, 4  ;;  %v3965_v23 = vrot.slane %v3963_v56, 5 }
 0x38d   : > { %v4735_v30 = vsel %vm9863_vm3, %v4730_v33, %v4734_v48  ;;  %v12475_v31 = vrot.slane %v11139_v43, 5  ;;  %v4737_v26 = vshrl.u32 %v11125_v1, 16  ;;  %v4746_v35 = vshll.u32 %v4647_v10, 16  ;;  %v3725_v33 = vld [vmem:[#allocation2 + $0x84] sm:$0xf]  ;;  %v8720_v56 = vld [vmem:[%s12450_s7 + $0x230] sm:$0xff]  }
 0x38e   : > { %6538 = vmatmul.mubr.bf16.gmra.mrb[88].mxu1 %v10884_v49  ;;  %v4750_v21 = vshrl.u32 %v4647_v10, 16  ;;  %v12535_v62 = vcombine.low %v10868_v22, %v10877_v14  ;;  %v3469_v45 = vrot.slane %v11127_v46, 5  ;;  %v11155_v27 = vcombine.low %v4701_v41, %v4711_v12  ;;  %v4239_v14 = vld [vmem:[#allocation2 + $0x8c] sm:$0x1]  ;;  %v3726_v48 = vld [vmem:[#allocation2 + $0x88] sm:$0xf] }
 0x38f   : > { %v11157_v60 = vcombine.low %v3948_v17, %v3958_v39  ;;  %8434 = vmatpush3.bf16.msra.mxu1 %v8714_v38  ;;  %v11163_v49 = vsel %vm9959_vm6, %v7519_v20, %v3466_v37  ;;  %v4725_v18 = vsel %vm9863_vm3, %v4720_v53, %v11059_v57  ;;  %v3976_v22 = vor.u32 %v3975_v2, %v11141_v7  ;;  %v4237_v39 = vld [vmem:[#allocation2 + $0x84] sm:$0xe]  ;;  %v4648_v57 = vld [vmem:[#allocation2 + $0x38] sm:$0x1] }
 0x390   : > { %6545 = vmatprep.mubr.bf16.mxu1 %v12535_v62  ;;  %v4740_v29 = vshll.u32 %v11125_v1, 16  ;;  %8435 = vmatprep.subr.bf16.mxu1 %v8717_v50  ;;  %v3468_v12 = vrot.slane %v3466_v37, 4  ;;  %v11173_v10 = vcombine.low %v4725_v18, %v4735_v30  ;;  %v3966_v46 = vor.u32 %v3965_v23, %v3962_v3  ;;  %v8723_v23 = vld [vmem:[%s12450_s7 + $0x238] sm:$0xff]  }
 0x391   : > { %v8003_v38 = vpop.f32.mrb[44].mxu0  ;;  %v7891_v41 = vpop.f32.mrb[28].mxu1  ;;  %v3979_v17 = vshll.u32 %v3724_v61, 16  ;;  %v4377_v1 = vrot.slane %v12475_v31, 4  ;;  %v4739_v53 = vrot.slane %v4737_v26, 4  ;;  %v11177_v62 = vrot.slane %v4746_v35, 5 }
 0x392   : > { %v8004_v20 = vpop.f32.mrb[45].mxu0  ;;  %v7892_v2 = vpop.f32.mrb[29].mxu1  ;;  %v4752_v54 = vrot.slane %v4750_v21, 4  ;;  %v3984_v3 = vshrl.u32 %v3725_v33, 16  ;;  %v3987_v61 = vshll.u32 %v3725_v33, 16  ;;  %v3977_v31 = vrot.slane %v3976_v22, 4 }
 0x393   : > { %v11179_v28 = vadd.f32 %v8004_v20, %v8003_v38  ;;  %v11181_v63 = vadd.f32 %v7892_v2, %v7891_v41  ;;  %v8006_v37 = vpop.f32.mrb[46].mxu0  ;;  %v7894_v30 = vpop.f32.mrb[30].mxu1  ;;  %8436 = vmatpush3.bf16.msra.mxu1 %v8717_v50  ;;  %v4742_v26 = vrot.slane %v4740_v29, 5  ;;  %v3993_v35 = vshll.u32 %v3726_v48, 16  ;;  %v4649_v22 = vld [vmem:[#allocation2 + $0x3c] sm:$0xf] }
 0x394   : > { %v8007_v18 = vpop.f32.mrb[47].mxu0  ;;  %v7895_v40 = vpop.f32.mrb[31].mxu1  ;;  %v3997_v32 = vshrl.u32 %v3726_v48, 16  ;;  %8437 = vmatprep.subr.bf16.mxu1 %v8720_v56  ;;  %v11192_v41 = vsel %vm9959_vm6, %v3468_v12, %v3469_v45  ;;  %v4378_v50 = vrot.slane %v4239_v14, 5  ;;  %v3967_v33 = vrot.slane %v3966_v46, 4 }
 0x395   : > { %12536 = vst [vmem:[#allocation21_spill] sm:$0xff] %v11179_v28  ;;  %v11186_v21 = vadd.f32 %v8007_v18, %v8006_v37  ;;  %v11188_v38 = vadd.f32 %v7895_v40, %v7894_v30  ;;  %v3981_v20 = vrot.slane %v3979_v17, 5  ;;  %v7578_v2 = vrot.slane %v4237_v39, 9  ;;  %v3727_v18 = vld [vmem:[#allocation2 + $0x8c] sm:$0x1] }
 0x396   : > { %6546 = vmatmul.mubr.bf16.gmra.mrb[92].mxu1 %v10935_v47  ;;  %v4756_v28 = vshll.u32 %v4648_v57, 16  ;;  %v12538_v29 = vcombine.low %v10897_v59, %v10913_v16  ;;  %v11200_v40 = vsel %vm9959_vm6, %v4377_v1, %v4378_v50  ;;  %v4753_v48 = vor.u32 %v4752_v54, %v11177_v62  ;;  %v4650_v57 = vld [vmem:[#allocation2 + $0x40] sm:$0xf]  ;;  %v11214_v1 = vld [vmem:[#allocation2 + $0x94] sm:$0xf] }
 0x397   : > { %12537 = vst [vmem:[#allocation22_spill] sm:$0xff] %v11186_v21  ;;  %v3986_v45 = vrot.slane %v3984_v3, 4  ;;  %v3989_v12 = vrot.slane %v3987_v61, 5  ;;  %8438 = vmatpush3.bf16.msra.mxu1 %v8720_v56  ;;  %v3982_v47 = vsel %vm9863_vm3, %v3977_v31, %v3981_v20  ;;  %v4743_v46 = vor.u32 %v4742_v26, %v4739_v53 }
 0x398   : > { %6553 = vmatprep.mubr.bf16.mxu1 %v12538_v29  ;;  %v11205_v17 = vrot.slane %v3993_v35, 5  ;;  %v3999_v39 = vrot.slane %v3997_v32, 4  ;;  %8439 = vmatprep.subr.bf16.mxu1 %v8723_v23  ;;  %v12539_v16 = vrot.slane %v11139_v43, 5  ;;  %v4761_v56 = vshrl.u32 %v4649_v22, 16 }
 0x399   : > { %v4764_v37 = vshll.u32 %v4649_v22, 16  ;;  %v7535_v31 = vcombine.low %v11163_v49, %v11192_v41  ;;  %v3972_v32 = vsel %vm9863_vm3, %v3967_v33, %v11141_v7  ;;  %v11223_v53 = vrot.slane %v4756_v28, 5  ;;  %v4242_v33 = vld [vmem:[#allocation2 + $0x98] sm:$0x1] }
 0x39a   : > { %v11212_v54 = vsel %vm9959_vm6, %v7578_v2, %v12539_v16  ;;  %v12540_v43 = vunpack.c.h.bf16 %v10790_v5  ;;  %v11227_v3 = vcombine.low %v3972_v32, %v3982_v47  ;;  %v11229_v61 = vrot.slane %v4753_v48, 4  ;;  %v11238_v48 = vld [vmem:[%s12451_s8] ss:$0 sm:$0xff] }
 0x39b   : > { %v1944_v14 = vpop.permute.xlu1 %1943  ;;  %v3990_v26 = vor.u32 %v3989_v12, %v3986_v45  ;;  %8440 = vmatpush3.bf16.msra.mxu1 %v8723_v23  ;;  %v11231_v50 = vrot.slane %v4743_v46, 4  ;;  %v4000_v7 = vor.u32 %v3999_v39, %v11205_v17  ;;  %v4382_v20 = vrot.slane %v11214_v1, 5 }
 0x39c   : > { %v1977_v59 = vmul.f32 %v1944_v14, %v10939_v4  ;;  %v4770_v28 = vshll.u32 %v4650_v57, 16  ;;  %v4763_v5 = vrot.slane %v4761_v56, 4  ;;  %v4766_v29 = vrot.slane %v4764_v37, 5  ;;  %v3729_v56 = vld [vmem:[#allocation2 + $0x94] sm:$0xf] }
 0x39d   : > { %v7897_v35 = vpop.f32.mrb[32].mxu1  ;;  %v4774_v14 = vshrl.u32 %v4650_v57, 16  ;;  %v11242_v23 = vadd.f32 %v11238_v48, %v11020_v0  ;;  %v4749_v47 = vsel %vm9863_vm3, %v11231_v50, %v11177_v62  ;;  %v4003_v46 = vshll.u32 %v3727_v18, 16 }
 0x39e   : > { %v2009_v30 = vadd.f32 %v1977_v59, %v12540_v43  ;;  %v7898_v2 = vpop.f32.mrb[33].mxu1  ;;  %6554 = vmatmul.mubr.bf16.gmra.mrb[96].mxu1 %v10947_v58  ;;  %v12541_v59 = vcombine.low %v10943_v52, %v10923_v9  ;;  %v4759_v0 = vsel %vm9863_vm3, %v11229_v61, %v11223_v53  ;;  %v3991_v16 = vrot.slane %v3990_v26, 4  ;;  %v4651_v58 = vld [vmem:[#allocation2 + $0x44] sm:$0x1]  ;;  %v4240_v9 = vld [vmem:[#allocation2 + $0x90] sm:$0xe] }
 0x39f   : > { %v11244_v45 = vadd.f32 %v7898_v2, %v7897_v35  ;;  %v7900_v12 = vpop.f32.mrb[34].mxu1  ;;  %v4385_v1 = vrot.slane %v4242_v33, 5  ;;  %v4001_v32 = vrot.slane %v4000_v7, 4  ;;  %v4384_v62 = vrot.slane %v4382_v20, 4  ;;  %v11263_v7 = vld [vmem:[#allocation2 + $0xa0] sm:$0xf] }
 0x3a0   : > { %v7807_v22 = vpack.c.bf16 %v2009_v30, %v2009_v30  ;;  %v7901_v39 = vpop.f32.mrb[35].mxu1  ;;  %6561 = vmatprep.mubr.bf16.mxu1 %v12541_v59  ;;  %v11260_v43 = vrot.slane %v4770_v28, 5  ;;  %v3728_v30 = vld [vmem:[#allocation2 + $0x90] sm:$0xf]  ;;  %v4767_v52 = vor.u32 %v4766_v29, %v4763_v5  ;;  %v4776_v50 = vrot.slane %v4774_v14, 4 }
 0x3a1   : > { %v11258_v37 = vadd.f32 %v7901_v39, %v7900_v12  ;;  %v2425_v2 = vrot.slane %v11061_v24, 4  ;;  %v2598_v59 = vld [vmem:[#allocation2 + $0xc8] sm:$0x1]  ;;  %v4005_v53 = vrot.slane %v4003_v46, 5  ;;  %v4017_v61 = vshll.u32 %v3729_v56, 16 }
 0x3a2   : > { %v2427_v57 = vshrl.u32 %v7807_v22, 16  ;;  %v2430_v35 = vshll.u32 %v7807_v22, 16  ;;  %v4021_v26 = vshrl.u32 %v3729_v56, 16  ;;  %v4008_v12 = vshrl.u32 %v3728_v30, 16 }
 0x3a3   : > { %v4011_v39 = vshll.u32 %v3728_v30, 16  ;;  %v4006_v28 = vsel %vm9863_vm3, %v4001_v32, %v4005_v53  ;;  %v11269_v22 = vsel %vm9959_vm6, %v4384_v62, %v4385_v1  ;;  %v4780_v5 = vshll.u32 %v4651_v58, 16  ;;  %v4652_v32 = vld [vmem:[#allocation2 + $0x48] sm:$0xf] }
 0x3a4   : > { %v2429_v18 = vrot.slane %v2427_v57, 7  ;;  %v7579_v57 = vrot.slane %v4240_v9, 9  ;;  %v11275_v46 = vrot.slane %v4767_v52, 4  ;;  %v4777_v56 = vor.u32 %v4776_v50, %v11260_v43 }
 0x3a5   : > { %v11280_v30 = vadd.f32 %v11238_v48, %v11031_v55  ;;  %v11283_v1 = vrot.slane %v4017_v61, 5  ;;  %v4023_v58 = vrot.slane %v4021_v26, 4  ;;  %v4389_v13 = vrot.slane %v11263_v7, 5  ;;  %v4656_v7 = vld [vmem:[#allocation2 + $0x58] sm:$0xf] }
 0x3a6   : > { %v2432_v33 = vor.u32 %v2430_v35, %v2429_v18  ;;  %v2434_v4 = vrot.slane %v2429_v18, 4  ;;  %6562 = vmatmul.mubr.bf16.gmra.mrb[100].mxu1 %v10994_v25  ;;  %v3996_v62 = vsel %vm9863_vm3, %v3991_v16, %v11205_v17  ;;  %v11294_v55 = vsel %vm9959_vm6, %v7579_v57, %v4382_v20  ;;  %v4245_v16 = vld [vmem:[#allocation2 + $0xa4] sm:$0x1] }
 0x3a7   : > { %v4010_v18 = vrot.slane %v4008_v12, 4  ;;  %v4013_v25 = vrot.slane %v4011_v39, 5  ;;  %v11296_v9 = vcombine.low %v4749_v47, %v4759_v0  ;;  %v11298_v52 = vcombine.low %v3996_v62, %v4006_v28  ;;  %v4243_v12 = vld [vmem:[#allocation2 + $0x9c] sm:$0xe] }
 0x3a8   : > { %v2433_v24 = vsel %vm10112_vm13, %v2425_v2, %v2432_v33  ;;  %v2599_v14 = vsel %vm10124_vm14, %v2434_v4, %v2598_v59  ;;  %v12543_v4 = vcombine.low %v10959_v11, %v10963_v19  ;;  %v4782_v11 = vrot.slane %v4780_v5, 5  ;;  %v3730_v19 = vld [vmem:[#allocation2 + $0x98] sm:$0x1]  ;;  %v4653_v2 = vld [vmem:[#allocation2 + $0x4c] sm:$0xf] }
 0x3a9   : > { %2597 = vst [vmem:[#allocation2 + $0xc4] sm:$0xf] %v2433_v24  ;;  %2600 = vst [vmem:[#allocation2 + $0xc8] sm:$0x1] %v2599_v14  ;;  %v4773_v17 = vsel %vm9863_vm3, %v11275_v46, %v11260_v43  ;;  %v4778_v20 = vrot.slane %v4777_v56, 4  ;;  %v4785_v53 = vshrl.u32 %v4652_v32, 16  ;;  %v6234_v47 = vadd.f32 %v11238_v48, %v11244_v45 }
 0x3aa   : > { %6569 = vmatprep.mubr.bf16.mxu1 %v12543_v4  ;;  %v8009_v35 = vpop.f32.mrb[48].mxu0  ;;  %v4788_v61 = vshll.u32 %v4652_v32, 16  ;;  %v4024_v33 = vor.u32 %v4023_v58, %v11283_v1  ;;  %v4391_v39 = vrot.slane %v4389_v13, 4  ;;  %v4014_v57 = vor.u32 %v4013_v25, %v4010_v18  ;;  %v4654_v24 = vld [vmem:[#allocation2 + $0x50] sm:$0x1] }
 0x3ab   : > { %v8010_v59 = vpop.f32.mrb[49].mxu0  ;;  %v4027_v5 = vshll.u32 %v3730_v19, 16  ;;  %v4794_v43 = vshll.u32 %v4653_v2, 16  ;;  %v4798_v29 = vshrl.u32 %v4653_v2, 16  ;;  %v6237_v14 = vadd.f32 %v11238_v48, %v11258_v37  ;;  %v3731_v32 = vld [vmem:[#allocation2 + $0x9c] sm:$0xf] }
 0x3ac   : > { %v8011_v0 = vadd.f32 %v8010_v59, %v8009_v35  ;;  %v8012_v26 = vpop.f32.mrb[50].mxu0  ;;  %v4392_v56 = vrot.slane %v4245_v16, 5  ;;  %v3732_v4 = vld [vmem:[#allocation2 + $0xa0] sm:$0xf]  ;;  %v4783_v62 = vsel %vm9863_vm3, %v4778_v20, %v4782_v11  ;;  %v7580_v35 = vrot.slane %v4243_v12, 9  ;;  %v12546_v16 = vld [vmem:[#allocation14_spill] sm:$0xff] }
 0x3ad   : > { %v8013_v28 = vpop.f32.mrb[51].mxu0  ;;  %v4787_v59 = vrot.slane %v4785_v53, 4  ;;  %v4790_v18 = vrot.slane %v4788_v61, 5  ;;  %v4025_v19 = vrot.slane %v4024_v33, 4  ;;  %v4804_v2 = vshll.u32 %v4654_v24, 16 }
 0x3ae   : > { %v11313_v46 = vadd.f32 %v8011_v0, %v6234_v47  ;;  %v8014_v45 = vadd.f32 %v8013_v28, %v8012_v26  ;;  %6570 = vmatmul.mubr.bf16.gmra.mrb[104].mxu1 %v11010_v36  ;;  %v11322_v37 = vsel %vm9959_vm6, %v4391_v39, %v4392_v56  ;;  %v12547_v47 = vld [vmem:[#allocation13_spill] sm:$0xff]  ;;  %v11327_v26 = vrot.slane %v4794_v43, 5 }
 0x3af   : > { %v12548_v0 = vcombine.low %v12546_v16, %v12547_v47  ;;  %v4800_v11 = vrot.slane %v4798_v29, 4  ;;  %v4041_v20 = vshll.u32 %v3732_v4, 16  ;;  %v4045_v53 = vshrl.u32 %v3732_v4, 16 }
 0x3b0   : > { %12544 = vst [vmem:[#allocation8_spill] sm:$0xff] %v11313_v46  ;;  %v8712_v58 = vld [vmem:[#allocation2 + $0xc0] sm:$0xff]   ;;  %v11317_v25 = vadd.f32 %v8014_v45, %v6237_v14  ;;  %v4015_v36 = vrot.slane %v4014_v57, 4  ;;  %v4029_v61 = vrot.slane %v4027_v5, 5  ;;  %v4032_v33 = vshrl.u32 %v3731_v32, 16 }
 0x3b1   : > { %6577 = vmatprep.mubr.bf16.mxu1 %v12548_v0  ;;  %6480 = vmatprep.mubr.bf16.mxu0 %v8712_v58  ;;  %v4035_v12 = vshll.u32 %v3731_v32, 16  ;;  %v11334_v39 = vadd.f32 %v11238_v48, %v11096_v42  ;;  %v11338_v28 = vadd.f32 %v11238_v48, %v11108_v8  ;;  %v11345_v49 = vsel %vm9959_vm6, %v7580_v35, %v4389_v13  ;;  %v4655_v57 = vld [vmem:[#allocation2 + $0x54] sm:$0xf]  ;;  %v3733_v14 = vld [vmem:[#allocation2 + $0xa4] sm:$0x1] }
 0x3b2   : > { %12545 = vst [vmem:[#allocation23_spill] sm:$0xff] %v11317_v25  ;;  %6481 = vmatmul.mubr.bf16.gmra.mrb[92].mxu0 %v7535_v31  ;;  %v4791_v41 = vor.u32 %v4790_v18, %v4787_v59  ;;  %v11347_v31 = vld [vmem:[#allocation2 + $0xac] sm:$0xf]  ;;  %v11349_v24 = vcombine.low %v4773_v17, %v4783_v62  ;;  %v4020_v42 = vsel %vm9863_vm3, %v4015_v36, %v11283_v1  ;;  %v11359_v29 = vrot.slane %v4804_v2, 5  ;;  %v8731_v51 = vld [vmem:[#allocation2 + $0xc0] sm:$0xff]  }
 0x3b3   : > { %6682 = vmatprep.mubr.bf16.mxu0 %v11155_v27  ;;  %v4030_v8 = vsel %vm9863_vm3, %v4025_v19, %v4029_v61  ;;  %v4801_v43 = vor.u32 %v4800_v11, %v11327_v26  ;;  %v11361_v45 = vrot.slane %v4041_v20, 5  ;;  %v4047_v17 = vrot.slane %v4045_v53, 4  ;;  %v12551_v20 = vld [vmem:[#allocation17_spill] sm:$0xff]  ;;  %v8713_v53 = vld [vmem:[#allocation2 + $0x18] sm:$0xff]  }
 0x3b4   : > { %v4034_v4 = vrot.slane %v4032_v33, 4  ;;  %v4037_v58 = vrot.slane %v4035_v12, 5  ;;  %v12477_v62 = vrot.slane %v11347_v31, 5  ;;  %v11366_v18 = vcombine.low %v4020_v42, %v4030_v8  ;;  %v3735_v33 = vld [vmem:[#allocation2 + $0xac] sm:$0xf] }
 0x3b5   : > { %v8015_v5 = vpop.f32.mrb[52].mxu0  ;;  %v11368_v19 = vrot.slane %v4791_v41, 4  ;;  %v4818_v2 = vshll.u32 %v4656_v7, 16  ;;  %v4822_v16 = vshrl.u32 %v4656_v7, 16  ;;  %v4809_v36 = vshrl.u32 %v4655_v57, 16 }
 0x3b6   : > { %v8016_v13 = vpop.f32.mrb[53].mxu0  ;;  %6578 = vmatmul.mubr.bf16.gmra.mrb[108].mxu1 %v12551_v20  ;;  %v4812_v61 = vshll.u32 %v4655_v57, 16  ;;  %v11377_v12 = vadd.f32 %v11238_v48, %v11181_v63  ;;  %v12552_v41 = vcombine.low %v11017_v44, %v11067_v6  ;;  %v4802_v42 = vrot.slane %v4801_v43, 4  ;;  %v4248_v63 = vld [vmem:[#allocation2 + $0xb0] sm:$0x1] }
 0x3b7   : > { %v7903_v56 = vpop.f32.mrb[36].mxu1  ;;  %v11363_v32 = vadd.f32 %v8016_v13, %v8015_v5  ;;  %v8018_v1 = vpop.f32.mrb[54].mxu0  ;;  %v4048_v8 = vor.u32 %v4047_v17, %v11361_v45  ;;  %v4051_v7 = vshll.u32 %v3733_v14, 16  ;;  %v4246_v13 = vld [vmem:[#allocation2 + $0xa8] sm:$0xe]  ;;  %v11392_v44 = vrot.slane %v4818_v2, 5 }
 0x3b8   : > { %v7904_v35 = vpop.f32.mrb[37].mxu1  ;;  %v8019_v59 = vpop.f32.mrb[55].mxu0  ;;  %6585 = vmatprep.mubr.bf16.mxu1 %v12552_v41  ;;  %v4824_v6 = vrot.slane %v4822_v16, 4  ;;  %v3734_v43 = vld [vmem:[#allocation2 + $0xa8] sm:$0xf]  ;;  %v4065_v14 = vshll.u32 %v3735_v33, 16 }
 0x3b9   : > { %12549 = vst [vmem:[#allocation14_spill] sm:$0xff] %v11363_v32  ;;  %v11370_v47 = vadd.f32 %v7904_v35, %v7903_v56  ;;  %v7906_v0 = vpop.f32.mrb[38].mxu1  ;;  %v11372_v11 = vadd.f32 %v8019_v59, %v8018_v1  ;;  %v11385_v56 = vadd.f32 %v11238_v48, %v11188_v38  ;;  %v4038_v1 = vor.u32 %v4037_v58, %v4034_v4  ;;  %v4657_v4 = vld [vmem:[#allocation2 + $0x5c] sm:$0x1]  ;;  %v11401_v41 = vld [vmem:[#allocation2 + $0xb8] sm:$0xf] }
 0x3ba   : > { %v7907_v5 = vpop.f32.mrb[39].mxu1  ;;  %6683 = vmatmul.mubr.bf16.vlgmr.msra.gmra.mrb[96].mxu0 %v8713_v53  ;;  %v4398_v35 = vrot.slane %v12477_v62, 4  ;;  %v4069_v17 = vshrl.u32 %v3735_v33, 16  ;;  %v4797_v38 = vsel %vm9863_vm3, %v11368_v19, %v11327_v26  ;;  %v4811_v58 = vrot.slane %v4809_v36, 4 }
 0x3bb   : > { %12550 = vst [vmem:[#allocation13_spill] sm:$0xff] %v11372_v11  ;;  %v11387_v57 = vadd.f32 %v7907_v5, %v7906_v0  ;;  %6690 = vmatprep.mubr.bf16.mxu0 %v11173_v10  ;;  %v7581_v0 = vrot.slane %v4246_v13, 9  ;;  %v4814_v20 = vrot.slane %v4812_v61, 5  ;;  %v4807_v10 = vsel %vm9863_vm3, %v4802_v42, %v11359_v29 }
 0x3bc   : > { %v4049_v2 = vrot.slane %v4048_v8, 4  ;;  %v4053_v16 = vrot.slane %v4051_v7, 5  ;;  %v4399_v5 = vrot.slane %v4248_v63, 5  ;;  %v4039_v62 = vrot.slane %v4038_v1, 4  ;;  %v8715_v1 = vld [vmem:[#allocation2 + $0x24] sm:$0xff]  }
 0x3bd   : > { %v8021_v59 = vpop.f32.mrb[56].mxu0  ;;  %v4056_v26 = vshrl.u32 %v3734_v43, 16  ;;  %v4059_v19 = vshll.u32 %v3734_v43, 16  ;;  %v4825_v29 = vor.u32 %v4824_v6, %v11392_v44  ;;  %v11410_v42 = vrot.slane %v4065_v14, 5 }
 0x3be   : > { %v8022_v53 = vpop.f32.mrb[57].mxu0  ;;  %v11407_v61 = vsel %vm9959_vm6, %v4398_v35, %v4399_v5  ;;  %v4071_v8 = vrot.slane %v4069_v17, 4  ;;  %6586 = vmatmul.mubr.bf16.gmra.mrb[112].mxu1 %v11157_v60  ;;  %v4815_v43 = vor.u32 %v4814_v20, %v4811_v58  ;;  %v12478_v25 = vrot.slane %v11401_v41, 5  ;;  %v12555_v35 = vld [vmem:[#allocation20_spill] sm:$0xff] }
 0x3bf   : > { %v7909_v33 = vpop.f32.mrb[40].mxu1  ;;  %v11403_v27 = vadd.f32 %v8022_v53, %v8021_v59  ;;  %v8024_v50 = vpop.f32.mrb[58].mxu0  ;;  %v3736_v53 = vld [vmem:[#allocation2 + $0xb0] sm:$0x1]  ;;  %v12556_v5 = vcombine.low %v11123_v34, %v12555_v35  ;;  %v11421_v6 = vcombine.low %v4797_v38, %v4807_v10  ;;  %v4054_v14 = vsel %vm9863_vm3, %v4049_v2, %v4053_v16  ;;  %v4658_v58 = vld [vmem:[#allocation2 + $0x60] sm:$0xf] }
 0x3c0   : > { %v7910_v13 = vpop.f32.mrb[41].mxu1  ;;  %v8025_v36 = vpop.f32.mrb[59].mxu0  ;;  %v4828_v17 = vshll.u32 %v4657_v4, 16  ;;  %v4044_v34 = vsel %vm9863_vm3, %v4039_v62, %v11361_v45  ;;  %v4058_v38 = vrot.slane %v4056_v26, 4  ;;  %v4061_v10 = vrot.slane %v4059_v19, 5 }
 0x3c1   : > { %12553 = vst [vmem:[#allocation17_spill] sm:$0xff] %v11403_v27  ;;  %v11412_v7 = vadd.f32 %v7910_v13, %v7909_v33  ;;  %v7912_v63 = vpop.f32.mrb[42].mxu1  ;;  %v11414_v59 = vadd.f32 %v8025_v36, %v8024_v50  ;;  %6593 = vmatprep.mubr.bf16.mxu1 %v12556_v5  ;;  %v12557_v50 = vrot.slane %v11347_v31, 5  ;;  %v4659_v33 = vld [vmem:[#allocation2 + $0x64] sm:$0xf]  ;;  %v4826_v2 = vrot.slane %v4825_v29, 4 }
 0x3c2   : > { %v7913_v46 = vpop.f32.mrb[43].mxu1  ;;  %6691 = vmatmul.mubr.bf16.gmra.mrb[100].mxu0 %v8715_v1  ;;  %v4075_v4 = vshll.u32 %v3736_v53, 16  ;;  %v4249_v16 = vld [vmem:[#allocation2 + $0xb4] sm:$0xe]  ;;  %v11440_v36 = vcombine.low %v4044_v34, %v4054_v14  ;;  %v4405_v45 = vrot.slane %v12478_v25, 4  ;;  %v4833_v62 = vshrl.u32 %v4658_v58, 16 }
 0x3c3   : > { %12554 = vst [vmem:[#allocation24_spill] sm:$0xff] %v11414_v59  ;;  %v11429_v60 = vsel %vm9959_vm6, %v7581_v0, %v12557_v50  ;;  %v11431_v20 = vadd.f32 %v7913_v46, %v7912_v63  ;;  %6698 = vmatprep.mubr.bf16.mxu0 %v11296_v9  ;;  %v4072_v0 = vor.u32 %v4071_v8, %v11410_v42  ;;  %v4251_v46 = vld [vmem:[#allocation2 + $0xbc] sm:$0x1]  ;;  %v4816_v63 = vrot.slane %v4815_v43, 4  ;;  %v3737_v26 = vld [vmem:[#allocation2 + $0xb4] sm:$0xf] }
 0x3c4   : > { %v4830_v9 = vrot.slane %v4828_v17, 5  ;;  %v4836_v1 = vshll.u32 %v4658_v58, 16  ;;  %v4842_v35 = vshll.u32 %v4659_v33, 16  ;;  %v4846_v5 = vshrl.u32 %v4659_v33, 16  ;;  %v3738_v34 = vld [vmem:[#allocation2 + $0xb8] sm:$0xf] }
 0x3c5   : > { %v8027_v13 = vpop.f32.mrb[60].mxu0  ;;  %v4821_v53 = vsel %vm9863_vm3, %v4816_v63, %v11392_v44  ;;  %v4062_v14 = vor.u32 %v4061_v10, %v4058_v38  ;;  %v4406_v43 = vrot.slane %v4251_v46, 5  ;;  %v4073_v17 = vrot.slane %v4072_v0, 4  ;;  %v4662_v10 = vld [vmem:[#allocation2 + $0x70] sm:$0xf] }
 0x3c6   : > { %v8028_v19 = vpop.f32.mrb[61].mxu0  ;;  %v4831_v59 = vsel %vm9863_vm3, %v4826_v2, %v4830_v9  ;;  %v4077_v58 = vrot.slane %v4075_v4, 5  ;;  %v7582_v27 = vrot.slane %v4249_v16, 9  ;;  %6594 = vmatmul.mubr.bf16.gmra.mrb[116].mxu1 %v11227_v3  ;;  %v4835_v38 = vrot.slane %v4833_v62, 4  ;;  %v4660_v63 = vld [vmem:[#allocation2 + $0x68] sm:$0x1] }
 0x3c7   : > { %v7915_v29 = vpop.f32.mrb[44].mxu1  ;;  %v11444_v50 = vadd.f32 %v8028_v19, %v8027_v13  ;;  %v8030_v8 = vpop.f32.mrb[62].mxu0  ;;  %v11458_v44 = vsel %vm9959_vm6, %v4405_v45, %v4406_v43  ;;  %v12560_v2 = vcombine.low %v11212_v54, %v11200_v40  ;;  %v4838_v0 = vrot.slane %v4836_v1, 5  ;;  %v3739_v43 = vld [vmem:[#allocation2 + $0xbc] sm:$0x1] }
 0x3c8   : > { %v7916_v31 = vpop.f32.mrb[45].mxu1  ;;  %v8031_v25 = vpop.f32.mrb[63].mxu0  ;;  %v4848_v4 = vrot.slane %v4846_v5, 4  ;;  %v4063_v3 = vrot.slane %v4062_v14, 4  ;;  %v4083_v9 = vshll.u32 %v3737_v26, 16  ;;  %v4089_v45 = vshll.u32 %v3738_v34, 16 }
 0x3c9   : > { %12558 = vst [vmem:[#allocation20_spill] sm:$0xff] %v11444_v50  ;;  %v11451_v33 = vadd.f32 %v7916_v31, %v7915_v29  ;;  %v7918_v13 = vpop.f32.mrb[46].mxu1  ;;  %v11453_v19 = vadd.f32 %v8031_v25, %v8030_v8  ;;  %v8716_v50 = vld [vmem:[#allocation2 + $0x30] sm:$0xff]   ;;  %6601 = vmatprep.mubr.bf16.mxu1 %v12560_v2  ;;  %v11463_v31 = vrot.slane %v4842_v35, 5  ;;  %v4080_v25 = vshrl.u32 %v3737_v26, 16 }
 0x3ca   : > { %v7919_v46 = vpop.f32.mrb[47].mxu1  ;;  %6699 = vmatmul.mubr.bf16.gmra.mrb[104].mxu0 %v8716_v50  ;;  %v11468_v62 = vcombine.low %v4821_v53, %v4831_v59  ;;  %v4078_v40 = vsel %vm9863_vm3, %v4073_v17, %v4077_v58  ;;  %v12561_v54 = vrot.slane %v11401_v41, 5  ;;  %v4093_v35 = vshrl.u32 %v3738_v34, 16  ;;  %v4661_v5 = vld [vmem:[#allocation2 + $0x6c] sm:$0xf] }
 0x3cb   : > { %12559 = vst [vmem:[#allocation25_spill] sm:$0xff] %v11453_v19  ;;  %v11465_v16 = vadd.f32 %v7919_v46, %v7918_v13  ;;  %6706 = vmatprep.mubr.bf16.mxu0 %v11349_v24  ;;  %v4068_v26 = vsel %vm9863_vm3, %v4063_v3, %v11410_v42  ;;  %v11483_v59 = vld [vmem:[#allocation2 + $0xc4] sm:$0xf]  ;;  %v4866_v50 = vshll.u32 %v4662_v10, 16  ;;  %v4870_v8 = vshrl.u32 %v4662_v10, 16 }
 0x3cc   : > { %v11476_v1 = vsel %vm9959_vm6, %v7582_v27, %v12561_v54  ;;  %v4839_v41 = vor.u32 %v4838_v0, %v4835_v38  ;;  %v4849_v14 = vor.u32 %v4848_v4, %v11463_v31  ;;  %v4852_v27 = vshll.u32 %v4660_v63, 16  ;;  %v3741_v3 = vld [vmem:[#allocation2 + $0xc4] sm:$0xf]  ;;  %v4663_v0 = vld [vmem:[#allocation2 + $0x74] sm:$0x1] }
 0x3cd   : > { %v8033_v29 = vpop.f32.mrb[64].mxu0  ;;  %v4082_v34 = vrot.slane %v4080_v25, 4  ;;  %v11488_v46 = vcombine.low %v4068_v26, %v4078_v40  ;;  %v4085_v42 = vrot.slane %v4083_v9, 5  ;;  %v11490_v2 = vrot.slane %v4089_v45, 5  ;;  %v8718_v40 = vld [vmem:[#allocation2 + $0x3c] sm:$0xff]  }
 0x3ce   : > { %v8034_v53 = vpop.f32.mrb[65].mxu0  ;;  %v4095_v10 = vrot.slane %v4093_v35, 4  ;;  %v4857_v4 = vshrl.u32 %v4661_v5, 16  ;;  %v4860_v63 = vshll.u32 %v4661_v5, 16  ;;  %6602 = vmatmul.mubr.bf16.gmra.mrb[120].mxu1 %v11298_v52  ;;  %v11498_v9 = vld [vmem:[#allocation2 + $0xc0] sm:$0xe]  ;;  %v12564_v35 = vcombine.low %v11294_v55, %v11269_v22 }
 0x3cf   : > { %v7921_v17 = vpop.f32.mrb[48].mxu1  ;;  %v11486_v58 = vadd.f32 %v8034_v53, %v8033_v29  ;;  %v8036_v13 = vpop.f32.mrb[66].mxu0  ;;  %v11500_v45 = vrot.slane %v4866_v50, 5  ;;  %v4872_v26 = vrot.slane %v4870_v8, 4  ;;  %v4840_v38 = vrot.slane %v4839_v41, 4 }
 0x3d0   : > { %v7922_v54 = vpop.f32.mrb[49].mxu1  ;;  %v8037_v24 = vpop.f32.mrb[67].mxu0  ;;  %6609 = vmatprep.mubr.bf16.mxu1 %v12564_v35  ;;  %v4850_v5 = vrot.slane %v4849_v14, 4  ;;  %v4254_v52 = vld [vmem:[#allocation2 + $0xc8] sm:$0x1]  ;;  %v4117_v11 = vshrl.u32 %v3741_v3, 16  ;;  %v4096_v50 = vor.u32 %v4095_v10, %v11490_v2 }
 0x3d1   : > { %12562 = vst [vmem:[#allocation26_spill] sm:$0xff] %v11486_v58  ;;  %v11493_v19 = vadd.f32 %v7922_v54, %v7921_v17  ;;  %v7924_v25 = vpop.f32.mrb[50].mxu1  ;;  %v11495_v29 = vadd.f32 %v8037_v24, %v8036_v13  ;;  %v4854_v17 = vrot.slane %v4852_v27, 5  ;;  %v4099_v54 = vshll.u32 %v3739_v43, 16  ;;  %v3740_v13 = vld [vmem:[#allocation2 + $0xc0] sm:$0xf] }
 0x3d2   : > { %v7925_v53 = vpop.f32.mrb[51].mxu1  ;;  %6707 = vmatmul.mubr.bf16.gmra.mrb[108].mxu0 %v8718_v40  ;;  %v4086_v24 = vor.u32 %v4085_v42, %v4082_v34  ;;  %v12565_v8 = vrot.slane %v11483_v59, 5  ;;  %v4859_v55 = vrot.slane %v4857_v4, 4  ;;  %v4862_v41 = vrot.slane %v4860_v63, 5 }
 0x3d3   : > { %12563 = vst [vmem:[#allocation27_spill] sm:$0xff] %v11495_v29  ;;  %v11505_v58 = vadd.f32 %v7925_v53, %v7924_v25  ;;  %v4113_v29 = vshll.u32 %v3741_v3, 16  ;;  %6714 = vmatprep.mubr.bf16.mxu0 %v11421_v6  ;;  %v4845_v27 = vsel %vm9863_vm3, %v4840_v38, %v11463_v31  ;;  %v7583_v43 = vrot.slane %v11498_v9, 9  ;;  %v4665_v53 = vld [vmem:[#allocation2 + $0x7c] sm:$0xf] }
 0x3d4   : > { %v4412_v22 = vrot.slane %v12565_v8, 4  ;;  %v4873_v34 = vor.u32 %v4872_v26, %v11500_v45  ;;  %v4876_v42 = vshll.u32 %v4663_v0, 16  ;;  %v4855_v6 = vsel %vm9863_vm3, %v4850_v5, %v4854_v17  ;;  %v4664_v17 = vld [vmem:[#allocation2 + $0x78] sm:$0xf] }
 0x3d5   : > { %v8039_v14 = vpop.f32.mrb[68].mxu0  ;;  %v4413_v10 = vrot.slane %v4254_v52, 5  ;;  %v4104_v25 = vshrl.u32 %v3740_v13, 16  ;;  %v4107_v40 = vshll.u32 %v3740_v13, 16  ;;  %v4101_v8 = vrot.slane %v4099_v54, 5 }
 0x3d6   : > { %v8040_v3 = vpop.f32.mrb[69].mxu0  ;;  %v11520_v32 = vrot.slane %v4113_v29, 5  ;;  %v4119_v31 = vrot.slane %v4117_v11, 4  ;;  %v4087_v26 = vrot.slane %v4086_v24, 4  ;;  %v4097_v0 = vrot.slane %v4096_v50, 4  ;;  %6610 = vmatmul.mubr.bf16.gmra.mrb[124].mxu1 %v11366_v18  ;;  %v8719_v29 = vld [vmem:[#allocation2 + $0x48] sm:$0xff]  }
 0x3d7   : > { %v7927_v4 = vpop.f32.mrb[52].mxu1  ;;  %v11518_v63 = vadd.f32 %v8040_v3, %v8039_v14  ;;  %v8042_v35 = vpop.f32.mrb[70].mxu0  ;;  %v11524_v21 = vsel %vm9959_vm6, %v4412_v22, %v4413_v10  ;;  %v4863_v5 = vor.u32 %v4862_v41, %v4859_v55  ;;  %v4874_v54 = vrot.slane %v4873_v34, 4  ;;  %v3742_v3 = vld [vmem:[#allocation2 + $0xc8] sm:$0x1] }
 0x3d8   : > { %v7928_v38 = vpop.f32.mrb[53].mxu1  ;;  %v8043_v9 = vpop.f32.mrb[71].mxu0  ;;  %v4878_v11 = vrot.slane %v4876_v42, 5  ;;  %v12568_v24 = vcombine.low %v11345_v49, %v11322_v37  ;;  %v4106_v50 = vrot.slane %v4104_v25, 4  ;;  %v4109_v22 = vrot.slane %v4107_v40, 5 }
 0x3d9   : > { %12566 = vst [vmem:[#allocation28_spill] sm:$0xff] %v11518_v63  ;;  %v11526_v52 = vadd.f32 %v7928_v38, %v7927_v4  ;;  %v7930_v13 = vpop.f32.mrb[54].mxu1  ;;  %v11528_v14 = vadd.f32 %v8043_v9, %v8042_v35  ;;  %v4890_v55 = vshll.u32 %v4665_v53, 16  ;;  %v4894_v41 = vshrl.u32 %v4665_v53, 16  ;;  %v4668_v9 = vld [vmem:[#allocation2 + $0x88] sm:$0xf] }
 0x3da   : > { %v7931_v63 = vpop.f32.mrb[55].mxu1  ;;  %6617 = vmatprep.mubr.bf16.mxu1 %v12568_v24  ;;  %6715 = vmatmul.mubr.bf16.gmra.mrb[112].mxu0 %v8719_v29  ;;  %v4120_v4 = vor.u32 %v4119_v31, %v11520_v32  ;;  %v4881_v35 = vshrl.u32 %v4664_v17, 16  ;;  %v4884_v18 = vshll.u32 %v4664_v17, 16  ;;  %v7622_v34 = vcombine.low %v4845_v27, %v4855_v6  ;;  %v11553_v6 = vld [vmem:[#allocation2 + $0x1c] sm:$0xf] }
 0x3db   : > { %12567 = vst [vmem:[#allocation29_spill] sm:$0xff] %v11528_v14  ;;  %v11534_v10 = vadd.f32 %v7931_v63, %v7930_v13  ;;  %6722 = vmatprep.mubr.bf16.mxu0 %v11468_v62  ;;  %v4092_v42 = vsel %vm9863_vm3, %v4087_v26, %v11490_v2  ;;  %v12569_v37 = vrot.slane %v11483_v59, 5  ;;  %v4864_v25 = vrot.slane %v4863_v5, 4  ;;  %v11648_v63 = vld [vmem:[#allocation2 + $0x4c] sm:$0xf] }
 0x3dc   : > { %v4102_v53 = vsel %vm9863_vm3, %v4097_v0, %v4101_v8  ;;  %v4879_v62 = vsel %vm9863_vm3, %v4874_v54, %v4878_v11  ;;  %v4123_v27 = vshll.u32 %v3742_v3, 16  ;;  %v11558_v31 = vrot.slane %v4890_v55, 5 }
 0x3dd   : > { %v11545_v49 = vsel %vm9959_vm6, %v7583_v43, %v12569_v37  ;;  %v8045_v40 = vpop.f32.mrb[72].mxu0  ;;  %v4869_v59 = vsel %vm9863_vm3, %v4864_v25, %v11500_v45  ;;  %v4110_v43 = vor.u32 %v4109_v22, %v4106_v50  ;;  %v4896_v38 = vrot.slane %v4894_v41, 4  ;;  %v4666_v50 = vld [vmem:[#allocation2 + $0x80] sm:$0x1]  ;;  %v5152_v22 = vld [vmem:[#allocation2 + $0x18] sm:$0xe] }
 0x3de   : > { %v8046_v2 = vpop.f32.mrb[73].mxu0  ;;  %v4121_v5 = vrot.slane %v4120_v4, 4  ;;  %v4883_v17 = vrot.slane %v4881_v35, 4  ;;  %v4886_v13 = vrot.slane %v4884_v18, 5  ;;  %v11564_v29 = vadd.f32 %v11238_v48, %v11370_v47  ;;  %6618 = vmatmul.mubr.bf16.gmra.mrb[128].mxu1 %v11440_v36  ;;  %v8721_v47 = vld [vmem:[#allocation2 + $0x54] sm:$0xff]  }
 0x3df   : > { %v7933_v8 = vpop.f32.mrb[56].mxu1  ;;  %v11560_v26 = vadd.f32 %v8046_v2, %v8045_v40  ;;  %v8048_v0 = vpop.f32.mrb[74].mxu0  ;;  %v11568_v54 = vadd.f32 %v11238_v48, %v11387_v57  ;;  %v11570_v3 = vcombine.low %v4092_v42, %v4102_v53  ;;  %v11572_v24 = vcombine.low %v4869_v59, %v4879_v62  ;;  %v4667_v18 = vld [vmem:[#allocation2 + $0x84] sm:$0xf]  ;;  %v5156_v53 = vld [vmem:[#allocation2 + $0x28] sm:$0xf] }
 0x3e0   : > { %v7934_v45 = vpop.f32.mrb[57].mxu1  ;;  %v8049_v11 = vpop.f32.mrb[75].mxu0  ;;  %v4125_v35 = vrot.slane %v4123_v27, 5  ;;  %v5250_v57 = vrot.slane %v11553_v6, 5  ;;  %v12572_v42 = vcombine.low %v11429_v60, %v11407_v61  ;;  %v4111_v25 = vrot.slane %v4110_v43, 4 }
 0x3e1   : > { %12570 = vst [vmem:[#allocation30_spill] sm:$0xff] %v11560_v26  ;;  %v11574_v55 = vadd.f32 %v7934_v45, %v7933_v8  ;;  %v7936_v41 = vpop.f32.mrb[58].mxu1  ;;  %v11576_v4 = vadd.f32 %v8049_v11, %v8048_v0  ;;  %v4897_v40 = vor.u32 %v4896_v38, %v11558_v31  ;;  %v4914_v62 = vshll.u32 %v4668_v9, 16  ;;  %v5154_v60 = vld [vmem:[#allocation2 + $0x20] sm:$0x1] }
 0x3e2   : > { %v7937_v37 = vpop.f32.mrb[59].mxu1  ;;  %6625 = vmatprep.mubr.bf16.mxu1 %v12572_v42  ;;  %v4918_v2 = vshrl.u32 %v4668_v9, 16  ;;  %6723 = vmatmul.mubr.bf16.gmra.mrb[116].mxu0 %v8721_v47  ;;  %v4126_v36 = vsel %vm9863_vm3, %v4121_v5, %v4125_v35  ;;  %v4887_v27 = vor.u32 %v4886_v13, %v4883_v17  ;;  %v4900_v6 = vshll.u32 %v4666_v50, 16  ;;  %v5155_v43 = vld [vmem:[#allocation2 + $0x24] sm:$0xe] }
 0x3e3   : > { %12571 = vst [vmem:[#allocation31_spill] sm:$0xff] %v11576_v4  ;;  %v11584_v59 = vadd.f32 %v7937_v37, %v7936_v41  ;;  %v11590_v8 = vadd.f32 %v11238_v48, %v11412_v7  ;;  %6730 = vmatprep.mubr.bf16.mxu0 %v7622_v34  ;;  %v4116_v61 = vsel %vm9863_vm3, %v4111_v25, %v11520_v32  ;;  %v4905_v38 = vshrl.u32 %v4667_v18, 16  ;;  %v5157_v13 = vld [vmem:[#allocation2 + $0x2c] sm:$0x1]  ;;  %v11599_v11 = vld [vmem:[#allocation2 + $0x34] sm:$0xf] }
 0x3e4   : > { %v4908_v9 = vshll.u32 %v4667_v18, 16  ;;  %v11597_v0 = vadd.f32 %v11238_v48, %v11431_v20  ;;  %v7632_v5 = vrot.slane %v5152_v22, 9  ;;  %v5252_v17 = vrot.slane %v5250_v57, 4  ;;  %v11605_v41 = vld [vmem:[#allocation2 + $0x40] sm:$0xf] }
 0x3e5   : > { %12573 = vst [vmem:[#allocation32_spill] sm:$0xff] %v11584_v59  ;;  %v5257_v45 = vrot.slane %v5156_v53, 5  ;;  %v11601_v7 = vcombine.low %v4116_v61, %v4126_v36  ;;  %v4898_v34 = vrot.slane %v4897_v40, 4  ;;  %v11603_v50 = vrot.slane %v4914_v62, 5  ;;  %v4671_v61 = vld [vmem:[#allocation2 + $0x94] sm:$0xf] }
 0x3e6   : > { %v4920_v32 = vrot.slane %v4918_v2, 4  ;;  %v4888_v35 = vrot.slane %v4887_v27, 4  ;;  %v4902_v18 = vrot.slane %v4900_v6, 5  ;;  %v5253_v37 = vrot.slane %v5154_v60, 5  ;;  %6626 = vmatmul.mubr.bf16.gmra.mrb[132].mxu1 %v11488_v46  ;;  %v8722_v2 = vld [vmem:[#allocation2 + $0x60] sm:$0xff]  }
 0x3e7   : > { %v7939_v47 = vpop.f32.mrb[60].mxu1  ;;  %v7633_v20 = vrot.slane %v5155_v43, 9  ;;  %v11609_v22 = vsel %vm9959_vm6, %v7632_v5, %v5250_v57  ;;  %v5260_v25 = vrot.slane %v5157_v13, 5  ;;  %v4907_v53 = vrot.slane %v4905_v38, 4  ;;  %v4669_v57 = vld [vmem:[#allocation2 + $0x8c] sm:$0x1] }
 0x3e8   : > { %v7940_v42 = vpop.f32.mrb[61].mxu1  ;;  %v4910_v36 = vrot.slane %v4908_v9, 5  ;;  %v4893_v27 = vsel %vm9863_vm3, %v4888_v35, %v11558_v31  ;;  %v11617_v6 = vsel %vm9959_vm6, %v5252_v17, %v5253_v37  ;;  %v5259_v60 = vrot.slane %v5257_v45, 4  ;;  %v5158_v5 = vld [vmem:[#allocation2 + $0x30] sm:$0xe] }
 0x3e9   : > { %v7941_v40 = vadd.f32 %v7940_v42, %v7939_v47  ;;  %v7942_v62 = vpop.f32.mrb[62].mxu1  ;;  %v12574_v38 = vcombine.low %v11476_v1, %v11458_v44  ;;  %v4903_v9 = vsel %vm9863_vm3, %v4898_v34, %v4902_v18  ;;  %v11626_v46 = vsel %vm9959_vm6, %v7633_v20, %v5257_v45  ;;  %v4670_v13 = vld [vmem:[#allocation2 + $0x90] sm:$0xf]  ;;  %v5160_v35 = vld [vmem:[#allocation2 + $0x38] sm:$0x1] }
 0x3ea   : > { %v7943_v43 = vpop.f32.mrb[63].mxu1  ;;  %v4921_v31 = vor.u32 %v4920_v32, %v11603_v50  ;;  %v5264_v17 = vrot.slane %v11599_v11, 5  ;;  %6731 = vmatmul.mubr.bf16.gmra.mrb[120].mxu0 %v8722_v2  ;;  %v5271_v37 = vrot.slane %v11605_v41, 5  ;;  %v4938_v44 = vshll.u32 %v4671_v61, 16  ;;  %v5163_v20 = vld [vmem:[#allocation2 + $0x44] sm:$0x1] }
 0x3eb   : > { %6633 = vmatprep.mubr.bf16.mxu1 %v12574_v38  ;;  %v7944_v47 = vadd.f32 %v7943_v43, %v7942_v62  ;;  %v4942_v1 = vshrl.u32 %v4671_v61, 16  ;;  %v11633_v34 = vadd.f32 %v11238_v48, %v11451_v33  ;;  %6738 = vmatprep.mubr.bf16.mxu0 %v11572_v24  ;;  %v4911_v32 = vor.u32 %v4910_v36, %v4907_v53  ;;  %v5161_v38 = vld [vmem:[#allocation2 + $0x3c] sm:$0xe]  ;;  %v4672_v59 = vld [vmem:[#allocation2 + $0x98] sm:$0x1] }
 0x3ec   : > { %v4924_v18 = vshll.u32 %v4669_v57, 16  ;;  %v11640_v11 = vadd.f32 %v11238_v48, %v11465_v16  ;;  %v11644_v41 = vsel %vm9959_vm6, %v5259_v60, %v5260_v25  ;;  %v4929_v42 = vshrl.u32 %v4670_v13, 16 }
 0x3ed   : > { %v4932_v61 = vshll.u32 %v4670_v13, 16  ;;  %v7624_v62 = vcombine.low %v4893_v27, %v4903_v9  ;;  %v7634_v2 = vrot.slane %v5158_v5, 9  ;;  %v5266_v24 = vrot.slane %v5264_v17, 4  ;;  %v8724_v9 = vld [vmem:[#allocation2 + $0x6c] sm:$0xff]  }
 0x3ee   : > { %v8051_v33 = vpop.f32.mrb[76].mxu0  ;;  %v5267_v43 = vrot.slane %v5160_v35, 5  ;;  %v4922_v53 = vrot.slane %v4921_v31, 4  ;;  %v5273_v36 = vrot.slane %v5271_v37, 4  ;;  %v11646_v57 = vrot.slane %v4938_v44, 5  ;;  %6634 = vmatmul.mubr.bf16.gmra.mrb[136].mxu1 %v11570_v3 }
 0x3ef   : > { %v8052_v45 = vpop.f32.mrb[77].mxu0  ;;  %v4944_v16 = vrot.slane %v4942_v1, 4  ;;  %v6290_v25 = vadd.f32 %v11238_v48, %v7941_v40  ;;  %v4912_v26 = vrot.slane %v4911_v32, 4  ;;  %v4926_v13 = vrot.slane %v4924_v18, 5 }
 0x3f0   : > { %v8053_v60 = vadd.f32 %v8052_v45, %v8051_v33  ;;  %v8054_v4 = vpop.f32.mrb[78].mxu0  ;;  %v7635_v5 = vrot.slane %v5161_v38, 9  ;;  %v5274_v35 = vrot.slane %v5163_v20, 5  ;;  %v4931_v31 = vrot.slane %v4929_v42, 4  ;;  %v5164_v20 = vld [vmem:[#allocation2 + $0x48] sm:$0xe] }
 0x3f1   : > { %v8055_v27 = vpop.f32.mrb[79].mxu0  ;;  %v4934_v14 = vrot.slane %v4932_v61, 5  ;;  %v6293_v44 = vadd.f32 %v11238_v48, %v7944_v47  ;;  %v12575_v1 = vcombine.low %v11545_v49, %v11524_v21  ;;  %v11660_v32 = vsel %vm9959_vm6, %v5266_v24, %v5267_v43  ;;  %v4674_v61 = vld [vmem:[#allocation2 + $0xa0] sm:$0xf]  ;;  %v5167_v24 = vld [vmem:[#allocation2 + $0x54] sm:$0xe] }
 0x3f2   : > { %v11656_v40 = vadd.f32 %v8053_v60, %v6290_v25  ;;  %v8056_v45 = vadd.f32 %v8055_v27, %v8054_v4  ;;  %6739 = vmatmul.mubr.bf16.gmra.mrb[124].mxu0 %v8724_v9  ;;  %v4927_v3 = vsel %vm9863_vm3, %v4922_v53, %v4926_v13  ;;  %v11666_v18 = vsel %vm9959_vm6, %v5273_v36, %v5274_v35  ;;  %v11681_v33 = vld [vmem:[%s12451_s8] ss:$0 sm:$0xff]  ;;  %v5168_v43 = vld [vmem:[#allocation2 + $0x58] sm:$0xf] }
 0x3f3   : > { %6641 = vmatprep.mubr.bf16.mxu1 %v12575_v1  ;;  %v4945_v48 = vor.u32 %v4944_v16, %v11646_v57  ;;  %v4948_v47 = vshll.u32 %v4672_v59, 16  ;;  %6746 = vmatprep.mubr.bf16.mxu0 %v7624_v62  ;;  %v11675_v4 = vsel %vm9959_vm6, %v7634_v2, %v5264_v17  ;;  %v5278_v42 = vrot.slane %v11648_v63, 5  ;;  %v5166_v63 = vld [vmem:[#allocation2 + $0x50] sm:$0x1]  ;;  %v11702_v16 = vld [vmem:[#allocation2 + $0x64] sm:$0xf] }
 0x3f4   : > { %12576 = vst [vmem:[#allocation33_spill] sm:$0xff] %v11656_v40  ;;  %v11669_v21 = vadd.f32 %v8056_v45, %v6293_v44  ;;  %v11685_v59 = vadd.f32 %v11681_v33, %v11493_v19  ;;  %v4917_v62 = vsel %vm9863_vm3, %v4912_v26, %v11603_v50  ;;  %v11692_v17 = vsel %vm9959_vm6, %v7635_v5, %v5271_v37  ;;  %v4673_v50 = vld [vmem:[#allocation2 + $0x9c] sm:$0xf]  ;;  %v4677_v26 = vld [vmem:[#allocation2 + $0xac] sm:$0xf] }
 0x3f5   : > { %v4935_v2 = vor.u32 %v4934_v14, %v4931_v31  ;;  %v11696_v38 = vadd.f32 %v11681_v33, %v11505_v58  ;;  %v7625_v36 = vcombine.low %v4917_v62, %v4927_v3  ;;  %v4946_v14 = vrot.slane %v4945_v48, 4  ;;  %v8725_v3 = vld [vmem:[#allocation2 + $0x78] sm:$0xff]  }
 0x3f6   : > { %12577 = vst [vmem:[#allocation34_spill] sm:$0xff] %v11669_v21  ;;  %v8057_v53 = vpop.f32.mrb[80].mxu0  ;;  %v4950_v25 = vrot.slane %v4948_v47, 5  ;;  %v4962_v60 = vshll.u32 %v4674_v61, 16  ;;  %v4966_v13 = vshrl.u32 %v4674_v61, 16  ;;  %v7636_v5 = vrot.slane %v5164_v20, 9  ;;  %6642 = vmatmul.mubr.bf16.gmra.mrb[140].mxu1 %v11601_v7 }
 0x3f7   : > { %v8058_v37 = vpop.f32.mrb[81].mxu0  ;;  %v5280_v35 = vrot.slane %v5278_v42, 4  ;;  %v5285_v31 = vrot.slane %v5168_v43, 5  ;;  %v11708_v44 = vadd.f32 %v11681_v33, %v11526_v52  ;;  %v4936_v48 = vrot.slane %v4935_v2, 4  ;;  %v5169_v2 = vld [vmem:[#allocation2 + $0x5c] sm:$0x1] }
 0x3f8   : > { %v11704_v9 = vadd.f32 %v8058_v37, %v8057_v53  ;;  %v8060_v58 = vpop.f32.mrb[82].mxu0  ;;  %v5281_v47 = vrot.slane %v5166_v63, 5  ;;  %v7637_v62 = vrot.slane %v5167_v24, 9  ;;  %v12579_v61 = vcombine.low %v11609_v22, %v11617_v6 }
 0x3f9   : > { %v8061_v45 = vpop.f32.mrb[83].mxu0  ;;  %v4953_v37 = vshrl.u32 %v4673_v50, 16  ;;  %v4956_v52 = vshll.u32 %v4673_v50, 16  ;;  %v4951_v7 = vsel %vm9863_vm3, %v4946_v14, %v4950_v25  ;;  %v11720_v63 = vrot.slane %v4962_v60, 5  ;;  %v4675_v25 = vld [vmem:[#allocation2 + $0xa4] sm:$0x1] }
 0x3fa   : > { %v7945_v27 = vpop.f32.mrb[64].mxu1  ;;  %12578 = vst [vmem:[#allocation35_spill] sm:$0xff] %v11704_v9  ;;  %8441 = vmatprep.mubr.bf16.mxu1 %v12579_v61  ;;  %v11716_v43 = vadd.f32 %v8061_v45, %v8060_v58  ;;  %6747 = vmatmul.mubr.bf16.gmra.mrb[128].mxu0 %v8725_v3  ;;  %v4968_v24 = vrot.slane %v4966_v13, 4  ;;  %v5292_v22 = vrot.slane %v11702_v16, 5  ;;  %v11731_v50 = vsel %vm9959_vm6, %v5280_v35, %v5281_v47  ;;  %v5170_v60 = vld [vmem:[#allocation2 + $0x60] sm:$0xe] }
 0x3fb   : > { %v7946_v1 = vpop.f32.mrb[65].mxu1  ;;  %6754 = vmatprep.mubr.bf16.mxu0 %v7625_v36  ;;  %v11735_v14 = vsel %vm9959_vm6, %v7637_v62, %v5285_v31  ;;  %v11737_v13 = vld [vmem:[#allocation2 + $0x70] sm:$0xf]  ;;  %v4941_v36 = vsel %vm9863_vm3, %v4936_v48, %v11646_v57  ;;  %v4676_v16 = vld [vmem:[#allocation2 + $0xa8] sm:$0xf]  ;;  %v4990_v58 = vshrl.u32 %v4677_v26, 16 }
 0x3fc   : > { %v11714_v53 = vadd.f32 %v7946_v1, %v7945_v27  ;;  %v7948_v20 = vpop.f32.mrb[66].mxu1  ;;  %12580 = vst [vmem:[#allocation36_spill] sm:$0xff] %v11716_v43  ;;  %v11727_v27 = vsel %vm9959_vm6, %v7636_v5, %v5278_v42  ;;  %v4986_v42 = vshll.u32 %v4677_v26, 16  ;;  %v7626_v1 = vcombine.low %v4941_v36, %v4951_v7  ;;  %v5172_v47 = vld [vmem:[#allocation2 + $0x68] sm:$0x1] }
 0x3fd   : > { %v7949_v19 = vpop.f32.mrb[67].mxu1  ;;  %v5288_v35 = vrot.slane %v5169_v2, 5  ;;  %v4955_v45 = vrot.slane %v4953_v37, 4  ;;  %v4958_v3 = vrot.slane %v4956_v52, 5  ;;  %v4972_v49 = vshll.u32 %v4675_v25, 16  ;;  %v8726_v48 = vld [vmem:[#allocation2 + $0x84] sm:$0xff]  }
 0x3fe   : > { %v11723_v6 = vadd.f32 %v7949_v19, %v7948_v20  ;;  %v5287_v19 = vrot.slane %v5285_v31, 4  ;;  %v8063_v5 = vpop.f32.mrb[84].mxu0  ;;  %v4969_v20 = vor.u32 %v4968_v24, %v11720_v63  ;;  %v5294_v21 = vrot.slane %v5292_v22, 4  ;;  %v5173_v26 = vld [vmem:[#allocation2 + $0x6c] sm:$0xe] }
 0x3ff   : > { %v8064_v62 = vpop.f32.mrb[85].mxu0  ;;  %v5299_v7 = vrot.slane %v11737_v13, 5  ;;  %v4977_v2 = vshrl.u32 %v4676_v16, 16  ;;  %v4980_v37 = vshll.u32 %v4676_v16, 16  ;;  %v12582_v52 = vcombine.low %v11626_v46, %v11644_v41  ;;  %v5175_v16 = vld [vmem:[#allocation2 + $0x74] sm:$0x1] }
 0x400   : > { %v11745_v57 = vadd.f32 %v8064_v62, %v8063_v5  ;;  %v8066_v31 = vpop.f32.mrb[86].mxu0  ;;  %v7638_v43 = vrot.slane %v5170_v60, 9  ;;  %v5295_v24 = vrot.slane %v5172_v47, 5  ;;  %v11751_v25 = vrot.slane %v4986_v42, 5  ;;  %v4679_v60 = vld [vmem:[#allocation2 + $0xb4] sm:$0xf] }
 0x401   : > { %8442 = vmatmul.mubr.bf16.vlgmr.msra.gmra.mrb[144].mxu1 %v12582_v52  ;;  %v8067_v61 = vpop.f32.mrb[87].mxu0  ;;  %v4992_v9 = vrot.slane %v4990_v58, 4  ;;  %v12583_v5 = vcombine.low %v11675_v4, %v11660_v32  ;;  %v11762_v46 = vsel %vm9959_vm6, %v5287_v19, %v5288_v35  ;;  %v4959_v41 = vor.u32 %v4958_v3, %v4955_v45  ;;  %v4680_v4 = vld [vmem:[#allocation2 + $0xb8] sm:$0xf]  ;;  %v4678_v35 = vld [vmem:[#allocation2 + $0xb0] sm:$0x1] }
 0x402   : > { %v7951_v40 = vpop.f32.mrb[68].mxu1  ;;  %12581 = vst [vmem:[#allocation37_spill] sm:$0xff] %v11745_v57  ;;  %v11758_v57 = vadd.f32 %v8067_v61, %v8066_v31  ;;  %6755 = vmatmul.mubr.bf16.gmra.mrb[132].mxu0 %v8726_v48  ;;  %v4970_v42 = vrot.slane %v4969_v20, 4  ;;  %v4974_v58 = vrot.slane %v4972_v49, 5  ;;  %v11766_v32 = vsel %vm9959_vm6, %v7638_v43, %v5292_v22  ;;  %v11775_v22 = vld [vmem:[#allocation2 + $0x7c] sm:$0xf] }
 0x403   : > { %v7952_v36 = vpop.f32.mrb[69].mxu1  ;;  %8445 = vmatprep.mubr.bf16.mxu1 %v12583_v5  ;;  %6762 = vmatprep.mubr.bf16.mxu0 %v7626_v1  ;;  %v5301_v19 = vrot.slane %v5299_v7, 4  ;;  %v4979_v45 = vrot.slane %v4977_v2, 4  ;;  %v4982_v3 = vrot.slane %v4980_v37, 5  ;;  %v7639_v31 = vrot.slane %v5173_v26, 9 }
 0x404   : > { %v11756_v62 = vadd.f32 %v7952_v36, %v7951_v40  ;;  %v7954_v13 = vpop.f32.mrb[70].mxu1  ;;  %v11770_v40 = vsel %vm9959_vm6, %v5294_v21, %v5295_v24  ;;  %v4993_v20 = vor.u32 %v4992_v9, %v11751_v25  ;;  %v5001_v49 = vshrl.u32 %v4679_v60, 16 }
 0x405   : > { %v7955_v47 = vpop.f32.mrb[71].mxu1  ;;  %v5004_v48 = vshll.u32 %v4679_v60, 16  ;;  %v4960_v52 = vrot.slane %v4959_v41, 4  ;;  %v5302_v43 = vrot.slane %v5175_v16, 5  ;;  %v5010_v36 = vshll.u32 %v4680_v4, 16  ;;  %v8727_v60 = vld [vmem:[#allocation2 + $0x90] sm:$0xff]  }
 0x406   : > { %v11772_v61 = vadd.f32 %v7955_v47, %v7954_v13  ;;  %v5014_v21 = vshrl.u32 %v4680_v4, 16  ;;  %v7653_v24 = vcombine.low %v11735_v14, %v11762_v46  ;;  %v4975_v1 = vsel %vm9863_vm3, %v4970_v42, %v4974_v58  ;;  %v11794_v46 = vld [vmem:[#allocation2 + $0x78] sm:$0xe] }
 0x407   : > { %v7654_v2 = vcombine.low %v11766_v32, %v11770_v40  ;;  %v4996_v26 = vshll.u32 %v4678_v35, 16  ;;  %v4965_v9 = vsel %vm9863_vm3, %v4960_v52, %v11720_v63  ;;  %v11788_v5 = vsel %vm9959_vm6, %v7639_v31, %v5299_v7  ;;  %v12587_v31 = vld [vmem:[#allocation11_spill] sm:$0xff] }
 0x408   : > { %v11792_v13 = vsel %vm9959_vm6, %v5301_v19, %v5302_v43  ;;  %v4983_v14 = vor.u32 %v4982_v3, %v4979_v45  ;;  %v12584_v41 = vcombine.low %v11692_v17, %v11666_v18  ;;  %v4994_v47 = vrot.slane %v4993_v20, 4  ;;  %v12586_v3 = vld [vmem:[#allocation9_spill] sm:$0xff] }
 0x409   : > { %v5306_v63 = vrot.slane %v11775_v22, 5  ;;  %v5003_v42 = vrot.slane %v5001_v49, 4  ;;  %v5006_v58 = vrot.slane %v5004_v48, 5  ;;  %v12585_v7 = vcombine.low %v11727_v27, %v11731_v50  ;;  %v12588_v49 = vld [vmem:[#allocation10_spill] sm:$0xff]  ;;  %v12589_v27 = vld [vmem:[#allocation12_spill] sm:$0xff]  ;;  %v12614_v15 = vld [vmem:[#allocation37_spill] sm:$0xff] }
 0x40a   : > { %v7957_v37 = vpop.f32.mrb[72].mxu1  ;;  %8446 = vmatmul.mubr.bf16.gmra.mrb[148].mxu1 %v12584_v41  ;;  %v7627_v4 = vcombine.low %v4965_v9, %v4975_v1  ;;  %v11805_v19 = vrot.slane %v5010_v36, 5  ;;  %v5016_v35 = vrot.slane %v5014_v21, 4  ;;  %6763 = vmatmul.mubr.bf16.gmra.mrb[136].mxu0 %v8727_v60  ;;  %v4998_v45 = vrot.slane %v4996_v26, 5  ;;  %v4683_v36 = vld [vmem:[#allocation2 + $0xc4] sm:$0xf] }
 0x40b   : > { %v7958_v16 = vpop.f32.mrb[73].mxu1  ;;  %8449 = vmatprep.mubr.bf16.mxu1 %v12585_v7  ;;  %v11811_v20 = vadd.f32 %v12587_v31, %v12586_v3  ;;  %v11815_v50 = vadd.f32 %v12589_v27, %v12588_v49  ;;  %v4984_v52 = vrot.slane %v4983_v14, 4  ;;  %v7640_v43 = vrot.slane %v11794_v46, 9  ;;  %v12590_v21 = vld [vmem:[#allocation15_spill] sm:$0xff]  ;;  %v4681_v9 = vld [vmem:[#allocation2 + $0xbc] sm:$0x1] }
 0x40c   : > { %v11803_v32 = vadd.f32 %v7958_v16, %v7957_v37  ;;  %v7960_v40 = vpop.f32.mrb[74].mxu1  ;;  %6770 = vmatprep.mubr.bf16.mxu0 %v7627_v4  ;;  %v11822_v1 = vadd.f32 %v12590_v21, %v11242_v23  ;;  %v4999_v26 = vsel %vm9863_vm3, %v4994_v47, %v4998_v45  ;;  %v5308_v37 = vrot.slane %v5306_v63, 4  ;;  %v12591_v16 = vld [vmem:[#allocation16_spill] sm:$0xff]  ;;  %v12592_v7 = vld [vmem:[#allocation18_spill] sm:$0xff]  ;;  %v12593_v23 = vld [vmem:[#allocation19_spill] sm:$0xff] }
 0x40d   : > { %v7961_v18 = vpop.f32.mrb[75].mxu1  ;;  %v5007_v41 = vor.u32 %v5006_v58, %v5003_v42  ;;  %v11830_v60 = vadd.f32 %v12591_v16, %v11280_v30  ;;  %v5178_v14 = vld [vmem:[#allocation2 + $0x80] sm:$0x1]  ;;  %v5017_v46 = vor.u32 %v5016_v35, %v11805_v19  ;;  %v11839_v4 = vadd.f32 %v12593_v23, %v11338_v28  ;;  %v12594_v47 = vld [vmem:[#allocation21_spill] sm:$0xff]  ;;  %v12595_v45 = vld [vmem:[#allocation22_spill] sm:$0xff] }
 0x40e   : > { %v11817_v48 = vadd.f32 %v7961_v18, %v7960_v40  ;;  %v11835_v40 = vadd.f32 %v12592_v7, %v11334_v39  ;;  %v11843_v18 = vadd.f32 %v12594_v47, %v11377_v12  ;;  %v11845_v42 = vld [vmem:[#allocation2 + $0x88] sm:$0xf]  ;;  %v5034_v58 = vshll.u32 %v4683_v36, 16  ;;  %v4682_v49 = vld [vmem:[#allocation2 + $0xc0] sm:$0xf] }
 0x40f   : > { %v5038_v30 = vshrl.u32 %v4683_v36, 16  ;;  %v11849_v3 = vadd.f32 %v12595_v45, %v11385_v56  ;;  %v12596_v35 = vld [vmem:[#allocation14_spill] sm:$0xff]  ;;  %v5020_v31 = vshll.u32 %v4681_v9, 16  ;;  %v12597_v28 = vld [vmem:[#allocation13_spill] sm:$0xff]  ;;  %v12599_v36 = vld [vmem:[#allocation24_spill] sm:$0xff]  ;;  %v5309_v9 = vrot.slane %v5178_v14, 5 }
 0x410   : > { %v11853_v39 = vadd.f32 %v12596_v35, %v11564_v29  ;;  %v11857_v27 = vadd.f32 %v12597_v28, %v11568_v54  ;;  %v12598_v12 = vld [vmem:[#allocation17_spill] sm:$0xff]  ;;  %v11865_v16 = vadd.f32 %v12599_v36, %v11597_v0  ;;  %v4989_v29 = vsel %vm9863_vm3, %v4984_v52, %v11751_v25  ;;  %v11870_v7 = vld [vmem:[#allocation2 + $0x94] sm:$0xf]  ;;  %v4685_v23 = vld [vmem:[#allocation2 + $0xcc] sm:$0xf] }
 0x411   : > { %v11861_v21 = vadd.f32 %v12598_v12, %v11590_v8  ;;  %v8728_v56 = vld [vmem:[#allocation2 + $0x9c] sm:$0xff]   ;;  %v7628_v0 = vcombine.low %v4989_v29, %v4999_v26  ;;  %v5008_v35 = vrot.slane %v5007_v41, 4  ;;  %v5018_v28 = vrot.slane %v5017_v46, 4  ;;  %v4686_v12 = vld [vmem:[#allocation2 + $0xd0] sm:$0xf] }
 0x412   : > { %8450 = vmatmul.mubr.bf16.gmra.mrb[152].mxu1 %v7653_v24  ;;  %v12600_v54 = vld [vmem:[#allocation20_spill] sm:$0xff]  ;;  %v12601_v8 = vld [vmem:[#allocation25_spill] sm:$0xff]  ;;  %v12479_v24 = vrot.slane %v11845_v42, 5  ;;  %6771 = vmatmul.mubr.bf16.gmra.mrb[140].mxu0 %v8728_v56  ;;  %v5181_v25 = vld [vmem:[#allocation2 + $0x8c] sm:$0x1]  ;;  %v5025_v52 = vshrl.u32 %v4682_v49, 16 }
 0x413   : > { %v11874_v47 = vadd.f32 %v12600_v54, %v11633_v34  ;;  %v11878_v45 = vadd.f32 %v12601_v8, %v11640_v11  ;;  %8453 = vmatprep.mubr.bf16.mxu1 %v7654_v2  ;;  %v5028_v14 = vshll.u32 %v4682_v49, 16  ;;  %v11881_v36 = vrot.slane %v5034_v58, 5  ;;  %6778 = vmatprep.mubr.bf16.mxu0 %v7628_v0  ;;  %v12602_v26 = vld [vmem:[#allocation26_spill] sm:$0xff]  ;;  %v4684_v41 = vld [vmem:[#allocation2 + $0xc8] sm:$0x1] }
 0x414   : > { %v5040_v17 = vrot.slane %v5038_v30, 4  ;;  %v5310_v34 = vsel %vm9959_vm6, %v5308_v37, %v5309_v9  ;;  %v5022_v11 = vrot.slane %v5020_v31, 5  ;;  %v5320_v2 = vrot.slane %v11870_v7, 5  ;;  %v5179_v30 = vld [vmem:[#allocation2 + $0x84] sm:$0xe]  ;;  %v8729_v49 = vld [vmem:[#allocation2 + $0xa8] sm:$0xff]  }
 0x415   : > { %v11888_v29 = vadd.f32 %v12602_v26, %v11685_v59  ;;  %v5049_v46 = vshrl.u32 %v4685_v23, 16  ;;  %v5052_v56 = vshll.u32 %v4685_v23, 16  ;;  %v5058_v54 = vshll.u32 %v4686_v12, 16  ;;  %v5184_v7 = vld [vmem:[#allocation2 + $0x98] sm:$0x1] }
 0x416   : > { %v5062_v8 = vshrl.u32 %v4686_v12, 16  ;;  %v5307_v58 = vsel %vm9959_vm6, %v7640_v43, %v5306_v63  ;;  %v5315_v37 = vrot.slane %v12479_v24, 4  ;;  %v5316_v31 = vrot.slane %v5181_v25, 5  ;;  %v5182_v63 = vld [vmem:[#allocation2 + $0x90] sm:$0xe] }
 0x417   : > { %12603 = vst [vmem:[#allocation9_spill] sm:$0xff] %v11888_v29  ;;  %v5013_v59 = vsel %vm9863_vm3, %v5008_v35, %v11805_v19  ;;  %v5023_v9 = vsel %vm9863_vm3, %v5018_v28, %v5022_v11  ;;  %v5027_v23 = vrot.slane %v5025_v52, 4  ;;  %v5030_v0 = vrot.slane %v5028_v14, 5  ;;  %v11902_v26 = vld [vmem:[#allocation2 + $0xa0] sm:$0xf]  ;;  %v12604_v25 = vld [vmem:[#allocation27_spill] sm:$0xff] }
 0x418   : > { %v5041_v22 = vor.u32 %v5040_v17, %v11881_v36  ;;  %v7656_v12 = vcombine.low %v5307_v58, %v5310_v34  ;;  %v5322_v43 = vrot.slane %v5320_v2, 4  ;;  %v5044_v24 = vshll.u32 %v4684_v41, 16  ;;  %v11911_v35 = vld [vmem:[#allocation2 + $0xac] sm:$0xf] }
 0x419   : > { %v11906_v29 = vadd.f32 %v12604_v25, %v11696_v38  ;;  %v12605_v19 = vcombine.low %v11788_v5, %v11792_v13  ;;  %v5051_v28 = vrot.slane %v5049_v46, 4  ;;  %v5054_v52 = vrot.slane %v5052_v56, 5  ;;  %v4687_v38 = vld [vmem:[#allocation2 + $0xd4] sm:$0x1] }
 0x41a   : > { %v11913_v14 = vrot.slane %v5058_v54, 5  ;;  %v5064_v17 = vrot.slane %v5062_v8, 4  ;;  %v6277_v34 = vadd.f32 %v11681_v33, %v11534_v10  ;;  %v7641_v11 = vrot.slane %v5179_v30, 9  ;;  %6779 = vmatmul.mubr.bf16.gmra.mrb[144].mxu0 %v8729_v49  ;;  %v12606_v54 = vld [vmem:[#allocation28_spill] sm:$0xff] }
 0x41b   : > { %8454 = vmatmul.mubr.bf16.gmra.mrb[156].mxu1 %v12605_v19  ;;  %v7629_v41 = vcombine.low %v5013_v59, %v5023_v9  ;;  %v5323_v58 = vrot.slane %v5184_v7, 5  ;;  %v5317_v5 = vsel %vm9959_vm6, %v5315_v37, %v5316_v31  ;;  %v7642_v13 = vrot.slane %v5182_v63, 9 }
 0x41c   : > { %8457 = vmatprep.mubr.bf16.mxu1 %v7656_v12  ;;  %v5031_v25 = vor.u32 %v5030_v0, %v5027_v23  ;;  %v5042_v19 = vrot.slane %v5041_v22, 4  ;;  %v5327_v56 = vrot.slane %v11902_v26, 5  ;;  %v5334_v10 = vrot.slane %v11911_v35, 5  ;;  %v5185_v22 = vld [vmem:[#allocation2 + $0x9c] sm:$0xe] }
 0x41d   : > { %6786 = vmatprep.mubr.bf16.mxu0 %v7629_v41  ;;  %v5324_v46 = vsel %vm9959_vm6, %v5322_v43, %v5323_v58  ;;  %v11925_v8 = vadd.f32 %v12606_v54, %v11708_v44  ;;  %v5046_v30 = vrot.slane %v5044_v24, 5  ;;  %v5055_v59 = vor.u32 %v5054_v52, %v5051_v28  ;;  %v5187_v44 = vld [vmem:[#allocation2 + $0xa4] sm:$0x1]  ;;  %v5188_v26 = vld [vmem:[#allocation2 + $0xa8] sm:$0xe]  ;;  %v8730_v52 = vld [vmem:[#allocation2 + $0xb4] sm:$0xff]  }
 0x41e   : > { %v5065_v49 = vor.u32 %v5064_v17, %v11913_v14  ;;  %v5068_v37 = vshll.u32 %v4687_v38, 16  ;;  %v6282_v31 = vadd.f32 %v11681_v33, %v11574_v55  ;;  %v12607_v9 = vrot.slane %v11845_v42, 5  ;;  %v5190_v35 = vld [vmem:[#allocation2 + $0xb0] sm:$0x1]  ;;  %v12608_v28 = vld [vmem:[#allocation29_spill] sm:$0xff] }
 0x41f   : > { %v5321_v0 = vsel %vm9959_vm6, %v7642_v13, %v5320_v2  ;;  %v5032_v12 = vrot.slane %v5031_v25, 4  ;;  %v5047_v24 = vsel %vm9863_vm3, %v5042_v19, %v5046_v30  ;;  %v5329_v43 = vrot.slane %v5327_v56, 4  ;;  %v5192_v17 = vld [vmem:[#allocation2 + $0xb8] sm:$0xf]  ;;  %v5195_v13 = vld [vmem:[#allocation2 + $0xc4] sm:$0xf] }
 0x420   : > { %v5314_v7 = vsel %vm9959_vm6, %v7641_v11, %v12607_v9  ;;  %v7658_v63 = vcombine.low %v5321_v0, %v5324_v46  ;;  %v5336_v55 = vrot.slane %v5334_v10, 4  ;;  %v11939_v42 = vadd.f32 %v12608_v28, %v6277_v34  ;;  %v12609_v25 = vld [vmem:[#allocation32_spill] sm:$0xff]  ;;  %v12610_v9 = vld [vmem:[#allocation30_spill] sm:$0xff] }
 0x421   : > { %v7657_v23 = vcombine.low %v5314_v7, %v5317_v5  ;;  %v5037_v2 = vsel %vm9863_vm3, %v5032_v12, %v11881_v36  ;;  %v5056_v11 = vrot.slane %v5055_v59, 4  ;;  %v5066_v41 = vrot.slane %v5065_v49, 4  ;;  %v5193_v12 = vld [vmem:[#allocation2 + $0xbc] sm:$0x1] }
 0x422   : > { %v5070_v58 = vrot.slane %v5068_v37, 5  ;;  %v5330_v38 = vrot.slane %v5187_v44, 5  ;;  %v7630_v5 = vcombine.low %v5037_v2, %v5047_v24  ;;  %v6285_v19 = vadd.f32 %v11681_v33, %v12609_v25  ;;  %6787 = vmatmul.mubr.bf16.gmra.mrb[148].mxu0 %v8730_v52  ;;  %v5198_v24 = vld [vmem:[#allocation2 + $0xd0] sm:$0xf]  ;;  %v5194_v2 = vld [vmem:[#allocation2 + $0xc0] sm:$0xe] }
 0x423   : > { %8458 = vmatmul.mubr.bf16.gmra.mrb[160].mxu1 %v7657_v23  ;;  %v7643_v34 = vrot.slane %v5185_v22, 9  ;;  %v5337_v46 = vrot.slane %v5190_v35, 5  ;;  %v7644_v30 = vrot.slane %v5188_v26, 9  ;;  %v5341_v36 = vrot.slane %v5192_v17, 5  ;;  %v5196_v26 = vld [vmem:[#allocation2 + $0xc8] sm:$0x1] }
 0x424   : > { %8461 = vmatprep.mubr.bf16.mxu1 %v7658_v63  ;;  %v5331_v54 = vsel %vm9959_vm6, %v5329_v43, %v5330_v38  ;;  %6794 = vmatprep.mubr.bf16.mxu0 %v7630_v5  ;;  %v11949_v59 = vadd.f32 %v12610_v9, %v6282_v31  ;;  %v5348_v37 = vrot.slane %v5195_v13, 5  ;;  %v5061_v7 = vsel %vm9863_vm3, %v5056_v11, %v11913_v14  ;;  %v5191_v31 = vld [vmem:[#allocation2 + $0xb4] sm:$0xe]  ;;  %v5197_v11 = vld [vmem:[#allocation2 + $0xcc] sm:$0xe] }
 0x425   : > { %v5338_v49 = vsel %vm9959_vm6, %v5336_v55, %v5337_v46  ;;  %v5071_v23 = vsel %vm9863_vm3, %v5066_v41, %v5070_v58  ;;  %v5328_v0 = vsel %vm9959_vm6, %v7643_v34, %v5327_v56  ;;  %v5335_v44 = vsel %vm9959_vm6, %v7644_v30, %v5334_v10  ;;  %v12611_v55 = vld [vmem:[#allocation31_spill] sm:$0xff] }
 0x426   : > { %v7659_v22 = vcombine.low %v5328_v0, %v5331_v54  ;;  %v7660_v63 = vcombine.low %v5335_v44, %v5338_v49  ;;  %v5343_v43 = vrot.slane %v5341_v36, 4  ;;  %v7631_v35 = vcombine.low %v5061_v7, %v5071_v23  ;;  %v5199_v41 = vld [vmem:[#allocation2 + $0xd4] sm:$0x1]  ;;  %v8732_v30 = vld [vmem:[#allocation2 + $0xcc] sm:$0xff]   ;;  %v12613_v44 = vld [vmem:[#allocation36_spill] sm:$0xff] }
 0x427   : > { %v11963_v28 = vadd.f32 %v12611_v55, %v6285_v19  ;;  %v5350_v14 = vrot.slane %v5348_v37, 4  ;;  %v7645_v52 = vrot.slane %v5191_v31, 9  ;;  %v5344_v56 = vrot.slane %v5193_v12, 5  ;;  %v12612_v0 = vld [vmem:[#allocation35_spill] sm:$0xff] }
 0x428   : > { %v5355_v17 = vrot.slane %v5198_v24, 5  ;;  %v5351_v10 = vrot.slane %v5196_v26, 5  ;;  %v7646_v38 = vrot.slane %v5194_v2, 9  ;;  %v7647_v25 = vrot.slane %v5197_v11, 9 }
 0x429   : > { %v5345_v58 = vsel %vm9959_vm6, %v5343_v43, %v5344_v56  ;;  %v5342_v13 = vsel %vm9959_vm6, %v7645_v52, %v5341_v36  ;;  %v5358_v34 = vrot.slane %v5199_v41, 5  ;;  %v6298_v9 = vadd.f32 %v11681_v33, %v11714_v53 }
 0x42a   : > { %6795 = vmatmul.mubr.bf16.gmra.mrb[152].mxu0 %v8731_v51  ;;  %v5352_v5 = vsel %vm9959_vm6, %v5350_v14, %v5351_v10  ;;  %v5357_v19 = vrot.slane %v5355_v17, 4  ;;  %v7661_v46 = vcombine.low %v5342_v13, %v5345_v58  ;;  %v5349_v54 = vsel %vm9959_vm6, %v7646_v38, %v5348_v37 }
 0x42b   : > { %8462 = vmatmul.mubr.bf16.gmra.mrb[164].mxu1 %v7659_v22  ;;  %6802 = vmatprep.mubr.bf16.mxu0 %v7631_v35  ;;  %v7662_v49 = vcombine.low %v5349_v54, %v5352_v5  ;;  %v5356_v7 = vsel %vm9959_vm6, %v7647_v25, %v5355_v17  ;;  %v6301_v23 = vadd.f32 %v11681_v33, %v11723_v6 }
 0x42c   : > { %8465 = vmatprep.mubr.bf16.mxu1 %v7660_v63  ;;  %v5359_v36 = vsel %vm9959_vm6, %v5357_v19, %v5358_v34  ;;  %v11982_v22 = vadd.f32 %v12612_v0, %v6298_v9  ;;  %v6306_v53 = vadd.f32 %v11681_v33, %v11756_v62  ;;  %v6309_v12 = vadd.f32 %v11681_v33, %v11772_v61 }
 0x42d   : > { %v7663_v37 = vcombine.low %v5356_v7, %v5359_v36  ;;  %v11987_v31 = vadd.f32 %v12613_v44, %v6301_v23  ;;  %v6314_v26 = vadd.f32 %v11681_v33, %v11803_v32  ;;  %v6317_v51 = vadd.f32 %v11681_v33, %v11817_v48 }
 0x42e   : > { %v11992_v24 = vadd.f32 %v12614_v15, %v6306_v53  ;;  %v11995_v63 = vadd.f32 %v11758_v57, %v6309_v12 }
 0x432   : > { %6803 = vmatmul.mubr.bf16.gmra.mrb[156].mxu0 %v8732_v30 }
 0x433   : > { %8466 = vmatmul.mubr.bf16.gmra.mrb[168].mxu1 %v7661_v46 }
 0x434   : > { %8469 = vmatprep.mubr.bf16.mxu1 %v7662_v49 }
 0x43b   : > { %8470 = vmatmul.mubr.bf16.gmra.mrb[172].mxu1 %v7663_v37 }
 0x43d   : > { %v8069_v6 = vpop.f32.mrb[88].mxu0 }
 0x43e   : > { %v8070_v43 = vpop.f32.mrb[89].mxu0 }
 0x43f   : > { %v8071_v35 = vadd.f32 %v8070_v43, %v8069_v6  ;;  %v8072_v62 = vpop.f32.mrb[90].mxu0 }
 0x440   : > { %v8073_v55 = vpop.f32.mrb[91].mxu0 }
 0x441   : > { %v12001_v14 = vadd.f32 %v8071_v35, %v6314_v26  ;;  %v8074_v61 = vadd.f32 %v8073_v55, %v8072_v62 }
 0x443   : > { %v12003_v52 = vadd.f32 %v8074_v61, %v6317_v51 }
 0x449   : > { %v7963_v56 = vpop.f32.mrb[76].mxu1 }
 0x44a   : > { %v7964_v2 = vpop.f32.mrb[77].mxu1 }
 0x44b   : > { %v7965_v57 = vadd.f32 %v7964_v2, %v7963_v56  ;;  %v7966_v17 = vpop.f32.mrb[78].mxu1  ;;  %v12615_v56 = vld [vmem:[#allocation8_spill] sm:$0xff] }
 0x44c   : > { %v7967_v10 = vpop.f32.mrb[79].mxu1 }
 0x44d   : > { %v7968_v11 = vadd.f32 %v7967_v10, %v7966_v17  ;;  %v12616_v17 = vld [vmem:[#allocation23_spill] sm:$0xff] }
 0x451   : > { %v8097_v41 = vpop.f32.mrb[80].mxu1 }
 0x452   : > { %v8098_v58 = vpop.f32.mrb[81].mxu1 }
 0x453   : > { %v8099_v32 = vadd.f32 %v8098_v58, %v8097_v41  ;;  %v8100_v38 = vpop.f32.mrb[82].mxu1 }
 0x454   : > { %v8101_v5 = vpop.f32.mrb[83].mxu1 }
 0x455   : > { %v12006_v13 = vadd.f32 %v8099_v32, %v11811_v20  ;;  %v8102_v48 = vadd.f32 %v8101_v5, %v8100_v38 }
 0x457   : > { %v12009_v25 = vadd.f32 %v8102_v48, %v11815_v50 }
 0x459   : > { %v8103_v19 = vpop.f32.mrb[84].mxu1 }
 0x45a   : > { %v8104_v34 = vpop.f32.mrb[85].mxu1 }
 0x45b   : > { %v8105_v46 = vadd.f32 %v8104_v34, %v8103_v19  ;;  %v8106_v54 = vpop.f32.mrb[86].mxu1 }
 0x45c   : > { %v8107_v30 = vpop.f32.mrb[87].mxu1 }
 0x45d   : > { %v12012_v9 = vadd.f32 %v8105_v46, %v11822_v1  ;;  %v8108_v49 = vadd.f32 %v8107_v30, %v8106_v54 }
 0x45f   : > { %v12015_v7 = vadd.f32 %v8108_v49, %v11830_v60 }
 0x461   : > { %v8109_v36 = vpop.f32.mrb[88].mxu1 }
 0x462   : > { %v8110_v23 = vpop.f32.mrb[89].mxu1 }
 0x463   : > { %v8111_v20 = vadd.f32 %v8110_v23, %v8109_v36  ;;  %v8112_v0 = vpop.f32.mrb[90].mxu1  ;;  %v6322_v23 = vadd.f32 %v11681_v33, %v7965_v57 }
 0x464   : > { %v8113_v37 = vpop.f32.mrb[91].mxu1 }
 0x465   : > { %v12018_v50 = vadd.f32 %v8111_v20, %v11835_v40  ;;  %v8114_v53 = vadd.f32 %v8113_v37, %v8112_v0 }
 0x467   : > { %v12021_v44 = vadd.f32 %v8114_v53, %v11839_v4 }
 0x469   : > { %v8115_v12 = vpop.f32.mrb[92].mxu1 }
 0x46a   : > { %v8116_v15 = vpop.f32.mrb[93].mxu1 }
 0x46b   : > { %v8117_v1 = vadd.f32 %v8116_v15, %v8115_v12  ;;  %v8118_v6 = vpop.f32.mrb[94].mxu1  ;;  %v6325_v12 = vadd.f32 %v11681_v33, %v7968_v11 }
 0x46c   : > { %v8119_v43 = vpop.f32.mrb[95].mxu1 }
 0x46d   : > { %v12024_v60 = vadd.f32 %v8117_v1, %v11843_v18  ;;  %v8120_v26 = vadd.f32 %v8119_v43, %v8118_v6 }
 0x46f   : > { %v12027_v35 = vadd.f32 %v8120_v26, %v11849_v3 }
 0x471   : > { %v8121_v62 = vpop.f32.mrb[96].mxu1 }
 0x472   : > { %v8122_v55 = vpop.f32.mrb[97].mxu1 }
 0x473   : > { %v8123_v40 = vadd.f32 %v8122_v55, %v8121_v62  ;;  %v8124_v51 = vpop.f32.mrb[98].mxu1 }
 0x474   : > { %v8125_v61 = vpop.f32.mrb[99].mxu1 }
 0x475   : > { %v12030_v4 = vadd.f32 %v8123_v40, %v12615_v56  ;;  %v8126_v2 = vadd.f32 %v8125_v61, %v8124_v51 }
 0x477   : > { %v12033_v10 = vadd.f32 %v8126_v2, %v12616_v17 }
 0x479   : > { %v8127_v41 = vpop.f32.mrb[100].mxu1 }
 0x47a   : > { %v8128_v58 = vpop.f32.mrb[101].mxu1 }
 0x47b   : > { %v8129_v18 = vadd.f32 %v8128_v58, %v8127_v41  ;;  %v8130_v32 = vpop.f32.mrb[102].mxu1 }
 0x47c   : > { %v8131_v38 = vpop.f32.mrb[103].mxu1 }
 0x47d   : > { %v12036_v3 = vadd.f32 %v8129_v18, %v11853_v39  ;;  %v8132_v5 = vadd.f32 %v8131_v38, %v8130_v32 }
 0x47f   : > { %v12039_v48 = vadd.f32 %v8132_v5, %v11857_v27 }
 0x481   : > { %v8133_v19 = vpop.f32.mrb[104].mxu1 }
 0x482   : > { %v8134_v34 = vpop.f32.mrb[105].mxu1 }
 0x483   : > { %v8135_v46 = vadd.f32 %v8134_v34, %v8133_v19  ;;  %v8136_v54 = vpop.f32.mrb[106].mxu1  ;;  %v12617_v34 = vld [vmem:[#allocation9_spill] sm:$0xff] }
 0x484   : > { %v8137_v49 = vpop.f32.mrb[107].mxu1 }
 0x485   : > { %v8075_v30 = vpop.f32.mrb[92].mxu0  ;;  %v12043_v20 = vadd.f32 %v8135_v46, %v11861_v21  ;;  %v8138_v0 = vadd.f32 %v8137_v49, %v8136_v54 }
 0x486   : > { %v8076_v36 = vpop.f32.mrb[93].mxu0 }
 0x487   : > { %v8077_v37 = vadd.f32 %v8076_v36, %v8075_v30  ;;  %v8078_v39 = vpop.f32.mrb[94].mxu0  ;;  %v12047_v27 = vadd.f32 %v8138_v0, %v11865_v16 }
 0x488   : > { %v8079_v53 = vpop.f32.mrb[95].mxu0 }
 0x489   : > { %v12049_v15 = vadd.f32 %v8077_v37, %v6322_v23  ;;  %v8080_v1 = vadd.f32 %v8079_v53, %v8078_v39  ;;  %v8139_v6 = vpop.f32.mrb[108].mxu1 }
 0x48a   : > { %v8140_v26 = vpop.f32.mrb[109].mxu1 }
 0x48b   : > { %v12051_v43 = vadd.f32 %v8080_v1, %v6325_v12  ;;  %v8141_v57 = vadd.f32 %v8140_v26, %v8139_v6  ;;  %v8142_v62 = vpop.f32.mrb[110].mxu1 }
 0x48c   : > { %v8143_v55 = vpop.f32.mrb[111].mxu1 }
 0x48d   : > { %v8209_v21 = vpop.f32.mrb[96].mxu0  ;;  %v12054_v51 = vadd.f32 %v8141_v57, %v11874_v47  ;;  %v8144_v61 = vadd.f32 %v8143_v55, %v8142_v62 }
 0x48e   : > { %v8210_v40 = vpop.f32.mrb[97].mxu0 }
 0x48f   : > { %v8211_v33 = vadd.f32 %v8210_v40, %v8209_v21  ;;  %v8212_v11 = vpop.f32.mrb[98].mxu0  ;;  %v12057_v56 = vadd.f32 %v8144_v61, %v11878_v45 }
 0x490   : > { %v8213_v16 = vpop.f32.mrb[99].mxu0 }
 0x491   : > { %v8214_v2 = vadd.f32 %v8213_v16, %v8212_v11  ;;  %v12060_v17 = vadd.f32 %v8211_v33, %v12006_v13  ;;  %v8145_v41 = vpop.f32.mrb[112].mxu1 }
 0x492   : > { %v8146_v18 = vpop.f32.mrb[113].mxu1 }
 0x493   : > { %v12063_v58 = vadd.f32 %v8214_v2, %v12009_v25  ;;  %v8147_v32 = vadd.f32 %v8146_v18, %v8145_v41  ;;  %v8148_v38 = vpop.f32.mrb[114].mxu1 }
 0x494   : > { %v8149_v5 = vpop.f32.mrb[115].mxu1 }
 0x495   : > { %v8215_v47 = vpop.f32.mrb[100].mxu0  ;;  %v12066_v46 = vadd.f32 %v8147_v32, %v12617_v34  ;;  %v8150_v54 = vadd.f32 %v8149_v5, %v8148_v38 }
 0x496   : > { %v8216_v19 = vpop.f32.mrb[101].mxu0 }
 0x497   : > { %v8217_v45 = vadd.f32 %v8216_v19, %v8215_v47  ;;  %v8218_v30 = vpop.f32.mrb[102].mxu0  ;;  %v12069_v13 = vadd.f32 %v8150_v54, %v11906_v29 }
 0x498   : > { %v8219_v49 = vpop.f32.mrb[103].mxu0 }
 0x499   : > { %v8220_v36 = vadd.f32 %v8219_v49, %v8218_v30  ;;  %v12072_v25 = vadd.f32 %v8217_v45, %v12012_v9  ;;  %v8151_v23 = vpop.f32.mrb[116].mxu1 }
 0x49a   : > { %v8152_v37 = vpop.f32.mrb[117].mxu1 }
 0x49b   : > { %v12075_v0 = vadd.f32 %v8220_v36, %v12015_v7  ;;  %v8153_v39 = vadd.f32 %v8152_v37, %v8151_v23  ;;  %v8154_v53 = vpop.f32.mrb[118].mxu1  ;;  %v12618_v23 = vld [vmem:[#allocation33_spill] sm:$0xff] }
 0x49c   : > { %v8155_v1 = vpop.f32.mrb[119].mxu1 }
 0x49d   : > { %v8221_v12 = vpop.f32.mrb[104].mxu0  ;;  %v12078_v26 = vadd.f32 %v8153_v39, %v11925_v8  ;;  %v8156_v57 = vadd.f32 %v8155_v1, %v8154_v53  ;;  %v12619_v1 = vld [vmem:[#allocation34_spill] sm:$0xff] }
 0x49e   : > { %v8222_v6 = vpop.f32.mrb[105].mxu0 }
 0x49f   : > { %v8223_v29 = vadd.f32 %v8222_v6, %v8221_v12  ;;  %v8224_v62 = vpop.f32.mrb[106].mxu0  ;;  %v12081_v9 = vadd.f32 %v8156_v57, %v11939_v42 }
 0x4a0   : > { %v8225_v21 = vpop.f32.mrb[107].mxu0 }
 0x4a1   : > { %v8226_v55 = vadd.f32 %v8225_v21, %v8224_v62  ;;  %v12084_v7 = vadd.f32 %v8223_v29, %v12018_v50  ;;  %v8157_v40 = vpop.f32.mrb[120].mxu1 }
 0x4a2   : > { %v8158_v33 = vpop.f32.mrb[121].mxu1 }
 0x4a3   : > { %v12087_v61 = vadd.f32 %v8226_v55, %v12021_v44  ;;  %v8159_v11 = vadd.f32 %v8158_v33, %v8157_v40  ;;  %v8160_v16 = vpop.f32.mrb[122].mxu1 }
 0x4a4   : > { %v8161_v2 = vpop.f32.mrb[123].mxu1 }
 0x4a5   : > { %v8227_v8 = vpop.f32.mrb[108].mxu0  ;;  %v12090_v18 = vadd.f32 %v8159_v11, %v11949_v59  ;;  %v8162_v32 = vadd.f32 %v8161_v2, %v8160_v16 }
 0x4a6   : > { %v8228_v41 = vpop.f32.mrb[109].mxu0 }
 0x4a7   : > { %v8229_v42 = vadd.f32 %v8228_v41, %v8227_v8  ;;  %v8230_v38 = vpop.f32.mrb[110].mxu0  ;;  %v12093_v50 = vadd.f32 %v8162_v32, %v11963_v28 }
 0x4a8   : > { %v8231_v47 = vpop.f32.mrb[111].mxu0 }
 0x4a9   : > { %v8232_v5 = vadd.f32 %v8231_v47, %v8230_v38  ;;  %v12096_v44 = vadd.f32 %v8229_v42, %v12024_v60  ;;  %v8163_v19 = vpop.f32.mrb[124].mxu1 }
 0x4aa   : > { %v8164_v54 = vpop.f32.mrb[125].mxu1 }
 0x4ab   : > { %v12099_v34 = vadd.f32 %v8232_v5, %v12027_v35  ;;  %v8165_v45 = vadd.f32 %v8164_v54, %v8163_v19  ;;  %v8166_v30 = vpop.f32.mrb[126].mxu1 }
 0x4ac   : > { %v8167_v49 = vpop.f32.mrb[127].mxu1 }
 0x4ad   : > { %v8233_v59 = vpop.f32.mrb[112].mxu0  ;;  %v12102_v37 = vadd.f32 %v8165_v45, %v12618_v23  ;;  %v8168_v39 = vadd.f32 %v8167_v49, %v8166_v30 }
 0x4ae   : > { %v8234_v36 = vpop.f32.mrb[113].mxu0 }
 0x4af   : > { %v8235_v28 = vadd.f32 %v8234_v36, %v8233_v59  ;;  %v8236_v53 = vpop.f32.mrb[114].mxu0  ;;  %v12105_v60 = vadd.f32 %v8168_v39, %v12619_v1 }
 0x4b0   : > { %v8237_v12 = vpop.f32.mrb[115].mxu0 }
 0x4b1   : > { %v8238_v6 = vadd.f32 %v8237_v12, %v8236_v53  ;;  %v12108_v35 = vadd.f32 %v8235_v28, %v12030_v4  ;;  %v8169_v57 = vpop.f32.mrb[128].mxu1 }
 0x4b2   : > { %v8170_v62 = vpop.f32.mrb[129].mxu1 }
 0x4b3   : > { %v12111_v29 = vadd.f32 %v8238_v6, %v12033_v10  ;;  %v8171_v21 = vadd.f32 %v8170_v62, %v8169_v57  ;;  %v8172_v55 = vpop.f32.mrb[130].mxu1 }
 0x4b4   : > { %v8173_v33 = vpop.f32.mrb[131].mxu1 }
 0x4b5   : > { %v8239_v40 = vpop.f32.mrb[116].mxu0  ;;  %v12114_v16 = vadd.f32 %v8171_v21, %v11982_v22  ;;  %v8174_v8 = vadd.f32 %v8173_v33, %v8172_v55 }
 0x4b6   : > { %v8240_v11 = vpop.f32.mrb[117].mxu0 }
 0x4b7   : > { %v8241_v2 = vadd.f32 %v8240_v11, %v8239_v40  ;;  %v8242_v41 = vpop.f32.mrb[118].mxu0  ;;  %v12117_v4 = vadd.f32 %v8174_v8, %v11987_v31 }
 0x4b8   : > { %v8243_v32 = vpop.f32.mrb[119].mxu0 }
 0x4b9   : > { %v8244_v42 = vadd.f32 %v8243_v32, %v8242_v41  ;;  %v12120_v10 = vadd.f32 %v8241_v2, %v12036_v3  ;;  %v8175_v38 = vpop.f32.mrb[132].mxu1 }
 0x4ba   : > { %v8176_v5 = vpop.f32.mrb[133].mxu1 }
 0x4bb   : > { %v12123_v47 = vadd.f32 %v8244_v42, %v12039_v48  ;;  %v8177_v19 = vadd.f32 %v8176_v5, %v8175_v38  ;;  %v8178_v54 = vpop.f32.mrb[134].mxu1 }
 0x4bc   : > { %v8179_v45 = vpop.f32.mrb[135].mxu1 }
 0x4bd   : > { %v8245_v22 = vpop.f32.mrb[120].mxu0  ;;  %v12126_v59 = vadd.f32 %v8177_v19, %v11992_v24  ;;  %v8180_v49 = vadd.f32 %v8179_v45, %v8178_v54 }
 0x4be   : > { %v8246_v30 = vpop.f32.mrb[121].mxu0 }
 0x4bf   : > { %v8247_v31 = vadd.f32 %v8246_v30, %v8245_v22  ;;  %v8248_v36 = vpop.f32.mrb[122].mxu0  ;;  %v12129_v3 = vadd.f32 %v8180_v49, %v11995_v63 }
 0x4c0   : > { %v8249_v23 = vpop.f32.mrb[123].mxu0 }
 0x4c1   : > { %v8250_v39 = vadd.f32 %v8249_v23, %v8248_v36  ;;  %v12132_v48 = vadd.f32 %v8247_v31, %v12043_v20  ;;  %v8181_v28 = vpop.f32.mrb[136].mxu1 }
 0x4c2   : > { %v8182_v12 = vpop.f32.mrb[137].mxu1 }
 0x4c3   : > { %v12135_v53 = vadd.f32 %v8250_v39, %v12047_v27  ;;  %v8183_v1 = vadd.f32 %v8182_v12, %v8181_v28  ;;  %v8184_v6 = vpop.f32.mrb[138].mxu1 }
 0x4c4   : > { %v8185_v57 = vpop.f32.mrb[139].mxu1 }
 0x4c5   : > { %v8251_v24 = vpop.f32.mrb[124].mxu0  ;;  %v12138_v21 = vadd.f32 %v8183_v1, %v12001_v14  ;;  %v8186_v55 = vadd.f32 %v8185_v57, %v8184_v6 }
 0x4c6   : > { %v8252_v62 = vpop.f32.mrb[125].mxu0 }
 0x4c7   : > { %v8253_v63 = vadd.f32 %v8252_v62, %v8251_v24  ;;  %v8254_v40 = vpop.f32.mrb[126].mxu0  ;;  %v12141_v20 = vadd.f32 %v8186_v55, %v12003_v52 }
 0x4c8   : > { %v8255_v33 = vpop.f32.mrb[127].mxu0 }
 0x4c9   : > { %v8256_v11 = vadd.f32 %v8255_v33, %v8254_v40  ;;  %v12144_v27 = vadd.f32 %v8253_v63, %v12054_v51  ;;  %v8187_v8 = vpop.f32.mrb[140].mxu1 }
 0x4ca   : > { %v8188_v41 = vpop.f32.mrb[141].mxu1 }
 0x4cb   : > { %v12147_v2 = vadd.f32 %v8256_v11, %v12057_v56  ;;  %v8189_v32 = vadd.f32 %v8188_v41, %v8187_v8  ;;  %v8190_v42 = vpop.f32.mrb[142].mxu1 }
 0x4cc   : > { %v8191_v38 = vpop.f32.mrb[143].mxu1 }
 0x4cd   : > { %v8257_v14 = vpop.f32.mrb[128].mxu0  ;;  %v12150_v19 = vadd.f32 %v8189_v32, %v12049_v15  ;;  %v8192_v54 = vadd.f32 %v8191_v38, %v8190_v42 }
 0x4ce   : > { %v8258_v5 = vpop.f32.mrb[129].mxu0 }
 0x4cf   : > { %v8259_v52 = vadd.f32 %v8258_v5, %v8257_v14  ;;  %v8260_v22 = vpop.f32.mrb[130].mxu0  ;;  %v12153_v51 = vadd.f32 %v8192_v54, %v12051_v43 }
 0x4d0   : > { %v8261_v45 = vpop.f32.mrb[131].mxu0 }
 0x4d1   : > { %v8262_v30 = vadd.f32 %v8261_v45, %v8260_v22  ;;  %v12156_v56 = vadd.f32 %v8259_v52, %v12066_v46 }
 0x4d3   : > { %v12159_v31 = vadd.f32 %v8262_v30, %v12069_v13 }
 0x4d4   : > { %v8443_v49 = vpop.f32.mrb[144].mxu1 }
 0x4d5   : > { %v12162_v36 = vadd.f32 %v8443_v49, %v12072_v25  ;;  %v6845_v15 = vpop.f32.mrb[145].mxu1  ;;  %v8263_v28 = vpop.f32.mrb[132].mxu0 }
 0x4d6   : > { %v12165_v23 = vadd.f32 %v6845_v15, %v12060_v17  ;;  %v8444_v39 = vpop.f32.mrb[146].mxu1  ;;  %v8264_v1 = vpop.f32.mrb[133].mxu0 }
 0x4d7   : > { %v7739_v43 = vmul.f32 -1.442695, %v12162_v36  ;;  %v12169_v12 = vadd.f32 %v8444_v39, %v12075_v0  ;;  %v6848_v46 = vpop.f32.mrb[147].mxu1  ;;  %v8265_v25 = vadd.f32 %v8264_v1, %v8263_v28  ;;  %v8266_v24 = vpop.f32.mrb[134].mxu0 }
 0x4d8   : > { %v7737_v6 = vmul.f32 -1.442695, %v12165_v23  ;;  %v12173_v13 = vadd.f32 %v6848_v46, %v12063_v58  ;;  %v8267_v57 = vpop.f32.mrb[135].mxu0 }
 0x4d9   : > { %9021 = vpow2.f32 %v7739_v43  ;;  %v7740_v17 = vmul.f32 -1.442695, %v12169_v12  ;;  %v8268_v55 = vadd.f32 %v8267_v57, %v8266_v24  ;;  %v12178_v0 = vadd.f32 %v8265_v25, %v12078_v26 }
 0x4da   : > { %9023 = vpow2.f32 %v7737_v6  ;;  %v7738_v62 = vmul.f32 -1.442695, %v12173_v13 }
 0x4db   : > { %9025 = vpow2.f32 %v7740_v17  ;;  %v12181_v40 = vadd.f32 %v8268_v55, %v12081_v9 }
 0x4dc   : > { %9027 = vpow2.f32 %v7738_v62 }
 0x4dd   : > { %v8447_v63 = vpop.f32.mrb[148].mxu1  ;;  %v8269_v41 = vpop.f32.mrb[136].mxu0 }
 0x4de   : > { %v12184_v58 = vadd.f32 %v8447_v63, %v12096_v44  ;;  %v6861_v33 = vpop.f32.mrb[149].mxu1  ;;  %v8270_v14 = vpop.f32.mrb[137].mxu0 }
 0x4df   : > { %v12187_v11 = vadd.f32 %v6861_v33, %v12084_v7  ;;  %v8448_v8 = vpop.f32.mrb[150].mxu1  ;;  %v8271_v44 = vadd.f32 %v8270_v14, %v8269_v41  ;;  %v8272_v5 = vpop.f32.mrb[138].mxu0 }
 0x4e0   : > { %v7743_v32 = vmul.f32 -1.442695, %v12184_v58  ;;  %v12191_v26 = vadd.f32 %v8448_v8, %v12099_v34  ;;  %v6864_v42 = vpop.f32.mrb[151].mxu1  ;;  %v8273_v54 = vpop.f32.mrb[139].mxu0 }
 0x4e1   : > { %v7741_v38 = vmul.f32 -1.442695, %v12187_v11  ;;  %v12195_v9 = vadd.f32 %v6864_v42, %v12087_v61  ;;  %v8274_v22 = vadd.f32 %v8273_v54, %v8272_v5  ;;  %v12200_v34 = vadd.f32 %v8271_v44, %v12090_v18 }
 0x4e2   : > { %9029 = vpow2.f32 %v7743_v32  ;;  %v7744_v7 = vmul.f32 -1.442695, %v12191_v26 }
 0x4e3   : > { %9031 = vpow2.f32 %v7741_v38  ;;  %v7742_v52 = vmul.f32 -1.442695, %v12195_v9  ;;  %v9022_v45 = vpop.eup %9021  ;;  %v12203_v15 = vadd.f32 %v8274_v22, %v12093_v50 }
 0x4e4   : > { %9033 = vpow2.f32 %v7744_v7  ;;  %v9024_v30 = vpop.eup %9023  ;;  %v7070_v49 = vadd.f32 1.0, %v9022_v45 }
 0x4e5   : > { %9035 = vpow2.f32 %v7742_v52  ;;  %v8451_v61 = vpop.f32.mrb[152].mxu1  ;;  %v9026_v39 = vpop.eup %9025  ;;  %v7068_v28 = vadd.f32 1.0, %v9024_v30 }
 0x4e6   : > { %v12206_v43 = vadd.f32 %v8451_v61, %v12120_v10  ;;  %v6877_v46 = vpop.f32.mrb[153].mxu1  ;;  %v9028_v1 = vpop.eup %9027  ;;  %9037 = vrcp.f32 %v7070_v49  ;;  %v7071_v6 = vadd.f32 1.0, %v9026_v39 }
 0x4e7   : > { %v12209_v18 = vadd.f32 %v6877_v46, %v12108_v35  ;;  %v8452_v25 = vpop.f32.mrb[154].mxu1  ;;  %v8275_v24 = vpop.f32.mrb[140].mxu0  ;;  %9039 = vrcp.f32 %v7068_v28  ;;  %v7069_v17 = vadd.f32 1.0, %v9028_v1 }
 0x4e8   : > { %v7747_v50 = vmul.f32 -1.442695, %v12206_v43  ;;  %v12213_v57 = vadd.f32 %v8452_v25, %v12123_v47  ;;  %v6880_v62 = vpop.f32.mrb[155].mxu1  ;;  %v8276_v10 = vpop.f32.mrb[141].mxu0  ;;  %9041 = vrcp.f32 %v7071_v6 }
 0x4e9   : > { %v7745_v55 = vmul.f32 -1.442695, %v12209_v18  ;;  %v12217_v63 = vadd.f32 %v6880_v62, %v12111_v29  ;;  %v8277_v35 = vadd.f32 %v8276_v10, %v8275_v24  ;;  %v8278_v33 = vpop.f32.mrb[142].mxu0  ;;  %9043 = vrcp.f32 %v7069_v17 }
 0x4ea   : > { %v7748_v8 = vmul.f32 -1.442695, %v12213_v57  ;;  %v8279_v41 = vpop.f32.mrb[143].mxu0  ;;  %9045 = vpow2.f32 %v7747_v50 }
 0x4eb   : > { %v7746_v47 = vmul.f32 -1.442695, %v12217_v63  ;;  %v8280_v32 = vadd.f32 %v8279_v41, %v8278_v33  ;;  %v12223_v42 = vadd.f32 %v8277_v35, %v12102_v37  ;;  %9047 = vpow2.f32 %v7745_v55 }
 0x4ec   : > { %v9030_v14 = vpop.eup %9029  ;;  %9049 = vpow2.f32 %v7748_v8 }
 0x4ed   : > { %v9032_v38 = vpop.eup %9031  ;;  %v7074_v29 = vadd.f32 1.0, %v9030_v14  ;;  %v12226_v5 = vadd.f32 %v8280_v32, %v12105_v60  ;;  %9051 = vpow2.f32 %v7746_v47  ;;  %v8281_v61 = vpop.f32.mrb[144].mxu0 }
 0x4ee   : > { %v8455_v44 = vpop.f32.mrb[156].mxu1  ;;  %v9034_v7 = vpop.eup %9033  ;;  %v7072_v54 = vadd.f32 1.0, %v9032_v38 }
 0x4ef   : > { %v12233_v52 = vadd.f32 %v8455_v44, %v12144_v27  ;;  %v6893_v37 = vpop.f32.mrb[157].mxu1  ;;  %v9036_v22 = vpop.eup %9035  ;;  %9053 = vrcp.f32 %v7074_v29  ;;  %v7075_v45 = vadd.f32 1.0, %v9034_v7 }
 0x4f0   : > { %v12236_v30 = vadd.f32 %v6893_v37, %v12132_v48  ;;  %v8456_v49 = vpop.f32.mrb[158].mxu1  ;;  %9055 = vrcp.f32 %v7072_v54  ;;  %v7073_v60 = vadd.f32 1.0, %v9036_v22  ;;  %v8282_v1 = vpop.f32.mrb[145].mxu0 }
 0x4f1   : > { %v7751_v39 = vmul.f32 -1.442695, %v12233_v52  ;;  %v12240_v28 = vadd.f32 %v8456_v49, %v12147_v2  ;;  %v6896_v46 = vpop.f32.mrb[159].mxu1  ;;  %v9038_v27 = vpop.eup %9037  ;;  %9057 = vrcp.f32 %v7075_v45  ;;  %v8283_v48 = vadd.f32 %v8282_v1, %v8281_v61 }
 0x4f2   : > { %v7749_v6 = vmul.f32 -1.442695, %v12236_v30  ;;  %v12244_v25 = vadd.f32 %v6896_v46, %v12135_v53  ;;  %v8284_v24 = vpop.f32.mrb[146].mxu0  ;;  %v9040_v17 = vpop.eup %9039  ;;  %v7166_v50 = vmul.f32 %v9038_v27, %v12162_v36  ;;  %9059 = vrcp.f32 %v7073_v60 }
 0x4f3   : > { %v7752_v62 = vmul.f32 -1.442695, %v12240_v28  ;;  %v8285_v2 = vpop.f32.mrb[147].mxu0  ;;  %v9042_v10 = vpop.eup %9041  ;;  %v7164_v55 = vmul.f32 %v9040_v17, %v12165_v23  ;;  %9061 = vpow2.f32 %v7751_v39  ;;  %v12256_v36 = vadd.f32 %v8283_v48, %v12114_v16 }
 0x4f4   : > { %v7750_v35 = vmul.f32 -1.442695, %v12244_v25  ;;  %v8286_v33 = vadd.f32 %v8285_v2, %v8284_v24  ;;  %v9044_v8 = vpop.eup %9043  ;;  %7198 = vst [vmem:[%s12251_s18 + $0x10] sm:$0xff] %v7166_v50  ;;  %v7167_v53 = vmul.f32 %v9042_v10, %v12169_v12  ;;  %9063 = vpow2.f32 %v7749_v6 }
 0x4f5   : > { %v9046_v41 = vpop.eup %9045  ;;  %7196 = vst [vmem:[%s12251_s18] sm:$0xff] %v7164_v55  ;;  %v7165_v23 = vmul.f32 %v9044_v8, %v12173_v13  ;;  %9065 = vpow2.f32 %v7752_v62  ;;  %v8287_v54 = vpop.f32.mrb[148].mxu0 }
 0x4f6   : > { %v8459_v47 = vpop.f32.mrb[160].mxu1  ;;  %v12261_v32 = vadd.f32 %v8286_v33, %v12117_v4  ;;  %v9048_v14 = vpop.eup %9047  ;;  %7199 = vst [vmem:[%s12251_s18 + $0x18] sm:$0xff] %v7167_v53  ;;  %v7078_v38 = vadd.f32 1.0, %v9046_v41  ;;  %9067 = vpow2.f32 %v7750_v35 }
 0x4f7   : > { %v12265_v12 = vadd.f32 %v8459_v47, %v12178_v0  ;;  %v6909_v29 = vpop.f32.mrb[161].mxu1  ;;  %v9050_v44 = vpop.eup %9049  ;;  %7197 = vst [vmem:[%s12251_s18 + $0x8] sm:$0xff] %v7165_v23  ;;  %v7076_v16 = vadd.f32 1.0, %v9048_v14 }
 0x4f8   : > { %v12269_v7 = vadd.f32 %v6909_v29, %v12156_v56  ;;  %v8460_v13 = vpop.f32.mrb[162].mxu1  ;;  %v9052_v37 = vpop.eup %9051  ;;  %9069 = vrcp.f32 %v7078_v38  ;;  %v7079_v4 = vadd.f32 1.0, %v9050_v44 }
 0x4f9   : > { %v7755_v22 = vmul.f32 -1.442695, %v12265_v12  ;;  %v12273_v45 = vadd.f32 %v8460_v13, %v12181_v40  ;;  %v6912_v49 = vpop.f32.mrb[163].mxu1  ;;  %v8288_v0 = vpop.f32.mrb[149].mxu0  ;;  %9071 = vrcp.f32 %v7076_v16  ;;  %v7077_v60 = vadd.f32 1.0, %v9052_v37 }
 0x4fa   : > { %v9054_v61 = vpop.eup %9053  ;;  %v7753_v39 = vmul.f32 -1.442695, %v12269_v7  ;;  %v12277_v56 = vadd.f32 %v6912_v49, %v12159_v31  ;;  %v8290_v46 = vpop.f32.mrb[150].mxu0  ;;  %9073 = vrcp.f32 %v7079_v4  ;;  %v8289_v6 = vadd.f32 %v8288_v0, %v8287_v54 }
 0x4fb   : > { %v9056_v1 = vpop.eup %9055  ;;  %v7170_v27 = vmul.f32 %v9054_v61, %v12184_v58  ;;  %v7756_v40 = vmul.f32 -1.442695, %v12273_v45  ;;  %v8291_v48 = vpop.f32.mrb[151].mxu0  ;;  %9075 = vrcp.f32 %v7077_v60 }
 0x4fc   : > { %v9058_v24 = vpop.eup %9057  ;;  %v7168_v17 = vmul.f32 %v9056_v1, %v12187_v11  ;;  %v7754_v50 = vmul.f32 -1.442695, %v12277_v56  ;;  %v8292_v62 = vadd.f32 %v8291_v48, %v8290_v46  ;;  %9077 = vpow2.f32 %v7755_v22 }
 0x4fd   : > { %v9060_v31 = vpop.eup %9059  ;;  %7202 = vst [vmem:[%s12251_s18 + $0x30] sm:$0xff] %v7170_v27  ;;  %v7171_v2 = vmul.f32 %v9058_v24, %v12191_v26  ;;  %v6789_v58 = vadd.f32 %v8289_v6, %v12126_v59  ;;  %9079 = vpow2.f32 %v7753_v39  ;;  %v8293_v47 = vpop.f32.mrb[152].mxu0 }
 0x4fe   : > { %v9062_v10 = vpop.eup %9061  ;;  %7200 = vst [vmem:[%s12251_s18 + $0x20] sm:$0xff] %v7168_v17  ;;  %v7169_v55 = vmul.f32 %v9060_v31, %v12195_v9  ;;  %v8463_v35 = vpop.f32.mrb[164].mxu1  ;;  %v6792_v11 = vadd.f32 %v8292_v62, %v12129_v3  ;;  %9081 = vpow2.f32 %v7756_v40 }
 0x4ff   : > { %v9064_v33 = vpop.eup %9063  ;;  %7203 = vst [vmem:[%s12251_s18 + $0x38] sm:$0xff] %v7171_v2  ;;  %v7082_v8 = vadd.f32 1.0, %v9062_v10  ;;  %v12291_v53 = vadd.f32 %v8463_v35, %v12223_v42  ;;  %v6925_v26 = vpop.f32.mrb[165].mxu1  ;;  %9083 = vpow2.f32 %v7754_v50 }
 0x500   : > { %v9066_v41 = vpop.eup %9065  ;;  %7201 = vst [vmem:[%s12251_s18 + $0x28] sm:$0xff] %v7169_v55  ;;  %v7080_v23 = vadd.f32 1.0, %v9064_v33  ;;  %v12295_v59 = vadd.f32 %v6925_v26, %v12200_v34  ;;  %v8464_v9 = vpop.f32.mrb[166].mxu1 }
 0x501   : > { %v9068_v14 = vpop.eup %9067  ;;  %9085 = vrcp.f32 %v7082_v8  ;;  %v7083_v3 = vadd.f32 1.0, %v9066_v41  ;;  %v7759_v38 = vmul.f32 -1.442695, %v12291_v53  ;;  %v12299_v29 = vadd.f32 %v8464_v9, %v12226_v5  ;;  %v6928_v42 = vpop.f32.mrb[167].mxu1 }
 0x502   : > { %v8294_v44 = vpop.f32.mrb[153].mxu0  ;;  %9087 = vrcp.f32 %v7080_v23  ;;  %v7081_v16 = vadd.f32 1.0, %v9068_v14  ;;  %v7757_v13 = vmul.f32 -1.442695, %v12295_v59  ;;  %v12303_v54 = vadd.f32 %v6928_v42, %v12203_v15  ;;  %v9070_v37 = vpop.eup %9069 }
 0x503   : > { %v8296_v34 = vpop.f32.mrb[154].mxu0  ;;  %9089 = vrcp.f32 %v7083_v3  ;;  %v7760_v4 = vmul.f32 -1.442695, %v12299_v29  ;;  %v8295_v22 = vadd.f32 %v8294_v44, %v8293_v47  ;;  %v9072_v0 = vpop.eup %9071  ;;  %v7174_v5 = vmul.f32 %v9070_v37, %v12206_v43 }
 0x504   : > { %v8297_v49 = vpop.f32.mrb[155].mxu0  ;;  %9091 = vrcp.f32 %v7081_v16  ;;  %v7758_v61 = vmul.f32 -1.442695, %v12303_v54  ;;  %v9074_v39 = vpop.eup %9073  ;;  %v7172_v15 = vmul.f32 %v9072_v0, %v12209_v18 }
 0x505   : > { %v8298_v60 = vadd.f32 %v8297_v49, %v8296_v34  ;;  %9093 = vpow2.f32 %v7759_v38  ;;  %v12310_v46 = vadd.f32 %v8295_v22, %v12138_v21  ;;  %v9076_v1 = vpop.eup %9075  ;;  %7206 = vst [vmem:[%s12251_s18 + $0x50] sm:$0xff] %v7174_v5  ;;  %v7175_v27 = vmul.f32 %v9074_v39, %v12213_v57  ;;  %v8299_v62 = vpop.f32.mrb[156].mxu0 }
 0x506   : > { %9095 = vpow2.f32 %v7757_v13  ;;  %v8467_v40 = vpop.f32.mrb[168].mxu1  ;;  %v9078_v6 = vpop.eup %9077  ;;  %7204 = vst [vmem:[%s12251_s18 + $0x40] sm:$0xff] %v7172_v15  ;;  %v7173_v48 = vmul.f32 %v9076_v1, %v12217_v63 }
 0x507   : > { %v12315_v43 = vadd.f32 %v8298_v60, %v12141_v20  ;;  %9097 = vpow2.f32 %v7760_v4  ;;  %v12319_v18 = vadd.f32 %v8467_v40, %v6789_v58  ;;  %v6941_v24 = vpop.f32.mrb[169].mxu1  ;;  %v9080_v21 = vpop.eup %9079  ;;  %7207 = vst [vmem:[%s12251_s18 + $0x58] sm:$0xff] %v7175_v27  ;;  %v7086_v17 = vadd.f32 1.0, %v9078_v6 }
 0x508   : > { %9099 = vpow2.f32 %v7758_v61  ;;  %v12323_v57 = vadd.f32 %v6941_v24, %v12256_v36  ;;  %v8468_v50 = vpop.f32.mrb[170].mxu1  ;;  %v9082_v31 = vpop.eup %9081  ;;  %7205 = vst [vmem:[%s12251_s18 + $0x48] sm:$0xff] %v7173_v48  ;;  %v7084_v20 = vadd.f32 1.0, %v9080_v21 }
 0x509   : > { %v12326_v2 = vadd.f32 %v8468_v50, %v6792_v11  ;;  %v6944_v10 = vpop.f32.mrb[171].mxu1  ;;  %v8300_v63 = vpop.f32.mrb[157].mxu0  ;;  %9101 = vrcp.f32 %v7086_v17  ;;  %v7087_v58 = vadd.f32 1.0, %v9082_v31  ;;  %v7763_v35 = vmul.f32 -1.442695, %v12319_v18 }
 0x50a   : > { %v9084_v55 = vpop.eup %9083  ;;  %v12330_v33 = vadd.f32 %v6944_v10, %v12261_v32  ;;  %v8302_v8 = vpop.f32.mrb[158].mxu0  ;;  %9103 = vrcp.f32 %v7084_v20  ;;  %v7761_v41 = vmul.f32 -1.442695, %v12323_v57  ;;  %v8301_v23 = vadd.f32 %v8300_v63, %v8299_v62 }
 0x50b   : > { %v9086_v36 = vpop.eup %9085  ;;  %v7085_v26 = vadd.f32 1.0, %v9084_v55  ;;  %v8303_v11 = vpop.f32.mrb[159].mxu0  ;;  %9105 = vrcp.f32 %v7087_v58  ;;  %v7764_v14 = vmul.f32 -1.442695, %v12326_v2 }
 0x50c   : > { %v9088_v9 = vpop.eup %9087  ;;  %v7178_v47 = vmul.f32 %v9086_v36, %v12233_v52  ;;  %v8304_v3 = vadd.f32 %v8303_v11, %v8302_v8  ;;  %v7762_v42 = vmul.f32 -1.442695, %v12330_v33  ;;  %v6805_v44 = vadd.f32 %v8301_v23, %v12150_v19 }
 0x50d   : > { %v9090_v38 = vpop.eup %9089  ;;  %v7176_v32 = vmul.f32 %v9088_v9, %v12236_v30  ;;  %9107 = vrcp.f32 %v7085_v26 }
 0x50e   : > { %v9092_v16 = vpop.eup %9091  ;;  %7210 = vst [vmem:[%s12251_s18 + $0x70] sm:$0xff] %v7178_v47  ;;  %v7179_v13 = vmul.f32 %v9090_v38, %v12240_v28  ;;  %9109 = vpow2.f32 %v7763_v35  ;;  %v8471_v52 = vpop.f32.mrb[172].mxu1  ;;  %v6808_v34 = vadd.f32 %v8304_v3, %v12153_v51 }
 0x50f   : > { %v9094_v37 = vpop.eup %9093  ;;  %7208 = vst [vmem:[%s12251_s18 + $0x60] sm:$0xff] %v7176_v32  ;;  %v7177_v4 = vmul.f32 %v9092_v16, %v12244_v25  ;;  %9111 = vpow2.f32 %v7761_v41  ;;  %v12343_v30 = vadd.f32 %v8471_v52, %v6805_v44  ;;  %v6957_v22 = vpop.f32.mrb[173].mxu1 }
 0x510   : > { %v9096_v49 = vpop.eup %9095  ;;  %7211 = vst [vmem:[%s12251_s18 + $0x78] sm:$0xff] %v7179_v13  ;;  %v7090_v19 = vadd.f32 1.0, %v9094_v37  ;;  %9113 = vpow2.f32 %v7764_v14  ;;  %v12347_v0 = vadd.f32 %v6957_v22, %v12310_v46  ;;  %v8472_v28 = vpop.f32.mrb[174].mxu1 }
 0x511   : > { %v9098_v5 = vpop.eup %9097  ;;  %7209 = vst [vmem:[%s12251_s18 + $0x68] sm:$0xff] %v7177_v4  ;;  %v7088_v61 = vadd.f32 1.0, %v9096_v49  ;;  %9115 = vpow2.f32 %v7762_v42  ;;  %v12350_v51 = vadd.f32 %v8472_v28, %v6808_v34  ;;  %v6960_v60 = vpop.f32.mrb[175].mxu1  ;;  %v7767_v15 = vmul.f32 -1.442695, %v12343_v30 }
 0x512   : > { %v9100_v25 = vpop.eup %9099  ;;  %9117 = vrcp.f32 %v7090_v19  ;;  %v7091_v39 = vadd.f32 1.0, %v9098_v5  ;;  %v12354_v1 = vadd.f32 %v6960_v60, %v12315_v43  ;;  %v7765_v27 = vmul.f32 -1.442695, %v12347_v0 }
 0x513   : > { %9119 = vrcp.f32 %v7088_v61  ;;  %v7089_v46 = vadd.f32 1.0, %v9100_v25  ;;  %v9102_v40 = vpop.eup %9101  ;;  %v7768_v6 = vmul.f32 -1.442695, %v12350_v51 }
 0x514   : > { %9121 = vrcp.f32 %v7091_v39  ;;  %v9104_v48 = vpop.eup %9103  ;;  %v7182_v24 = vmul.f32 %v9102_v40, %v12265_v12  ;;  %v7766_v21 = vmul.f32 -1.442695, %v12354_v1 }
 0x515   : > { %9123 = vrcp.f32 %v7089_v46  ;;  %v9106_v17 = vpop.eup %9105  ;;  %v7180_v43 = vmul.f32 %v9104_v48, %v12269_v7 }
 0x516   : > { %9125 = vpow2.f32 %v7767_v15  ;;  %7214 = vst [vmem:[%s12251_s18 + $0x90] sm:$0xff] %v7182_v24  ;;  %v7183_v62 = vmul.f32 %v9106_v17, %v12273_v45 }
 0x517   : > { %v9108_v50 = vpop.eup %9107  ;;  %9127 = vpow2.f32 %v7765_v27  ;;  %7212 = vst [vmem:[%s12251_s18 + $0x80] sm:$0xff] %v7180_v43 }
 0x518   : > { %v9110_v31 = vpop.eup %9109  ;;  %v7181_v20 = vmul.f32 %v9108_v50, %v12277_v56  ;;  %9129 = vpow2.f32 %v7768_v6  ;;  %7215 = vst [vmem:[%s12251_s18 + $0x98] sm:$0xff] %v7183_v62 }
 0x519   : > { %v9112_v10 = vpop.eup %9111  ;;  %v7094_v12 = vadd.f32 1.0, %v9110_v31  ;;  %9131 = vpow2.f32 %v7766_v21 }
 0x51a   : > { %v9114_v63 = vpop.eup %9113  ;;  %7213 = vst [vmem:[%s12251_s18 + $0x88] sm:$0xff] %v7181_v20  ;;  %v7092_v55 = vadd.f32 1.0, %v9112_v10 }
 0x51b   : > { %v9116_v7 = vpop.eup %9115  ;;  %9133 = vrcp.f32 %v7094_v12  ;;  %v7095_v58 = vadd.f32 1.0, %v9114_v63 }
 0x51c   : > { %v9118_v35 = vpop.eup %9117  ;;  %9135 = vrcp.f32 %v7092_v55  ;;  %v7093_v45 = vadd.f32 1.0, %v9116_v7 }
 0x51d   : > { %v9120_v8 = vpop.eup %9119  ;;  %v7186_v56 = vmul.f32 %v9118_v35, %v12291_v53  ;;  %9137 = vrcp.f32 %v7095_v58 }
 0x51e   : > { %v9122_v36 = vpop.eup %9121  ;;  %v7184_v26 = vmul.f32 %v9120_v8, %v12295_v59  ;;  %9139 = vrcp.f32 %v7093_v45 }
 0x51f   : > { %v9124_v41 = vpop.eup %9123  ;;  %7218 = vst [vmem:[%s12251_s18 + $0xb0] sm:$0xff] %v7186_v56  ;;  %v7187_v23 = vmul.f32 %v9122_v36, %v12299_v29 }
 0x520   : > { %v9126_v11 = vpop.eup %9125  ;;  %7216 = vst [vmem:[%s12251_s18 + $0xa0] sm:$0xff] %v7184_v26  ;;  %v7185_v9 = vmul.f32 %v9124_v41, %v12303_v54 }
 0x521   : > { %v9128_v47 = vpop.eup %9127  ;;  %7219 = vst [vmem:[%s12251_s18 + $0xb8] sm:$0xff] %v7187_v23  ;;  %v7098_v14 = vadd.f32 1.0, %v9126_v11 }
 0x522   : > { %v9130_v3 = vpop.eup %9129  ;;  %7217 = vst [vmem:[%s12251_s18 + $0xa8] sm:$0xff] %v7185_v9  ;;  %v7096_v53 = vadd.f32 1.0, %v9128_v47 }
 0x523   : > { %v9132_v38 = vpop.eup %9131  ;;  %9141 = vrcp.f32 %v7098_v14  ;;  %v7099_v59 = vadd.f32 1.0, %v9130_v3 }
 0x524   : > { %9143 = vrcp.f32 %v7096_v53  ;;  %v7097_v32 = vadd.f32 1.0, %v9132_v38 }
 0x525   : > { %v9134_v29 = vpop.eup %9133  ;;  %9145 = vrcp.f32 %v7099_v59 }
 0x526   : > { %v9136_v54 = vpop.eup %9135  ;;  %v7190_v42 = vmul.f32 %v9134_v29, %v12319_v18  ;;  %9147 = vrcp.f32 %v7097_v32 }
 0x527   : > { %v9138_v44 = vpop.eup %9137  ;;  %v7188_v16 = vmul.f32 %v9136_v54, %v12323_v57 }
 0x528   : > { %v9140_v13 = vpop.eup %9139  ;;  %7222 = vst [vmem:[%s12251_s18 + $0xd0] sm:$0xff] %v7190_v42  ;;  %v7191_v52 = vmul.f32 %v9138_v44, %v12326_v2 }
 0x529   : > { %7220 = vst [vmem:[%s12251_s18 + $0xc0] sm:$0xff] %v7188_v16  ;;  %v7189_v34 = vmul.f32 %v9140_v13, %v12330_v33 }
 0x52a   : > { %7223 = vst [vmem:[%s12251_s18 + $0xd8] sm:$0xff] %v7191_v52 }
 0x52b   : > { %7221 = vst [vmem:[%s12251_s18 + $0xc8] sm:$0xff] %v7189_v34 }
 0x52d   : > { %v9142_v37 = vpop.eup %9141 }
 0x52e   : > { %v9144_v18 = vpop.eup %9143  ;;  %v7194_v57 = vmul.f32 %v9142_v37, %v12343_v30 }
 0x52f   : > { %v9146_v4 = vpop.eup %9145  ;;  %v7192_v22 = vmul.f32 %v9144_v18, %v12347_v0 }
 0x530   : > { %v9148_v2 = vpop.eup %9147  ;;  %7226 = vst [vmem:[%s12251_s18 + $0xf0] sm:$0xff] %v7194_v57  ;;  %v7195_v49 = vmul.f32 %v9146_v4, %v12350_v51 }
 0x531   : > { %7224 = vst [vmem:[%s12251_s18 + $0xe0] sm:$0xff] %v7192_v22  ;;  %v7193_v33 = vmul.f32 %v9148_v2, %v12354_v1 }
 0x532   : > { %7227 = vst [vmem:[%s12251_s18 + $0xf8] sm:$0xff] %v7195_v49 }
 0x533   : > { %7225 = vst [vmem:[%s12251_s18 + $0xe8] sm:$0xff] %v7193_v33 }
 0x534   : > { %9202 = shalt.err (!%p9199_p3)
}
 0x535   : > { %s9203_s30 = scalar_lea.hbm %s12392_s24, 4096  ;;  %s9207_s18 = scalar_lea.hbm %s12452_s9, 8192 }
 0x536   : > { %p9204_p4 = scmp.ne.s32.totalorder %s12392_s24, %s9203_s30  ;;  %p9208_p9 = scmp.lt.u32.totalorder %s12392_s24, %s12452_s9 }
 0x537   : > { %p9209_p10 = scmp.lt.u32.totalorder %s9207_s18, %s9203_s30  ;;  %p9211_p12 = scmp.lt.u32.totalorder %s9203_s30, %s12392_s24 }
 0x538   : > { %p9205_p7 = pnand %p9204_p4, %p9348_p5 }
 0x539   : > { %p9210_p11 = por %p9209_p10, %p9208_p9 }
 0x53a   : > { %p9206_p8 = pneg %p9205_p7 }
 0x53b   : > { %p9212_p13 = por %p9211_p12, %p9210_p11 }
 0x53d   : > { %p9213_p0 = pnand %p9212_p13, %p9206_p8 }
 0x53f   : > { %9216 = shalt.err (!%p9213_p0)
}
 0x540   : > { %s9255_s15 = smov 128   ;;  %s9256_s27 = smov 8  }
 0x541   : > { %8521 = dma.vmem_to_hbm [thread:$0]  (%p9348_p5), %s12394_s23, 4096, %s12392_s24, %s12402_s6, %s9255_s15, %s9255_s15, %s9256_s27  }
 0x542 PF: > { %p8527_p1 = scmp.ge.s32.totalorder %s9251_s14, 2  ;;  %s7257_s26 = sand.u32 1, %s9239_s11  }
 0x543   : > { %s7258_s29 = scalar_lea.sflag [#allocation6], %s7257_s26 }
 0x544   : > { %p8524_p2 = pnand %p8527_p1, %p9352_p6 }
 0x546   : > { %9234 = dma.done.wait (!%p8524_p2), %s7258_s29, 4096  }
 0x547   : > { %9236 = vsyncadd (!%p8524_p2), %s7258_s29, 4294963200  ;;  %p21_p3 = scmp.ge.s32.totalorder %s9335_s16, 4   ;;  %s12620_s11 = smov %s9243_s12 }
 0x548   : > { %s12621_s12 = smov %s9247_s13  ;;  %s12622_s13 = smov %s9346_s19 }
 0x549   : > { %s12623_s14 = smov %s9335_s16  ;;  %23 = sbr.rel (!%p21_p3) target bundleno = 6 (0x6), region = 96 }
 0x550   :  { %7263 = vsyncpa [#allocation6], 1 }
 0x551   :  { %7265 = vsyncpa [#allocation6 + $0x1], 1 }

</bundles_post_ra>
